<compile_context>
chip_gen: v5e
topology: v5e:2x2
jax: 0.10.0
libtpu: 0.0.40
codegen_flags: <defaults>
</compile_context>

<pallas_src>
import math
import functools

import jax
import jax.numpy as jnp
from jax import lax
from jax.experimental import pallas as pl
from jax.experimental.pallas import tpu as pltpu

VMEM = pltpu.MemorySpace.VMEM

# f32 for the tiny demo; set jnp.bfloat16 on v6e/v7x at realistic H=768
# (store weights bf16 there too — halves weight DMA/VMEM, ~2-4x MXU).
MATMUL_DTYPE = jnp.float32

# dot_general dimension-number shorthands (2-D operands).
_NN = (((1,), (0,)), ((), ()))   # a @ b
_NT = (((1,), (1,)), ((), ()))   # a @ b.T
_TN = (((0,), (0,)), ((), ()))   # a.T @ b


def _mm(a, b, dims=_NN):
    return lax.dot_general(a.astype(MATMUL_DTYPE), b.astype(MATMUL_DTYPE),
                           dimension_numbers=dims,
                           preferred_element_type=jnp.float32)


# ----------------------------- fused model kernel -----------------------------

def _model_kernel(img_ref, convw_ref, emb_ref, mb_ref,
                  eg_ref, eb_ref, g_ref, b_ref,
                  wqkv_ref, bqkv_ref, wp_ref, bp_ref,
                  w1_ref, b1_ref, w2_ref, b2_ref,
                  pw_ref, pb_ref, fw_ref, fb_ref,
                  c1w_ref, c1b_ref, clng_ref, clnb_ref, c2w_ref, c2b_ref,
                  logits_ref, v2_ref,
                  attn_scr,
                  *, B, S, heads, n_layers, eps=1e-12):
    H = emb_ref.shape[1]
    dh = H // heads
    scale = 1.0 / math.sqrt(dh)

    # ---------- Transfer: Conv2d(2048, H, 1, bias=False) ----------
    # img_ref[b] is [C, P] (metadata-only reshape of NCHW); convw is [C, H].
    # TN contraction emits [P, H] directly -> no transpose on either side of HBM.
    for b in range(B):
        v2_ref[b] = _mm(img_ref[b], convw_ref[...], _TN)

    def layer_norm(t, gamma, beta):
        mu = jnp.mean(t, axis=-1, keepdims=True)
        var = jnp.mean((t - mu) ** 2, axis=-1, keepdims=True)
        return (t - mu) * lax.rsqrt(var + eps) * gamma + beta

    # ---------- BertModel embedding LayerNorm (fused; no dedicated launch) ----
    h = layer_norm(emb_ref[...], eg_ref[...], eb_ref[...])          # [B*S, H]

    g = g_ref[...]                                                   # norm1 gamma
    bb = b_ref[...]                                                  # norm1 beta

    # ---------- n_layers BertLayers (share='none', norm='pre') ----------
    for l in range(n_layers):
        # attention pre-norm (source: self.norm1(hidden_states))
        xn = layer_norm(h, g, bb)
        # fused Wq|Wk|Wv projection on the whole [B*S, H] slab
        qkv = _mm(xn, wqkv_ref[l]) + bqkv_ref[l]                     # [B*S, 3H]

        for b in range(B):
            bias = mb_ref[pl.ds(b, 1), :]                            # [1, S] additive mask
            base = b * S
            for hh in range(heads):
                q = qkv[base:base + S, hh * dh:(hh + 1) * dh]
                k = qkv[base:base + S, H + hh * dh:H + (hh + 1) * dh]
                v = qkv[base:base + S, 2 * H + hh * dh:2 * H + (hh + 1) * dh]
                s = _mm(q, k, _NT) * scale + bias                    # [S, S]
                s = s - jnp.max(s, axis=-1, keepdims=True)
                p = jnp.exp(s)
                # EUP approx reciprocal: tiny relative error vs. exact softmax,
                # acceptable for inference.
                p = p * pl.reciprocal(jnp.sum(p, axis=-1, keepdims=True),
                                      approx=True)
                # write head output into the VMEM slab (no concat)
                attn_scr[pl.ds(base, S), pl.ds(hh * dh, dh)] = _mm(p, v)

        attn = attn_scr[...]                                         # [B*S, H]
        # output projection + residual (dropout = identity at inference)
        out1 = h + _mm(attn, wp_ref[l]) + bp_ref[l]

        # FFN on norm1(out1) — the source reuses norm1 here — + residual
        xn2 = layer_norm(out1, g, bb)
        hf = _mm(xn2, w1_ref[l]) + b1_ref[l]
        hf = hf * 0.5 * (1.0 + lax.erf(hf / math.sqrt(2.0)))         # gelu()
        h = out1 + _mm(hf, w2_ref[l]) + b2_ref[l]

    # ---------- BertPooler + fc1/swish + classifier ----------
    # token-0 rows of each batch element
    pooled = jnp.concatenate([h[b * S:b * S + 1, :] for b in range(B)], axis=0)
    hp = jnp.tanh(_mm(pooled, pw_ref[...]) + pb_ref[...])            # pooler
    hp = _mm(hp, fw_ref[...]) + fb_ref[...]
    hp = hp * jax.nn.sigmoid(hp)                                     # swish(x, beta=1)
    hp = _mm(hp, c1w_ref[...]) + c1b_ref[...]
    hp = layer_norm(hp, clng_ref[...], clnb_ref[...])
    # classifier output padded to 128 lanes -> unmasked store
    logits_ref[...] = _mm(hp, c2w_ref[...]) + c2b_ref[...]           # [B, Vpad]


# ----------------------------- wrapper -----------------------------

def model_forward(params, img, input_ids, segment_ids, input_mask, args):
    H, heads = args["hidden_size"], args["heads"]
    n_layers, vocab = args["n_layers"], args["vocab_size"]
    B, S = input_ids.shape
    C = img.shape[1]
    P = img.shape[2] * img.shape[3]
    Vpad = params["cls2_w"].shape[1]

    img_r = img.reshape(B, C, P)                         # metadata-only reshape

    # BertModel embedding: word + position + token-type gathers (tiny, XLA level)
    we = params["word_emb"][input_ids]                   # [B, S, H]
    pe = params["pos_emb"][jnp.arange(S)][None, :, :]    # [1, S, H]
    te = params["type_emb"][segment_ids]                 # [B, S, H]
    emb_sum = (we + pe + te).reshape(B * S, H)

    # additive attention-mask bias, precomputed once: [B, S]
    mask_bias = -10000.0 * (1.0 - input_mask.astype(jnp.float32))

    vspec = pl.BlockSpec(memory_space=VMEM)
    kern = functools.partial(_model_kernel, B=B, S=S, heads=heads,
                             n_layers=n_layers)

    logits_pad, v_2 = pl.pallas_call(
        kern,
        out_shape=(jax.ShapeDtypeStruct((B, Vpad), jnp.float32),
                   jax.ShapeDtypeStruct((B, P, H), jnp.float32)),
        in_specs=[vspec] * 26,
        out_specs=[vspec, vspec],
        scratch_shapes=[pltpu.VMEM((B * S, H), jnp.float32)],
    )(img_r, params["conv2_w_t"], emb_sum, mask_bias,
      params["emb_ln_g"], params["emb_ln_b"],
      params["ln1_g"], params["ln1_b"],
      params["wqkv"], params["bqkv"], params["proj_w"], params["proj_b"],
      params["ffn_w1"], params["ffn_b1"], params["ffn_w2"], params["ffn_b2"],
      params["pool_w"], params["pool_b"], params["fc1_w"], params["fc1_b"],
      params["cls1_w"], params["cls1_b"], params["cls_ln_g"], params["cls_ln_b"],
      params["cls2_w"], params["cls2_b"])

    logits = logits_pad[:, :vocab]
    attn_scores = None                                    # as in Model.forward
    # v_2 (Transfer features) returned as an auxiliary output: the CMEncoder
    # that would consume it is not defined in the source file.
    return logits, attn_scores, v_2


# ----------------------------- parameter init -----------------------------

def init_params(key, H, n_layers, vocab, word_vocab=100, type_vocab=2, max_pos=64):
    keys = jax.random.split(key, 16)
    it = iter(keys)

    def nrm(shape):
        return 0.02 * jax.random.normal(next(it), shape, jnp.float32)

    Vpad = ((vocab + 127) // 128) * 128                  # lane-dense classifier width

    params = {
        # Conv2d(2048, H, 1, bias=False); stored pre-transposed as [C, H] so the
        # kernel's TN dot_general consumes NCHW features directly.
        "conv2_w_t": nrm((2048, H)),
        "word_emb": nrm((word_vocab, H)),
        "pos_emb": nrm((max_pos, H)),
        "type_emb": nrm((type_vocab, H)),
        "emb_ln_g": jnp.ones((1, H), jnp.float32),
        "emb_ln_b": jnp.zeros((1, H), jnp.float32),
        # BertLayer(share='none') owns a single norm1 reused for every layer_num
        "ln1_g": jnp.ones((1, H), jnp.float32),
        "ln1_b": jnp.zeros((1, H), jnp.float32),
        # per-layer weights stacked on a leading [n_layers] axis
        # (fused Wq|Wk|Wv columns; head hh reads columns [hh*dh, (hh+1)*dh))
        "wqkv": nrm((n_layers, H, 3 * H)),
        "bqkv": jnp.zeros((n_layers, 1, 3 * H), jnp.float32),
        "proj_w": nrm((n_layers, H, H)),
        "proj_b": jnp.zeros((n_layers, 1, H), jnp.float32),
        "ffn_w1": nrm((n_layers, H, 4 * H)),
        "ffn_b1": jnp.zeros((n_layers, 1, 4 * H), jnp.float32),
        "ffn_w2": nrm((n_layers, 4 * H, H)),
        "ffn_b2": jnp.zeros((n_layers, 1, H), jnp.float32),
        # head: BertPooler + fc1 + classifier (Linear -> LayerNorm -> Linear)
        "pool_w": nrm((H, H)), "pool_b": jnp.zeros((1, H), jnp.float32),
        "fc1_w": nrm((H, H)), "fc1_b": jnp.zeros((1, H), jnp.float32),
        "cls1_w": nrm((H, H)), "cls1_b": jnp.zeros((1, H), jnp.float32),
        "cls_ln_g": jnp.ones((1, H), jnp.float32),
        "cls_ln_b": jnp.zeros((1, H), jnp.float32),
        # classifier output zero-padded to a multiple-of-128 lane width
        "cls2_w": jnp.pad(nrm((H, vocab)), ((0, 0), (0, Vpad - vocab))),
        "cls2_b": jnp.zeros((1, Vpad), jnp.float32),
    }
    return params


# ----------------------------- main -----------------------------

if __name__ == "__main__":
    args = dict(hidden_size=32, heads=4, n_layers=2, vocab_size=64,
                hidden_dropout_prob=0.0)
    B, S = 2, 8
    WORD_VOCAB = 100

    key = jax.random.PRNGKey(0)
    kp, k_img, k_ids, k_seg = jax.random.split(key, 4)

    params = init_params(kp, args["hidden_size"], args["n_layers"],
                         args["vocab_size"], word_vocab=WORD_VOCAB)

    # TODO(synk): pretrained torchvision resnet152 backbone is external to the
    # file; the kernel consumes its precomputed [B, 2048, 7, 7] feature map.
    img = jax.random.normal(k_img, (B, 2048, 7, 7), jnp.float32)
    input_ids = jax.random.randint(k_ids, (B, S), 0, WORD_VOCAB, dtype=jnp.int32)
    segment_ids = jax.random.randint(k_seg, (B, S), 0, 2, dtype=jnp.int32)
    input_mask = jnp.array([[1] * S, [1] * (S - 2) + [0] * 2], dtype=jnp.int32)

    fwd = jax.jit(functools.partial(model_forward, args=args))
    logits, attn_scores, v_2 = fwd(params, img, input_ids, segment_ids, input_mask)
    jax.block_until_ready((logits, v_2))

    assert logits.shape == (B, args["vocab_size"])
    assert v_2.shape == (B, 49, args["hidden_size"])
    assert attn_scores is None
    print("KERNEL_OK")
</pallas_src>

<mosaic_0001>
module attributes {stable_mosaic.version = 11 : i64} {
  func.func @_model_kernel(%arg0: memref<2x2048x49xf32, #tpu.memory_space<vmem>>, %arg1: memref<2048x32xf32, #tpu.memory_space<vmem>>, %arg2: memref<16x32xf32, #tpu.memory_space<vmem>>, %arg3: memref<2x8xf32, #tpu.memory_space<vmem>>, %arg4: memref<1x32xf32, #tpu.memory_space<vmem>>, %arg5: memref<1x32xf32, #tpu.memory_space<vmem>>, %arg6: memref<1x32xf32, #tpu.memory_space<vmem>>, %arg7: memref<1x32xf32, #tpu.memory_space<vmem>>, %arg8: memref<2x32x96xf32, #tpu.memory_space<vmem>>, %arg9: memref<2x1x96xf32, #tpu.memory_space<vmem>>, %arg10: memref<2x32x32xf32, #tpu.memory_space<vmem>>, %arg11: memref<2x1x32xf32, #tpu.memory_space<vmem>>, %arg12: memref<2x32x128xf32, #tpu.memory_space<vmem>>, %arg13: memref<2x1x128xf32, #tpu.memory_space<vmem>>, %arg14: memref<2x128x32xf32, #tpu.memory_space<vmem>>, %arg15: memref<2x1x32xf32, #tpu.memory_space<vmem>>, %arg16: memref<32x32xf32, #tpu.memory_space<vmem>>, %arg17: memref<1x32xf32, #tpu.memory_space<vmem>>, %arg18: memref<32x32xf32, #tpu.memory_space<vmem>>, %arg19: memref<1x32xf32, #tpu.memory_space<vmem>>, %arg20: memref<32x32xf32, #tpu.memory_space<vmem>>, %arg21: memref<1x32xf32, #tpu.memory_space<vmem>>, %arg22: memref<1x32xf32, #tpu.memory_space<vmem>>, %arg23: memref<1x32xf32, #tpu.memory_space<vmem>>, %arg24: memref<32x128xf32, #tpu.memory_space<vmem>>, %arg25: memref<1x128xf32, #tpu.memory_space<vmem>>, %arg26: memref<2x128xf32, #tpu.memory_space<vmem>>, %arg27: memref<2x49x32xf32, #tpu.memory_space<vmem>>, %arg28: memref<16x32xf32, #tpu.memory_space<vmem>>) attributes {dimension_semantics = [], scalar_prefetch = 0 : i64, scratch_operands = 1 : i64, tpu.core_type = #tpu.core_type<tc>} {
    %c0 = arith.constant 0 : index
    %c0_0 = arith.constant 0 : index
    %c0_1 = arith.constant 0 : index
    %0 = vector.load %arg0[%c0, %c0_0, %c0_1] : memref<2x2048x49xf32, #tpu.memory_space<vmem>>, vector<1x2048x49xf32>
    %1 = vector.shape_cast %0 : vector<1x2048x49xf32> to vector<2048x49xf32>
    %c0_2 = arith.constant 0 : index
    %c0_3 = arith.constant 0 : index
    %2 = vector.load %arg1[%c0_2, %c0_3] : memref<2048x32xf32, #tpu.memory_space<vmem>>, vector<2048x32xf32>
    %cst = arith.constant dense<0.000000e+00> : vector<49x32xf32>
    %3 = tpu.matmul %1, %2, %cst {dimension_numbers = #tpu.dot_dimension_numbers<[0], [0], [1], [1], [0, 1, 1, 1], [], []>} : vector<2048x49xf32>, vector<2048x32xf32>, vector<49x32xf32> -> vector<49x32xf32>
    %c0_4 = arith.constant 0 : index
    %c0_5 = arith.constant 0 : index
    %c0_6 = arith.constant 0 : index
    %4 = vector.load %arg27[%c0_4, %c0_5, %c0_6] : memref<2x49x32xf32, #tpu.memory_space<vmem>>, vector<1x49x32xf32>
    %5 = vector.shape_cast %4 : vector<1x49x32xf32> to vector<49x32xf32>
    %6 = vector.shape_cast %3 : vector<49x32xf32> to vector<1x49x32xf32>
    tpu.vector_store %arg27[%c0_4, %c0_5, %c0_6], %6 {strides = array<i32>} : memref<2x49x32xf32, #tpu.memory_space<vmem>>, vector<1x49x32xf32>,
    %c1 = arith.constant 1 : index
    %c0_7 = arith.constant 0 : index
    %c0_8 = arith.constant 0 : index
    %7 = vector.load %arg0[%c1, %c0_7, %c0_8] : memref<2x2048x49xf32, #tpu.memory_space<vmem>>, vector<1x2048x49xf32>
    %8 = vector.shape_cast %7 : vector<1x2048x49xf32> to vector<2048x49xf32>
    %c0_9 = arith.constant 0 : index
    %c0_10 = arith.constant 0 : index
    %9 = vector.load %arg1[%c0_9, %c0_10] : memref<2048x32xf32, #tpu.memory_space<vmem>>, vector<2048x32xf32>
    %cst_11 = arith.constant dense<0.000000e+00> : vector<49x32xf32>
    %10 = tpu.matmul %8, %9, %cst_11 {dimension_numbers = #tpu.dot_dimension_numbers<[0], [0], [1], [1], [0, 1, 1, 1], [], []>} : vector<2048x49xf32>, vector<2048x32xf32>, vector<49x32xf32> -> vector<49x32xf32>
    %c1_12 = arith.constant 1 : index
    %c0_13 = arith.constant 0 : index
    %c0_14 = arith.constant 0 : index
    %11 = vector.load %arg27[%c1_12, %c0_13, %c0_14] : memref<2x49x32xf32, #tpu.memory_space<vmem>>, vector<1x49x32xf32>
    %12 = vector.shape_cast %11 : vector<1x49x32xf32> to vector<49x32xf32>
    %13 = vector.shape_cast %10 : vector<49x32xf32> to vector<1x49x32xf32>
    tpu.vector_store %arg27[%c1_12, %c0_13, %c0_14], %13 {strides = array<i32>} : memref<2x49x32xf32, #tpu.memory_space<vmem>>, vector<1x49x32xf32>,
    %c0_15 = arith.constant 0 : index
    %c0_16 = arith.constant 0 : index
    %14 = vector.load %arg2[%c0_15, %c0_16] : memref<16x32xf32, #tpu.memory_space<vmem>>, vector<16x32xf32>
    %c0_17 = arith.constant 0 : index
    %c0_18 = arith.constant 0 : index
    %15 = vector.load %arg4[%c0_17, %c0_18] : memref<1x32xf32, #tpu.memory_space<vmem>>, vector<1x32xf32>
    %c0_19 = arith.constant 0 : index
    %c0_20 = arith.constant 0 : index
    %16 = vector.load %arg5[%c0_19, %c0_20] : memref<1x32xf32, #tpu.memory_space<vmem>>, vector<1x32xf32>
    %cst_21 = arith.constant dense<0.000000e+00> : vector<16xf32>
    %17 = vector.multi_reduction <add>, %14, %cst_21 [1] : vector<16x32xf32> to vector<16xf32>
    %18 = vector.shape_cast %17 : vector<16xf32> to vector<16x1xf32>
    %cst_22 = arith.constant 3.200000e+01 : f32
    %19 = vector.broadcast %cst_22 : f32 to vector<16x1xf32>
    %20 = arith.divf %18, %19 : vector<16x1xf32>
    %21 = vector.broadcast %20 : vector<16x1xf32> to vector<16x32xf32>
    %22 = arith.subf %14, %21 : vector<16x32xf32>
    %23 = arith.mulf %22, %22 : vector<16x32xf32>
    %cst_23 = arith.constant dense<0.000000e+00> : vector<16xf32>
    %24 = vector.multi_reduction <add>, %23, %cst_23 [1] : vector<16x32xf32> to vector<16xf32>
    %25 = vector.shape_cast %24 : vector<16xf32> to vector<16x1xf32>
    %cst_24 = arith.constant 3.200000e+01 : f32
    %26 = vector.broadcast %cst_24 : f32 to vector<16x1xf32>
    %27 = arith.divf %25, %26 : vector<16x1xf32>
    %28 = vector.broadcast %20 : vector<16x1xf32> to vector<16x32xf32>
    %29 = arith.subf %14, %28 : vector<16x32xf32>
    %cst_25 = arith.constant 9.99999996E-13 : f32
    %30 = vector.broadcast %cst_25 : f32 to vector<16x1xf32>
    %31 = arith.addf %27, %30 : vector<16x1xf32>
    %32 = math.rsqrt %31 : vector<16x1xf32>
    %33 = vector.broadcast %32 : vector<16x1xf32> to vector<16x32xf32>
    %34 = arith.mulf %29, %33 : vector<16x32xf32>
    %35 = vector.broadcast %15 : vector<1x32xf32> to vector<16x32xf32>
    %36 = arith.mulf %34, %35 : vector<16x32xf32>
    %37 = vector.broadcast %16 : vector<1x32xf32> to vector<16x32xf32>
    %38 = arith.addf %36, %37 : vector<16x32xf32>
    %c0_26 = arith.constant 0 : index
    %c0_27 = arith.constant 0 : index
    %39 = vector.load %arg6[%c0_26, %c0_27] : memref<1x32xf32, #tpu.memory_space<vmem>>, vector<1x32xf32>
    %c0_28 = arith.constant 0 : index
    %c0_29 = arith.constant 0 : index
    %40 = vector.load %arg7[%c0_28, %c0_29] : memref<1x32xf32, #tpu.memory_space<vmem>>, vector<1x32xf32>
    %cst_30 = arith.constant dense<0.000000e+00> : vector<16xf32>
    %41 = vector.multi_reduction <add>, %38, %cst_30 [1] : vector<16x32xf32> to vector<16xf32>
    %42 = vector.shape_cast %41 : vector<16xf32> to vector<16x1xf32>
    %cst_31 = arith.constant 3.200000e+01 : f32
    %43 = vector.broadcast %cst_31 : f32 to vector<16x1xf32>
    %44 = arith.divf %42, %43 : vector<16x1xf32>
    %45 = vector.broadcast %44 : vector<16x1xf32> to vector<16x32xf32>
    %46 = arith.subf %38, %45 : vector<16x32xf32>
    %47 = arith.mulf %46, %46 : vector<16x32xf32>
    %cst_32 = arith.constant dense<0.000000e+00> : vector<16xf32>
    %48 = vector.multi_reduction <add>, %47, %cst_32 [1] : vector<16x32xf32> to vector<16xf32>
    %49 = vector.shape_cast %48 : vector<16xf32> to vector<16x1xf32>
    %cst_33 = arith.constant 3.200000e+01 : f32
    %50 = vector.broadcast %cst_33 : f32 to vector<16x1xf32>
    %51 = arith.divf %49, %50 : vector<16x1xf32>
    %52 = vector.broadcast %44 : vector<16x1xf32> to vector<16x32xf32>
    %53 = arith.subf %38, %52 : vector<16x32xf32>
    %cst_34 = arith.constant 9.99999996E-13 : f32
    %54 = vector.broadcast %cst_34 : f32 to vector<16x1xf32>
    %55 = arith.addf %51, %54 : vector<16x1xf32>
    %56 = math.rsqrt %55 : vector<16x1xf32>
    %57 = vector.broadcast %56 : vector<16x1xf32> to vector<16x32xf32>
    %58 = arith.mulf %53, %57 : vector<16x32xf32>
    %59 = vector.broadcast %39 : vector<1x32xf32> to vector<16x32xf32>
    %60 = arith.mulf %58, %59 : vector<16x32xf32>
    %61 = vector.broadcast %40 : vector<1x32xf32> to vector<16x32xf32>
    %62 = arith.addf %60, %61 : vector<16x32xf32>
    %c0_35 = arith.constant 0 : index
    %c0_36 = arith.constant 0 : index
    %c0_37 = arith.constant 0 : index
    %63 = vector.load %arg8[%c0_35, %c0_36, %c0_37] : memref<2x32x96xf32, #tpu.memory_space<vmem>>, vector<1x32x96xf32>
    %64 = vector.shape_cast %63 : vector<1x32x96xf32> to vector<32x96xf32>
    %cst_38 = arith.constant dense<0.000000e+00> : vector<16x96xf32>
    %65 = tpu.matmul %62, %64, %cst_38 {dimension_numbers = #tpu.dot_dimension_numbers<[1], [0], [0], [1], [0, 0, 1, 1], [], []>} : vector<16x32xf32>, vector<32x96xf32>, vector<16x96xf32> -> vector<16x96xf32>
    %c0_39 = arith.constant 0 : index
    %c0_40 = arith.constant 0 : index
    %c0_41 = arith.constant 0 : index
    %66 = vector.load %arg9[%c0_39, %c0_40, %c0_41] : memref<2x1x96xf32, #tpu.memory_space<vmem>>, vector<1x1x96xf32>
    %67 = vector.shape_cast %66 : vector<1x1x96xf32> to vector<1x96xf32>
    %68 = vector.broadcast %67 : vector<1x96xf32> to vector<16x96xf32>
    %69 = arith.addf %65, %68 : vector<16x96xf32>
    %c0_42 = arith.constant 0 : index
    %c0_43 = arith.constant 0 : index
    %70 = vector.load %arg3[%c0_42, %c0_43] : memref<2x8xf32, #tpu.memory_space<vmem>>, vector<1x8xf32>
    %71 = vector.extract_strided_slice %69 {offsets = [0, 0], sizes = [8, 8], strides = [1, 1]} : vector<16x96xf32> to vector<8x8xf32>
    %72 = vector.extract_strided_slice %69 {offsets = [0, 32], sizes = [8, 8], strides = [1, 1]} : vector<16x96xf32> to vector<8x8xf32>
    %73 = vector.extract_strided_slice %69 {offsets = [0, 64], sizes = [8, 8], strides = [1, 1]} : vector<16x96xf32> to vector<8x8xf32>
    %cst_44 = arith.constant dense<0.000000e+00> : vector<8x8xf32>
    %74 = tpu.matmul %71, %72, %cst_44 {dimension_numbers = #tpu.dot_dimension_numbers<[1], [1], [0], [0], [0, 0, 1, 0], [], []>} : vector<8x8xf32>, vector<8x8xf32>, vector<8x8xf32> -> vector<8x8xf32>
    %cst_45 = arith.constant 0.353553385 : f32
    %75 = vector.broadcast %cst_45 : f32 to vector<8x8xf32>
    %76 = arith.mulf %74, %75 : vector<8x8xf32>
    %77 = vector.broadcast %70 : vector<1x8xf32> to vector<8x8xf32>
    %78 = arith.addf %76, %77 : vector<8x8xf32>
    %cst_46 = arith.constant dense<0xFF800000> : vector<8xf32>
    %79 = vector.multi_reduction <maximumf>, %78, %cst_46 [1] : vector<8x8xf32> to vector<8xf32>
    %80 = vector.shape_cast %79 : vector<8xf32> to vector<8x1xf32>
    %81 = vector.broadcast %80 : vector<8x1xf32> to vector<8x8xf32>
    %82 = arith.subf %78, %81 : vector<8x8xf32>
    %83 = math.exp %82 : vector<8x8xf32>
    %cst_47 = arith.constant dense<0.000000e+00> : vector<8xf32>
    %84 = vector.multi_reduction <add>, %83, %cst_47 [1] : vector<8x8xf32> to vector<8xf32>
    %85 = vector.shape_cast %84 : vector<8xf32> to vector<8x1xf32>
    %86 = tpu.reciprocal %85 {approx = true} : vector<8x1xf32> -> vector<8x1xf32>
    %87 = vector.broadcast %86 : vector<8x1xf32> to vector<8x8xf32>
    %88 = arith.mulf %83, %87 : vector<8x8xf32>
    %cst_48 = arith.constant dense<0.000000e+00> : vector<8x8xf32>
    %89 = tpu.matmul %88, %73, %cst_48 {dimension_numbers = #tpu.dot_dimension_numbers<[1], [0], [0], [1], [0, 0, 1, 1], [], []>} : vector<8x8xf32>, vector<8x8xf32>, vector<8x8xf32> -> vector<8x8xf32>
    %c0_49 = arith.constant 0 : index
    %c0_50 = arith.constant 0 : index
    %90 = vector.load %arg28[%c0_49, %c0_50] : memref<16x32xf32, #tpu.memory_space<vmem>>, vector<8x8xf32>
    tpu.vector_store %arg28[%c0_49, %c0_50], %89 {strides = array<i32>} : memref<16x32xf32, #tpu.memory_space<vmem>>, vector<8x8xf32>,
    %91 = vector.extract_strided_slice %69 {offsets = [0, 8], sizes = [8, 8], strides = [1, 1]} : vector<16x96xf32> to vector<8x8xf32>
    %92 = vector.extract_strided_slice %69 {offsets = [0, 40], sizes = [8, 8], strides = [1, 1]} : vector<16x96xf32> to vector<8x8xf32>
    %93 = vector.extract_strided_slice %69 {offsets = [0, 72], sizes = [8, 8], strides = [1, 1]} : vector<16x96xf32> to vector<8x8xf32>
    %cst_51 = arith.constant dense<0.000000e+00> : vector<8x8xf32>
    %94 = tpu.matmul %91, %92, %cst_51 {dimension_numbers = #tpu.dot_dimension_numbers<[1], [1], [0], [0], [0, 0, 1, 0], [], []>} : vector<8x8xf32>, vector<8x8xf32>, vector<8x8xf32> -> vector<8x8xf32>
    %cst_52 = arith.constant 0.353553385 : f32
    %95 = vector.broadcast %cst_52 : f32 to vector<8x8xf32>
    %96 = arith.mulf %94, %95 : vector<8x8xf32>
    %97 = vector.broadcast %70 : vector<1x8xf32> to vector<8x8xf32>
    %98 = arith.addf %96, %97 : vector<8x8xf32>
    %cst_53 = arith.constant dense<0xFF800000> : vector<8xf32>
    %99 = vector.multi_reduction <maximumf>, %98, %cst_53 [1] : vector<8x8xf32> to vector<8xf32>
    %100 = vector.shape_cast %99 : vector<8xf32> to vector<8x1xf32>
    %101 = vector.broadcast %100 : vector<8x1xf32> to vector<8x8xf32>
    %102 = arith.subf %98, %101 : vector<8x8xf32>
    %103 = math.exp %102 : vector<8x8xf32>
    %cst_54 = arith.constant dense<0.000000e+00> : vector<8xf32>
    %104 = vector.multi_reduction <add>, %103, %cst_54 [1] : vector<8x8xf32> to vector<8xf32>
    %105 = vector.shape_cast %104 : vector<8xf32> to vector<8x1xf32>
    %106 = tpu.reciprocal %105 {approx = true} : vector<8x1xf32> -> vector<8x1xf32>
    %107 = vector.broadcast %106 : vector<8x1xf32> to vector<8x8xf32>
    %108 = arith.mulf %103, %107 : vector<8x8xf32>
    %cst_55 = arith.constant dense<0.000000e+00> : vector<8x8xf32>
    %109 = tpu.matmul %108, %93, %cst_55 {dimension_numbers = #tpu.dot_dimension_numbers<[1], [0], [0], [1], [0, 0, 1, 1], [], []>} : vector<8x8xf32>, vector<8x8xf32>, vector<8x8xf32> -> vector<8x8xf32>
    %c0_56 = arith.constant 0 : index
    %c8 = arith.constant 8 : index
    %110 = vector.load %arg28[%c0_56, %c8] : memref<16x32xf32, #tpu.memory_space<vmem>>, vector<8x8xf32>
    tpu.vector_store %arg28[%c0_56, %c8], %109 {strides = array<i32>} : memref<16x32xf32, #tpu.memory_space<vmem>>, vector<8x8xf32>,
    %111 = vector.extract_strided_slice %69 {offsets = [0, 16], sizes = [8, 8], strides = [1, 1]} : vector<16x96xf32> to vector<8x8xf32>
    %112 = vector.extract_strided_slice %69 {offsets = [0, 48], sizes = [8, 8], strides = [1, 1]} : vector<16x96xf32> to vector<8x8xf32>
    %113 = vector.extract_strided_slice %69 {offsets = [0, 80], sizes = [8, 8], strides = [1, 1]} : vector<16x96xf32> to vector<8x8xf32>
    %cst_57 = arith.constant dense<0.000000e+00> : vector<8x8xf32>
    %114 = tpu.matmul %111, %112, %cst_57 {dimension_numbers = #tpu.dot_dimension_numbers<[1], [1], [0], [0], [0, 0, 1, 0], [], []>} : vector<8x8xf32>, vector<8x8xf32>, vector<8x8xf32> -> vector<8x8xf32>
    %cst_58 = arith.constant 0.353553385 : f32
    %115 = vector.broadcast %cst_58 : f32 to vector<8x8xf32>
    %116 = arith.mulf %114, %115 : vector<8x8xf32>
    %117 = vector.broadcast %70 : vector<1x8xf32> to vector<8x8xf32>
    %118 = arith.addf %116, %117 : vector<8x8xf32>
    %cst_59 = arith.constant dense<0xFF800000> : vector<8xf32>
    %119 = vector.multi_reduction <maximumf>, %118, %cst_59 [1] : vector<8x8xf32> to vector<8xf32>
    %120 = vector.shape_cast %119 : vector<8xf32> to vector<8x1xf32>
    %121 = vector.broadcast %120 : vector<8x1xf32> to vector<8x8xf32>
    %122 = arith.subf %118, %121 : vector<8x8xf32>
    %123 = math.exp %122 : vector<8x8xf32>
    %cst_60 = arith.constant dense<0.000000e+00> : vector<8xf32>
    %124 = vector.multi_reduction <add>, %123, %cst_60 [1] : vector<8x8xf32> to vector<8xf32>
    %125 = vector.shape_cast %124 : vector<8xf32> to vector<8x1xf32>
    %126 = tpu.reciprocal %125 {approx = true} : vector<8x1xf32> -> vector<8x1xf32>
    %127 = vector.broadcast %126 : vector<8x1xf32> to vector<8x8xf32>
    %128 = arith.mulf %123, %127 : vector<8x8xf32>
    %cst_61 = arith.constant dense<0.000000e+00> : vector<8x8xf32>
    %129 = tpu.matmul %128, %113, %cst_61 {dimension_numbers = #tpu.dot_dimension_numbers<[1], [0], [0], [1], [0, 0, 1, 1], [], []>} : vector<8x8xf32>, vector<8x8xf32>, vector<8x8xf32> -> vector<8x8xf32>
    %c0_62 = arith.constant 0 : index
    %c16 = arith.constant 16 : index
    %130 = vector.load %arg28[%c0_62, %c16] : memref<16x32xf32, #tpu.memory_space<vmem>>, vector<8x8xf32>
    tpu.vector_store %arg28[%c0_62, %c16], %129 {strides = array<i32>} : memref<16x32xf32, #tpu.memory_space<vmem>>, vector<8x8xf32>,
    %131 = vector.extract_strided_slice %69 {offsets = [0, 24], sizes = [8, 8], strides = [1, 1]} : vector<16x96xf32> to vector<8x8xf32>
    %132 = vector.extract_strided_slice %69 {offsets = [0, 56], sizes = [8, 8], strides = [1, 1]} : vector<16x96xf32> to vector<8x8xf32>
    %133 = vector.extract_strided_slice %69 {offsets = [0, 88], sizes = [8, 8], strides = [1, 1]} : vector<16x96xf32> to vector<8x8xf32>
    %cst_63 = arith.constant dense<0.000000e+00> : vector<8x8xf32>
    %134 = tpu.matmul %131, %132, %cst_63 {dimension_numbers = #tpu.dot_dimension_numbers<[1], [1], [0], [0], [0, 0, 1, 0], [], []>} : vector<8x8xf32>, vector<8x8xf32>, vector<8x8xf32> -> vector<8x8xf32>
    %cst_64 = arith.constant 0.353553385 : f32
    %135 = vector.broadcast %cst_64 : f32 to vector<8x8xf32>
    %136 = arith.mulf %134, %135 : vector<8x8xf32>
    %137 = vector.broadcast %70 : vector<1x8xf32> to vector<8x8xf32>
    %138 = arith.addf %136, %137 : vector<8x8xf32>
    %cst_65 = arith.constant dense<0xFF800000> : vector<8xf32>
    %139 = vector.multi_reduction <maximumf>, %138, %cst_65 [1] : vector<8x8xf32> to vector<8xf32>
    %140 = vector.shape_cast %139 : vector<8xf32> to vector<8x1xf32>
    %141 = vector.broadcast %140 : vector<8x1xf32> to vector<8x8xf32>
    %142 = arith.subf %138, %141 : vector<8x8xf32>
    %143 = math.exp %142 : vector<8x8xf32>
    %cst_66 = arith.constant dense<0.000000e+00> : vector<8xf32>
    %144 = vector.multi_reduction <add>, %143, %cst_66 [1] : vector<8x8xf32> to vector<8xf32>
    %145 = vector.shape_cast %144 : vector<8xf32> to vector<8x1xf32>
    %146 = tpu.reciprocal %145 {approx = true} : vector<8x1xf32> -> vector<8x1xf32>
    %147 = vector.broadcast %146 : vector<8x1xf32> to vector<8x8xf32>
    %148 = arith.mulf %143, %147 : vector<8x8xf32>
    %cst_67 = arith.constant dense<0.000000e+00> : vector<8x8xf32>
    %149 = tpu.matmul %148, %133, %cst_67 {dimension_numbers = #tpu.dot_dimension_numbers<[1], [0], [0], [1], [0, 0, 1, 1], [], []>} : vector<8x8xf32>, vector<8x8xf32>, vector<8x8xf32> -> vector<8x8xf32>
    %c0_68 = arith.constant 0 : index
    %c24 = arith.constant 24 : index
    %150 = vector.load %arg28[%c0_68, %c24] : memref<16x32xf32, #tpu.memory_space<vmem>>, vector<8x8xf32>
    tpu.vector_store %arg28[%c0_68, %c24], %149 {strides = array<i32>} : memref<16x32xf32, #tpu.memory_space<vmem>>, vector<8x8xf32>,
    %c1_69 = arith.constant 1 : index
    %c0_70 = arith.constant 0 : index
    %151 = vector.load %arg3[%c1_69, %c0_70] : memref<2x8xf32, #tpu.memory_space<vmem>>, vector<1x8xf32>
    %152 = vector.extract_strided_slice %69 {offsets = [8, 0], sizes = [8, 8], strides = [1, 1]} : vector<16x96xf32> to vector<8x8xf32>
    %153 = vector.extract_strided_slice %69 {offsets = [8, 32], sizes = [8, 8], strides = [1, 1]} : vector<16x96xf32> to vector<8x8xf32>
    %154 = vector.extract_strided_slice %69 {offsets = [8, 64], sizes = [8, 8], strides = [1, 1]} : vector<16x96xf32> to vector<8x8xf32>
    %cst_71 = arith.constant dense<0.000000e+00> : vector<8x8xf32>
    %155 = tpu.matmul %152, %153, %cst_71 {dimension_numbers = #tpu.dot_dimension_numbers<[1], [1], [0], [0], [0, 0, 1, 0], [], []>} : vector<8x8xf32>, vector<8x8xf32>, vector<8x8xf32> -> vector<8x8xf32>
    %cst_72 = arith.constant 0.353553385 : f32
    %156 = vector.broadcast %cst_72 : f32 to vector<8x8xf32>
    %157 = arith.mulf %155, %156 : vector<8x8xf32>
    %158 = vector.broadcast %151 : vector<1x8xf32> to vector<8x8xf32>
    %159 = arith.addf %157, %158 : vector<8x8xf32>
    %cst_73 = arith.constant dense<0xFF800000> : vector<8xf32>
    %160 = vector.multi_reduction <maximumf>, %159, %cst_73 [1] : vector<8x8xf32> to vector<8xf32>
    %161 = vector.shape_cast %160 : vector<8xf32> to vector<8x1xf32>
    %162 = vector.broadcast %161 : vector<8x1xf32> to vector<8x8xf32>
    %163 = arith.subf %159, %162 : vector<8x8xf32>
    %164 = math.exp %163 : vector<8x8xf32>
    %cst_74 = arith.constant dense<0.000000e+00> : vector<8xf32>
    %165 = vector.multi_reduction <add>, %164, %cst_74 [1] : vector<8x8xf32> to vector<8xf32>
    %166 = vector.shape_cast %165 : vector<8xf32> to vector<8x1xf32>
    %167 = tpu.reciprocal %166 {approx = true} : vector<8x1xf32> -> vector<8x1xf32>
    %168 = vector.broadcast %167 : vector<8x1xf32> to vector<8x8xf32>
    %169 = arith.mulf %164, %168 : vector<8x8xf32>
    %cst_75 = arith.constant dense<0.000000e+00> : vector<8x8xf32>
    %170 = tpu.matmul %169, %154, %cst_75 {dimension_numbers = #tpu.dot_dimension_numbers<[1], [0], [0], [1], [0, 0, 1, 1], [], []>} : vector<8x8xf32>, vector<8x8xf32>, vector<8x8xf32> -> vector<8x8xf32>
    %c8_76 = arith.constant 8 : index
    %c0_77 = arith.constant 0 : index
    %171 = vector.load %arg28[%c8_76, %c0_77] : memref<16x32xf32, #tpu.memory_space<vmem>>, vector<8x8xf32>
    tpu.vector_store %arg28[%c8_76, %c0_77], %170 {strides = array<i32>} : memref<16x32xf32, #tpu.memory_space<vmem>>, vector<8x8xf32>,
    %172 = vector.extract_strided_slice %69 {offsets = [8, 8], sizes = [8, 8], strides = [1, 1]} : vector<16x96xf32> to vector<8x8xf32>
    %173 = vector.extract_strided_slice %69 {offsets = [8, 40], sizes = [8, 8], strides = [1, 1]} : vector<16x96xf32> to vector<8x8xf32>
    %174 = vector.extract_strided_slice %69 {offsets = [8, 72], sizes = [8, 8], strides = [1, 1]} : vector<16x96xf32> to vector<8x8xf32>
    %cst_78 = arith.constant dense<0.000000e+00> : vector<8x8xf32>
    %175 = tpu.matmul %172, %173, %cst_78 {dimension_numbers = #tpu.dot_dimension_numbers<[1], [1], [0], [0], [0, 0, 1, 0], [], []>} : vector<8x8xf32>, vector<8x8xf32>, vector<8x8xf32> -> vector<8x8xf32>
    %cst_79 = arith.constant 0.353553385 : f32
    %176 = vector.broadcast %cst_79 : f32 to vector<8x8xf32>
    %177 = arith.mulf %175, %176 : vector<8x8xf32>
    %178 = vector.broadcast %151 : vector<1x8xf32> to vector<8x8xf32>
    %179 = arith.addf %177, %178 : vector<8x8xf32>
    %cst_80 = arith.constant dense<0xFF800000> : vector<8xf32>
    %180 = vector.multi_reduction <maximumf>, %179, %cst_80 [1] : vector<8x8xf32> to vector<8xf32>
    %181 = vector.shape_cast %180 : vector<8xf32> to vector<8x1xf32>
    %182 = vector.broadcast %181 : vector<8x1xf32> to vector<8x8xf32>
    %183 = arith.subf %179, %182 : vector<8x8xf32>
    %184 = math.exp %183 : vector<8x8xf32>
    %cst_81 = arith.constant dense<0.000000e+00> : vector<8xf32>
    %185 = vector.multi_reduction <add>, %184, %cst_81 [1] : vector<8x8xf32> to vector<8xf32>
    %186 = vector.shape_cast %185 : vector<8xf32> to vector<8x1xf32>
    %187 = tpu.reciprocal %186 {approx = true} : vector<8x1xf32> -> vector<8x1xf32>
    %188 = vector.broadcast %187 : vector<8x1xf32> to vector<8x8xf32>
    %189 = arith.mulf %184, %188 : vector<8x8xf32>
    %cst_82 = arith.constant dense<0.000000e+00> : vector<8x8xf32>
    %190 = tpu.matmul %189, %174, %cst_82 {dimension_numbers = #tpu.dot_dimension_numbers<[1], [0], [0], [1], [0, 0, 1, 1], [], []>} : vector<8x8xf32>, vector<8x8xf32>, vector<8x8xf32> -> vector<8x8xf32>
    %c8_83 = arith.constant 8 : index
    %c8_84 = arith.constant 8 : index
    %191 = vector.load %arg28[%c8_83, %c8_84] : memref<16x32xf32, #tpu.memory_space<vmem>>, vector<8x8xf32>
    tpu.vector_store %arg28[%c8_83, %c8_84], %190 {strides = array<i32>} : memref<16x32xf32, #tpu.memory_space<vmem>>, vector<8x8xf32>,
    %192 = vector.extract_strided_slice %69 {offsets = [8, 16], sizes = [8, 8], strides = [1, 1]} : vector<16x96xf32> to vector<8x8xf32>
    %193 = vector.extract_strided_slice %69 {offsets = [8, 48], sizes = [8, 8], strides = [1, 1]} : vector<16x96xf32> to vector<8x8xf32>
    %194 = vector.extract_strided_slice %69 {offsets = [8, 80], sizes = [8, 8], strides = [1, 1]} : vector<16x96xf32> to vector<8x8xf32>
    %cst_85 = arith.constant dense<0.000000e+00> : vector<8x8xf32>
    %195 = tpu.matmul %192, %193, %cst_85 {dimension_numbers = #tpu.dot_dimension_numbers<[1], [1], [0], [0], [0, 0, 1, 0], [], []>} : vector<8x8xf32>, vector<8x8xf32>, vector<8x8xf32> -> vector<8x8xf32>
    %cst_86 = arith.constant 0.353553385 : f32
    %196 = vector.broadcast %cst_86 : f32 to vector<8x8xf32>
    %197 = arith.mulf %195, %196 : vector<8x8xf32>
    %198 = vector.broadcast %151 : vector<1x8xf32> to vector<8x8xf32>
    %199 = arith.addf %197, %198 : vector<8x8xf32>
    %cst_87 = arith.constant dense<0xFF800000> : vector<8xf32>
    %200 = vector.multi_reduction <maximumf>, %199, %cst_87 [1] : vector<8x8xf32> to vector<8xf32>
    %201 = vector.shape_cast %200 : vector<8xf32> to vector<8x1xf32>
    %202 = vector.broadcast %201 : vector<8x1xf32> to vector<8x8xf32>
    %203 = arith.subf %199, %202 : vector<8x8xf32>
    %204 = math.exp %203 : vector<8x8xf32>
    %cst_88 = arith.constant dense<0.000000e+00> : vector<8xf32>
    %205 = vector.multi_reduction <add>, %204, %cst_88 [1] : vector<8x8xf32> to vector<8xf32>
    %206 = vector.shape_cast %205 : vector<8xf32> to vector<8x1xf32>
    %207 = tpu.reciprocal %206 {approx = true} : vector<8x1xf32> -> vector<8x1xf32>
    %208 = vector.broadcast %207 : vector<8x1xf32> to vector<8x8xf32>
    %209 = arith.mulf %204, %208 : vector<8x8xf32>
    %cst_89 = arith.constant dense<0.000000e+00> : vector<8x8xf32>
    %210 = tpu.matmul %209, %194, %cst_89 {dimension_numbers = #tpu.dot_dimension_numbers<[1], [0], [0], [1], [0, 0, 1, 1], [], []>} : vector<8x8xf32>, vector<8x8xf32>, vector<8x8xf32> -> vector<8x8xf32>
    %c8_90 = arith.constant 8 : index
    %c16_91 = arith.constant 16 : index
    %211 = vector.load %arg28[%c8_90, %c16_91] : memref<16x32xf32, #tpu.memory_space<vmem>>, vector<8x8xf32>
    tpu.vector_store %arg28[%c8_90, %c16_91], %210 {strides = array<i32>} : memref<16x32xf32, #tpu.memory_space<vmem>>, vector<8x8xf32>,
    %212 = vector.extract_strided_slice %69 {offsets = [8, 24], sizes = [8, 8], strides = [1, 1]} : vector<16x96xf32> to vector<8x8xf32>
    %213 = vector.extract_strided_slice %69 {offsets = [8, 56], sizes = [8, 8], strides = [1, 1]} : vector<16x96xf32> to vector<8x8xf32>
    %214 = vector.extract_strided_slice %69 {offsets = [8, 88], sizes = [8, 8], strides = [1, 1]} : vector<16x96xf32> to vector<8x8xf32>
    %cst_92 = arith.constant dense<0.000000e+00> : vector<8x8xf32>
    %215 = tpu.matmul %212, %213, %cst_92 {dimension_numbers = #tpu.dot_dimension_numbers<[1], [1], [0], [0], [0, 0, 1, 0], [], []>} : vector<8x8xf32>, vector<8x8xf32>, vector<8x8xf32> -> vector<8x8xf32>
    %cst_93 = arith.constant 0.353553385 : f32
    %216 = vector.broadcast %cst_93 : f32 to vector<8x8xf32>
    %217 = arith.mulf %215, %216 : vector<8x8xf32>
    %218 = vector.broadcast %151 : vector<1x8xf32> to vector<8x8xf32>
    %219 = arith.addf %217, %218 : vector<8x8xf32>
    %cst_94 = arith.constant dense<0xFF800000> : vector<8xf32>
    %220 = vector.multi_reduction <maximumf>, %219, %cst_94 [1] : vector<8x8xf32> to vector<8xf32>
    %221 = vector.shape_cast %220 : vector<8xf32> to vector<8x1xf32>
    %222 = vector.broadcast %221 : vector<8x1xf32> to vector<8x8xf32>
    %223 = arith.subf %219, %222 : vector<8x8xf32>
    %224 = math.exp %223 : vector<8x8xf32>
    %cst_95 = arith.constant dense<0.000000e+00> : vector<8xf32>
    %225 = vector.multi_reduction <add>, %224, %cst_95 [1] : vector<8x8xf32> to vector<8xf32>
    %226 = vector.shape_cast %225 : vector<8xf32> to vector<8x1xf32>
    %227 = tpu.reciprocal %226 {approx = true} : vector<8x1xf32> -> vector<8x1xf32>
    %228 = vector.broadcast %227 : vector<8x1xf32> to vector<8x8xf32>
    %229 = arith.mulf %224, %228 : vector<8x8xf32>
    %cst_96 = arith.constant dense<0.000000e+00> : vector<8x8xf32>
    %230 = tpu.matmul %229, %214, %cst_96 {dimension_numbers = #tpu.dot_dimension_numbers<[1], [0], [0], [1], [0, 0, 1, 1], [], []>} : vector<8x8xf32>, vector<8x8xf32>, vector<8x8xf32> -> vector<8x8xf32>
    %c8_97 = arith.constant 8 : index
    %c24_98 = arith.constant 24 : index
    %231 = vector.load %arg28[%c8_97, %c24_98] : memref<16x32xf32, #tpu.memory_space<vmem>>, vector<8x8xf32>
    tpu.vector_store %arg28[%c8_97, %c24_98], %230 {strides = array<i32>} : memref<16x32xf32, #tpu.memory_space<vmem>>, vector<8x8xf32>,
    %c0_99 = arith.constant 0 : index
    %c0_100 = arith.constant 0 : index
    %232 = vector.load %arg28[%c0_99, %c0_100] : memref<16x32xf32, #tpu.memory_space<vmem>>, vector<16x32xf32>
    %c0_101 = arith.constant 0 : index
    %c0_102 = arith.constant 0 : index
    %c0_103 = arith.constant 0 : index
    %233 = vector.load %arg10[%c0_101, %c0_102, %c0_103] : memref<2x32x32xf32, #tpu.memory_space<vmem>>, vector<1x32x32xf32>
    %234 = vector.shape_cast %233 : vector<1x32x32xf32> to vector<32x32xf32>
    %cst_104 = arith.constant dense<0.000000e+00> : vector<16x32xf32>
    %235 = tpu.matmul %232, %234, %cst_104 {dimension_numbers = #tpu.dot_dimension_numbers<[1], [0], [0], [1], [0, 0, 1, 1], [], []>} : vector<16x32xf32>, vector<32x32xf32>, vector<16x32xf32> -> vector<16x32xf32>
    %236 = arith.addf %38, %235 : vector<16x32xf32>
    %c0_105 = arith.constant 0 : index
    %c0_106 = arith.constant 0 : index
    %c0_107 = arith.constant 0 : index
    %237 = vector.load %arg11[%c0_105, %c0_106, %c0_107] : memref<2x1x32xf32, #tpu.memory_space<vmem>>, vector<1x1x32xf32>
    %238 = vector.shape_cast %237 : vector<1x1x32xf32> to vector<1x32xf32>
    %239 = vector.broadcast %238 : vector<1x32xf32> to vector<16x32xf32>
    %240 = arith.addf %236, %239 : vector<16x32xf32>
    %cst_108 = arith.constant dense<0.000000e+00> : vector<16xf32>
    %241 = vector.multi_reduction <add>, %240, %cst_108 [1] : vector<16x32xf32> to vector<16xf32>
    %242 = vector.shape_cast %241 : vector<16xf32> to vector<16x1xf32>
    %cst_109 = arith.constant 3.200000e+01 : f32
    %243 = vector.broadcast %cst_109 : f32 to vector<16x1xf32>
    %244 = arith.divf %242, %243 : vector<16x1xf32>
    %245 = vector.broadcast %244 : vector<16x1xf32> to vector<16x32xf32>
    %246 = arith.subf %240, %245 : vector<16x32xf32>
    %247 = arith.mulf %246, %246 : vector<16x32xf32>
    %cst_110 = arith.constant dense<0.000000e+00> : vector<16xf32>
    %248 = vector.multi_reduction <add>, %247, %cst_110 [1] : vector<16x32xf32> to vector<16xf32>
    %249 = vector.shape_cast %248 : vector<16xf32> to vector<16x1xf32>
    %cst_111 = arith.constant 3.200000e+01 : f32
    %250 = vector.broadcast %cst_111 : f32 to vector<16x1xf32>
    %251 = arith.divf %249, %250 : vector<16x1xf32>
    %252 = vector.broadcast %244 : vector<16x1xf32> to vector<16x32xf32>
    %253 = arith.subf %240, %252 : vector<16x32xf32>
    %cst_112 = arith.constant 9.99999996E-13 : f32
    %254 = vector.broadcast %cst_112 : f32 to vector<16x1xf32>
    %255 = arith.addf %251, %254 : vector<16x1xf32>
    %256 = math.rsqrt %255 : vector<16x1xf32>
    %257 = vector.broadcast %256 : vector<16x1xf32> to vector<16x32xf32>
    %258 = arith.mulf %253, %257 : vector<16x32xf32>
    %259 = vector.broadcast %39 : vector<1x32xf32> to vector<16x32xf32>
    %260 = arith.mulf %258, %259 : vector<16x32xf32>
    %261 = vector.broadcast %40 : vector<1x32xf32> to vector<16x32xf32>
    %262 = arith.addf %260, %261 : vector<16x32xf32>
    %c0_113 = arith.constant 0 : index
    %c0_114 = arith.constant 0 : index
    %c0_115 = arith.constant 0 : index
    %263 = vector.load %arg12[%c0_113, %c0_114, %c0_115] : memref<2x32x128xf32, #tpu.memory_space<vmem>>, vector<1x32x128xf32>
    %264 = vector.shape_cast %263 : vector<1x32x128xf32> to vector<32x128xf32>
    %cst_116 = arith.constant dense<0.000000e+00> : vector<16x128xf32>
    %265 = tpu.matmul %262, %264, %cst_116 {dimension_numbers = #tpu.dot_dimension_numbers<[1], [0], [0], [1], [0, 0, 1, 1], [], []>} : vector<16x32xf32>, vector<32x128xf32>, vector<16x128xf32> -> vector<16x128xf32>
    %c0_117 = arith.constant 0 : index
    %c0_118 = arith.constant 0 : index
    %c0_119 = arith.constant 0 : index
    %266 = vector.load %arg13[%c0_117, %c0_118, %c0_119] : memref<2x1x128xf32, #tpu.memory_space<vmem>>, vector<1x1x128xf32>
    %267 = vector.shape_cast %266 : vector<1x1x128xf32> to vector<1x128xf32>
    %268 = vector.broadcast %267 : vector<1x128xf32> to vector<16x128xf32>
    %269 = arith.addf %265, %268 : vector<16x128xf32>
    %cst_120 = arith.constant 5.000000e-01 : f32
    %270 = vector.broadcast %cst_120 : f32 to vector<16x128xf32>
    %271 = arith.mulf %269, %270 : vector<16x128xf32>
    %cst_121 = arith.constant 1.41421354 : f32
    %272 = vector.broadcast %cst_121 : f32 to vector<16x128xf32>
    %273 = arith.divf %269, %272 : vector<16x128xf32>
    %274 = math.erf %273 : vector<16x128xf32>
    %cst_122 = arith.constant 1.000000e+00 : f32
    %275 = vector.broadcast %cst_122 : f32 to vector<16x128xf32>
    %276 = arith.addf %275, %274 : vector<16x128xf32>
    %277 = arith.mulf %271, %276 : vector<16x128xf32>
    %c0_123 = arith.constant 0 : index
    %c0_124 = arith.constant 0 : index
    %c0_125 = arith.constant 0 : index
    %278 = vector.load %arg14[%c0_123, %c0_124, %c0_125] : memref<2x128x32xf32, #tpu.memory_space<vmem>>, vector<1x128x32xf32>
    %279 = vector.shape_cast %278 : vector<1x128x32xf32> to vector<128x32xf32>
    %cst_126 = arith.constant dense<0.000000e+00> : vector<16x32xf32>
    %280 = tpu.matmul %277, %279, %cst_126 {dimension_numbers = #tpu.dot_dimension_numbers<[1], [0], [0], [1], [0, 0, 1, 1], [], []>} : vector<16x128xf32>, vector<128x32xf32>, vector<16x32xf32> -> vector<16x32xf32>
    %281 = arith.addf %240, %280 : vector<16x32xf32>
    %c0_127 = arith.constant 0 : index
    %c0_128 = arith.constant 0 : index
    %c0_129 = arith.constant 0 : index
    %282 = vector.load %arg15[%c0_127, %c0_128, %c0_129] : memref<2x1x32xf32, #tpu.memory_space<vmem>>, vector<1x1x32xf32>
    %283 = vector.shape_cast %282 : vector<1x1x32xf32> to vector<1x32xf32>
    %284 = vector.broadcast %283 : vector<1x32xf32> to vector<16x32xf32>
    %285 = arith.addf %281, %284 : vector<16x32xf32>
    %cst_130 = arith.constant dense<0.000000e+00> : vector<16xf32>
    %286 = vector.multi_reduction <add>, %285, %cst_130 [1] : vector<16x32xf32> to vector<16xf32>
    %287 = vector.shape_cast %286 : vector<16xf32> to vector<16x1xf32>
    %cst_131 = arith.constant 3.200000e+01 : f32
    %288 = vector.broadcast %cst_131 : f32 to vector<16x1xf32>
    %289 = arith.divf %287, %288 : vector<16x1xf32>
    %290 = vector.broadcast %289 : vector<16x1xf32> to vector<16x32xf32>
    %291 = arith.subf %285, %290 : vector<16x32xf32>
    %292 = arith.mulf %291, %291 : vector<16x32xf32>
    %cst_132 = arith.constant dense<0.000000e+00> : vector<16xf32>
    %293 = vector.multi_reduction <add>, %292, %cst_132 [1] : vector<16x32xf32> to vector<16xf32>
    %294 = vector.shape_cast %293 : vector<16xf32> to vector<16x1xf32>
    %cst_133 = arith.constant 3.200000e+01 : f32
    %295 = vector.broadcast %cst_133 : f32 to vector<16x1xf32>
    %296 = arith.divf %294, %295 : vector<16x1xf32>
    %297 = vector.broadcast %289 : vector<16x1xf32> to vector<16x32xf32>
    %298 = arith.subf %285, %297 : vector<16x32xf32>
    %cst_134 = arith.constant 9.99999996E-13 : f32
    %299 = vector.broadcast %cst_134 : f32 to vector<16x1xf32>
    %300 = arith.addf %296, %299 : vector<16x1xf32>
    %301 = math.rsqrt %300 : vector<16x1xf32>
    %302 = vector.broadcast %301 : vector<16x1xf32> to vector<16x32xf32>
    %303 = arith.mulf %298, %302 : vector<16x32xf32>
    %304 = vector.broadcast %39 : vector<1x32xf32> to vector<16x32xf32>
    %305 = arith.mulf %303, %304 : vector<16x32xf32>
    %306 = vector.broadcast %40 : vector<1x32xf32> to vector<16x32xf32>
    %307 = arith.addf %305, %306 : vector<16x32xf32>
    %c1_135 = arith.constant 1 : index
    %c0_136 = arith.constant 0 : index
    %c0_137 = arith.constant 0 : index
    %308 = vector.load %arg8[%c1_135, %c0_136, %c0_137] : memref<2x32x96xf32, #tpu.memory_space<vmem>>, vector<1x32x96xf32>
    %309 = vector.shape_cast %308 : vector<1x32x96xf32> to vector<32x96xf32>
    %cst_138 = arith.constant dense<0.000000e+00> : vector<16x96xf32>
    %310 = tpu.matmul %307, %309, %cst_138 {dimension_numbers = #tpu.dot_dimension_numbers<[1], [0], [0], [1], [0, 0, 1, 1], [], []>} : vector<16x32xf32>, vector<32x96xf32>, vector<16x96xf32> -> vector<16x96xf32>
    %c1_139 = arith.constant 1 : index
    %c0_140 = arith.constant 0 : index
    %c0_141 = arith.constant 0 : index
    %311 = vector.load %arg9[%c1_139, %c0_140, %c0_141] : memref<2x1x96xf32, #tpu.memory_space<vmem>>, vector<1x1x96xf32>
    %312 = vector.shape_cast %311 : vector<1x1x96xf32> to vector<1x96xf32>
    %313 = vector.broadcast %312 : vector<1x96xf32> to vector<16x96xf32>
    %314 = arith.addf %310, %313 : vector<16x96xf32>
    %c0_142 = arith.constant 0 : index
    %c0_143 = arith.constant 0 : index
    %315 = vector.load %arg3[%c0_142, %c0_143] : memref<2x8xf32, #tpu.memory_space<vmem>>, vector<1x8xf32>
    %316 = vector.extract_strided_slice %314 {offsets = [0, 0], sizes = [8, 8], strides = [1, 1]} : vector<16x96xf32> to vector<8x8xf32>
    %317 = vector.extract_strided_slice %314 {offsets = [0, 32], sizes = [8, 8], strides = [1, 1]} : vector<16x96xf32> to vector<8x8xf32>
    %318 = vector.extract_strided_slice %314 {offsets = [0, 64], sizes = [8, 8], strides = [1, 1]} : vector<16x96xf32> to vector<8x8xf32>
    %cst_144 = arith.constant dense<0.000000e+00> : vector<8x8xf32>
    %319 = tpu.matmul %316, %317, %cst_144 {dimension_numbers = #tpu.dot_dimension_numbers<[1], [1], [0], [0], [0, 0, 1, 0], [], []>} : vector<8x8xf32>, vector<8x8xf32>, vector<8x8xf32> -> vector<8x8xf32>
    %cst_145 = arith.constant 0.353553385 : f32
    %320 = vector.broadcast %cst_145 : f32 to vector<8x8xf32>
    %321 = arith.mulf %319, %320 : vector<8x8xf32>
    %322 = vector.broadcast %315 : vector<1x8xf32> to vector<8x8xf32>
    %323 = arith.addf %321, %322 : vector<8x8xf32>
    %cst_146 = arith.constant dense<0xFF800000> : vector<8xf32>
    %324 = vector.multi_reduction <maximumf>, %323, %cst_146 [1] : vector<8x8xf32> to vector<8xf32>
    %325 = vector.shape_cast %324 : vector<8xf32> to vector<8x1xf32>
    %326 = vector.broadcast %325 : vector<8x1xf32> to vector<8x8xf32>
    %327 = arith.subf %323, %326 : vector<8x8xf32>
    %328 = math.exp %327 : vector<8x8xf32>
    %cst_147 = arith.constant dense<0.000000e+00> : vector<8xf32>
    %329 = vector.multi_reduction <add>, %328, %cst_147 [1] : vector<8x8xf32> to vector<8xf32>
    %330 = vector.shape_cast %329 : vector<8xf32> to vector<8x1xf32>
    %331 = tpu.reciprocal %330 {approx = true} : vector<8x1xf32> -> vector<8x1xf32>
    %332 = vector.broadcast %331 : vector<8x1xf32> to vector<8x8xf32>
    %333 = arith.mulf %328, %332 : vector<8x8xf32>
    %cst_148 = arith.constant dense<0.000000e+00> : vector<8x8xf32>
    %334 = tpu.matmul %333, %318, %cst_148 {dimension_numbers = #tpu.dot_dimension_numbers<[1], [0], [0], [1], [0, 0, 1, 1], [], []>} : vector<8x8xf32>, vector<8x8xf32>, vector<8x8xf32> -> vector<8x8xf32>
    %c0_149 = arith.constant 0 : index
    %c0_150 = arith.constant 0 : index
    %335 = vector.load %arg28[%c0_149, %c0_150] : memref<16x32xf32, #tpu.memory_space<vmem>>, vector<8x8xf32>
    tpu.vector_store %arg28[%c0_149, %c0_150], %334 {strides = array<i32>} : memref<16x32xf32, #tpu.memory_space<vmem>>, vector<8x8xf32>,
    %336 = vector.extract_strided_slice %314 {offsets = [0, 8], sizes = [8, 8], strides = [1, 1]} : vector<16x96xf32> to vector<8x8xf32>
    %337 = vector.extract_strided_slice %314 {offsets = [0, 40], sizes = [8, 8], strides = [1, 1]} : vector<16x96xf32> to vector<8x8xf32>
    %338 = vector.extract_strided_slice %314 {offsets = [0, 72], sizes = [8, 8], strides = [1, 1]} : vector<16x96xf32> to vector<8x8xf32>
    %cst_151 = arith.constant dense<0.000000e+00> : vector<8x8xf32>
    %339 = tpu.matmul %336, %337, %cst_151 {dimension_numbers = #tpu.dot_dimension_numbers<[1], [1], [0], [0], [0, 0, 1, 0], [], []>} : vector<8x8xf32>, vector<8x8xf32>, vector<8x8xf32> -> vector<8x8xf32>
    %cst_152 = arith.constant 0.353553385 : f32
    %340 = vector.broadcast %cst_152 : f32 to vector<8x8xf32>
    %341 = arith.mulf %339, %340 : vector<8x8xf32>
    %342 = vector.broadcast %315 : vector<1x8xf32> to vector<8x8xf32>
    %343 = arith.addf %341, %342 : vector<8x8xf32>
    %cst_153 = arith.constant dense<0xFF800000> : vector<8xf32>
    %344 = vector.multi_reduction <maximumf>, %343, %cst_153 [1] : vector<8x8xf32> to vector<8xf32>
    %345 = vector.shape_cast %344 : vector<8xf32> to vector<8x1xf32>
    %346 = vector.broadcast %345 : vector<8x1xf32> to vector<8x8xf32>
    %347 = arith.subf %343, %346 : vector<8x8xf32>
    %348 = math.exp %347 : vector<8x8xf32>
    %cst_154 = arith.constant dense<0.000000e+00> : vector<8xf32>
    %349 = vector.multi_reduction <add>, %348, %cst_154 [1] : vector<8x8xf32> to vector<8xf32>
    %350 = vector.shape_cast %349 : vector<8xf32> to vector<8x1xf32>
    %351 = tpu.reciprocal %350 {approx = true} : vector<8x1xf32> -> vector<8x1xf32>
    %352 = vector.broadcast %351 : vector<8x1xf32> to vector<8x8xf32>
    %353 = arith.mulf %348, %352 : vector<8x8xf32>
    %cst_155 = arith.constant dense<0.000000e+00> : vector<8x8xf32>
    %354 = tpu.matmul %353, %338, %cst_155 {dimension_numbers = #tpu.dot_dimension_numbers<[1], [0], [0], [1], [0, 0, 1, 1], [], []>} : vector<8x8xf32>, vector<8x8xf32>, vector<8x8xf32> -> vector<8x8xf32>
    %c0_156 = arith.constant 0 : index
    %c8_157 = arith.constant 8 : index
    %355 = vector.load %arg28[%c0_156, %c8_157] : memref<16x32xf32, #tpu.memory_space<vmem>>, vector<8x8xf32>
    tpu.vector_store %arg28[%c0_156, %c8_157], %354 {strides = array<i32>} : memref<16x32xf32, #tpu.memory_space<vmem>>, vector<8x8xf32>,
    %356 = vector.extract_strided_slice %314 {offsets = [0, 16], sizes = [8, 8], strides = [1, 1]} : vector<16x96xf32> to vector<8x8xf32>
    %357 = vector.extract_strided_slice %314 {offsets = [0, 48], sizes = [8, 8], strides = [1, 1]} : vector<16x96xf32> to vector<8x8xf32>
    %358 = vector.extract_strided_slice %314 {offsets = [0, 80], sizes = [8, 8], strides = [1, 1]} : vector<16x96xf32> to vector<8x8xf32>
    %cst_158 = arith.constant dense<0.000000e+00> : vector<8x8xf32>
    %359 = tpu.matmul %356, %357, %cst_158 {dimension_numbers = #tpu.dot_dimension_numbers<[1], [1], [0], [0], [0, 0, 1, 0], [], []>} : vector<8x8xf32>, vector<8x8xf32>, vector<8x8xf32> -> vector<8x8xf32>
    %cst_159 = arith.constant 0.353553385 : f32
    %360 = vector.broadcast %cst_159 : f32 to vector<8x8xf32>
    %361 = arith.mulf %359, %360 : vector<8x8xf32>
    %362 = vector.broadcast %315 : vector<1x8xf32> to vector<8x8xf32>
    %363 = arith.addf %361, %362 : vector<8x8xf32>
    %cst_160 = arith.constant dense<0xFF800000> : vector<8xf32>
    %364 = vector.multi_reduction <maximumf>, %363, %cst_160 [1] : vector<8x8xf32> to vector<8xf32>
    %365 = vector.shape_cast %364 : vector<8xf32> to vector<8x1xf32>
    %366 = vector.broadcast %365 : vector<8x1xf32> to vector<8x8xf32>
    %367 = arith.subf %363, %366 : vector<8x8xf32>
    %368 = math.exp %367 : vector<8x8xf32>
    %cst_161 = arith.constant dense<0.000000e+00> : vector<8xf32>
    %369 = vector.multi_reduction <add>, %368, %cst_161 [1] : vector<8x8xf32> to vector<8xf32>
    %370 = vector.shape_cast %369 : vector<8xf32> to vector<8x1xf32>
    %371 = tpu.reciprocal %370 {approx = true} : vector<8x1xf32> -> vector<8x1xf32>
    %372 = vector.broadcast %371 : vector<8x1xf32> to vector<8x8xf32>
    %373 = arith.mulf %368, %372 : vector<8x8xf32>
    %cst_162 = arith.constant dense<0.000000e+00> : vector<8x8xf32>
    %374 = tpu.matmul %373, %358, %cst_162 {dimension_numbers = #tpu.dot_dimension_numbers<[1], [0], [0], [1], [0, 0, 1, 1], [], []>} : vector<8x8xf32>, vector<8x8xf32>, vector<8x8xf32> -> vector<8x8xf32>
    %c0_163 = arith.constant 0 : index
    %c16_164 = arith.constant 16 : index
    %375 = vector.load %arg28[%c0_163, %c16_164] : memref<16x32xf32, #tpu.memory_space<vmem>>, vector<8x8xf32>
    tpu.vector_store %arg28[%c0_163, %c16_164], %374 {strides = array<i32>} : memref<16x32xf32, #tpu.memory_space<vmem>>, vector<8x8xf32>,
    %376 = vector.extract_strided_slice %314 {offsets = [0, 24], sizes = [8, 8], strides = [1, 1]} : vector<16x96xf32> to vector<8x8xf32>
    %377 = vector.extract_strided_slice %314 {offsets = [0, 56], sizes = [8, 8], strides = [1, 1]} : vector<16x96xf32> to vector<8x8xf32>
    %378 = vector.extract_strided_slice %314 {offsets = [0, 88], sizes = [8, 8], strides = [1, 1]} : vector<16x96xf32> to vector<8x8xf32>
    %cst_165 = arith.constant dense<0.000000e+00> : vector<8x8xf32>
    %379 = tpu.matmul %376, %377, %cst_165 {dimension_numbers = #tpu.dot_dimension_numbers<[1], [1], [0], [0], [0, 0, 1, 0], [], []>} : vector<8x8xf32>, vector<8x8xf32>, vector<8x8xf32> -> vector<8x8xf32>
    %cst_166 = arith.constant 0.353553385 : f32
    %380 = vector.broadcast %cst_166 : f32 to vector<8x8xf32>
    %381 = arith.mulf %379, %380 : vector<8x8xf32>
    %382 = vector.broadcast %315 : vector<1x8xf32> to vector<8x8xf32>
    %383 = arith.addf %381, %382 : vector<8x8xf32>
    %cst_167 = arith.constant dense<0xFF800000> : vector<8xf32>
    %384 = vector.multi_reduction <maximumf>, %383, %cst_167 [1] : vector<8x8xf32> to vector<8xf32>
    %385 = vector.shape_cast %384 : vector<8xf32> to vector<8x1xf32>
    %386 = vector.broadcast %385 : vector<8x1xf32> to vector<8x8xf32>
    %387 = arith.subf %383, %386 : vector<8x8xf32>
    %388 = math.exp %387 : vector<8x8xf32>
    %cst_168 = arith.constant dense<0.000000e+00> : vector<8xf32>
    %389 = vector.multi_reduction <add>, %388, %cst_168 [1] : vector<8x8xf32> to vector<8xf32>
    %390 = vector.shape_cast %389 : vector<8xf32> to vector<8x1xf32>
    %391 = tpu.reciprocal %390 {approx = true} : vector<8x1xf32> -> vector<8x1xf32>
    %392 = vector.broadcast %391 : vector<8x1xf32> to vector<8x8xf32>
    %393 = arith.mulf %388, %392 : vector<8x8xf32>
    %cst_169 = arith.constant dense<0.000000e+00> : vector<8x8xf32>
    %394 = tpu.matmul %393, %378, %cst_169 {dimension_numbers = #tpu.dot_dimension_numbers<[1], [0], [0], [1], [0, 0, 1, 1], [], []>} : vector<8x8xf32>, vector<8x8xf32>, vector<8x8xf32> -> vector<8x8xf32>
    %c0_170 = arith.constant 0 : index
    %c24_171 = arith.constant 24 : index
    %395 = vector.load %arg28[%c0_170, %c24_171] : memref<16x32xf32, #tpu.memory_space<vmem>>, vector<8x8xf32>
    tpu.vector_store %arg28[%c0_170, %c24_171], %394 {strides = array<i32>} : memref<16x32xf32, #tpu.memory_space<vmem>>, vector<8x8xf32>,
    %c1_172 = arith.constant 1 : index
    %c0_173 = arith.constant 0 : index
    %396 = vector.load %arg3[%c1_172, %c0_173] : memref<2x8xf32, #tpu.memory_space<vmem>>, vector<1x8xf32>
    %397 = vector.extract_strided_slice %314 {offsets = [8, 0], sizes = [8, 8], strides = [1, 1]} : vector<16x96xf32> to vector<8x8xf32>
    %398 = vector.extract_strided_slice %314 {offsets = [8, 32], sizes = [8, 8], strides = [1, 1]} : vector<16x96xf32> to vector<8x8xf32>
    %399 = vector.extract_strided_slice %314 {offsets = [8, 64], sizes = [8, 8], strides = [1, 1]} : vector<16x96xf32> to vector<8x8xf32>
    %cst_174 = arith.constant dense<0.000000e+00> : vector<8x8xf32>
    %400 = tpu.matmul %397, %398, %cst_174 {dimension_numbers = #tpu.dot_dimension_numbers<[1], [1], [0], [0], [0, 0, 1, 0], [], []>} : vector<8x8xf32>, vector<8x8xf32>, vector<8x8xf32> -> vector<8x8xf32>
    %cst_175 = arith.constant 0.353553385 : f32
    %401 = vector.broadcast %cst_175 : f32 to vector<8x8xf32>
    %402 = arith.mulf %400, %401 : vector<8x8xf32>
    %403 = vector.broadcast %396 : vector<1x8xf32> to vector<8x8xf32>
    %404 = arith.addf %402, %403 : vector<8x8xf32>
    %cst_176 = arith.constant dense<0xFF800000> : vector<8xf32>
    %405 = vector.multi_reduction <maximumf>, %404, %cst_176 [1] : vector<8x8xf32> to vector<8xf32>
    %406 = vector.shape_cast %405 : vector<8xf32> to vector<8x1xf32>
    %407 = vector.broadcast %406 : vector<8x1xf32> to vector<8x8xf32>
    %408 = arith.subf %404, %407 : vector<8x8xf32>
    %409 = math.exp %408 : vector<8x8xf32>
    %cst_177 = arith.constant dense<0.000000e+00> : vector<8xf32>
    %410 = vector.multi_reduction <add>, %409, %cst_177 [1] : vector<8x8xf32> to vector<8xf32>
    %411 = vector.shape_cast %410 : vector<8xf32> to vector<8x1xf32>
    %412 = tpu.reciprocal %411 {approx = true} : vector<8x1xf32> -> vector<8x1xf32>
    %413 = vector.broadcast %412 : vector<8x1xf32> to vector<8x8xf32>
    %414 = arith.mulf %409, %413 : vector<8x8xf32>
    %cst_178 = arith.constant dense<0.000000e+00> : vector<8x8xf32>
    %415 = tpu.matmul %414, %399, %cst_178 {dimension_numbers = #tpu.dot_dimension_numbers<[1], [0], [0], [1], [0, 0, 1, 1], [], []>} : vector<8x8xf32>, vector<8x8xf32>, vector<8x8xf32> -> vector<8x8xf32>
    %c8_179 = arith.constant 8 : index
    %c0_180 = arith.constant 0 : index
    %416 = vector.load %arg28[%c8_179, %c0_180] : memref<16x32xf32, #tpu.memory_space<vmem>>, vector<8x8xf32>
    tpu.vector_store %arg28[%c8_179, %c0_180], %415 {strides = array<i32>} : memref<16x32xf32, #tpu.memory_space<vmem>>, vector<8x8xf32>,
    %417 = vector.extract_strided_slice %314 {offsets = [8, 8], sizes = [8, 8], strides = [1, 1]} : vector<16x96xf32> to vector<8x8xf32>
    %418 = vector.extract_strided_slice %314 {offsets = [8, 40], sizes = [8, 8], strides = [1, 1]} : vector<16x96xf32> to vector<8x8xf32>
    %419 = vector.extract_strided_slice %314 {offsets = [8, 72], sizes = [8, 8], strides = [1, 1]} : vector<16x96xf32> to vector<8x8xf32>
    %cst_181 = arith.constant dense<0.000000e+00> : vector<8x8xf32>
    %420 = tpu.matmul %417, %418, %cst_181 {dimension_numbers = #tpu.dot_dimension_numbers<[1], [1], [0], [0], [0, 0, 1, 0], [], []>} : vector<8x8xf32>, vector<8x8xf32>, vector<8x8xf32> -> vector<8x8xf32>
    %cst_182 = arith.constant 0.353553385 : f32
    %421 = vector.broadcast %cst_182 : f32 to vector<8x8xf32>
    %422 = arith.mulf %420, %421 : vector<8x8xf32>
    %423 = vector.broadcast %396 : vector<1x8xf32> to vector<8x8xf32>
    %424 = arith.addf %422, %423 : vector<8x8xf32>
    %cst_183 = arith.constant dense<0xFF800000> : vector<8xf32>
    %425 = vector.multi_reduction <maximumf>, %424, %cst_183 [1] : vector<8x8xf32> to vector<8xf32>
    %426 = vector.shape_cast %425 : vector<8xf32> to vector<8x1xf32>
    %427 = vector.broadcast %426 : vector<8x1xf32> to vector<8x8xf32>
    %428 = arith.subf %424, %427 : vector<8x8xf32>
    %429 = math.exp %428 : vector<8x8xf32>
    %cst_184 = arith.constant dense<0.000000e+00> : vector<8xf32>
    %430 = vector.multi_reduction <add>, %429, %cst_184 [1] : vector<8x8xf32> to vector<8xf32>
    %431 = vector.shape_cast %430 : vector<8xf32> to vector<8x1xf32>
    %432 = tpu.reciprocal %431 {approx = true} : vector<8x1xf32> -> vector<8x1xf32>
    %433 = vector.broadcast %432 : vector<8x1xf32> to vector<8x8xf32>
    %434 = arith.mulf %429, %433 : vector<8x8xf32>
    %cst_185 = arith.constant dense<0.000000e+00> : vector<8x8xf32>
    %435 = tpu.matmul %434, %419, %cst_185 {dimension_numbers = #tpu.dot_dimension_numbers<[1], [0], [0], [1], [0, 0, 1, 1], [], []>} : vector<8x8xf32>, vector<8x8xf32>, vector<8x8xf32> -> vector<8x8xf32>
    %c8_186 = arith.constant 8 : index
    %c8_187 = arith.constant 8 : index
    %436 = vector.load %arg28[%c8_186, %c8_187] : memref<16x32xf32, #tpu.memory_space<vmem>>, vector<8x8xf32>
    tpu.vector_store %arg28[%c8_186, %c8_187], %435 {strides = array<i32>} : memref<16x32xf32, #tpu.memory_space<vmem>>, vector<8x8xf32>,
    %437 = vector.extract_strided_slice %314 {offsets = [8, 16], sizes = [8, 8], strides = [1, 1]} : vector<16x96xf32> to vector<8x8xf32>
    %438 = vector.extract_strided_slice %314 {offsets = [8, 48], sizes = [8, 8], strides = [1, 1]} : vector<16x96xf32> to vector<8x8xf32>
    %439 = vector.extract_strided_slice %314 {offsets = [8, 80], sizes = [8, 8], strides = [1, 1]} : vector<16x96xf32> to vector<8x8xf32>
    %cst_188 = arith.constant dense<0.000000e+00> : vector<8x8xf32>
    %440 = tpu.matmul %437, %438, %cst_188 {dimension_numbers = #tpu.dot_dimension_numbers<[1], [1], [0], [0], [0, 0, 1, 0], [], []>} : vector<8x8xf32>, vector<8x8xf32>, vector<8x8xf32> -> vector<8x8xf32>
    %cst_189 = arith.constant 0.353553385 : f32
    %441 = vector.broadcast %cst_189 : f32 to vector<8x8xf32>
    %442 = arith.mulf %440, %441 : vector<8x8xf32>
    %443 = vector.broadcast %396 : vector<1x8xf32> to vector<8x8xf32>
    %444 = arith.addf %442, %443 : vector<8x8xf32>
    %cst_190 = arith.constant dense<0xFF800000> : vector<8xf32>
    %445 = vector.multi_reduction <maximumf>, %444, %cst_190 [1] : vector<8x8xf32> to vector<8xf32>
    %446 = vector.shape_cast %445 : vector<8xf32> to vector<8x1xf32>
    %447 = vector.broadcast %446 : vector<8x1xf32> to vector<8x8xf32>
    %448 = arith.subf %444, %447 : vector<8x8xf32>
    %449 = math.exp %448 : vector<8x8xf32>
    %cst_191 = arith.constant dense<0.000000e+00> : vector<8xf32>
    %450 = vector.multi_reduction <add>, %449, %cst_191 [1] : vector<8x8xf32> to vector<8xf32>
    %451 = vector.shape_cast %450 : vector<8xf32> to vector<8x1xf32>
    %452 = tpu.reciprocal %451 {approx = true} : vector<8x1xf32> -> vector<8x1xf32>
    %453 = vector.broadcast %452 : vector<8x1xf32> to vector<8x8xf32>
    %454 = arith.mulf %449, %453 : vector<8x8xf32>
    %cst_192 = arith.constant dense<0.000000e+00> : vector<8x8xf32>
    %455 = tpu.matmul %454, %439, %cst_192 {dimension_numbers = #tpu.dot_dimension_numbers<[1], [0], [0], [1], [0, 0, 1, 1], [], []>} : vector<8x8xf32>, vector<8x8xf32>, vector<8x8xf32> -> vector<8x8xf32>
    %c8_193 = arith.constant 8 : index
    %c16_194 = arith.constant 16 : index
    %456 = vector.load %arg28[%c8_193, %c16_194] : memref<16x32xf32, #tpu.memory_space<vmem>>, vector<8x8xf32>
    tpu.vector_store %arg28[%c8_193, %c16_194], %455 {strides = array<i32>} : memref<16x32xf32, #tpu.memory_space<vmem>>, vector<8x8xf32>,
    %457 = vector.extract_strided_slice %314 {offsets = [8, 24], sizes = [8, 8], strides = [1, 1]} : vector<16x96xf32> to vector<8x8xf32>
    %458 = vector.extract_strided_slice %314 {offsets = [8, 56], sizes = [8, 8], strides = [1, 1]} : vector<16x96xf32> to vector<8x8xf32>
    %459 = vector.extract_strided_slice %314 {offsets = [8, 88], sizes = [8, 8], strides = [1, 1]} : vector<16x96xf32> to vector<8x8xf32>
    %cst_195 = arith.constant dense<0.000000e+00> : vector<8x8xf32>
    %460 = tpu.matmul %457, %458, %cst_195 {dimension_numbers = #tpu.dot_dimension_numbers<[1], [1], [0], [0], [0, 0, 1, 0], [], []>} : vector<8x8xf32>, vector<8x8xf32>, vector<8x8xf32> -> vector<8x8xf32>
    %cst_196 = arith.constant 0.353553385 : f32
    %461 = vector.broadcast %cst_196 : f32 to vector<8x8xf32>
    %462 = arith.mulf %460, %461 : vector<8x8xf32>
    %463 = vector.broadcast %396 : vector<1x8xf32> to vector<8x8xf32>
    %464 = arith.addf %462, %463 : vector<8x8xf32>
    %cst_197 = arith.constant dense<0xFF800000> : vector<8xf32>
    %465 = vector.multi_reduction <maximumf>, %464, %cst_197 [1] : vector<8x8xf32> to vector<8xf32>
    %466 = vector.shape_cast %465 : vector<8xf32> to vector<8x1xf32>
    %467 = vector.broadcast %466 : vector<8x1xf32> to vector<8x8xf32>
    %468 = arith.subf %464, %467 : vector<8x8xf32>
    %469 = math.exp %468 : vector<8x8xf32>
    %cst_198 = arith.constant dense<0.000000e+00> : vector<8xf32>
    %470 = vector.multi_reduction <add>, %469, %cst_198 [1] : vector<8x8xf32> to vector<8xf32>
    %471 = vector.shape_cast %470 : vector<8xf32> to vector<8x1xf32>
    %472 = tpu.reciprocal %471 {approx = true} : vector<8x1xf32> -> vector<8x1xf32>
    %473 = vector.broadcast %472 : vector<8x1xf32> to vector<8x8xf32>
    %474 = arith.mulf %469, %473 : vector<8x8xf32>
    %cst_199 = arith.constant dense<0.000000e+00> : vector<8x8xf32>
    %475 = tpu.matmul %474, %459, %cst_199 {dimension_numbers = #tpu.dot_dimension_numbers<[1], [0], [0], [1], [0, 0, 1, 1], [], []>} : vector<8x8xf32>, vector<8x8xf32>, vector<8x8xf32> -> vector<8x8xf32>
    %c8_200 = arith.constant 8 : index
    %c24_201 = arith.constant 24 : index
    %476 = vector.load %arg28[%c8_200, %c24_201] : memref<16x32xf32, #tpu.memory_space<vmem>>, vector<8x8xf32>
    tpu.vector_store %arg28[%c8_200, %c24_201], %475 {strides = array<i32>} : memref<16x32xf32, #tpu.memory_space<vmem>>, vector<8x8xf32>,
    %c0_202 = arith.constant 0 : index
    %c0_203 = arith.constant 0 : index
    %477 = vector.load %arg28[%c0_202, %c0_203] : memref<16x32xf32, #tpu.memory_space<vmem>>, vector<16x32xf32>
    %c1_204 = arith.constant 1 : index
    %c0_205 = arith.constant 0 : index
    %c0_206 = arith.constant 0 : index
    %478 = vector.load %arg10[%c1_204, %c0_205, %c0_206] : memref<2x32x32xf32, #tpu.memory_space<vmem>>, vector<1x32x32xf32>
    %479 = vector.shape_cast %478 : vector<1x32x32xf32> to vector<32x32xf32>
    %cst_207 = arith.constant dense<0.000000e+00> : vector<16x32xf32>
    %480 = tpu.matmul %477, %479, %cst_207 {dimension_numbers = #tpu.dot_dimension_numbers<[1], [0], [0], [1], [0, 0, 1, 1], [], []>} : vector<16x32xf32>, vector<32x32xf32>, vector<16x32xf32> -> vector<16x32xf32>
    %481 = arith.addf %285, %480 : vector<16x32xf32>
    %c1_208 = arith.constant 1 : index
    %c0_209 = arith.constant 0 : index
    %c0_210 = arith.constant 0 : index
    %482 = vector.load %arg11[%c1_208, %c0_209, %c0_210] : memref<2x1x32xf32, #tpu.memory_space<vmem>>, vector<1x1x32xf32>
    %483 = vector.shape_cast %482 : vector<1x1x32xf32> to vector<1x32xf32>
    %484 = vector.broadcast %483 : vector<1x32xf32> to vector<16x32xf32>
    %485 = arith.addf %481, %484 : vector<16x32xf32>
    %cst_211 = arith.constant dense<0.000000e+00> : vector<16xf32>
    %486 = vector.multi_reduction <add>, %485, %cst_211 [1] : vector<16x32xf32> to vector<16xf32>
    %487 = vector.shape_cast %486 : vector<16xf32> to vector<16x1xf32>
    %cst_212 = arith.constant 3.200000e+01 : f32
    %488 = vector.broadcast %cst_212 : f32 to vector<16x1xf32>
    %489 = arith.divf %487, %488 : vector<16x1xf32>
    %490 = vector.broadcast %489 : vector<16x1xf32> to vector<16x32xf32>
    %491 = arith.subf %485, %490 : vector<16x32xf32>
    %492 = arith.mulf %491, %491 : vector<16x32xf32>
    %cst_213 = arith.constant dense<0.000000e+00> : vector<16xf32>
    %493 = vector.multi_reduction <add>, %492, %cst_213 [1] : vector<16x32xf32> to vector<16xf32>
    %494 = vector.shape_cast %493 : vector<16xf32> to vector<16x1xf32>
    %cst_214 = arith.constant 3.200000e+01 : f32
    %495 = vector.broadcast %cst_214 : f32 to vector<16x1xf32>
    %496 = arith.divf %494, %495 : vector<16x1xf32>
    %497 = vector.broadcast %489 : vector<16x1xf32> to vector<16x32xf32>
    %498 = arith.subf %485, %497 : vector<16x32xf32>
    %cst_215 = arith.constant 9.99999996E-13 : f32
    %499 = vector.broadcast %cst_215 : f32 to vector<16x1xf32>
    %500 = arith.addf %496, %499 : vector<16x1xf32>
    %501 = math.rsqrt %500 : vector<16x1xf32>
    %502 = vector.broadcast %501 : vector<16x1xf32> to vector<16x32xf32>
    %503 = arith.mulf %498, %502 : vector<16x32xf32>
    %504 = vector.broadcast %39 : vector<1x32xf32> to vector<16x32xf32>
    %505 = arith.mulf %503, %504 : vector<16x32xf32>
    %506 = vector.broadcast %40 : vector<1x32xf32> to vector<16x32xf32>
    %507 = arith.addf %505, %506 : vector<16x32xf32>
    %c1_216 = arith.constant 1 : index
    %c0_217 = arith.constant 0 : index
    %c0_218 = arith.constant 0 : index
    %508 = vector.load %arg12[%c1_216, %c0_217, %c0_218] : memref<2x32x128xf32, #tpu.memory_space<vmem>>, vector<1x32x128xf32>
    %509 = vector.shape_cast %508 : vector<1x32x128xf32> to vector<32x128xf32>
    %cst_219 = arith.constant dense<0.000000e+00> : vector<16x128xf32>
    %510 = tpu.matmul %507, %509, %cst_219 {dimension_numbers = #tpu.dot_dimension_numbers<[1], [0], [0], [1], [0, 0, 1, 1], [], []>} : vector<16x32xf32>, vector<32x128xf32>, vector<16x128xf32> -> vector<16x128xf32>
    %c1_220 = arith.constant 1 : index
    %c0_221 = arith.constant 0 : index
    %c0_222 = arith.constant 0 : index
    %511 = vector.load %arg13[%c1_220, %c0_221, %c0_222] : memref<2x1x128xf32, #tpu.memory_space<vmem>>, vector<1x1x128xf32>
    %512 = vector.shape_cast %511 : vector<1x1x128xf32> to vector<1x128xf32>
    %513 = vector.broadcast %512 : vector<1x128xf32> to vector<16x128xf32>
    %514 = arith.addf %510, %513 : vector<16x128xf32>
    %cst_223 = arith.constant 5.000000e-01 : f32
    %515 = vector.broadcast %cst_223 : f32 to vector<16x128xf32>
    %516 = arith.mulf %514, %515 : vector<16x128xf32>
    %cst_224 = arith.constant 1.41421354 : f32
    %517 = vector.broadcast %cst_224 : f32 to vector<16x128xf32>
    %518 = arith.divf %514, %517 : vector<16x128xf32>
    %519 = math.erf %518 : vector<16x128xf32>
    %cst_225 = arith.constant 1.000000e+00 : f32
    %520 = vector.broadcast %cst_225 : f32 to vector<16x128xf32>
    %521 = arith.addf %520, %519 : vector<16x128xf32>
    %522 = arith.mulf %516, %521 : vector<16x128xf32>
    %c1_226 = arith.constant 1 : index
    %c0_227 = arith.constant 0 : index
    %c0_228 = arith.constant 0 : index
    %523 = vector.load %arg14[%c1_226, %c0_227, %c0_228] : memref<2x128x32xf32, #tpu.memory_space<vmem>>, vector<1x128x32xf32>
    %524 = vector.shape_cast %523 : vector<1x128x32xf32> to vector<128x32xf32>
    %cst_229 = arith.constant dense<0.000000e+00> : vector<16x32xf32>
    %525 = tpu.matmul %522, %524, %cst_229 {dimension_numbers = #tpu.dot_dimension_numbers<[1], [0], [0], [1], [0, 0, 1, 1], [], []>} : vector<16x128xf32>, vector<128x32xf32>, vector<16x32xf32> -> vector<16x32xf32>
    %526 = arith.addf %485, %525 : vector<16x32xf32>
    %c1_230 = arith.constant 1 : index
    %c0_231 = arith.constant 0 : index
    %c0_232 = arith.constant 0 : index
    %527 = vector.load %arg15[%c1_230, %c0_231, %c0_232] : memref<2x1x32xf32, #tpu.memory_space<vmem>>, vector<1x1x32xf32>
    %528 = vector.shape_cast %527 : vector<1x1x32xf32> to vector<1x32xf32>
    %529 = vector.broadcast %528 : vector<1x32xf32> to vector<16x32xf32>
    %530 = arith.addf %526, %529 : vector<16x32xf32>
    %531 = vector.extract_strided_slice %530 {offsets = [0, 0], sizes = [1, 32], strides = [1, 1]} : vector<16x32xf32> to vector<1x32xf32>
    %532 = vector.extract_strided_slice %530 {offsets = [8, 0], sizes = [1, 32], strides = [1, 1]} : vector<16x32xf32> to vector<1x32xf32>
    %533 = tpu.concatenate %531, %532 in 0 : vector<1x32xf32>, vector<1x32xf32> -> vector<2x32xf32>
    %c0_233 = arith.constant 0 : index
    %c0_234 = arith.constant 0 : index
    %534 = vector.load %arg16[%c0_233, %c0_234] : memref<32x32xf32, #tpu.memory_space<vmem>>, vector<32x32xf32>
    %cst_235 = arith.constant dense<0.000000e+00> : vector<2x32xf32>
    %535 = tpu.matmul %533, %534, %cst_235 {dimension_numbers = #tpu.dot_dimension_numbers<[1], [0], [0], [1], [0, 0, 1, 1], [], []>} : vector<2x32xf32>, vector<32x32xf32>, vector<2x32xf32> -> vector<2x32xf32>
    %c0_236 = arith.constant 0 : index
    %c0_237 = arith.constant 0 : index
    %536 = vector.load %arg17[%c0_236, %c0_237] : memref<1x32xf32, #tpu.memory_space<vmem>>, vector<1x32xf32>
    %537 = vector.broadcast %536 : vector<1x32xf32> to vector<2x32xf32>
    %538 = arith.addf %535, %537 : vector<2x32xf32>
    %539 = math.tanh %538 : vector<2x32xf32>
    %c0_238 = arith.constant 0 : index
    %c0_239 = arith.constant 0 : index
    %540 = vector.load %arg18[%c0_238, %c0_239] : memref<32x32xf32, #tpu.memory_space<vmem>>, vector<32x32xf32>
    %cst_240 = arith.constant dense<0.000000e+00> : vector<2x32xf32>
    %541 = tpu.matmul %539, %540, %cst_240 {dimension_numbers = #tpu.dot_dimension_numbers<[1], [0], [0], [1], [0, 0, 1, 1], [], []>} : vector<2x32xf32>, vector<32x32xf32>, vector<2x32xf32> -> vector<2x32xf32>
    %c0_241 = arith.constant 0 : index
    %c0_242 = arith.constant 0 : index
    %542 = vector.load %arg19[%c0_241, %c0_242] : memref<1x32xf32, #tpu.memory_space<vmem>>, vector<1x32xf32>
    %543 = vector.broadcast %542 : vector<1x32xf32> to vector<2x32xf32>
    %544 = arith.addf %541, %543 : vector<2x32xf32>
    %545 = arith.negf %544 : vector<2x32xf32>
    %546 = math.exp %545 : vector<2x32xf32>
    %cst_243 = arith.constant 1.000000e+00 : f32
    %547 = vector.broadcast %cst_243 : f32 to vector<2x32xf32>
    %548 = arith.addf %547, %546 : vector<2x32xf32>
    %549 = arith.divf %547, %548 : vector<2x32xf32>
    %550 = arith.mulf %544, %549 : vector<2x32xf32>
    %c0_244 = arith.constant 0 : index
    %c0_245 = arith.constant 0 : index
    %551 = vector.load %arg20[%c0_244, %c0_245] : memref<32x32xf32, #tpu.memory_space<vmem>>, vector<32x32xf32>
    %cst_246 = arith.constant dense<0.000000e+00> : vector<2x32xf32>
    %552 = tpu.matmul %550, %551, %cst_246 {dimension_numbers = #tpu.dot_dimension_numbers<[1], [0], [0], [1], [0, 0, 1, 1], [], []>} : vector<2x32xf32>, vector<32x32xf32>, vector<2x32xf32> -> vector<2x32xf32>
    %c0_247 = arith.constant 0 : index
    %c0_248 = arith.constant 0 : index
    %553 = vector.load %arg21[%c0_247, %c0_248] : memref<1x32xf32, #tpu.memory_space<vmem>>, vector<1x32xf32>
    %554 = vector.broadcast %553 : vector<1x32xf32> to vector<2x32xf32>
    %555 = arith.addf %552, %554 : vector<2x32xf32>
    %c0_249 = arith.constant 0 : index
    %c0_250 = arith.constant 0 : index
    %556 = vector.load %arg22[%c0_249, %c0_250] : memref<1x32xf32, #tpu.memory_space<vmem>>, vector<1x32xf32>
    %c0_251 = arith.constant 0 : index
    %c0_252 = arith.constant 0 : index
    %557 = vector.load %arg23[%c0_251, %c0_252] : memref<1x32xf32, #tpu.memory_space<vmem>>, vector<1x32xf32>
    %cst_253 = arith.constant dense<0.000000e+00> : vector<2xf32>
    %558 = vector.multi_reduction <add>, %555, %cst_253 [1] : vector<2x32xf32> to vector<2xf32>
    %559 = vector.shape_cast %558 : vector<2xf32> to vector<2x1xf32>
    %cst_254 = arith.constant 3.200000e+01 : f32
    %560 = vector.broadcast %cst_254 : f32 to vector<2x1xf32>
    %561 = arith.divf %559, %560 : vector<2x1xf32>
    %562 = vector.broadcast %561 : vector<2x1xf32> to vector<2x32xf32>
    %563 = arith.subf %555, %562 : vector<2x32xf32>
    %564 = arith.mulf %563, %563 : vector<2x32xf32>
    %cst_255 = arith.constant dense<0.000000e+00> : vector<2xf32>
    %565 = vector.multi_reduction <add>, %564, %cst_255 [1] : vector<2x32xf32> to vector<2xf32>
    %566 = vector.shape_cast %565 : vector<2xf32> to vector<2x1xf32>
    %cst_256 = arith.constant 3.200000e+01 : f32
    %567 = vector.broadcast %cst_256 : f32 to vector<2x1xf32>
    %568 = arith.divf %566, %567 : vector<2x1xf32>
    %569 = vector.broadcast %561 : vector<2x1xf32> to vector<2x32xf32>
    %570 = arith.subf %555, %569 : vector<2x32xf32>
    %cst_257 = arith.constant 9.99999996E-13 : f32
    %571 = vector.broadcast %cst_257 : f32 to vector<2x1xf32>
    %572 = arith.addf %568, %571 : vector<2x1xf32>
    %573 = math.rsqrt %572 : vector<2x1xf32>
    %574 = vector.broadcast %573 : vector<2x1xf32> to vector<2x32xf32>
    %575 = arith.mulf %570, %574 : vector<2x32xf32>
    %576 = vector.broadcast %556 : vector<1x32xf32> to vector<2x32xf32>
    %577 = arith.mulf %575, %576 : vector<2x32xf32>
    %578 = vector.broadcast %557 : vector<1x32xf32> to vector<2x32xf32>
    %579 = arith.addf %577, %578 : vector<2x32xf32>
    %c0_258 = arith.constant 0 : index
    %c0_259 = arith.constant 0 : index
    %580 = vector.load %arg24[%c0_258, %c0_259] : memref<32x128xf32, #tpu.memory_space<vmem>>, vector<32x128xf32>
    %cst_260 = arith.constant dense<0.000000e+00> : vector<2x128xf32>
    %581 = tpu.matmul %579, %580, %cst_260 {dimension_numbers = #tpu.dot_dimension_numbers<[1], [0], [0], [1], [0, 0, 1, 1], [], []>} : vector<2x32xf32>, vector<32x128xf32>, vector<2x128xf32> -> vector<2x128xf32>
    %c0_261 = arith.constant 0 : index
    %c0_262 = arith.constant 0 : index
    %582 = vector.load %arg25[%c0_261, %c0_262] : memref<1x128xf32, #tpu.memory_space<vmem>>, vector<1x128xf32>
    %583 = vector.broadcast %582 : vector<1x128xf32> to vector<2x128xf32>
    %584 = arith.addf %581, %583 : vector<2x128xf32>
    %c0_263 = arith.constant 0 : index
    %c0_264 = arith.constant 0 : index
    %585 = vector.load %arg26[%c0_263, %c0_264] : memref<2x128xf32, #tpu.memory_space<vmem>>, vector<2x128xf32>
    tpu.vector_store %arg26[%c0_263, %c0_264], %584 {strides = array<i32>} : memref<2x128xf32, #tpu.memory_space<vmem>>, vector<2x128xf32>,
    return
  }
}

</mosaic_0001>

<bundles_post_ra>
// kernel: model_forward.1
= control target key start
LH: loop header
LB: loop body
LE: loop exit
PB: predicated region body
PF: predicated region fallthrough
CT: control target
= control target key end

     0   :  { %s11979_s0 = inlined_call_operand.vmem [shape: f32[2,2048,49], index: 0, kind: input, shape index: {}]   ;;  %s11980_s1 = inlined_call_operand.vmem [shape: f32[2048,32], index: 1, kind: input, shape index: {}]   ;;  %s11981_s2 = inlined_call_operand.vmem [shape: f32[16,32], index: 2, kind: input, shape index: {}]   ;;  %s11982_s3 = inlined_call_operand.vmem [shape: f32[2,8], index: 3, kind: input, shape index: {}]   ;;  %s11983_s4 = inlined_call_operand.vmem [shape: f32[1,32], index: 4, kind: input, shape index: {}]   ;;  %s11984_s5 = inlined_call_operand.vmem [shape: f32[1,32], index: 5, kind: input, shape index: {}]   ;;  %s11985_s6 = inlined_call_operand.vmem [shape: f32[1,32], index: 6, kind: input, shape index: {}]   ;;  %s11986_s7 = inlined_call_operand.vmem [shape: f32[1,32], index: 7, kind: input, shape index: {}]   ;;  %s11987_s8 = inlined_call_operand.vmem [shape: f32[2,32,96], index: 8, kind: input, shape index: {}]   ;;  %s11988_s9 = inlined_call_operand.vmem [shape: f32[2,1,96], index: 9, kind: input, shape index: {}]   ;;  %s11989_s10 = inlined_call_operand.vmem [shape: f32[2,32,32], index: 10, kind: input, shape index: {}]   ;;  %s11990_s11 = inlined_call_operand.vmem [shape: f32[2,1,32], index: 11, kind: input, shape index: {}]   ;;  %s11991_s12 = inlined_call_operand.vmem [shape: f32[2,32,128], index: 12, kind: input, shape index: {}]   ;;  %s11992_s13 = inlined_call_operand.vmem [shape: f32[2,1,128], index: 13, kind: input, shape index: {}]   ;;  %s11993_s14 = inlined_call_operand.vmem [shape: f32[2,128,32], index: 14, kind: input, shape index: {}]   ;;  %s11994_s15 = inlined_call_operand.vmem [shape: f32[2,1,32], index: 15, kind: input, shape index: {}]   ;;  %s11995_s16 = inlined_call_operand.vmem [shape: f32[32,32], index: 16, kind: input, shape index: {}]   ;;  %s11996_s17 = inlined_call_operand.vmem [shape: f32[1,32], index: 17, kind: input, shape index: {}]   ;;  %s11997_s18 = inlined_call_operand.vmem [shape: f32[32,32], index: 18, kind: input, shape index: {}]   ;;  %s11998_s19 = inlined_call_operand.vmem [shape: f32[1,32], index: 19, kind: input, shape index: {}]   ;;  %s11999_s20 = inlined_call_operand.vmem [shape: f32[32,32], index: 20, kind: input, shape index: {}]   ;;  %s12000_s21 = inlined_call_operand.vmem [shape: f32[1,32], index: 21, kind: input, shape index: {}]   ;;  %s12001_s22 = inlined_call_operand.vmem [shape: f32[1,32], index: 22, kind: input, shape index: {}]   ;;  %s12002_s23 = inlined_call_operand.vmem [shape: f32[1,32], index: 23, kind: input, shape index: {}]   ;;  %s12003_s24 = inlined_call_operand.vmem [shape: f32[32,128], index: 24, kind: input, shape index: {}]   ;;  %s12004_s25 = inlined_call_operand.vmem [shape: f32[1,128], index: 25, kind: input, shape index: {}]   ;;  %s12005_s26 = inlined_call_operand.hbm [shape: f32[2,128], index: 26, kind: output, shape index: {0}]   ;;  %s12006_s27 = inlined_call_operand.vmem [shape: f32[2,49,32], index: 27, kind: output, shape index: {1}]  }
   0x1   :  { %12059 = sst [smem:[#allocation97_spill]] %s11979_s0 }
   0x2   :  { %12060 = sst [smem:[#allocation98_spill]] %s11980_s1 }
   0x3   :  { %12061 = sst [smem:[#allocation99_spill]] %s11981_s2 }
   0x4   :  { %12062 = sst [smem:[#allocation100_spill]] %s11982_s3 }
   0x5   :  { %12063 = sst [smem:[#allocation101_spill]] %s11983_s4 }
   0x6   :  { %12064 = sst [smem:[#allocation102_spill]] %s11984_s5 }
   0x7   :  { %12065 = sst [smem:[#allocation103_spill]] %s11985_s6 }
   0x8   :  { %12066 = sst [smem:[#allocation104_spill]] %s11986_s7 }
   0x9   :  { %12067 = sst [smem:[#allocation105_spill]] %s11987_s8 }
   0xa   :  { %12068 = sst [smem:[#allocation106_spill]] %s11988_s9 }
   0xb   :  { %12069 = sst [smem:[#allocation107_spill]] %s11989_s10 }
   0xc   :  { %12070 = sst [smem:[#allocation108_spill]] %s11990_s11 }
   0xd   :  { %12071 = sst [smem:[#allocation109_spill]] %s12002_s23 }
   0xe   :  { %12072 = sst [smem:[#allocation110_spill]] %s12004_s25 }
   0xf   :  { %12073 = sst [smem:[#allocation111_spill]] %s12005_s26 }
  0x10   :  { %vm1718_vm0 = vcmask 261120   ;;  %s12074_s8 = sld [smem:[#allocation99_spill]] }
  0x11   :  { %s12075_s5 = sld [smem:[#allocation97_spill]] }
  0x16   :  { %v7236_v0 = vld [vmem:[%s12074_s8] sm:$0xff] }
  0x17   :  { %v102_v1 = vld [vmem:[%s12075_s5 + $0x80] sm:$0xff]  ;;  %v3372_v3 = vsel %vm1718_vm0, %v7236_v0, 0.0  ;;  %v103_v8 = vld [vmem:[%s12075_s5 + $0x88] sm:$0xff]  ;;  %v104_v14 = vld [vmem:[%s12075_s5 + $0x90] sm:$0xff] }
  0x18   :  { %v5500_v2 = vld [vmem:[%s12075_s5 + $0x800] sm:$0xff]  ;;  %3373 = vadd.xlane.f32.xlu2 %v3372_v3  ;;  %v5501_v9 = vld [vmem:[%s12075_s5 + $0x808] sm:$0xff]  ;;  %v5502_v15 = vld [vmem:[%s12075_s5 + $0x810] sm:$0xff] }
  0x19   :  { %v6417_v4 = vpack.i.bf16 %v5500_v2, %v102_v1  ;;  %v86_v5 = vld [vmem:[%s12075_s5] sm:$0xff]  ;;  %v87_v10 = vld [vmem:[%s12075_s5 + $0x8] sm:$0xff]  ;;  %v6419_v12 = vpack.i.bf16 %v5501_v9, %v103_v8  ;;  %v88_v16 = vld [vmem:[%s12075_s5 + $0x10] sm:$0xff]  ;;  %v6421_v18 = vpack.i.bf16 %v5502_v15, %v104_v14 }
  0x1a   :  { %v214_v6 = vld [vmem:[%s12075_s5 + $0x400] sm:$0xff]  ;;  %v215_v11 = vld [vmem:[%s12075_s5 + $0x408] sm:$0xff]  ;;  %v216_v17 = vld [vmem:[%s12075_s5 + $0x410] sm:$0xff] }
  0x1b   :  { %v6350_v7 = vpack.i.bf16 %v214_v6, %v86_v5  ;;  %6418 = vxpose.xlu1.b32.start [1/16] (narrow) %v6417_v4, 56  ;;  %v6352_v13 = vpack.i.bf16 %v215_v11, %v87_v10  ;;  %v6354_v19 = vpack.i.bf16 %v216_v17, %v88_v16 }
  0x1d   :  { %6351 = vxpose.xlu0.b32.start [1/16] (narrow) %v6350_v7, 56 }
  0x23   :  { %6420 = vxpose.xlu1.b32.cont [2/16] (narrow) %v6419_v12, 56 }
  0x25   :  { %6353 = vxpose.xlu0.b32.cont [2/16] (narrow) %v6352_v13, 56 }
  0x26   :  { %33 = vsyncpa [#allocation4], 0  ;;  %v105_v20 = vld [vmem:[%s12075_s5 + $0x98] sm:$0xff]  ;;  %v106_v26 = vld [vmem:[%s12075_s5 + $0xa0] sm:$0xff]  ;;  %v7061_v11 = vmov 32.0   ;;  %s12076_s28 = sld [smem:[#allocation98_spill]] }
  0x27   :  { %v5503_v21 = vld [vmem:[%s12075_s5 + $0x818] sm:$0xff]  ;;  %v5504_v27 = vld [vmem:[%s12075_s5 + $0x820] sm:$0xff]  ;;  %v107_v32 = vld [vmem:[%s12075_s5 + $0xa8] sm:$0xff]  ;;  %6908 = vrcp.f32 %v7061_v11  ;;  %s12077_s6 = sld [smem:[#allocation101_spill]]  ;;  %s12051_s25 = smov 96   ;;  %vm1725_vm11 = vcmask 253952  }
  0x28   :  { %v89_v22 = vld [vmem:[%s12075_s5 + $0x18] sm:$0xff]  ;;  %v6423_v24 = vpack.i.bf16 %v5503_v21, %v105_v20  ;;  %v90_v28 = vld [vmem:[%s12075_s5 + $0x20] sm:$0xff]  ;;  %v6425_v30 = vpack.i.bf16 %v5504_v27, %v106_v26  ;;  %v5505_v33 = vld [vmem:[%s12075_s5 + $0x828] sm:$0xff]  ;;  %s12078_s1 = sld [smem:[#allocation102_spill]]  ;;  %s12028_s26 = smov 120   ;;  %vm3530_vm12 = vcmask 64512  }
  0x29   :  { %v217_v23 = vld [vmem:[%s12075_s5 + $0x418] sm:$0xff]  ;;  %v218_v29 = vld [vmem:[%s12075_s5 + $0x420] sm:$0xff]  ;;  %v91_v34 = vld [vmem:[%s12075_s5 + $0x28] sm:$0xff]  ;;  %v6427_v36 = vpack.i.bf16 %v5505_v33, %v107_v32  ;;  %s12133_s9 = sld [smem:[#allocation103_spill]]  ;;  %s12032_s29 = smov 88  }
  0x2a   :  { %v6356_v25 = vpack.i.bf16 %v217_v23, %v89_v22  ;;  %v6358_v31 = vpack.i.bf16 %v218_v29, %v90_v28  ;;  %v219_v35 = vld [vmem:[%s12075_s5 + $0x428] sm:$0xff]  ;;  %v108_v38 = vld [vmem:[%s12075_s5 + $0xb0] sm:$0xff]  ;;  %v109_v44 = vld [vmem:[%s12075_s5 + $0xb8] sm:$0xff]  ;;  %s12136_s11 = sld [smem:[#allocation105_spill]]  ;;  %s12043_s2 = smov 80  }
  0x2b   :  { %6422 = vxpose.xlu1.b32.cont [3/16] (narrow) %v6421_v18, 56  ;;  %v6360_v37 = vpack.i.bf16 %v219_v35, %v91_v34  ;;  %v5506_v39 = vld [vmem:[%s12075_s5 + $0x830] sm:$0xff]  ;;  %v5507_v45 = vld [vmem:[%s12075_s5 + $0x838] sm:$0xff]  ;;  %v110_v50 = vld [vmem:[%s12075_s5 + $0xc0] sm:$0xff]  ;;  %s12174_s3 = sld [smem:[#allocation106_spill]]  ;;  %s12272_s4 = smov 120  }
  0x2c   :  { %v92_v40 = vld [vmem:[%s12075_s5 + $0x30] sm:$0xff]  ;;  %v6429_v42 = vpack.i.bf16 %v5506_v39, %v108_v38  ;;  %v93_v46 = vld [vmem:[%s12075_s5 + $0x38] sm:$0xff]  ;;  %v6431_v48 = vpack.i.bf16 %v5507_v45, %v109_v44  ;;  %v5508_v51 = vld [vmem:[%s12075_s5 + $0x840] sm:$0xff]  ;;  %s12037_s30 = smov 48   ;;  %s12274_s7 = smov 64  }
  0x2d   :  { %6355 = vxpose.xlu0.b32.cont [3/16] (narrow) %v6354_v19, 56  ;;  %v220_v41 = vld [vmem:[%s12075_s5 + $0x430] sm:$0xff]  ;;  %v221_v47 = vld [vmem:[%s12075_s5 + $0x438] sm:$0xff]  ;;  %v94_v52 = vld [vmem:[%s12075_s5 + $0x40] sm:$0xff]  ;;  %v6433_v54 = vpack.i.bf16 %v5508_v51, %v110_v50  ;;  %v6909_v17 = vpop.eup %6908  ;;  %s12053_s0 = smov 8   ;;  %s12057_s10 = smov 24  }
  0x2e   :  { %v6362_v43 = vpack.i.bf16 %v220_v41, %v92_v40  ;;  %v6364_v49 = vpack.i.bf16 %v221_v47, %v93_v46  ;;  %v222_v53 = vld [vmem:[%s12075_s5 + $0x440] sm:$0xff]  ;;  %v111_v56 = vld [vmem:[%s12075_s5 + $0xc8] sm:$0xff]  ;;  %v112_v62 = vld [vmem:[%s12075_s5 + $0xd0] sm:$0xff]  ;;  %v3379_v19 = vmul.f32 32.0, %v6909_v17  ;;  %vm3383_vm1 = vweird.f32 %v6909_v17  ;;  %s12291_s23 = sld [smem:[#allocation110_spill]] }
  0x2f   :  { %v6366_v55 = vpack.i.bf16 %v222_v53, %v94_v52  ;;  %v5509_v57 = vld [vmem:[%s12075_s5 + $0x848] sm:$0xff]  ;;  %v5510_v63 = vld [vmem:[%s12075_s5 + $0x850] sm:$0xff]  ;;  %v113_v5 = vld [vmem:[%s12075_s5 + $0xd8] sm:$0xff] }
  0x30   :  { %v95_v58 = vld [vmem:[%s12075_s5 + $0x48] sm:$0xff]  ;;  %v6435_v60 = vpack.i.bf16 %v5509_v57, %v111_v56  ;;  %v96_v1 = vld [vmem:[%s12075_s5 + $0x50] sm:$0xff]  ;;  %v6437_v3 = vpack.i.bf16 %v5510_v63, %v112_v62  ;;  %v5511_v6 = vld [vmem:[%s12075_s5 + $0x858] sm:$0xff]  ;;  %v3380_v27 = vsub.f32 1.0, %v3379_v19 }
  0x31   :  { %v223_v59 = vld [vmem:[%s12075_s5 + $0x448] sm:$0xff]  ;;  %v224_v2 = vld [vmem:[%s12075_s5 + $0x450] sm:$0xff]  ;;  %v97_v7 = vld [vmem:[%s12075_s5 + $0x58] sm:$0xff]  ;;  %v6439_v9 = vpack.i.bf16 %v5511_v6, %v113_v5 }
  0x32   :  { %v6368_v61 = vpack.i.bf16 %v223_v59, %v95_v58  ;;  %v6370_v4 = vpack.i.bf16 %v224_v2, %v96_v1  ;;  %v225_v8 = vld [vmem:[%s12075_s5 + $0x458] sm:$0xff]  ;;  %v114_v12 = vld [vmem:[%s12075_s5 + $0xe0] sm:$0xff]  ;;  %v115_v22 = vld [vmem:[%s12075_s5 + $0xe8] sm:$0xff]  ;;  %v3381_v29 = vmul.f32 %v6909_v17, %v3380_v27 }
  0x33   :  { %6424 = vxpose.xlu1.b32.cont [4/16] (narrow) %v6423_v24, 56  ;;  %v6372_v10 = vpack.i.bf16 %v225_v8, %v97_v7  ;;  %v5512_v13 = vld [vmem:[%s12075_s5 + $0x860] sm:$0xff]  ;;  %v357_v20 = vld [vmem:[%s12076_s28 + $0x78] sm:$0xff]  ;;  %v5513_v23 = vld [vmem:[%s12075_s5 + $0x868] sm:$0xff] }
  0x34   :  { %v98_v14 = vld [vmem:[%s12075_s5 + $0x60] sm:$0xff]  ;;  %v6441_v16 = vpack.i.bf16 %v5512_v13, %v114_v12  ;;  %v373_v21 = vld [vmem:[%s12076_s28 + $0xf8] sm:$0xff]  ;;  %1110 = vmatpush.msra.mxu0 %v357_v20  ;;  %v99_v24 = vld [vmem:[%s12075_s5 + $0x68] sm:$0xff]  ;;  %v6443_v26 = vpack.i.bf16 %v5513_v23, %v115_v22  ;;  %v3382_v41 = vadd.f32 %v6909_v17, %v3381_v29 }
  0x35   :  { %6357 = vxpose.xlu0.b32.cont [4/16] (narrow) %v6356_v25, 56  ;;  %v226_v15 = vld [vmem:[%s12075_s5 + $0x460] sm:$0xff]  ;;  %v227_v25 = vld [vmem:[%s12075_s5 + $0x468] sm:$0xff]  ;;  %1148 = vmatpush.msra.mxu1 %v373_v21  ;;  %v116_v33 = vld [vmem:[%s12075_s5 + $0xf0] sm:$0xff] }
  0x36   :  { %v6374_v18 = vpack.i.bf16 %v226_v15, %v98_v14  ;;  %v6376_v28 = vpack.i.bf16 %v227_v25, %v99_v24  ;;  %v355_v32 = vld [vmem:[%s12076_s28 + $0x68] sm:$0xff]  ;;  %v5514_v34 = vld [vmem:[%s12075_s5 + $0x870] sm:$0xff]  ;;  %v354_v38 = vld [vmem:[%s12076_s28 + $0x60] sm:$0xff]  ;;  %v7450_v45 = vsel %vm3383_vm1, %v6909_v17, %v3382_v41  ;;  %vm3667_vm1 = vcmask 130112  }
  0x37   :  { %v371_v35 = vld [vmem:[%s12076_s28 + $0xe8] sm:$0xff]  ;;  %v370_v39 = vld [vmem:[%s12076_s28 + $0xe0] sm:$0xff]  ;;  %v6445_v40 = vpack.i.bf16 %v5514_v34, %v116_v33  ;;  %v369_v44 = vld [vmem:[%s12076_s28 + $0xd8] sm:$0xff] }
  0x38   :  { %v352_v46 = vld [vmem:[%s12076_s28 + $0x50] sm:$0xff]  ;;  %v5515_v50 = vld [vmem:[%s12075_s5 + $0x878] sm:$0xff]  ;;  %v367_v51 = vld [vmem:[%s12076_s28 + $0xc8] sm:$0xff] }
  0x39   :  { %v368_v47 = vld [vmem:[%s12076_s28 + $0xd0] sm:$0xff]  ;;  %v101_v53 = vld [vmem:[%s12075_s5 + $0x78] sm:$0xff]  ;;  %v366_v57 = vld [vmem:[%s12076_s28 + $0xc0] sm:$0xff] }
  0x3a   :  { %v349_v59 = vld [vmem:[%s12076_s28 + $0x38] sm:$0xff]  ;;  %v348_v1 = vld [vmem:[%s12076_s28 + $0x30] sm:$0xff]  ;;  %v347_v2 = vld [vmem:[%s12076_s28 + $0x28] sm:$0xff] }
  0x3b   :  { %6426 = vxpose.xlu1.b32.cont [5/16] (narrow) %v6425_v30, 56  ;;  %v356_v30 = vld [vmem:[%s12076_s28 + $0x70] sm:$0xff]  ;;  %v365_v62 = vld [vmem:[%s12076_s28 + $0xb8] sm:$0xff]  ;;  %v5516_v5 = vld [vmem:[%s12075_s5 + $0x880] sm:$0xff] }
  0x3c   :  { %1111 = vmatpush.msra.mxu0 %v356_v30  ;;  %v363_v6 = vld [vmem:[%s12076_s28 + $0xa8] sm:$0xff]  ;;  %v346_v7 = vld [vmem:[%s12076_s28 + $0x20] sm:$0xff]  ;;  %v165_v8 = vld [vmem:[%s12075_s5 + $0x278] sm:$0xff] }
  0x3d   :  { %6359 = vxpose.xlu0.b32.cont [5/16] (narrow) %v6358_v31, 56  ;;  %v372_v31 = vld [vmem:[%s12076_s28 + $0xf0] sm:$0xff]  ;;  %v345_v11 = vld [vmem:[%s12076_s28 + $0x18] sm:$0xff]  ;;  %v5517_v17 = vld [vmem:[%s12075_s5 + $0x888] sm:$0xff] }
  0x3e   :  { %1149 = vmatpush.msra.mxu1 %v372_v31  ;;  %1112 = vmatpush.msra.mxu0 %v355_v32  ;;  %v361_v12 = vld [vmem:[%s12076_s28 + $0x98] sm:$0xff]  ;;  %v164_v13 = vld [vmem:[%s12075_s5 + $0x270] sm:$0xff]  ;;  %v343_v19 = vld [vmem:[%s12076_s28 + $0x8] sm:$0xff] }
  0x3f   :  { %v344_v14 = vld [vmem:[%s12076_s28 + $0x10] sm:$0xff]  ;;  %v359_v20 = vld [vmem:[%s12076_s28 + $0x88] sm:$0xff]  ;;  %v162_v22 = vld [vmem:[%s12075_s5 + $0x260] sm:$0xff] }
  0x40   :  { %1150 = vmatpush.msra.mxu1 %v371_v35  ;;  %1113 = vmatpush.msra.mxu0 %v354_v38  ;;  %v360_v15 = vld [vmem:[%s12076_s28 + $0x90] sm:$0xff]  ;;  %v342_v23 = vld [vmem:[%s12076_s28] sm:$0xff]  ;;  %v161_v25 = vld [vmem:[%s12075_s5 + $0x258] sm:$0xff] }
  0x41   :  { %v358_v24 = vld [vmem:[%s12076_s28 + $0x80] sm:$0xff]  ;;  %v120_v27 = vld [vmem:[%s12075_s5 + $0x110] sm:$0xff]  ;;  %v159_v29 = vld [vmem:[%s12075_s5 + $0x248] sm:$0xff] }
  0x42   :  { %1151 = vmatpush.msra.mxu1 %v370_v39  ;;  %v158_v31 = vld [vmem:[%s12075_s5 + $0x240] sm:$0xff]  ;;  %v157_v32 = vld [vmem:[%s12075_s5 + $0x238] sm:$0xff]  ;;  %v156_v33 = vld [vmem:[%s12075_s5 + $0x230] sm:$0xff] }
  0x43   :  { %6428 = vxpose.xlu1.b32.cont [6/16] (narrow) %v6427_v36, 56  ;;  %v100_v36 = vld [vmem:[%s12075_s5 + $0x70] sm:$0xff]  ;;  %v121_v34 = vld [vmem:[%s12075_s5 + $0x118] sm:$0xff]  ;;  %v154_v38 = vld [vmem:[%s12075_s5 + $0x220] sm:$0xff] }
  0x44   :  { %1152 = vmatpush.msra.mxu1 %v369_v44  ;;  %v5519_v35 = vld [vmem:[%s12075_s5 + $0x898] sm:$0xff]  ;;  %v122_v41 = vld [vmem:[%s12075_s5 + $0x120] sm:$0xff] }
  0x45   :  { %6361 = vxpose.xlu0.b32.cont [6/16] (narrow) %v6360_v37, 56  ;;  %v228_v37 = vld [vmem:[%s12075_s5 + $0x470] sm:$0xff]  ;;  %v153_v39 = vld [vmem:[%s12075_s5 + $0x218] sm:$0xff] }
  0x46   :  { %1153 = vmatpush.msra.mxu1 %v368_v47  ;;  %v5628_v47 = vld [vmem:[%s12075_s5 + $0xc00] sm:$0xff] }
  0x48   :  { %1154 = vmatpush.msra.mxu1 %v367_v51  ;;  %v5521_v51 = vld [vmem:[%s12075_s5 + $0x8a8] sm:$0xff] }
  0x4a   :  { %1155 = vmatpush.msra.mxu1 %v366_v57 }
  0x4b   :  { %6430 = vxpose.xlu1.b32.cont [7/16] (narrow) %v6429_v42, 56  ;;  %v353_v42 = vld [vmem:[%s12076_s28 + $0x58] sm:$0xff] }
  0x4c   :  { %1114 = vmatpush.msra.mxu0 %v353_v42  ;;  %1156 = vmatpush.msra.mxu1 %v365_v62  ;;  %v5520_v42 = vld [vmem:[%s12075_s5 + $0x8a0] sm:$0xff]  ;;  %v181_v62 = vld [vmem:[%s12075_s5 + $0x2f8] sm:$0xff] }
  0x4d   :  { %6363 = vxpose.xlu0.b32.cont [7/16] (narrow) %v6362_v43, 56  ;;  %v6378_v43 = vpack.i.bf16 %v228_v37, %v100_v36  ;;  %v155_v36 = vld [vmem:[%s12075_s5 + $0x228] sm:$0xff]  ;;  %v6557_v37 = vpack.i.bf16 %v121_v34, %v5519_v35  ;;  %v6559_v44 = vpack.i.bf16 %v122_v41, %v5520_v42  ;;  %v126_v34 = vld [vmem:[%s12075_s5 + $0x140] sm:$0xff] }
  0x4e   :  { %1115 = vmatpush.msra.mxu0 %v352_v46  ;;  %v230_v46 = vld [vmem:[%s12075_s5 + $0x480] sm:$0xff] }
  0x4f   :  { %v5524_v35 = vld [vmem:[%s12075_s5 + $0x8c0] sm:$0xff] }
  0x50   :  { %v234_v41 = vld [vmem:[%s12075_s5 + $0x4a0] sm:$0xff] }
  0x51   :  { %v5632_v42 = vld [vmem:[%s12075_s5 + $0xc20] sm:$0xff] }
  0x53   :  { %6432 = vxpose.xlu1.b32.cont [8/16] (narrow) %v6431_v48, 56  ;;  %v351_v48 = vld [vmem:[%s12076_s28 + $0x48] sm:$0xff] }
  0x54   :  { %1116 = vmatpush.msra.mxu0 %v351_v48  ;;  %v150_v48 = vld [vmem:[%s12075_s5 + $0x200] sm:$0xff] }
  0x55   :  { %6365 = vxpose.xlu0.b32.cont [8/16] (narrow) %v6364_v49, 56  ;;  %v117_v49 = vld [vmem:[%s12075_s5 + $0xf8] sm:$0xff] }
  0x56   :  { %v6447_v58 = vpack.i.bf16 %v5515_v50, %v117_v49  ;;  %v6484_v49 = vpack.i.bf16 %v5628_v47, %v230_v46  ;;  %v123_v50 = vld [vmem:[%s12075_s5 + $0x128] sm:$0xff] }
  0x5b   :  { %6434 = vxpose.xlu1.b32.cont [9/16] (narrow) %v6433_v54, 56  ;;  %v229_v54 = vld [vmem:[%s12075_s5 + $0x478] sm:$0xff] }
  0x5d   :  { %6367 = vxpose.xlu0.b32.cont [9/16] (narrow) %v6366_v55, 56  ;;  %v350_v55 = vld [vmem:[%s12076_s28 + $0x40] sm:$0xff] }
  0x5e   :  { %1117 = vmatpush.msra.mxu0 %v350_v55  ;;  %v5629_v55 = vld [vmem:[%s12075_s5 + $0xc08] sm:$0xff] }
  0x60   :  { %1118 = vmatpush.msra.mxu0 %v349_v59  ;;  %v421_v59 = vld [vmem:[%s12076_s28 + $0x278] sm:$0xff] }
  0x62   :  { %1119 = vmatpush.msra.mxu0 %v348_v1  ;;  %v124_v1 = vld [vmem:[%s12075_s5 + $0x130] sm:$0xff] }
  0x63   :  { %6436 = vxpose.xlu1.b32.cont [10/16] (narrow) %v6435_v60, 56 }
  0x64   :  { %1120 = vmatpush.msra.mxu0 %v347_v2  ;;  %v180_v2 = vld [vmem:[%s12075_s5 + $0x2f0] sm:$0xff] }
  0x65   :  { %6369 = vxpose.xlu0.b32.cont [10/16] (narrow) %v6368_v61, 56  ;;  %v6380_v61 = vpack.i.bf16 %v229_v54, %v101_v53  ;;  %v6561_v53 = vpack.i.bf16 %v123_v50, %v5521_v51  ;;  %v231_v54 = vld [vmem:[%s12075_s5 + $0x488] sm:$0xff]  ;;  %v6492_v50 = vpack.i.bf16 %v5632_v42, %v234_v41  ;;  %v408_v51 = vld [vmem:[%s12076_s28 + $0x210] sm:$0xff]  ;;  %v130_v41 = vld [vmem:[%s12075_s5 + $0x160] sm:$0xff] }
  0x66   :  { %5904 = vmatpush.lsf.msrb.mxu0 %v165_v8  ;;  %v5630_v8 = vld [vmem:[%s12075_s5 + $0xc10] sm:$0xff]  ;;  %v5528_v42 = vld [vmem:[%s12075_s5 + $0x8e0] sm:$0xff] }
  0x68   :  { %1121 = vmatpush.msra.mxu0 %v346_v7  ;;  %v232_v7 = vld [vmem:[%s12075_s5 + $0x490] sm:$0xff] }
  0x6a   :  { %1122 = vmatpush.msra.mxu0 %v345_v11 }
  0x6b   :  { %6438 = vxpose.xlu1.b32.cont [11/16] (narrow) %v6437_v3, 56 }
  0x6c   :  { %5905 = vmatpush.lsf.msrb.mxu0 %v164_v13  ;;  %v417_v13 = vld [vmem:[%s12076_s28 + $0x258] sm:$0xff] }
  0x6d   :  { %6371 = vxpose.xlu0.b32.cont [11/16] (narrow) %v6370_v4, 56  ;;  %v118_v4 = vld [vmem:[%s12075_s5 + $0x100] sm:$0xff] }
  0x6e   :  { %1123 = vmatpush.msra.mxu0 %v344_v14  ;;  %v178_v14 = vld [vmem:[%s12075_s5 + $0x2e0] sm:$0xff] }
  0x73   :  { %6440 = vxpose.xlu1.b32.cont [12/16] (narrow) %v6439_v9, 56  ;;  %v362_v9 = vld [vmem:[%s12076_s28 + $0xa0] sm:$0xff] }
  0x75   :  { %6373 = vxpose.xlu0.b32.cont [12/16] (narrow) %v6372_v10, 56  ;;  %v6551_v10 = vpack.i.bf16 %v118_v4, %v5516_v5  ;;  %v179_v4 = vld [vmem:[%s12075_s5 + $0x2e8] sm:$0xff] }
  0x7b   :  { %6442 = vxpose.xlu1.b32.cont [13/16] (narrow) %v6441_v16, 56  ;;  %v119_v16 = vld [vmem:[%s12075_s5 + $0x108] sm:$0xff] }
  0x7c   :  { %v6553_v21 = vpack.i.bf16 %v119_v16, %v5517_v17  ;;  %v416_v16 = vld [vmem:[%s12076_s28 + $0x250] sm:$0xff]  ;;  %v125_v17 = vld [vmem:[%s12075_s5 + $0x138] sm:$0xff] }
  0x7d   :  { %6375 = vxpose.xlu0.b32.cont [13/16] (narrow) %v6374_v18, 56  ;;  %v163_v18 = vld [vmem:[%s12075_s5 + $0x268] sm:$0xff] }
  0x7e   :  { %5906 = vmatpush.lsf.msrb.mxu0 %v163_v18  ;;  %v5523_v18 = vld [vmem:[%s12075_s5 + $0x8b8] sm:$0xff] }
  0x80   :  { %1124 = vmatpush.msra.mxu0 %v343_v19  ;;  %v177_v19 = vld [vmem:[%s12075_s5 + $0x2d8] sm:$0xff] }
  0x82   :  { %5907 = vmatpush.lsf.msrb.mxu0 %v162_v22 }
  0x83   :  { %6444 = vxpose.xlu1.b32.cont [14/16] (narrow) %v6443_v26, 56  ;;  %v160_v26 = vld [vmem:[%s12075_s5 + $0x250] sm:$0xff] }
  0x84   :  { %1125 = vmatpush.msra.mxu0 %v342_v23  ;;  %v6565_v23 = vpack.i.bf16 %v125_v17, %v5523_v18  ;;  %v236_v17 = vld [vmem:[%s12075_s5 + $0x4b0] sm:$0xff] }
  0x85   :  { %6377 = vxpose.xlu0.b32.cont [14/16] (narrow) %v6376_v28, 56  ;;  %v5518_v28 = vld [vmem:[%s12075_s5 + $0x890] sm:$0xff] }
  0x86   :  { %5908 = vmatpush.lsf.msrb.mxu0 %v161_v25  ;;  %v6555_v30 = vpack.i.bf16 %v120_v27, %v5518_v28  ;;  %v5631_v25 = vld [vmem:[%s12075_s5 + $0xc18] sm:$0xff]  ;;  %v5634_v18 = vld [vmem:[%s12075_s5 + $0xc30] sm:$0xff] }
  0x88   :  { %5909 = vmatpush.lsf.msrb.mxu0 %v160_v26  ;;  %v414_v26 = vld [vmem:[%s12076_s28 + $0x240] sm:$0xff] }
  0x8a   :  { %5910 = vmatpush.lsf.msrb.mxu0 %v159_v29 }
  0x8b   :  { %6446 = vxpose.xlu1.b32.cont [15/16] (narrow) %v6445_v40, 56  ;;  %v3374_v52 = vpop.xlane.xlu2 %3373  ;;  %v152_v40 = vld [vmem:[%s12075_s5 + $0x210] sm:$0xff] }
  0x8c   :  { %v3385_v56 = vmul.f32 %v7450_v45, %v3374_v52  ;;  %5911 = vmatpush.lsf.msrb.mxu0 %v158_v31  ;;  %v175_v31 = vld [vmem:[%s12075_s5 + $0x2c8] sm:$0xff] }
  0x8d   :  { %6379 = vxpose.xlu0.b32.cont [15/16] (narrow) %v6378_v43, 56  ;;  %v151_v43 = vld [vmem:[%s12075_s5 + $0x208] sm:$0xff] }
  0x8e   :  { %v7487_v60 = vsub.f32 %v7236_v0, %v3385_v56  ;;  %v364_v0 = vld [vmem:[%s12076_s28 + $0xb0] sm:$0xff]  ;;  %5912 = vmatpush.lsf.msrb.mxu0 %v157_v32 }
  0x8f   :  { %1157 = vmatpush.msra.mxu1 %v364_v0  ;;  %v5522_v0 = vld [vmem:[%s12075_s5 + $0x8b0] sm:$0xff] }
  0x90   :  { %v3389_v63 = vmul.f32 %v7487_v60, %v7487_v60  ;;  %5913 = vmatpush.lsf.msrb.mxu0 %v156_v33  ;;  %v412_v33 = vld [vmem:[%s12076_s28 + $0x230] sm:$0xff] }
  0x91   :  { %1158 = vmatpush.msra.mxu1 %v363_v6  ;;  %v6563_v6 = vpack.i.bf16 %v124_v1, %v5522_v0  ;;  %v406_v1 = vld [vmem:[%s12076_s28 + $0x200] sm:$0xff] }
  0x92   :  { %v3391_v3 = vsel %vm1718_vm0, %v3389_v63, 0.0  ;;  %5914 = vmatpush.lsf.msrb.mxu0 %v155_v36  ;;  %v420_v63 = vld [vmem:[%s12076_s28 + $0x270] sm:$0xff]  ;;  %v174_v36 = vld [vmem:[%s12075_s5 + $0x2c0] sm:$0xff] }
  0x93   :  { %6448 = vxpose.xlu1.b32.end [16/16] (narrow) %v6447_v58, 56  ;;  %3392 = vadd.xlane.f32.xlu2 %v3391_v3  ;;  %v419_v3 = vld [vmem:[%s12076_s28 + $0x268] sm:$0xff] }
  0x94   :  { %1159 = vmatpush.msra.mxu1 %v362_v9  ;;  %5915 = vmatpush.lsf.msrb.mxu0 %v154_v38  ;;  %v418_v9 = vld [vmem:[%s12076_s28 + $0x260] sm:$0xff]  ;;  %v173_v38 = vld [vmem:[%s12075_s5 + $0x2b8] sm:$0xff] }
  0x95   :  { %6381 = vxpose.xlu0.b32.end [16/16] (narrow) %v6380_v61, 56  ;;  %v6486_v61 = vpack.i.bf16 %v5629_v55, %v231_v54  ;;  %v5525_v54 = vld [vmem:[%s12075_s5 + $0x8c8] sm:$0xff] }
  0x96   :  { %1160 = vmatpush.msra.mxu1 %v361_v12  ;;  %5916 = vmatpush.lsf.msrb.mxu0 %v153_v39  ;;  %v171_v55 = vld [vmem:[%s12075_s5 + $0x2a8] sm:$0xff] }
  0x98   :  { %1161 = vmatpush.msra.mxu1 %v360_v15  ;;  %5917 = vmatpush.lsf.msrb.mxu0 %v152_v40  ;;  %v6488_v15 = vpack.i.bf16 %v5630_v8, %v232_v7  ;;  %v6567_v40 = vpack.i.bf16 %v126_v34, %v5524_v35  ;;  %v168_v7 = vld [vmem:[%s12075_s5 + $0x290] sm:$0xff]  ;;  %v437_v8 = vld [vmem:[%s12076_s28 + $0x2f8] sm:$0xff] }
  0x9a   :  { %1162 = vmatpush.msra.mxu1 %v359_v20  ;;  %5918 = vmatpush.lsf.msrb.mxu0 %v151_v43  ;;  %v415_v20 = vld [vmem:[%s12076_s28 + $0x248] sm:$0xff]  ;;  %v410_v43 = vld [vmem:[%s12076_s28 + $0x220] sm:$0xff] }
  0x9b   :  { %6552 = vxpose.xlu1.b32.start [1/16] (narrow) %v6551_v10, 56 }
  0x9c   :  { %1163 = vmatpush.msra.mxu1 %v358_v24  ;;  %5919 = vmatpush.lsf.msrb.mxu0 %v150_v48  ;;  %v233_v24 = vld [vmem:[%s12075_s5 + $0x498] sm:$0xff] }
  0x9d   :  { %5920 = vllmr.7.mxu0  ;;  %v6490_v32 = vpack.i.bf16 %v5631_v25, %v233_v24  ;;  %v409_v48 = vld [vmem:[%s12076_s28 + $0x218] sm:$0xff]  ;;  %v6496_v24 = vpack.i.bf16 %v5634_v18, %v236_v17  ;;  %v434_v25 = vld [vmem:[%s12076_s28 + $0x2e0] sm:$0xff]  ;;  %v479_v17 = vld [vmem:[%s12076_s28 + $0x448] sm:$0xff] }
  0x9e   :  { %6024 = vmatpush.lsf.msrb.mxu1 %v181_v62  ;;  %v235_v62 = vld [vmem:[%s12075_s5 + $0x4a8] sm:$0xff] }
  0x9f   :  { %v387_v18 = vld [vmem:[%s12076_s28 + $0x168] sm:$0xff] }
  0xa0   :  { %6025 = vmatpush.lsf.msrb.mxu1 %v180_v2 }
  0xa2   :  { %6026 = vmatpush.lsf.msrb.mxu1 %v179_v4  ;;  %v169_v4 = vld [vmem:[%s12075_s5 + $0x298] sm:$0xff] }
  0xa3   :  { %6554 = vxpose.xlu1.b32.cont [2/16] (narrow) %v6553_v21, 56  ;;  %v176_v21 = vld [vmem:[%s12075_s5 + $0x2d0] sm:$0xff] }
  0xa4   :  { %6027 = vmatpush.lsf.msrb.mxu1 %v178_v14  ;;  %v435_v14 = vld [vmem:[%s12076_s28 + $0x2e8] sm:$0xff] }
  0xa6   :  { %6028 = vmatpush.lsf.msrb.mxu1 %v177_v19 }
  0xa8   :  { %6029 = vmatpush.lsf.msrb.mxu1 %v176_v21 }
  0xaa   :  { %6030 = vmatpush.lsf.msrb.mxu1 %v175_v31 }
  0xab   :  { %6556 = vxpose.xlu1.b32.cont [3/16] (narrow) %v6555_v30, 56  ;;  %v413_v30 = vld [vmem:[%s12076_s28 + $0x238] sm:$0xff] }
  0xac   :  { %6031 = vmatpush.lsf.msrb.mxu1 %v174_v36 }
  0xae   :  { %6032 = vmatpush.lsf.msrb.mxu1 %v173_v38 }
  0xb3   :  { %6558 = vxpose.xlu1.b32.cont [4/16] (narrow) %v6557_v37, 56  ;;  %v411_v37 = vld [vmem:[%s12076_s28 + $0x228] sm:$0xff] }
  0xbb   :  { %6560 = vxpose.xlu1.b32.cont [5/16] (narrow) %v6559_v44, 56 }
  0xbc   :  { %6485 = vxpose.xlu2.b32.start [1/16] (narrow) %v6484_v49, 56  ;;  %v172_v49 = vld [vmem:[%s12075_s5 + $0x2b0] sm:$0xff] }
  0xbd   :  { %6033 = vmatpush.lsf.msrb.mxu1 %v172_v49  ;;  %v429_v49 = vld [vmem:[%s12076_s28 + $0x2b8] sm:$0xff] }
  0xbf   :  { %v7627_v52 = vpop.trf.xlu1  ;;  %6034 = vmatpush.lsf.msrb.mxu1 %v171_v55  ;;  %v131_v55 = vld [vmem:[%s12075_s5 + $0x168] sm:$0xff] }
  0xc0   :  { %v6450_v57 = vunpack.i.l.bf16 %v7627_v52 }
  0xc1   :  { %v7635_v56 = vpop.trf.xlu0 }
  0xc2   :  { %v6383_v58 = vunpack.i.l.bf16 %v7635_v56  ;;  %1164 = vmatmul.f32.vlgmr.msra.gmra.mxu1 %v6450_v57  ;;  %v407_v57 = vld [vmem:[%s12076_s28 + $0x208] sm:$0xff] }
  0xc3   :  { %6562 = vxpose.xlu1.b32.cont [6/16] (narrow) %v6561_v53, 56  ;;  %v127_v53 = vld [vmem:[%s12075_s5 + $0x148] sm:$0xff] }
  0xc4   :  { %1126 = vmatmul.f32.vlgmr.msra.gmra.mxu0 %v6383_v58  ;;  %6487 = vxpose.xlu2.b32.cont [2/16] (narrow) %v6486_v61, 56  ;;  %v170_v58 = vld [vmem:[%s12075_s5 + $0x2a0] sm:$0xff]  ;;  %v6569_v61 = vpack.i.bf16 %v127_v53, %v5525_v54  ;;  %v484_v54 = vld [vmem:[%s12076_s28 + $0x470] sm:$0xff] }
  0xc5   :  { %1262 = vmatpush.msra.mxu0 %v421_v59  ;;  %6035 = vmatpush.lsf.msrb.mxu1 %v170_v58  ;;  %v427_v58 = vld [vmem:[%s12076_s28 + $0x2a8] sm:$0xff] }
  0xc7   :  { %1263 = vmatpush.msra.mxu0 %v420_v63  ;;  %v7663_v5 = vpop.trf.xlu1  ;;  %v5633_v63 = vld [vmem:[%s12075_s5 + $0xc28] sm:$0xff]  ;;  %6036 = vmatpush.lsf.msrb.mxu1 %v169_v4  ;;  %v425_v4 = vld [vmem:[%s12076_s28 + $0x298] sm:$0xff] }
  0xc8   :  { %v6455_v11 = vunpack.i.l.bf16 %v7663_v5 }
  0xc9   :  { %v7674_v10 = vpop.trf.xlu0  ;;  %1264 = vmatpush.msra.mxu0 %v419_v3  ;;  %1300 = vmatpush.msra.mxu1 %v437_v8  ;;  %v132_v8 = vld [vmem:[%s12075_s5 + $0x170] sm:$0xff] }
  0xca   :  { %v6388_v12 = vunpack.i.l.bf16 %v7674_v10  ;;  %1167 = vmatmul.f32.gmra.mxu1 %v6455_v11  ;;  %v5526_v11 = vld [vmem:[%s12075_s5 + $0x8d0] sm:$0xff] }
  0xcb   :  { %1265 = vmatpush.msra.mxu0 %v418_v9  ;;  %6564 = vxpose.xlu1.b32.cont [7/16] (narrow) %v6563_v6, 56  ;;  %v6494_v6 = vpack.i.bf16 %v5633_v63, %v235_v62  ;;  %v128_v9 = vld [vmem:[%s12075_s5 + $0x150] sm:$0xff]  ;;  %v426_v62 = vld [vmem:[%s12076_s28 + $0x2a0] sm:$0xff] }
  0xcc   :  { %1129 = vmatmul.f32.gmra.mxu0 %v6388_v12  ;;  %6489 = vxpose.xlu2.b32.cont [3/16] (narrow) %v6488_v15, 56  ;;  %v436_v12 = vld [vmem:[%s12076_s28 + $0x2f0] sm:$0xff] }
  0xcd   :  { %1266 = vmatpush.msra.mxu0 %v417_v13  ;;  %v167_v13 = vld [vmem:[%s12075_s5 + $0x288] sm:$0xff]  ;;  %6037 = vmatpush.lsf.msrb.mxu1 %v168_v7 }
  0xcf   :  { %1267 = vmatpush.msra.mxu0 %v416_v16  ;;  %v7702_v22 = vpop.trf.xlu1  ;;  %v6571_v16 = vpack.i.bf16 %v128_v9, %v5526_v11  ;;  %1301 = vmatpush.msra.mxu1 %v436_v12  ;;  %v424_v9 = vld [vmem:[%s12076_s28 + $0x290] sm:$0xff]  ;;  %v389_v11 = vld [vmem:[%s12076_s28 + $0x178] sm:$0xff] }
  0xd0   :  { %v6460_v28 = vunpack.i.l.bf16 %v7702_v22  ;;  %v5530_v12 = vld [vmem:[%s12075_s5 + $0x8f0] sm:$0xff]  ;;  %1186 = vmatpush.msra.mxu2 %v389_v11 }
  0xd1   :  { %v7713_v27 = vpop.trf.xlu0  ;;  %1268 = vmatpush.msra.mxu0 %v415_v20  ;;  %6038 = vmatpush.lsf.msrb.mxu1 %v167_v13  ;;  %v480_v13 = vld [vmem:[%s12076_s28 + $0x450] sm:$0xff] }
  0xd2   :  { %v6393_v29 = vunpack.i.l.bf16 %v7713_v27  ;;  %1170 = vmatmul.f32.gmra.mxu1 %v6460_v28  ;;  %v5527_v28 = vld [vmem:[%s12075_s5 + $0x8d8] sm:$0xff] }
  0xd3   :  { %1269 = vmatpush.msra.mxu0 %v414_v26  ;;  %6566 = vxpose.xlu1.b32.cont [8/16] (narrow) %v6565_v23, 56  ;;  %v166_v23 = vld [vmem:[%s12075_s5 + $0x280] sm:$0xff]  ;;  %v129_v26 = vld [vmem:[%s12075_s5 + $0x158] sm:$0xff] }
  0xd4   :  { %1132 = vmatmul.f32.gmra.mxu0 %v6393_v29  ;;  %6491 = vxpose.xlu2.b32.cont [4/16] (narrow) %v6490_v32, 56  ;;  %v433_v29 = vld [vmem:[%s12076_s28 + $0x2d8] sm:$0xff]  ;;  %v6573_v31 = vpack.i.bf16 %v129_v26, %v5527_v28  ;;  %v478_v28 = vld [vmem:[%s12076_s28 + $0x440] sm:$0xff] }
  0xd5   :  { %1270 = vmatpush.msra.mxu0 %v413_v30  ;;  %1302 = vmatpush.msra.mxu1 %v435_v14  ;;  %v237_v32 = vld [vmem:[%s12075_s5 + $0x4b8] sm:$0xff]  ;;  %v388_v14 = vld [vmem:[%s12076_s28 + $0x170] sm:$0xff] }
  0xd6   :  { %1187 = vmatpush.msra.mxu2 %v388_v14  ;;  %v470_v14 = vld [vmem:[%s12076_s28 + $0x400] sm:$0xff] }
  0xd7   :  { %1271 = vmatpush.msra.mxu0 %v412_v33  ;;  %v7741_v39 = vpop.trf.xlu1  ;;  %6039 = vmatpush.lsf.msrb.mxu1 %v166_v23  ;;  %v5635_v33 = vld [vmem:[%s12075_s5 + $0xc38] sm:$0xff]  ;;  %v5638_v23 = vld [vmem:[%s12075_s5 + $0xc50] sm:$0xff] }
  0xd8   :  { %v6465_v46 = vunpack.i.l.bf16 %v7741_v39  ;;  %v6498_v38 = vpack.i.bf16 %v5635_v33, %v237_v32  ;;  %1188 = vmatpush.msra.mxu2 %v387_v18  ;;  %v293_v32 = vld [vmem:[%s12075_s5 + $0x678] sm:$0xff]  ;;  %v6886_v18 = vld [vmem:[%s12077_s6] ss:$0 sm:$0xff] }
  0xd9   :  { %v7752_v44 = vpop.trf.xlu0  ;;  %1272 = vmatpush.msra.mxu0 %v411_v37  ;;  %1303 = vmatpush.msra.mxu1 %v434_v25  ;;  %v432_v37 = vld [vmem:[%s12076_s28 + $0x2d0] sm:$0xff] }
  0xda   :  { %v6398_v47 = vunpack.i.l.bf16 %v7752_v44  ;;  %1173 = vmatmul.f32.gmra.mxu1 %v6465_v46  ;;  %v6575_v46 = vpack.i.bf16 %v130_v41, %v5528_v42  ;;  %v476_v41 = vld [vmem:[%s12076_s28 + $0x430] sm:$0xff] }
  0xdb   :  { %1273 = vmatpush.msra.mxu0 %v410_v43  ;;  %6568 = vxpose.xlu1.b32.cont [9/16] (narrow) %v6567_v40, 56  ;;  %v431_v40 = vld [vmem:[%s12076_s28 + $0x2c8] sm:$0xff]  ;;  %v430_v43 = vld [vmem:[%s12076_s28 + $0x2c0] sm:$0xff]  ;;  %v384_v42 = vld [vmem:[%s12076_s28 + $0x150] sm:$0xff] }
  0xdc   :  { %1135 = vmatmul.f32.gmra.mxu0 %v6398_v47  ;;  %6493 = vxpose.xlu2.b32.cont [5/16] (narrow) %v6492_v50, 56  ;;  %v238_v47 = vld [vmem:[%s12075_s5 + $0x4c0] sm:$0xff]  ;;  %v485_v50 = vld [vmem:[%s12076_s28 + $0x478] sm:$0xff] }
  0xdd   :  { %1274 = vmatpush.msra.mxu0 %v409_v48  ;;  %1304 = vmatpush.msra.mxu1 %v433_v29  ;;  %v5636_v48 = vld [vmem:[%s12075_s5 + $0xc40] sm:$0xff] }
  0xde   :  { %v6500_v53 = vpack.i.bf16 %v5636_v48, %v238_v47  ;;  %v386_v29 = vld [vmem:[%s12076_s28 + $0x160] sm:$0xff]  ;;  %v5639_v47 = vld [vmem:[%s12075_s5 + $0xc58] sm:$0xff]  ;;  %v291_v48 = vld [vmem:[%s12075_s5 + $0x668] sm:$0xff] }
  0xdf   :  { %1275 = vmatpush.msra.mxu0 %v408_v51  ;;  %v7780_v59 = vpop.trf.xlu1  ;;  %1305 = vmatpush.msra.mxu1 %v432_v37  ;;  %v428_v51 = vld [vmem:[%s12076_s28 + $0x2b0] sm:$0xff]  ;;  %v477_v37 = vld [vmem:[%s12076_s28 + $0x438] sm:$0xff] }
  0xe0   :  { %v6470_v2 = vunpack.i.l.bf16 %v7780_v59  ;;  %1189 = vmatpush.msra.mxu2 %v386_v29  ;;  %v5641_v29 = vld [vmem:[%s12075_s5 + $0xc68] sm:$0xff] }
  0xe1   :  { %v7791_v0 = vpop.trf.xlu0  ;;  %1276 = vmatpush.msra.mxu0 %v407_v57  ;;  %1306 = vmatpush.msra.mxu1 %v431_v40  ;;  %v5529_v57 = vld [vmem:[%s12075_s5 + $0x8e8] sm:$0xff]  ;;  %v292_v40 = vld [vmem:[%s12075_s5 + $0x670] sm:$0xff] }
  0xe2   :  { %v6403_v3 = vunpack.i.l.bf16 %v7791_v0  ;;  %1176 = vmatmul.f32.gmra.mxu1 %v6470_v2  ;;  %v6577_v63 = vpack.i.bf16 %v131_v55, %v5529_v57  ;;  %v5637_v2 = vld [vmem:[%s12075_s5 + $0xc48] sm:$0xff]  ;;  %v474_v55 = vld [vmem:[%s12076_s28 + $0x420] sm:$0xff] }
  0xe3   :  { %1277 = vmatpush.msra.mxu0 %v406_v1  ;;  %6570 = vxpose.xlu1.b32.cont [10/16] (narrow) %v6569_v61, 56  ;;  %v483_v61 = vld [vmem:[%s12076_s28 + $0x468] sm:$0xff] }
  0xe4   :  { %1138 = vmatmul.f32.gmra.mxu0 %v6403_v3  ;;  %6495 = vxpose.xlu2.b32.cont [6/16] (narrow) %v6494_v6, 56  ;;  %v239_v1 = vld [vmem:[%s12075_s5 + $0x4c8] sm:$0xff]  ;;  %v482_v3 = vld [vmem:[%s12076_s28 + $0x460] sm:$0xff]  ;;  %v481_v6 = vld [vmem:[%s12076_s28 + $0x458] sm:$0xff] }
  0xe5   :  { %1307 = vmatpush.msra.mxu1 %v430_v43  ;;  %v6502_v7 = vpack.i.bf16 %v5637_v2, %v239_v1  ;;  %v381_v1 = vld [vmem:[%s12076_s28 + $0x138] sm:$0xff]  ;;  %v242_v2 = vld [vmem:[%s12075_s5 + $0x4e0] sm:$0xff] }
  0xe7   :  { %v7819_v15 = vpop.trf.xlu1  ;;  %1308 = vmatpush.msra.mxu1 %v429_v49  ;;  %v475_v49 = vld [vmem:[%s12076_s28 + $0x428] sm:$0xff] }
  0xe8   :  { %v6475_v20 = vunpack.i.l.bf16 %v7819_v15 }
  0xe9   :  { %v7827_v19 = vpop.trf.xlu0  ;;  %1309 = vmatpush.msra.mxu1 %v428_v51 }
  0xea   :  { %v6408_v21 = vunpack.i.l.bf16 %v7827_v19  ;;  %1179 = vmatmul.f32.gmra.mxu1 %v6475_v20  ;;  %v6579_v20 = vpack.i.bf16 %v132_v8, %v5530_v12  ;;  %v471_v8 = vld [vmem:[%s12076_s28 + $0x408] sm:$0xff]  ;;  %v288_v12 = vld [vmem:[%s12075_s5 + $0x650] sm:$0xff] }
  0xeb   :  { %6572 = vxpose.xlu1.b32.cont [11/16] (narrow) %v6571_v16, 56  ;;  %1310 = vmatpush.msra.mxu1 %v427_v58  ;;  %v423_v16 = vld [vmem:[%s12076_s28 + $0x288] sm:$0xff]  ;;  %v382_v58 = vld [vmem:[%s12076_s28 + $0x140] sm:$0xff] }
  0xec   :  { %1141 = vmatmul.f32.gmra.mxu0 %v6408_v21  ;;  %6497 = vxpose.xlu2.b32.cont [7/16] (narrow) %v6496_v24, 56  ;;  %v240_v21 = vld [vmem:[%s12075_s5 + $0x4d0] sm:$0xff]  ;;  %v422_v24 = vld [vmem:[%s12076_s28 + $0x280] sm:$0xff] }
  0xed   :  { %1311 = vmatpush.msra.mxu1 %v426_v62 }
  0xef   :  { %v7846_v30 = vpop.trf.xlu1  ;;  %1312 = vmatpush.msra.mxu1 %v425_v4  ;;  %v472_v4 = vld [vmem:[%s12076_s28 + $0x410] sm:$0xff] }
  0xf0   :  { %v6480_v35 = vunpack.i.l.bf16 %v7846_v30 }
  0xf1   :  { %6040 = vllmr.7.mxu1  ;;  %v7854_v34 = vpop.trf.xlu0 }
  0xf2   :  { %v6413_v36 = vunpack.i.l.bf16 %v7854_v34  ;;  %1182 = vmatmul.f32.gmra.mxu1 %v6480_v35  ;;  %v133_v35 = vld [vmem:[%s12075_s5 + $0x178] sm:$0xff] }
  0xf3   :  { %6574 = vxpose.xlu1.b32.cont [12/16] (narrow) %v6573_v31, 56  ;;  %1313 = vmatpush.msra.mxu1 %v424_v9  ;;  %v6504_v31 = vpack.i.bf16 %v5638_v23, %v240_v21  ;;  %v378_v21 = vld [vmem:[%s12076_s28 + $0x120] sm:$0xff]  ;;  %v500_v23 = vld [vmem:[%s12076_s28 + $0x4f0] sm:$0xff] }
  0xf4   :  { %1144 = vmatmul.f32.gmra.mxu0 %v6413_v36  ;;  %6499 = vxpose.xlu2.b32.cont [8/16] (narrow) %v6498_v38, 56  ;;  %v5531_v36 = vld [vmem:[%s12075_s5 + $0x8f8] sm:$0xff] }
  0xf5   :  { %1314 = vmatpush.msra.mxu1 %v423_v16  ;;  %v385_v38 = vld [vmem:[%s12076_s28 + $0x158] sm:$0xff]  ;;  %v6581_v43 = vpack.i.bf16 %v133_v35, %v5531_v36 }
  0xf6   :  { %1190 = vmatpush.msra.mxu2 %v385_v38  ;;  %v501_v16 = vld [vmem:[%s12076_s28 + $0x4f8] sm:$0xff]  ;;  %v498_v38 = vld [vmem:[%s12076_s28 + $0x4e0] sm:$0xff] }
  0xf7   :  { %1315 = vmatpush.msra.mxu1 %v422_v24  ;;  %v243_v24 = vld [vmem:[%s12075_s5 + $0x4e8] sm:$0xff]  ;;  %v285_v36 = vld [vmem:[%s12075_s5 + $0x638] sm:$0xff] }
  0xf8   :  { %1191 = vmatpush.msra.mxu2 %v384_v42 }
  0xfb   :  { %6576 = vxpose.xlu1.b32.cont [13/16] (narrow) %v6575_v46, 56  ;;  %v241_v46 = vld [vmem:[%s12075_s5 + $0x4d8] sm:$0xff] }
  0xfc   :  { %5921 = vmatmul.lmr.bf16.vlgmr.msra.gmra.7.mxu0  ;;  %6501 = vxpose.xlu2.b32.cont [9/16] (narrow) %v6500_v53, 56  ;;  %v6506_v51 = vpack.i.bf16 %v5639_v47, %v241_v46  ;;  %v290_v53 = vld [vmem:[%s12075_s5 + $0x660] sm:$0xff]  ;;  %v497_v46 = vld [vmem:[%s12076_s28 + $0x4d8] sm:$0xff]  ;;  %v244_v47 = vld [vmem:[%s12075_s5 + $0x4f0] sm:$0xff] }
  0xfd   :  { %1414 = vmatpush.msra.mxu0 %v485_v50  ;;  %v383_v50 = vld [vmem:[%s12076_s28 + $0x148] sm:$0xff] }
  0xfe   :  { %1192 = vmatpush.msra.mxu2 %v383_v50  ;;  %v374_v50 = vld [vmem:[%s12076_s28 + $0x100] sm:$0xff] }
  0xff   :  { %1415 = vmatpush.msra.mxu0 %v484_v54 }
 0x100   :  { %1193 = vmatpush.msra.mxu2 %v382_v58  ;;  %v280_v58 = vld [vmem:[%s12075_s5 + $0x610] sm:$0xff] }
 0x101   :  { %1416 = vmatpush.msra.mxu0 %v483_v61  ;;  %v473_v61 = vld [vmem:[%s12076_s28 + $0x418] sm:$0xff] }
 0x102   :  { %1194 = vmatpush.msra.mxu2 %v381_v1  ;;  %v279_v1 = vld [vmem:[%s12075_s5 + $0x608] sm:$0xff] }
 0x103   :  { %1417 = vmatpush.msra.mxu0 %v482_v3  ;;  %6578 = vxpose.xlu1.b32.cont [14/16] (narrow) %v6577_v63, 56  ;;  %v289_v63 = vld [vmem:[%s12075_s5 + $0x658] sm:$0xff]  ;;  %v5640_v3 = vld [vmem:[%s12075_s5 + $0xc60] sm:$0xff] }
 0x104   :  { %5922 = vmatmul.lmr.bf16.gmra.7.mxu0  ;;  %6503 = vxpose.xlu2.b32.cont [10/16] (narrow) %v6502_v7, 56  ;;  %v380_v7 = vld [vmem:[%s12076_s28 + $0x130] sm:$0xff]  ;;  %v6508_v11 = vpack.i.bf16 %v5640_v3, %v242_v2  ;;  %v493_v2 = vld [vmem:[%s12076_s28 + $0x4b8] sm:$0xff]  ;;  %v6386_v3 = vunpack.i.h.bf16 %v7635_v56 }
 0x105   :  { %1418 = vmatpush.msra.mxu0 %v481_v6  ;;  %1195 = vmatpush.msra.mxu2 %v380_v7  ;;  %v549_v56 = vld [vmem:[%s12076_s28 + $0x678] sm:$0xff] }
 0x106   :  { %v3393_v25 = vpop.xlane.xlu2 %3392 }
 0x107   :  { %1419 = vmatpush.msra.mxu0 %v480_v13  ;;  %v3397_v26 = vmul.f32 %v3393_v25, %v7450_v45  ;;  %v379_v13 = vld [vmem:[%s12076_s28 + $0x128] sm:$0xff] }
 0x108   :  { %1196 = vmatpush.msra.mxu2 %v379_v13  ;;  %v548_v13 = vld [vmem:[%s12076_s28 + $0x670] sm:$0xff] }
 0x109   :  { %1420 = vmatpush.msra.mxu0 %v479_v17  ;;  %v7967_v33 = vadd.f32 1e-12, %v3397_v26  ;;  %v6887_v26 = vld [vmem:[%s12078_s1] ss:$0 sm:$0xff] }
 0x10a   :  { %1197 = vmatpush.msra.mxu2 %v378_v21  ;;  %v306_v21 = vld [vmem:[%s12075_s5 + $0x6e0] sm:$0xff] }
 0x10b   :  { %6580 = vxpose.xlu1.b32.cont [15/16] (narrow) %v6579_v20, 56  ;;  %1421 = vmatpush.msra.mxu0 %v478_v28  ;;  %6910 = vrsqrt.f32 %v7967_v33  ;;  %vm3407_vm3 = vweird.f32 %v7967_v33  ;;  %v287_v20 = vld [vmem:[%s12075_s5 + $0x648] sm:$0xff]  ;;  %v286_v28 = vld [vmem:[%s12075_s5 + $0x640] sm:$0xff] }
 0x10c   :  { %5923 = vmatmul.lmr.bf16.gmra.7.mxu0  ;;  %6505 = vxpose.xlu2.b32.cont [11/16] (narrow) %v6504_v31, 56 }
 0x10d   :  { %5928 = vmatpush.lsf.msrb.mxu0 %v293_v32  ;;  %v377_v32 = vld [vmem:[%s12076_s28 + $0x118] sm:$0xff] }
 0x10e   :  { %1198 = vmatpush.msra.mxu2 %v377_v32  ;;  %v487_v32 = vld [vmem:[%s12076_s28 + $0x488] sm:$0xff] }
 0x10f   :  { %1422 = vmatpush.msra.mxu0 %v477_v37  ;;  %v6510_v37 = vpack.i.bf16 %v5641_v29, %v243_v24  ;;  %v546_v24 = vld [vmem:[%s12076_s28 + $0x660] sm:$0xff]  ;;  %v247_v29 = vld [vmem:[%s12075_s5 + $0x508] sm:$0xff] }
 0x111   :  { %5929 = vmatpush.lsf.msrb.mxu0 %v292_v40  ;;  %v6911_v54 = vpop.eup %6910 }
 0x112   :  { %6041 = vmatmul.lmr.bf16.vlgmr.msra.gmra.7.mxu1  ;;  %v3402_v57 = vmul.f32 %v6911_v54, %v7967_v33  ;;  %vm3408_vm2 = vweird.f32 %v6911_v54  ;;  %v499_v33 = vld [vmem:[%s12076_s28 + $0x4e8] sm:$0xff] }
 0x113   :  { %1423 = vmatpush.msra.mxu0 %v476_v41  ;;  %6582 = vxpose.xlu1.b32.end [16/16] (narrow) %v6581_v43, 56  ;;  %vm3409_vm4 = vmor %vm3407_vm3, %vm3408_vm2  ;;  %v284_v41 = vld [vmem:[%s12075_s5 + $0x630] sm:$0xff]  ;;  %v375_v43 = vld [vmem:[%s12076_s28 + $0x108] sm:$0xff]  ;;  %vm3740_vm2 = vcmask 195712   ;;  %vm3813_vm3 = vcmask 261312  }
 0x114   :  { %5924 = vmatmul.lmr.bf16.gmra.7.mxu0  ;;  %v3403_v62 = vmul.f32 %v6911_v54, %v3402_v57  ;;  %6507 = vxpose.xlu2.b32.cont [12/16] (narrow) %v6506_v51, 56  ;;  %v496_v51 = vld [vmem:[%s12076_s28 + $0x4d0] sm:$0xff]  ;;  %v281_v57 = vld [vmem:[%s12075_s5 + $0x618] sm:$0xff] }
 0x115   :  { %5930 = vmatpush.lsf.msrb.mxu0 %v291_v48  ;;  %1452 = vmatpush.msra.mxu1 %v501_v16  ;;  %v283_v48 = vld [vmem:[%s12075_s5 + $0x628] sm:$0xff] }
 0x116   :  { %v3404_v6 = vmul.f32 0.5, %v3403_v62  ;;  %v245_v62 = vld [vmem:[%s12075_s5 + $0x4f8] sm:$0xff] }
 0x117   :  { %1424 = vmatpush.msra.mxu0 %v475_v49  ;;  %1453 = vmatpush.msra.mxu1 %v500_v23  ;;  %v5642_v49 = vld [vmem:[%s12075_s5 + $0xc70] sm:$0xff]  ;;  %v6391_v23 = vunpack.i.h.bf16 %v7674_v10 }
 0x118   :  { %v3405_v9 = vsub.f32 1.5, %v3404_v6  ;;  %v492_v6 = vld [vmem:[%s12076_s28 + $0x4b0] sm:$0xff] }
 0x119   :  { %5931 = vmatpush.lsf.msrb.mxu0 %v290_v53  ;;  %1454 = vmatpush.msra.mxu1 %v499_v33  ;;  %v282_v53 = vld [vmem:[%s12075_s5 + $0x620] sm:$0xff]  ;;  %v488_v10 = vld [vmem:[%s12076_s28 + $0x490] sm:$0xff]  ;;  %v5645_v33 = vld [vmem:[%s12075_s5 + $0xc88] sm:$0xff] }
 0x11a   :  { %6042 = vmatmul.lmr.bf16.gmra.7.mxu1  ;;  %v3406_v17 = vmul.f32 %v6911_v54, %v3405_v9  ;;  %v308_v9 = vld [vmem:[%s12075_s5 + $0x6f0] sm:$0xff] }
 0x11b   :  { %1425 = vmatpush.msra.mxu0 %v474_v55  ;;  %1455 = vmatpush.msra.mxu1 %v498_v38  ;;  %v6512_v55 = vpack.i.bf16 %v5642_v49, %v244_v47  ;;  %v303_v47 = vld [vmem:[%s12075_s5 + $0x6c8] sm:$0xff]  ;;  %v248_v49 = vld [vmem:[%s12075_s5 + $0x510] sm:$0xff] }
 0x11c   :  { %5925 = vmatmul.lmr.bf16.gmra.7.mxu0  ;;  %6509 = vxpose.xlu2.b32.cont [13/16] (narrow) %v6508_v11, 56  ;;  %v3410_v25 = vsel %vm3409_vm4, %v6911_v54, %v3406_v17  ;;  %v495_v54 = vld [vmem:[%s12076_s28 + $0x4c8] sm:$0xff]  ;;  %v246_v11 = vld [vmem:[%s12075_s5 + $0x500] sm:$0xff] }
 0x11d   :  { %1426 = vmatpush.msra.mxu0 %v473_v61  ;;  %v3421_v31 = vmul.f32 %v3410_v25, %v7487_v60  ;;  %v376_v60 = vld [vmem:[%s12076_s28 + $0x110] sm:$0xff]  ;;  %1456 = vmatpush.msra.mxu1 %v497_v46  ;;  %v494_v61 = vld [vmem:[%s12076_s28 + $0x4c0] sm:$0xff]  ;;  %v307_v17 = vld [vmem:[%s12075_s5 + $0x6e8] sm:$0xff] }
 0x11e   :  { %1199 = vmatpush.msra.mxu2 %v376_v60  ;;  %v489_v25 = vld [vmem:[%s12076_s28 + $0x498] sm:$0xff]  ;;  %v542_v46 = vld [vmem:[%s12076_s28 + $0x640] sm:$0xff] }
 0x11f   :  { %5932 = vmatpush.lsf.msrb.mxu0 %v289_v63  ;;  %v3426_v35 = vmul.f32 %v6886_v18, %v3421_v31  ;;  %1457 = vmatpush.msra.mxu1 %v496_v51  ;;  %v5643_v63 = vld [vmem:[%s12075_s5 + $0xc78] sm:$0xff]  ;;  %v547_v18 = vld [vmem:[%s12076_s28 + $0x668] sm:$0xff]  ;;  %v544_v31 = vld [vmem:[%s12076_s28 + $0x650] sm:$0xff] }
 0x120   :  { %1200 = vmatpush.msra.mxu2 %v375_v43  ;;  %v6514_v7 = vpack.i.bf16 %v5643_v63, %v245_v62  ;;  %v6396_v43 = vunpack.i.h.bf16 %v7713_v27  ;;  %v302_v27 = vld [vmem:[%s12075_s5 + $0x6c0] sm:$0xff]  ;;  %v301_v51 = vld [vmem:[%s12075_s5 + $0x6b8] sm:$0xff] }
 0x121   :  { %1427 = vmatpush.msra.mxu0 %v472_v4  ;;  %v8094_v40 = vadd.f32 %v6887_v26, %v3426_v35  ;;  %1458 = vmatpush.msra.mxu1 %v495_v54  ;;  %v278_v4 = vld [vmem:[%s12075_s5 + $0x600] sm:$0xff]  ;;  %v545_v26 = vld [vmem:[%s12076_s28 + $0x658] sm:$0xff]  ;;  %v304_v35 = vld [vmem:[%s12075_s5 + $0x6d0] sm:$0xff] }
 0x122   :  { %6043 = vmatmul.lmr.bf16.gmra.7.mxu1  ;;  %1201 = vmatpush.msra.mxu2 %v374_v50  ;;  %v540_v50 = vld [vmem:[%s12076_s28 + $0x630] sm:$0xff]  ;;  %v134_v62 = vld [vmem:[%s12075_s5 + $0x180] sm:$0xff] }
 0x123   :  { %1428 = vmatpush.msra.mxu0 %v471_v8  ;;  %12079 = vst [vmem:[#allocation6_spill] sm:$0xff] %v8094_v40  ;;  %v3435_v42 = vsel %vm1718_vm0, %v8094_v40, 0.0  ;;  %1459 = vmatpush.msra.mxu1 %v494_v61  ;;  %v309_v8 = vld [vmem:[%s12075_s5 + $0x6f8] sm:$0xff]  ;;  %v5740_v63 = vld [vmem:[%s12075_s5 + $0xf80] sm:$0xff] }
 0x124   :  { %5926 = vmatmul.lmr.bf16.gmra.7.mxu0  ;;  %6511 = vxpose.xlu2.b32.cont [14/16] (narrow) %v6510_v37, 56  ;;  %v543_v37 = vld [vmem:[%s12076_s28 + $0x648] sm:$0xff] }
 0x125   :  { %5933 = vmatpush.lsf.msrb.mxu0 %v288_v12  ;;  %3436 = vadd.xlane.f32.xlu0 %v3435_v42  ;;  %v5644_v12 = vld [vmem:[%s12075_s5 + $0xc80] sm:$0xff] }
 0x126   :  { %1460 = vmatpush.msra.mxu1 %v493_v2  ;;  %v6685_v16 = vpack.i.bf16 %v246_v11, %v5644_v12  ;;  %v486_v42 = vld [vmem:[%s12076_s28 + $0x480] sm:$0xff]  ;;  %v6401_v2 = vunpack.i.h.bf16 %v7752_v44  ;;  %v297_v12 = vld [vmem:[%s12075_s5 + $0x698] sm:$0xff] }
 0x127   :  { %1429 = vmatpush.msra.mxu0 %v470_v14  ;;  %v491_v14 = vld [vmem:[%s12076_s28 + $0x4a8] sm:$0xff]  ;;  %v298_v44 = vld [vmem:[%s12075_s5 + $0x6a0] sm:$0xff] }
 0x128   :  { %6048 = vmatpush.lsf.msrb.mxu1 %v309_v8  ;;  %6686 = vxpose.xlu1.b32.start [1/16] (narrow) %v6685_v16, 56  ;;  %v249_v8 = vld [vmem:[%s12075_s5 + $0x518] sm:$0xff] }
 0x129   :  { %5934 = vmatpush.lsf.msrb.mxu0 %v287_v20  ;;  %v490_v20 = vld [vmem:[%s12076_s28 + $0x4a0] sm:$0xff] }
 0x12a   :  { %6044 = vmatmul.lmr.bf16.gmra.7.mxu1 }
 0x12b   :  { %5935 = vmatpush.lsf.msrb.mxu0 %v286_v28  ;;  %1461 = vmatpush.msra.mxu1 %v492_v6  ;;  %v305_v28 = vld [vmem:[%s12075_s5 + $0x6d8] sm:$0xff]  ;;  %v6618_v6 = vpack.i.bf16 %v5740_v63, %v134_v62  ;;  %v6416_v62 = vunpack.i.h.bf16 %v7854_v34 }
 0x12c   :  { %5927 = vmatmul.lmr.bf16.gmra.7.mxu0  ;;  %6513 = vxpose.xlu2.b32.cont [15/16] (narrow) %v6512_v55, 56  ;;  %v197_v34 = vld [vmem:[%s12075_s5 + $0x378] sm:$0xff] }
 0x12d   :  { %5936 = vmatpush.lsf.msrb.mxu0 %v285_v36  ;;  %6049 = vmatpush.lsf.msrb.mxu1 %v308_v9  ;;  %v6687_v36 = vpack.i.bf16 %v247_v29, %v5645_v33  ;;  %v536_v9 = vld [vmem:[%s12076_s28 + $0x610] sm:$0xff] }
 0x12e   :  { %6144 = vmatpush.lsf.msrb.mxu2 %v197_v34  ;;  %v190_v34 = vld [vmem:[%s12075_s5 + $0x340] sm:$0xff] }
 0x12f   :  { %5937 = vmatpush.lsf.msrb.mxu0 %v284_v41  ;;  %1462 = vmatpush.msra.mxu1 %v491_v14  ;;  %v535_v14 = vld [vmem:[%s12076_s28 + $0x608] sm:$0xff] }
 0x130   :  { %6688 = vxpose.xlu1.b32.cont [2/16] (narrow) %v6687_v36, 56  ;;  %v5742_v36 = vld [vmem:[%s12075_s5 + $0xf90] sm:$0xff] }
 0x131   :  { %5938 = vmatpush.lsf.msrb.mxu0 %v283_v48  ;;  %6050 = vmatpush.lsf.msrb.mxu1 %v307_v17  ;;  %v541_v48 = vld [vmem:[%s12076_s28 + $0x638] sm:$0xff] }
 0x132   :  { %6045 = vmatmul.lmr.bf16.gmra.7.mxu1 }
 0x133   :  { %5939 = vmatpush.lsf.msrb.mxu0 %v282_v53  ;;  %1463 = vmatpush.msra.mxu1 %v490_v20  ;;  %v5646_v53 = vld [vmem:[%s12075_s5 + $0xc90] sm:$0xff]  ;;  %v5741_v20 = vld [vmem:[%s12075_s5 + $0xf88] sm:$0xff] }
 0x134   :  { %1430 = vmatmul.f32.vlgmr.msra.gmra.mxu0 %v6386_v3  ;;  %6515 = vxpose.xlu2.b32.end [16/16] (narrow) %v6514_v7, 56  ;;  %v6689_v54 = vpack.i.bf16 %v248_v49, %v5646_v53  ;;  %v538_v3 = vld [vmem:[%s12076_s28 + $0x620] sm:$0xff]  ;;  %v537_v7 = vld [vmem:[%s12076_s28 + $0x618] sm:$0xff]  ;;  %v563_v49 = vld [vmem:[%s12076_s28 + $0x6e8] sm:$0xff] }
 0x135   :  { %5940 = vmatpush.lsf.msrb.mxu0 %v281_v57  ;;  %6051 = vmatpush.lsf.msrb.mxu1 %v306_v21  ;;  %v539_v57 = vld [vmem:[%s12076_s28 + $0x628] sm:$0xff]  ;;  %v296_v21 = vld [vmem:[%s12075_s5 + $0x690] sm:$0xff] }
 0x137   :  { %5941 = vmatpush.lsf.msrb.mxu0 %v280_v58  ;;  %1464 = vmatpush.msra.mxu1 %v489_v25  ;;  %v295_v25 = vld [vmem:[%s12075_s5 + $0x688] sm:$0xff] }
 0x138   :  { %6690 = vxpose.xlu1.b32.cont [3/16] (narrow) %v6689_v54, 56  ;;  %v137_v54 = vld [vmem:[%s12075_s5 + $0x198] sm:$0xff] }
 0x139   :  { %5942 = vmatpush.lsf.msrb.mxu0 %v279_v1  ;;  %6052 = vmatpush.lsf.msrb.mxu1 %v305_v28  ;;  %v300_v1 = vld [vmem:[%s12075_s5 + $0x6b0] sm:$0xff]  ;;  %v5648_v28 = vld [vmem:[%s12075_s5 + $0xca0] sm:$0xff] }
 0x13a   :  { %6046 = vmatmul.lmr.bf16.gmra.7.mxu1 }
 0x13b   :  { %5943 = vmatpush.lsf.msrb.mxu0 %v278_v4  ;;  %1465 = vmatpush.msra.mxu1 %v488_v10  ;;  %v299_v4 = vld [vmem:[%s12075_s5 + $0x6a8] sm:$0xff]  ;;  %v250_v10 = vld [vmem:[%s12075_s5 + $0x520] sm:$0xff] }
 0x13c   :  { %5944 = vllmr.7.mxu0  ;;  %v6693_v29 = vpack.i.bf16 %v250_v10, %v5648_v28  ;;  %v1997_v10 = vld [vmem:[%s12076_s28 + $0x68] sm:$0xff]  ;;  %v193_v28 = vld [vmem:[%s12075_s5 + $0x358] sm:$0xff] }
 0x13d   :  { %1566 = vmatpush.msra.mxu0 %v549_v56  ;;  %1466 = vmatpush.msra.mxu1 %v487_v32  ;;  %v5647_v56 = vld [vmem:[%s12075_s5 + $0xc98] sm:$0xff] }
 0x13e   :  { %1433 = vmatmul.f32.gmra.mxu0 %v6391_v23  ;;  %v6691_v11 = vpack.i.bf16 %v249_v8, %v5647_v56  ;;  %v6406_v23 = vunpack.i.h.bf16 %v7791_v0  ;;  %v294_v0 = vld [vmem:[%s12075_s5 + $0x680] sm:$0xff]  ;;  %v196_v8 = vld [vmem:[%s12075_s5 + $0x370] sm:$0xff] }
 0x13f   :  { %1567 = vmatpush.msra.mxu0 %v548_v13  ;;  %v8220_v60 = vpop.trf.xlu1  ;;  %6053 = vmatpush.lsf.msrb.mxu1 %v304_v35  ;;  %v136_v35 = vld [vmem:[%s12075_s5 + $0x190] sm:$0xff] }
 0x140   :  { %v6587_v41 = vunpack.i.h.bf16 %v8220_v60  ;;  %6692 = vxpose.xlu1.b32.cont [4/16] (narrow) %v6691_v11, 56  ;;  %6145 = vmatpush.lsf.msrb.mxu2 %v196_v8  ;;  %v1992_v8 = vld [vmem:[%s12076_s28 + $0x40] sm:$0xff] }
 0x141   :  { %1568 = vmatpush.msra.mxu0 %v547_v18  ;;  %v8225_v38 = vpop.f32.mrf.mxu0  ;;  %1467 = vmatpush.msra.mxu1 %v486_v42  ;;  %v135_v18 = vld [vmem:[%s12075_s5 + $0x188] sm:$0xff] }
 0x142   :  { %6047 = vmatmul.lmr.bf16.gmra.7.mxu1  ;;  %1202 = vmatmul.f32.vlgmr.msra.gmra.mxu2 %v6587_v41  ;;  %v6411_v41 = vunpack.i.h.bf16 %v7827_v19  ;;  %v5649_v19 = vld [vmem:[%s12075_s5 + $0xca8] sm:$0xff] }
 0x143   :  { %1569 = vmatpush.msra.mxu0 %v546_v24  ;;  %6054 = vmatpush.lsf.msrb.mxu1 %v303_v47  ;;  %v534_v24 = vld [vmem:[%s12076_s28 + $0x600] sm:$0xff]  ;;  %v564_v47 = vld [vmem:[%s12076_s28 + $0x6f0] sm:$0xff] }
 0x145   :  { %1570 = vmatpush.msra.mxu0 %v545_v26  ;;  %6055 = vmatpush.lsf.msrb.mxu1 %v302_v27  ;;  %v6620_v26 = vpack.i.bf16 %v5741_v20, %v135_v18 }
 0x146   :  { %1436 = vmatmul.f32.gmra.mxu0 %v6396_v43  ;;  %v565_v43 = vld [vmem:[%s12076_s28 + $0x6f8] sm:$0xff] }
 0x147   :  { %1571 = vmatpush.msra.mxu0 %v544_v31  ;;  %v8256_v55 = vpop.trf.xlu1  ;;  %6056 = vmatpush.lsf.msrb.mxu1 %v301_v51 }
 0x148   :  { %v6592_v61 = vunpack.i.h.bf16 %v8256_v55  ;;  %6694 = vxpose.xlu1.b32.cont [5/16] (narrow) %v6693_v29, 56  ;;  %v253_v29 = vld [vmem:[%s12075_s5 + $0x538] sm:$0xff] }
 0x149   :  { %1572 = vmatpush.msra.mxu0 %v543_v37  ;;  %v8261_v58 = vpop.f32.mrf.mxu0  ;;  %6057 = vmatpush.lsf.msrb.mxu1 %v300_v1  ;;  %v562_v1 = vld [vmem:[%s12076_s28 + $0x6e0] sm:$0xff] }
 0x14a   :  { %1205 = vmatmul.f32.gmra.mxu2 %v6592_v61 }
 0x14b   :  { %1573 = vmatpush.msra.mxu0 %v542_v46  ;;  %6058 = vmatpush.lsf.msrb.mxu1 %v299_v4  ;;  %v6622_v46 = vpack.i.bf16 %v5742_v36, %v136_v35  ;;  %v252_v4 = vld [vmem:[%s12075_s5 + $0x530] sm:$0xff]  ;;  %v5651_v35 = vld [vmem:[%s12075_s5 + $0xcb8] sm:$0xff] }
 0x14c   :  { %v557_v36 = vld [vmem:[%s12076_s28 + $0x6b8] sm:$0xff] }
 0x14d   :  { %1574 = vmatpush.msra.mxu0 %v541_v48  ;;  %6059 = vmatpush.lsf.msrb.mxu1 %v298_v44  ;;  %v251_v48 = vld [vmem:[%s12075_s5 + $0x528] sm:$0xff] }
 0x14e   :  { %1439 = vmatmul.f32.gmra.mxu0 %v6401_v2  ;;  %6619 = vxpose.xlu0.b32.start [1/16] (narrow) %v6618_v6, 56  ;;  %v6695_v27 = vpack.i.bf16 %v251_v48, %v5649_v19  ;;  %v5650_v6 = vld [vmem:[%s12075_s5 + $0xcb0] sm:$0xff]  ;;  %v139_v48 = vld [vmem:[%s12075_s5 + $0x1a8] sm:$0xff] }
 0x14f   :  { %1575 = vmatpush.msra.mxu0 %v540_v50  ;;  %v8298_v13 = vpop.trf.xlu1  ;;  %6060 = vmatpush.lsf.msrb.mxu1 %v297_v12  ;;  %v6697_v44 = vpack.i.bf16 %v252_v4, %v5650_v6  ;;  %v138_v12 = vld [vmem:[%s12075_s5 + $0x1a0] sm:$0xff]  ;;  %v5745_v19 = vld [vmem:[%s12075_s5 + $0xfa8] sm:$0xff] }
 0x150   :  { %v6597_v17 = vunpack.i.h.bf16 %v8298_v13  ;;  %6696 = vxpose.xlu1.b32.cont [6/16] (narrow) %v6695_v27, 56  ;;  %v5652_v4 = vld [vmem:[%s12075_s5 + $0xcc0] sm:$0xff] }
 0x151   :  { %1576 = vmatpush.msra.mxu0 %v539_v57  ;;  %v8303_v16 = vpop.f32.mrf.mxu0  ;;  %6061 = vmatpush.lsf.msrb.mxu1 %v296_v21  ;;  %v5743_v57 = vld [vmem:[%s12075_s5 + $0xf98] sm:$0xff]  ;;  %v554_v6 = vld [vmem:[%s12076_s28 + $0x6a0] sm:$0xff] }
 0x152   :  { %1208 = vmatmul.f32.gmra.mxu2 %v6597_v17  ;;  %v6624_v2 = vpack.i.bf16 %v5743_v57, %v137_v54  ;;  %v195_v17 = vld [vmem:[%s12075_s5 + $0x368] sm:$0xff]  ;;  %v1999_v21 = vld [vmem:[%s12076_s28 + $0x78] sm:$0xff]  ;;  %v556_v57 = vld [vmem:[%s12076_s28 + $0x6b0] sm:$0xff] }
 0x153   :  { %1577 = vmatpush.msra.mxu0 %v538_v3  ;;  %6062 = vmatpush.lsf.msrb.mxu1 %v295_v25  ;;  %v561_v3 = vld [vmem:[%s12076_s28 + $0x6d8] sm:$0xff] }
 0x154   :  { %6146 = vmatpush.lsf.msrb.mxu2 %v195_v17  ;;  %v1995_v54 = vld [vmem:[%s12076_s28 + $0x58] sm:$0xff] }
 0x155   :  { %1578 = vmatpush.msra.mxu0 %v537_v7  ;;  %v8331_v31 = vpop.trf.xlu2  ;;  %6063 = vmatpush.lsf.msrb.mxu1 %v294_v0  ;;  %v560_v7 = vld [vmem:[%s12076_s28 + $0x6d0] sm:$0xff]  ;;  %v558_v0 = vld [vmem:[%s12076_s28 + $0x6c0] sm:$0xff] }
 0x156   :  { %1442 = vmatmul.f32.gmra.mxu0 %v6406_v23  ;;  %6621 = vxpose.xlu0.b32.cont [2/16] (narrow) %v6620_v26, 56  ;;  %v6517_v42 = vunpack.i.l.bf16 %v8331_v31  ;;  %v559_v23 = vld [vmem:[%s12076_s28 + $0x6c8] sm:$0xff]  ;;  %v1998_v26 = vld [vmem:[%s12076_s28 + $0x70] sm:$0xff] }
 0x157   :  { %1579 = vmatpush.msra.mxu0 %v536_v9  ;;  %v8333_v32 = vpop.trf.xlu1  ;;  %6064 = vllmr.7.mxu1 }
 0x158   :  { %v6602_v37 = vunpack.i.h.bf16 %v8333_v32  ;;  %1468 = vmatmul.f32.vlgmr.msra.gmra.mxu1 %v6517_v42  ;;  %6698 = vxpose.xlu1.b32.cont [7/16] (narrow) %v6697_v44, 56 }
 0x159   :  { %1580 = vmatpush.msra.mxu0 %v535_v14  ;;  %v8335_v33 = vpop.f32.mrf.mxu0  ;;  %1604 = vmatpush.msra.mxu1 %v565_v43  ;;  %v5744_v14 = vld [vmem:[%s12075_s5 + $0xfa0] sm:$0xff] }
 0x15a   :  { %1211 = vmatmul.f32.gmra.mxu2 %v6602_v37  ;;  %v6626_v25 = vpack.i.bf16 %v5744_v14, %v138_v12  ;;  %v6699_v37 = vpack.i.bf16 %v253_v29, %v5651_v35  ;;  %v1996_v43 = vld [vmem:[%s12076_s28 + $0x60] sm:$0xff]  ;;  %v189_v12 = vld [vmem:[%s12075_s5 + $0x338] sm:$0xff]  ;;  %v187_v29 = vld [vmem:[%s12075_s5 + $0x328] sm:$0xff] }
 0x15b   :  { %1581 = vmatpush.msra.mxu0 %v534_v24  ;;  %1605 = vmatpush.msra.mxu1 %v564_v47  ;;  %v194_v24 = vld [vmem:[%s12075_s5 + $0x360] sm:$0xff]  ;;  %v255_v35 = vld [vmem:[%s12075_s5 + $0x548] sm:$0xff] }
 0x15c   :  { %6147 = vmatpush.lsf.msrb.mxu2 %v194_v24  ;;  %v552_v24 = vld [vmem:[%s12076_s28 + $0x690] sm:$0xff] }
 0x15d   :  { %v8361_v50 = vpop.trf.xlu2  ;;  %1606 = vmatpush.msra.mxu1 %v563_v49 }
 0x15e   :  { %1445 = vmatmul.f32.gmra.mxu0 %v6411_v41  ;;  %6623 = vxpose.xlu0.b32.cont [3/16] (narrow) %v6622_v46, 56  ;;  %v6522_v63 = vunpack.i.l.bf16 %v8361_v50  ;;  %v192_v46 = vld [vmem:[%s12075_s5 + $0x350] sm:$0xff] }
 0x15f   :  { %v8363_v51 = vpop.trf.xlu1  ;;  %1607 = vmatpush.msra.mxu1 %v562_v1  ;;  %6148 = vmatpush.lsf.msrb.mxu2 %v193_v28  ;;  %v555_v1 = vld [vmem:[%s12076_s28 + $0x6a8] sm:$0xff] }
 0x160   :  { %v6607_v61 = vunpack.i.h.bf16 %v8363_v51  ;;  %1471 = vmatmul.f32.gmra.mxu1 %v6522_v63  ;;  %6700 = vxpose.xlu1.b32.cont [8/16] (narrow) %v6699_v37, 56  ;;  %v1994_v63 = vld [vmem:[%s12076_s28 + $0x50] sm:$0xff]  ;;  %v1989_v28 = vld [vmem:[%s12076_s28 + $0x28] sm:$0xff]  ;;  %v550_v37 = vld [vmem:[%s12076_s28 + $0x680] sm:$0xff] }
 0x161   :  { %v8365_v53 = vpop.f32.mrf.mxu0  ;;  %1608 = vmatpush.msra.mxu1 %v561_v3  ;;  %6149 = vmatpush.lsf.msrb.mxu2 %v192_v46  ;;  %v1993_v3 = vld [vmem:[%s12076_s28 + $0x48] sm:$0xff] }
 0x162   :  { %1214 = vmatmul.f32.gmra.mxu2 %v6607_v61  ;;  %v191_v61 = vld [vmem:[%s12075_s5 + $0x348] sm:$0xff] }
 0x163   :  { %1609 = vmatpush.msra.mxu1 %v560_v7  ;;  %6150 = vmatpush.lsf.msrb.mxu2 %v191_v61  ;;  %v5747_v61 = vld [vmem:[%s12075_s5 + $0xfb8] sm:$0xff] }
 0x165   :  { %v8397_v56 = vpop.trf.xlu2  ;;  %1610 = vmatpush.msra.mxu1 %v559_v23  ;;  %6151 = vmatpush.lsf.msrb.mxu2 %v190_v34  ;;  %v1991_v23 = vld [vmem:[%s12076_s28 + $0x38] sm:$0xff]  ;;  %v184_v34 = vld [vmem:[%s12075_s5 + $0x310] sm:$0xff] }
 0x166   :  { %1448 = vmatmul.f32.gmra.mxu0 %v6416_v62  ;;  %6625 = vxpose.xlu0.b32.cont [4/16] (narrow) %v6624_v2, 56  ;;  %v6527_v20 = vunpack.i.l.bf16 %v8397_v56  ;;  %v6628_v62 = vpack.i.bf16 %v5745_v19, %v139_v48  ;;  %v254_v2 = vld [vmem:[%s12075_s5 + $0x540] sm:$0xff] }
 0x167   :  { %v8399_v9 = vpop.trf.xlu1  ;;  %1611 = vmatpush.msra.mxu1 %v558_v0  ;;  %v6701_v7 = vpack.i.bf16 %v254_v2, %v5652_v4  ;;  %6152 = vmatpush.lsf.msrb.mxu2 %v189_v12  ;;  %v1990_v0 = vld [vmem:[%s12076_s28 + $0x30] sm:$0xff]  ;;  %v1988_v48 = vld [vmem:[%s12076_s28 + $0x20] sm:$0xff]  ;;  %v5577_v4 = vld [vmem:[%s12075_s5 + $0xa68] sm:$0xff] }
 0x168   :  { %v6612_v18 = vunpack.i.h.bf16 %v8399_v9  ;;  %1474 = vmatmul.f32.gmra.mxu1 %v6527_v20  ;;  %v5746_v20 = vld [vmem:[%s12075_s5 + $0xfb0] sm:$0xff]  ;;  %v186_v19 = vld [vmem:[%s12075_s5 + $0x320] sm:$0xff]  ;;  %v1985_v12 = vld [vmem:[%s12076_s28 + $0x8] sm:$0xff] }
 0x169   :  { %v8401_v11 = vpop.f32.mrf.mxu0  ;;  %1612 = vmatpush.msra.mxu1 %v557_v36  ;;  %6702 = vxpose.xlu1.b32.cont [9/16] (narrow) %v6701_v7, 56  ;;  %v5653_v36 = vld [vmem:[%s12075_s5 + $0xcc8] sm:$0xff]  ;;  %v452_v7 = vld [vmem:[%s12076_s28 + $0x370] sm:$0xff] }
 0x16a   :  { %12080 = vst [vmem:[#allocation7_spill] sm:$0xff] %v8401_v11  ;;  %1217 = vmatmul.f32.gmra.mxu2 %v6612_v18  ;;  %v140_v18 = vld [vmem:[%s12075_s5 + $0x1b0] sm:$0xff] }
 0x16b   :  { %1613 = vmatpush.msra.mxu1 %v556_v57  ;;  %v141_v57 = vld [vmem:[%s12075_s5 + $0x1b8] sm:$0xff]  ;;  %v5590_v11 = vld [vmem:[%s12075_s5 + $0xad0] sm:$0xff] }
 0x16c   :  { %v6632_v2 = vpack.i.bf16 %v5747_v61, %v141_v57  ;;  %v448_v57 = vld [vmem:[%s12076_s28 + $0x350] sm:$0xff] }
 0x16d   :  { %v8444_v41 = vpop.trf.xlu2  ;;  %1614 = vmatpush.msra.mxu1 %v555_v1  ;;  %v5578_v1 = vld [vmem:[%s12075_s5 + $0xa70] sm:$0xff] }
 0x16e   :  { %5945 = vmatmul.lmr.bf16.vlgmr.msra.gmra.7.mxu0  ;;  %6627 = vxpose.xlu0.b32.cont [5/16] (narrow) %v6626_v25, 56  ;;  %v6532_v49 = vunpack.i.l.bf16 %v8444_v41  ;;  %v188_v25 = vld [vmem:[%s12075_s5 + $0x330] sm:$0xff] }
 0x16f   :  { %2752 = vmatpush.msra.mxu0 %v1999_v21  ;;  %v8446_v42 = vpop.trf.xlu1  ;;  %v553_v21 = vld [vmem:[%s12076_s28 + $0x698] sm:$0xff]  ;;  %1615 = vmatpush.msra.mxu1 %v554_v6 }
 0x170   :  { %v6617_v27 = vunpack.i.h.bf16 %v8446_v42  ;;  %1477 = vmatmul.f32.gmra.mxu1 %v6532_v49  ;;  %6153 = vmatpush.lsf.msrb.mxu2 %v188_v25  ;;  %v453_v6 = vld [vmem:[%s12076_s28 + $0x378] sm:$0xff] }
 0x171   :  { %2753 = vmatpush.msra.mxu0 %v1998_v26  ;;  %v8454_v47 = vpop.f32.mrf.mxu0  ;;  %v6630_v26 = vpack.i.bf16 %v5746_v20, %v140_v18  ;;  %1616 = vmatpush.msra.mxu1 %v553_v21  ;;  %v5576_v20 = vld [vmem:[%s12075_s5 + $0xa60] sm:$0xff]  ;;  %v256_v21 = vld [vmem:[%s12075_s5 + $0x550] sm:$0xff] }
 0x172   :  { %12081 = vst [vmem:[#allocation8_spill] sm:$0xff] %v8454_v47  ;;  %1220 = vmatmul.f32.gmra.mxu2 %v6617_v27  ;;  %v6703_v27 = vpack.i.bf16 %v255_v35, %v5653_v36 }
 0x173   :  { %2754 = vmatpush.msra.mxu0 %v1997_v10  ;;  %v551_v10 = vld [vmem:[%s12076_s28 + $0x688] sm:$0xff]  ;;  %1617 = vmatpush.msra.mxu1 %v552_v24 }
 0x174   :  { %6154 = vmatpush.lsf.msrb.mxu2 %v187_v29  ;;  %6704 = vxpose.xlu1.b32.cont [10/16] (narrow) %v6703_v27, 56  ;;  %v5575_v29 = vld [vmem:[%s12075_s5 + $0xa58] sm:$0xff] }
 0x175   :  { %2755 = vmatpush.msra.mxu0 %v1996_v43  ;;  %v8494_v44 = vpop.trf.xlu2  ;;  %v5579_v43 = vld [vmem:[%s12075_s5 + $0xa78] sm:$0xff]  ;;  %1618 = vmatpush.msra.mxu1 %v551_v10  ;;  %v451_v10 = vld [vmem:[%s12076_s28 + $0x368] sm:$0xff] }
 0x176   :  { %5946 = vmatmul.lmr.bf16.gmra.7.mxu0  ;;  %6629 = vxpose.xlu0.b32.cont [6/16] (narrow) %v6628_v62, 56  ;;  %v6537_v17 = vunpack.i.l.bf16 %v8494_v44  ;;  %v1987_v62 = vld [vmem:[%s12076_s28 + $0x18] sm:$0xff] }
 0x177   :  { %2756 = vmatpush.msra.mxu0 %v1995_v54  ;;  %1619 = vmatpush.msra.mxu1 %v550_v37  ;;  %v5574_v37 = vld [vmem:[%s12075_s5 + $0xa50] sm:$0xff]  ;;  %v257_v27 = vld [vmem:[%s12075_s5 + $0x558] sm:$0xff] }
 0x178   :  { %1480 = vmatmul.f32.gmra.mxu1 %v6537_v17  ;;  %6155 = vmatpush.lsf.msrb.mxu2 %v186_v19  ;;  %v183_v17 = vld [vmem:[%s12075_s5 + $0x308] sm:$0xff] }
 0x179   :  { %2757 = vmatpush.msra.mxu0 %v1994_v63  ;;  %v8502_v14 = vpop.f32.mrf.mxu0  ;;  %v185_v63 = vld [vmem:[%s12075_s5 + $0x318] sm:$0xff]  ;;  %v5573_v19 = vld [vmem:[%s12075_s5 + $0xa48] sm:$0xff] }
 0x17a   :  { %6156 = vmatpush.lsf.msrb.mxu2 %v185_v63  ;;  %v5749_v63 = vld [vmem:[%s12075_s5 + $0xfc8] sm:$0xff] }
 0x17b   :  { %2758 = vmatpush.msra.mxu0 %v1993_v3  ;;  %v1986_v3 = vld [vmem:[%s12076_s28 + $0x10] sm:$0xff] }
 0x17c   :  { %1338 = vmatpush.msra.mxu2 %v453_v6  ;;  %v5571_v6 = vld [vmem:[%s12075_s5 + $0xa38] sm:$0xff] }
 0x17d   :  { %2759 = vmatpush.msra.mxu0 %v1992_v8  ;;  %v8547_v46 = vpop.trf.xlu2  ;;  %v142_v8 = vld [vmem:[%s12075_s5 + $0x1c0] sm:$0xff] }
 0x17e   :  { %5947 = vmatmul.lmr.bf16.gmra.7.mxu0  ;;  %6631 = vxpose.xlu0.b32.cont [7/16] (narrow) %v6630_v26, 56  ;;  %v6542_v54 = vunpack.i.l.bf16 %v8547_v46  ;;  %v5748_v26 = vld [vmem:[%s12075_s5 + $0xfc0] sm:$0xff] }
 0x17f   :  { %2760 = vmatpush.msra.mxu0 %v1991_v23  ;;  %6157 = vmatpush.lsf.msrb.mxu2 %v184_v34  ;;  %v5654_v23 = vld [vmem:[%s12075_s5 + $0xcd0] sm:$0xff]  ;;  %v6634_v36 = vpack.i.bf16 %v5748_v26, %v142_v8  ;;  %v447_v34 = vld [vmem:[%s12076_s28 + $0x348] sm:$0xff] }
 0x180   :  { %1483 = vmatmul.f32.gmra.mxu1 %v6542_v54  ;;  %v6705_v35 = vpack.i.bf16 %v256_v21, %v5654_v23  ;;  %v5655_v54 = vld [vmem:[%s12075_s5 + $0xcd8] sm:$0xff]  ;;  %v5570_v8 = vld [vmem:[%s12075_s5 + $0xa30] sm:$0xff]  ;;  %v258_v21 = vld [vmem:[%s12075_s5 + $0x560] sm:$0xff] }
 0x181   :  { %2761 = vmatpush.msra.mxu0 %v1990_v0  ;;  %v8555_v49 = vpop.f32.mrf.mxu0  ;;  %v182_v0 = vld [vmem:[%s12075_s5 + $0x300] sm:$0xff]  ;;  %1339 = vmatpush.msra.mxu2 %v452_v7  ;;  %v2014_v7 = vld [vmem:[%s12076_s28 + $0xf0] sm:$0xff] }
 0x182   :  { %6706 = vxpose.xlu1.b32.cont [11/16] (narrow) %v6705_v35, 56  ;;  %v5656_v23 = vld [vmem:[%s12075_s5 + $0xce0] sm:$0xff] }
 0x183   :  { %2762 = vmatpush.msra.mxu0 %v1989_v28  ;;  %6158 = vmatpush.lsf.msrb.mxu2 %v183_v17  ;;  %v1984_v28 = vld [vmem:[%s12076_s28] sm:$0xff]  ;;  %v5569_v17 = vld [vmem:[%s12075_s5 + $0xa28] sm:$0xff] }
 0x184   :  { %v5568_v35 = vld [vmem:[%s12075_s5 + $0xa20] sm:$0xff] }
 0x185   :  { %5952 = vmatpush.lsf.msrb.mxu0 %v5579_v43  ;;  %v8597_v18 = vpop.trf.xlu2  ;;  %1340 = vmatpush.msra.mxu2 %v451_v10  ;;  %v450_v43 = vld [vmem:[%s12076_s28 + $0x360] sm:$0xff]  ;;  %v5750_v10 = vld [vmem:[%s12075_s5 + $0xfd0] sm:$0xff] }
 0x186   :  { %5948 = vmatmul.lmr.bf16.gmra.7.mxu0  ;;  %6633 = vxpose.xlu0.b32.cont [8/16] (narrow) %v6632_v2, 56  ;;  %v6547_v25 = vunpack.i.l.bf16 %v8597_v18  ;;  %v2015_v2 = vld [vmem:[%s12076_s28 + $0xf8] sm:$0xff] }
 0x187   :  { %2763 = vmatpush.msra.mxu0 %v1988_v48  ;;  %6159 = vmatpush.lsf.msrb.mxu2 %v182_v0  ;;  %v449_v48 = vld [vmem:[%s12076_s28 + $0x358] sm:$0xff]  ;;  %v144_v0 = vld [vmem:[%s12075_s5 + $0x1d0] sm:$0xff] }
 0x188   :  { %1486 = vmatmul.f32.gmra.mxu1 %v6547_v25  ;;  %6160 = vllmr.7.mxu2  ;;  %v445_v25 = vld [vmem:[%s12076_s28 + $0x338] sm:$0xff] }
 0x189   :  { %2764 = vmatpush.msra.mxu0 %v1987_v62  ;;  %v8608_v24 = vpop.f32.mrf.mxu0  ;;  %1341 = vmatpush.msra.mxu2 %v450_v43  ;;  %v143_v62 = vld [vmem:[%s12075_s5 + $0x1c8] sm:$0xff]  ;;  %v2011_v43 = vld [vmem:[%s12076_s28 + $0xd8] sm:$0xff] }
 0x18b   :  { %5953 = vmatpush.lsf.msrb.mxu0 %v5578_v1  ;;  %1342 = vmatpush.msra.mxu2 %v449_v48  ;;  %v5572_v1 = vld [vmem:[%s12075_s5 + $0xa40] sm:$0xff]  ;;  %v6709_v48 = vpack.i.bf16 %v258_v21, %v5656_v23  ;;  %v2007_v23 = vld [vmem:[%s12076_s28 + $0xb8] sm:$0xff] }
 0x18d   :  { %2765 = vmatpush.msra.mxu0 %v1986_v3  ;;  %v6707_v3 = vpack.i.bf16 %v257_v27, %v5655_v54  ;;  %1343 = vmatpush.msra.mxu2 %v448_v57  ;;  %v6638_v27 = vpack.i.bf16 %v5750_v10, %v144_v0  ;;  %v5567_v54 = vld [vmem:[%s12075_s5 + $0xa18] sm:$0xff]  ;;  %v2010_v57 = vld [vmem:[%s12076_s28 + $0xd0] sm:$0xff] }
 0x18e   :  { %5949 = vmatmul.lmr.bf16.gmra.7.mxu0  ;;  %6635 = vxpose.xlu0.b32.cont [9/16] (narrow) %v6634_v36, 56  ;;  %v8705_v36 = vpop.f32.mrf.mxu1  ;;  %v2063_v10 = vld [vmem:[%s12076_s28 + $0x278] sm:$0xff] }
 0x18f   :  { %5954 = vmatpush.lsf.msrb.mxu0 %v5577_v4  ;;  %v6636_v4 = vpack.i.bf16 %v5749_v63, %v143_v62  ;;  %1344 = vmatpush.msra.mxu2 %v447_v34  ;;  %v5566_v62 = vld [vmem:[%s12075_s5 + $0xa10] sm:$0xff]  ;;  %v443_v63 = vld [vmem:[%s12076_s28 + $0x328] sm:$0xff]  ;;  %v6453_v34 = vunpack.i.h.bf16 %v7627_v52  ;;  %v145_v52 = vld [vmem:[%s12075_s5 + $0x1d8] sm:$0xff] }
 0x190   :  { %6065 = vmatmul.lmr.bf16.vlgmr.msra.gmra.7.mxu1  ;;  %6708 = vxpose.xlu1.b32.cont [12/16] (narrow) %v6707_v3, 56  ;;  %v2009_v3 = vld [vmem:[%s12076_s28 + $0xc8] sm:$0xff] }
 0x191   :  { %2766 = vmatpush.msra.mxu0 %v1985_v12  ;;  %v8647_v61 = vpop.f32.mrf.mxu0  ;;  %2790 = vmatpush.msra.mxu1 %v2015_v2  ;;  %v446_v12 = vld [vmem:[%s12076_s28 + $0x340] sm:$0xff]  ;;  %v5565_v2 = vld [vmem:[%s12075_s5 + $0xa08] sm:$0xff] }
 0x192   :  { %12082 = vst [vmem:[#allocation9_spill] sm:$0xff] %v8647_v61  ;;  %1345 = vmatpush.msra.mxu2 %v446_v12  ;;  %v5751_v12 = vld [vmem:[%s12075_s5 + $0xfd8] sm:$0xff] }
 0x193   :  { %5955 = vmatpush.lsf.msrb.mxu0 %v5576_v20  ;;  %v2013_v20 = vld [vmem:[%s12076_s28 + $0xe8] sm:$0xff]  ;;  %2791 = vmatpush.msra.mxu1 %v2014_v7  ;;  %v6640_v0 = vpack.i.bf16 %v5751_v12, %v145_v52  ;;  %v438_v52 = vld [vmem:[%s12076_s28 + $0x300] sm:$0xff]  ;;  %v2003_v12 = vld [vmem:[%s12076_s28 + $0x98] sm:$0xff] }
 0x194   :  { %1346 = vmatpush.msra.mxu2 %v445_v25  ;;  %v5657_v7 = vld [vmem:[%s12075_s5 + $0xce8] sm:$0xff] }
 0x195   :  { %2767 = vmatpush.msra.mxu0 %v1984_v28  ;;  %v2012_v28 = vld [vmem:[%s12076_s28 + $0xe0] sm:$0xff]  ;;  %2792 = vmatpush.msra.mxu1 %v2013_v20 }
 0x196   :  { %5950 = vmatmul.lmr.bf16.gmra.7.mxu0  ;;  %6637 = vxpose.xlu0.b32.cont [10/16] (narrow) %v6636_v4, 56  ;;  %v442_v4 = vld [vmem:[%s12076_s28 + $0x320] sm:$0xff] }
 0x197   :  { %5956 = vmatpush.lsf.msrb.mxu0 %v5575_v29  ;;  %2793 = vmatpush.msra.mxu1 %v2012_v28  ;;  %v5564_v20 = vld [vmem:[%s12075_s5 + $0xa00] sm:$0xff]  ;;  %v8767_v28 = vpop.f32.mrf.mxu1 }
 0x198   :  { %v3437_v29 = vpop.xlane.xlu0 %3436  ;;  %6066 = vmatmul.lmr.bf16.gmra.7.mxu1  ;;  %6710 = vxpose.xlu1.b32.cont [13/16] (narrow) %v6709_v48, 56  ;;  %v440_v48 = vld [vmem:[%s12076_s28 + $0x310] sm:$0xff] }
 0x199   :  { %5957 = vmatpush.lsf.msrb.mxu0 %v5574_v37  ;;  %v8691_v26 = vpop.f32.mrf.mxu0  ;;  %v3441_v37 = vmul.f32 %v3437_v29, %v7450_v45  ;;  %2794 = vmatpush.msra.mxu1 %v2011_v43  ;;  %v441_v29 = vld [vmem:[%s12076_s28 + $0x318] sm:$0xff]  ;;  %v2062_v43 = vld [vmem:[%s12076_s28 + $0x270] sm:$0xff] }
 0x19a   :  { %12083 = vst [vmem:[#allocation10_spill] sm:$0xff] %v8691_v26 }
 0x19b   :  { %5958 = vmatpush.lsf.msrb.mxu0 %v5573_v19  ;;  %v444_v19 = vld [vmem:[%s12076_s28 + $0x330] sm:$0xff]  ;;  %2795 = vmatpush.msra.mxu1 %v2010_v57 }
 0x19c   :  { %1347 = vmatpush.msra.mxu2 %v444_v19  ;;  %v6458_v19 = vunpack.i.h.bf16 %v7663_v5  ;;  %v5658_v57 = vld [vmem:[%s12075_s5 + $0xcf0] sm:$0xff]  ;;  %v5752_v5 = vld [vmem:[%s12075_s5 + $0xfe0] sm:$0xff] }
 0x19d   :  { %5959 = vmatpush.lsf.msrb.mxu0 %v5572_v1  ;;  %v8727_v1 = vsub.f32 %v8094_v40, %v3441_v37  ;;  %2796 = vmatpush.msra.mxu1 %v2009_v3  ;;  %v439_v3 = vld [vmem:[%s12076_s28 + $0x308] sm:$0xff] }
 0x19e   :  { %5951 = vmatmul.lmr.bf16.gmra.7.mxu0  ;;  %6639 = vxpose.xlu0.b32.cont [11/16] (narrow) %v6638_v27, 56  ;;  %v2005_v27 = vld [vmem:[%s12076_s28 + $0xa8] sm:$0xff] }
 0x19f   :  { %5960 = vmatpush.lsf.msrb.mxu0 %v5571_v6  ;;  %v259_v6 = vld [vmem:[%s12075_s5 + $0x568] sm:$0xff]  ;;  %1348 = vmatpush.msra.mxu2 %v443_v63  ;;  %v3445_v21 = vmul.f32 %v8727_v1, %v8727_v1  ;;  %v146_v63 = vld [vmem:[%s12075_s5 + $0x1e0] sm:$0xff] }
 0x1a0   :  { %v6711_v25 = vpack.i.bf16 %v259_v6, %v5657_v7  ;;  %6067 = vmatmul.lmr.bf16.gmra.7.mxu1  ;;  %v6642_v6 = vpack.i.bf16 %v5752_v5, %v146_v63  ;;  %v2060_v7 = vld [vmem:[%s12076_s28 + $0x260] sm:$0xff]  ;;  %v405_v63 = vld [vmem:[%s12076_s28 + $0x1f8] sm:$0xff]  ;;  %v6468_v5 = vunpack.i.h.bf16 %v7741_v39  ;;  %v2053_v39 = vld [vmem:[%s12076_s28 + $0x228] sm:$0xff] }
 0x1a1   :  { %5961 = vmatpush.lsf.msrb.mxu0 %v5570_v8  ;;  %v8745_v8 = vpop.f32.mrf.mxu0  ;;  %1349 = vmatpush.msra.mxu2 %v442_v4  ;;  %v3447_v37 = vsel %vm1718_vm0, %v3445_v21, 0.0  ;;  %v2002_v21 = vld [vmem:[%s12076_s28 + $0x90] sm:$0xff] }
 0x1a2   :  { %12084 = vst [vmem:[#allocation11_spill] sm:$0xff] %v8745_v8  ;;  %6712 = vxpose.xlu1.b32.cont [14/16] (narrow) %v6711_v25, 56  ;;  %v2058_v25 = vld [vmem:[%s12076_s28 + $0x250] sm:$0xff]  ;;  %1224 = vmatpush.msra.mxu3 %v405_v63  ;;  %v2048_v63 = vld [vmem:[%s12076_s28 + $0x200] sm:$0xff] }
 0x1a3   :  { %5962 = vmatpush.lsf.msrb.mxu0 %v5569_v17  ;;  %v2008_v17 = vld [vmem:[%s12076_s28 + $0xc0] sm:$0xff]  ;;  %1350 = vmatpush.msra.mxu2 %v441_v29  ;;  %v336_v8 = vld [vmem:[%s12075_s5 + $0x7d0] sm:$0xff] }
 0x1a4   :  { %2797 = vmatpush.msra.mxu1 %v2008_v17  ;;  %v2059_v17 = vld [vmem:[%s12076_s28 + $0x258] sm:$0xff] }
 0x1a5   :  { %5963 = vmatpush.lsf.msrb.mxu0 %v5568_v35  ;;  %v2006_v35 = vld [vmem:[%s12076_s28 + $0xb0] sm:$0xff]  ;;  %3448 = vadd.xlane.f32.xlu2 %v3447_v37  ;;  %v2057_v37 = vld [vmem:[%s12076_s28 + $0x248] sm:$0xff] }
 0x1a6   :  { %2768 = vmatmul.f32.vlgmr.msra.gmra.mxu0 %v6453_v34  ;;  %2798 = vmatpush.msra.mxu1 %v2007_v23  ;;  %v2004_v34 = vld [vmem:[%s12076_s28 + $0xa0] sm:$0xff]  ;;  %v6463_v23 = vunpack.i.h.bf16 %v7702_v22  ;;  %v5753_v22 = vld [vmem:[%s12075_s5 + $0xfe8] sm:$0xff] }
 0x1a7   :  { %5964 = vmatpush.lsf.msrb.mxu0 %v5567_v54  ;;  %6641 = vxpose.xlu0.b32.cont [12/16] (narrow) %v6640_v0, 56  ;;  %v260_v54 = vld [vmem:[%s12075_s5 + $0x570] sm:$0xff]  ;;  %v261_v0 = vld [vmem:[%s12075_s5 + $0x578] sm:$0xff] }
 0x1a8   :  { %2799 = vmatpush.msra.mxu1 %v2006_v35  ;;  %1351 = vmatpush.msra.mxu2 %v440_v48  ;;  %v6713_v4 = vpack.i.bf16 %v260_v54, %v5658_v57  ;;  %v147_v35 = vld [vmem:[%s12075_s5 + $0x1e8] sm:$0xff]  ;;  %v2000_v54 = vld [vmem:[%s12076_s28 + $0x80] sm:$0xff]  ;;  %v2055_v57 = vld [vmem:[%s12076_s28 + $0x238] sm:$0xff] }
 0x1a9   :  { %5965 = vmatpush.lsf.msrb.mxu0 %v5566_v62  ;;  %v8792_v62 = vpop.f32.mrf.mxu0  ;;  %6068 = vmatmul.lmr.bf16.gmra.7.mxu1 }
 0x1aa   :  { %12085 = vst [vmem:[#allocation12_spill] sm:$0xff] %v8792_v62  ;;  %2800 = vmatpush.msra.mxu1 %v2005_v27  ;;  %1352 = vmatpush.msra.mxu2 %v439_v3  ;;  %v2056_v27 = vld [vmem:[%s12076_s28 + $0x240] sm:$0xff] }
 0x1ab   :  { %5966 = vmatpush.lsf.msrb.mxu0 %v5565_v2  ;;  %v2061_v2 = vld [vmem:[%s12076_s28 + $0x268] sm:$0xff]  ;;  %6714 = vxpose.xlu1.b32.cont [15/16] (narrow) %v6713_v4, 56  ;;  %v148_v4 = vld [vmem:[%s12075_s5 + $0x1f0] sm:$0xff] }
 0x1ac   :  { %2801 = vmatpush.msra.mxu1 %v2004_v34  ;;  %1353 = vmatpush.msra.mxu2 %v438_v52 }
 0x1ad   :  { %5967 = vmatpush.lsf.msrb.mxu0 %v5564_v20  ;;  %v8821_v20 = vpop.f32.mrf.mxu1  ;;  %6161 = vmatmul.lmr.bf16.vlgmr.msra.gmra.7.mxu2 }
 0x1ae   :  { %5968 = vllmr.7.mxu0  ;;  %2802 = vmatpush.msra.mxu1 %v2003_v12  ;;  %v2052_v12 = vld [vmem:[%s12076_s28 + $0x220] sm:$0xff] }
 0x1af   :  { %2904 = vmatpush.msra.mxu0 %v2063_v10  ;;  %6643 = vxpose.xlu0.b32.cont [13/16] (narrow) %v6642_v6, 56  ;;  %v5659_v10 = vld [vmem:[%s12075_s5 + $0xcf8] sm:$0xff]  ;;  %v5754_v6 = vld [vmem:[%s12075_s5 + $0xff0] sm:$0xff] }
 0x1b0   :  { %2771 = vmatmul.f32.gmra.mxu0 %v6458_v19  ;;  %2803 = vmatpush.msra.mxu1 %v2002_v21  ;;  %v6715_v48 = vpack.i.bf16 %v261_v0, %v5659_v10  ;;  %v6644_v19 = vpack.i.bf16 %v5753_v22, %v147_v35  ;;  %v6646_v52 = vpack.i.bf16 %v5754_v6, %v148_v4  ;;  %v2051_v21 = vld [vmem:[%s12076_s28 + $0x218] sm:$0xff]  ;;  %v6473_v0 = vunpack.i.h.bf16 %v7780_v59  ;;  %v2050_v10 = vld [vmem:[%s12076_s28 + $0x210] sm:$0xff]  ;;  %v398_v4 = vld [vmem:[%s12076_s28 + $0x1c0] sm:$0xff] }
 0x1b1   :  { %2905 = vmatpush.msra.mxu0 %v2062_v43  ;;  %v8836_v29 = vpop.f32.mrf.mxu0  ;;  %v2001_v43 = vld [vmem:[%s12076_s28 + $0x88] sm:$0xff]  ;;  %6069 = vmatmul.lmr.bf16.gmra.7.mxu1  ;;  %v401_v35 = vld [vmem:[%s12076_s28 + $0x1d8] sm:$0xff]  ;;  %v516_v59 = vld [vmem:[%s12076_s28 + $0x570] sm:$0xff]  ;;  %v6478_v6 = vunpack.i.h.bf16 %v7819_v15 }
 0x1b2   :  { %2804 = vmatpush.msra.mxu1 %v2001_v43  ;;  %v5755_v43 = vld [vmem:[%s12075_s5 + $0xff8] sm:$0xff]  ;;  %v5532_v15 = vld [vmem:[%s12075_s5 + $0x900] sm:$0xff] }
 0x1b3   :  { %2906 = vmatpush.msra.mxu0 %v2061_v2  ;;  %6716 = vxpose.xlu1.b32.end [16/16] (narrow) %v6715_v48, 56  ;;  %v2054_v2 = vld [vmem:[%s12076_s28 + $0x230] sm:$0xff]  ;;  %v2049_v48 = vld [vmem:[%s12076_s28 + $0x208] sm:$0xff] }
 0x1b4   :  { %2805 = vmatpush.msra.mxu1 %v2000_v54  ;;  %v515_v54 = vld [vmem:[%s12076_s28 + $0x568] sm:$0xff] }
 0x1b5   :  { %2907 = vmatpush.msra.mxu0 %v2060_v7  ;;  %v8866_v3 = vpop.f32.mrf.mxu1  ;;  %6162 = vmatmul.lmr.bf16.gmra.7.mxu2  ;;  %v404_v7 = vld [vmem:[%s12076_s28 + $0x1f0] sm:$0xff] }
 0x1b6   :  { %1225 = vmatpush.msra.mxu3 %v404_v7  ;;  %v397_v7 = vld [vmem:[%s12076_s28 + $0x1b8] sm:$0xff] }
 0x1b7   :  { %2908 = vmatpush.msra.mxu0 %v2059_v17  ;;  %6645 = vxpose.xlu0.b32.cont [14/16] (narrow) %v6644_v19, 56  ;;  %v403_v17 = vld [vmem:[%s12076_s28 + $0x1e8] sm:$0xff]  ;;  %v400_v19 = vld [vmem:[%s12076_s28 + $0x1d0] sm:$0xff] }
 0x1b8   :  { %2774 = vmatmul.f32.gmra.mxu0 %v6463_v23  ;;  %1226 = vmatpush.msra.mxu3 %v403_v17  ;;  %v402_v23 = vld [vmem:[%s12076_s28 + $0x1e0] sm:$0xff] }
 0x1b9   :  { %2909 = vmatpush.msra.mxu0 %v2058_v25  ;;  %6070 = vmatmul.lmr.bf16.gmra.7.mxu1  ;;  %v517_v25 = vld [vmem:[%s12076_s28 + $0x578] sm:$0xff]  ;;  %v262_v17 = vld [vmem:[%s12075_s5 + $0x580] sm:$0xff] }
 0x1ba   :  { %1227 = vmatpush.msra.mxu3 %v402_v23  ;;  %1490 = vmatpush.msra.mxu2 %v517_v25  ;;  %v511_v23 = vld [vmem:[%s12076_s28 + $0x548] sm:$0xff] }
 0x1bb   :  { %2910 = vmatpush.msra.mxu0 %v2057_v37  ;;  %v8868_v34 = vpop.f32.mrf.mxu0  ;;  %v149_v37 = vld [vmem:[%s12075_s5 + $0x1f8] sm:$0xff] }
 0x1bc   :  { %12086 = vst [vmem:[#allocation13_spill] sm:$0xff] %v8868_v34  ;;  %1228 = vmatpush.msra.mxu3 %v401_v35  ;;  %1491 = vmatpush.msra.mxu2 %v516_v59  ;;  %v510_v35 = vld [vmem:[%s12076_s28 + $0x540] sm:$0xff]  ;;  %v509_v59 = vld [vmem:[%s12076_s28 + $0x538] sm:$0xff] }
 0x1bd   :  { %2911 = vmatpush.msra.mxu0 %v2056_v27  ;;  %6163 = vmatmul.lmr.bf16.gmra.7.mxu2  ;;  %v8921_v27 = vpop.f32.mrf.mxu1  ;;  %v5587_v34 = vld [vmem:[%s12075_s5 + $0xab8] sm:$0xff] }
 0x1be   :  { %1229 = vmatpush.msra.mxu3 %v400_v19  ;;  %1492 = vmatpush.msra.mxu2 %v515_v54  ;;  %v6589_v54 = vunpack.i.l.bf16 %v8256_v55  ;;  %v212_v55 = vld [vmem:[%s12075_s5 + $0x3f0] sm:$0xff] }
 0x1bf   :  { %2912 = vmatpush.msra.mxu0 %v2055_v57  ;;  %6647 = vxpose.xlu0.b32.cont [15/16] (narrow) %v6646_v52, 56  ;;  %v6648_v57 = vpack.i.bf16 %v5755_v43, %v149_v37  ;;  %v6584_v52 = vunpack.i.l.bf16 %v8220_v60  ;;  %v396_v60 = vld [vmem:[%s12076_s28 + $0x1b0] sm:$0xff]  ;;  %v394_v37 = vld [vmem:[%s12076_s28 + $0x1a0] sm:$0xff]  ;;  %v6483_v43 = vunpack.i.h.bf16 %v7846_v30  ;;  %v263_v30 = vld [vmem:[%s12075_s5 + $0x588] sm:$0xff] }
 0x1c0   :  { %2777 = vmatmul.f32.gmra.mxu0 %v6468_v5  ;;  %v399_v5 = vld [vmem:[%s12076_s28 + $0x1c8] sm:$0xff] }
 0x1c1   :  { %2913 = vmatpush.msra.mxu0 %v2054_v2  ;;  %6071 = vmatmul.lmr.bf16.gmra.7.mxu1  ;;  %v514_v2 = vld [vmem:[%s12076_s28 + $0x560] sm:$0xff] }
 0x1c2   :  { %1230 = vmatpush.msra.mxu3 %v399_v5  ;;  %1493 = vmatpush.msra.mxu2 %v514_v2  ;;  %v508_v5 = vld [vmem:[%s12076_s28 + $0x530] sm:$0xff] }
 0x1c3   :  { %2914 = vmatpush.msra.mxu0 %v2053_v39  ;;  %v8904_v22 = vpop.f32.mrf.mxu0  ;;  %v513_v39 = vld [vmem:[%s12076_s28 + $0x558] sm:$0xff]  ;;  %v392_v2 = vld [vmem:[%s12076_s28 + $0x190] sm:$0xff] }
 0x1c4   :  { %12087 = vst [vmem:[#allocation14_spill] sm:$0xff] %v8904_v22  ;;  %1231 = vmatpush.msra.mxu3 %v398_v4  ;;  %1494 = vmatpush.msra.mxu2 %v513_v39  ;;  %v507_v4 = vld [vmem:[%s12076_s28 + $0x528] sm:$0xff] }
 0x1c5   :  { %2915 = vmatpush.msra.mxu0 %v2052_v12  ;;  %6164 = vmatmul.lmr.bf16.gmra.7.mxu2  ;;  %v8963_v25 = vpop.f32.mrf.mxu1  ;;  %v211_v39 = vld [vmem:[%s12075_s5 + $0x3e8] sm:$0xff] }
 0x1c6   :  { %1232 = vmatpush.msra.mxu3 %v397_v7  ;;  %12089 = vst [vmem:[#allocation16_spill] sm:$0xff] %v8963_v25  ;;  %v391_v7 = vld [vmem:[%s12076_s28 + $0x188] sm:$0xff]  ;;  %v5591_v25 = vld [vmem:[%s12075_s5 + $0xad8] sm:$0xff] }
 0x1c7   :  { %2916 = vmatpush.msra.mxu0 %v2051_v21  ;;  %6649 = vxpose.xlu0.b32.end [16/16] (narrow) %v6648_v57, 56  ;;  %v512_v21 = vld [vmem:[%s12076_s28 + $0x550] sm:$0xff]  ;;  %v393_v57 = vld [vmem:[%s12076_s28 + $0x198] sm:$0xff] }
 0x1c8   :  { %2780 = vmatmul.f32.gmra.mxu0 %v6473_v0  ;;  %v6752_v0 = vpack.i.bf16 %v5532_v15, %v262_v17  ;;  %1495 = vmatpush.msra.mxu2 %v512_v21  ;;  %v210_v15 = vld [vmem:[%s12075_s5 + $0x3e0] sm:$0xff] }
 0x1c9   :  { %2917 = vmatpush.msra.mxu0 %v2050_v10  ;;  %2806 = vmatmul.f32.vlgmr.msra.gmra.mxu1 %v6584_v52  ;;  %v395_v10 = vld [vmem:[%s12076_s28 + $0x1a8] sm:$0xff]  ;;  %v325_v52 = vld [vmem:[%s12075_s5 + $0x778] sm:$0xff]  ;;  %v506_v21 = vld [vmem:[%s12076_s28 + $0x520] sm:$0xff] }
 0x1ca   :  { %1233 = vmatpush.msra.mxu3 %v396_v60  ;;  %1496 = vmatpush.msra.mxu2 %v511_v23  ;;  %v390_v60 = vld [vmem:[%s12076_s28 + $0x180] sm:$0xff] }
 0x1cb   :  { %2918 = vmatpush.msra.mxu0 %v2049_v48  ;;  %v8946_v12 = vpop.f32.mrf.mxu0  ;;  %v213_v48 = vld [vmem:[%s12075_s5 + $0x3f8] sm:$0xff] }
 0x1cc   :  { %12088 = vst [vmem:[#allocation15_spill] sm:$0xff] %v8946_v12  ;;  %1234 = vmatpush.msra.mxu3 %v395_v10  ;;  %1497 = vmatpush.msra.mxu2 %v510_v35  ;;  %v209_v10 = vld [vmem:[%s12075_s5 + $0x3d8] sm:$0xff]  ;;  %v264_v35 = vld [vmem:[%s12075_s5 + $0x590] sm:$0xff] }
 0x1cd   :  { %2919 = vmatpush.msra.mxu0 %v2048_v63  ;;  %v5533_v63 = vld [vmem:[%s12075_s5 + $0x908] sm:$0xff]  ;;  %6165 = vmatmul.lmr.bf16.gmra.7.mxu2  ;;  %v9014_v17 = vpop.f32.mrf.mxu1  ;;  %v333_v12 = vld [vmem:[%s12075_s5 + $0x7b8] sm:$0xff] }
 0x1ce   :  { %6753 = vxpose.xlu2.b32.start [1/16] (narrow) %v6752_v0, 56  ;;  %1235 = vmatpush.msra.mxu3 %v394_v37  ;;  %12091 = vst [vmem:[#allocation18_spill] sm:$0xff] %v9014_v17  ;;  %v6594_v0 = vunpack.i.l.bf16 %v8298_v13  ;;  %v5534_v37 = vld [vmem:[%s12075_s5 + $0x910] sm:$0xff]  ;;  %v505_v13 = vld [vmem:[%s12076_s28 + $0x518] sm:$0xff] }
 0x1cf   :  { %1498 = vmatpush.msra.mxu2 %v509_v59  ;;  %v208_v59 = vld [vmem:[%s12075_s5 + $0x3d0] sm:$0xff] }
 0x1d0   :  { %2783 = vmatmul.f32.gmra.mxu0 %v6478_v6  ;;  %6261 = vmatpush.lsf.msrb.mxu3 %v213_v48  ;;  %v6754_v6 = vpack.i.bf16 %v5533_v63, %v263_v30  ;;  %v2126_v48 = vld [vmem:[%s12076_s28 + $0x470] sm:$0xff]  ;;  %v207_v63 = vld [vmem:[%s12075_s5 + $0x3c8] sm:$0xff] }
 0x1d1   :  { %2809 = vmatmul.f32.gmra.mxu1 %v6589_v54  ;;  %1499 = vmatpush.msra.mxu2 %v508_v5  ;;  %v324_v54 = vld [vmem:[%s12075_s5 + $0x770] sm:$0xff]  ;;  %v2125_v5 = vld [vmem:[%s12076_s28 + $0x468] sm:$0xff] }
 0x1d2   :  { %1236 = vmatpush.msra.mxu3 %v393_v57  ;;  %v6756_v57 = vpack.i.bf16 %v5534_v37, %v264_v35  ;;  %v504_v30 = vld [vmem:[%s12076_s28 + $0x510] sm:$0xff]  ;;  %v321_v35 = vld [vmem:[%s12075_s5 + $0x758] sm:$0xff] }
 0x1d3   :  { %v8981_v19 = vpop.f32.mrf.mxu0  ;;  %1500 = vmatpush.msra.mxu2 %v507_v4  ;;  %v323_v4 = vld [vmem:[%s12075_s5 + $0x768] sm:$0xff]  ;;  %v205_v37 = vld [vmem:[%s12075_s5 + $0x3b8] sm:$0xff] }
 0x1d4   :  { %12090 = vst [vmem:[#allocation17_spill] sm:$0xff] %v8981_v19  ;;  %6262 = vmatpush.lsf.msrb.mxu3 %v212_v55  ;;  %v9710_v19 = vld [vmem:[%s12076_s28 + $0x7d8] sm:$0xff] }
 0x1d5   :  { %6168 = vmatpush.lsf.msrb.mxu2 %v325_v52  ;;  %v9061_v55 = vpop.f32.mrf.mxu1  ;;  %v503_v52 = vld [vmem:[%s12076_s28 + $0x508] sm:$0xff] }
 0x1d6   :  { %1237 = vmatpush.msra.mxu3 %v392_v2  ;;  %6755 = vxpose.xlu2.b32.cont [2/16] (narrow) %v6754_v6, 56  ;;  %v206_v2 = vld [vmem:[%s12075_s5 + $0x3c0] sm:$0xff] }
 0x1d7   :  { %6166 = vmatmul.lmr.bf16.gmra.7.mxu2  ;;  %v2124_v6 = vld [vmem:[%s12076_s28 + $0x460] sm:$0xff] }
 0x1d8   :  { %2786 = vmatmul.f32.gmra.mxu0 %v6483_v43  ;;  %6263 = vmatpush.lsf.msrb.mxu3 %v211_v39  ;;  %v2127_v43 = vld [vmem:[%s12076_s28 + $0x478] sm:$0xff] }
 0x1d9   :  { %1501 = vmatpush.msra.mxu2 %v506_v21  ;;  %2812 = vmatmul.f32.gmra.mxu1 %v6594_v0  ;;  %v5535_v21 = vld [vmem:[%s12075_s5 + $0x918] sm:$0xff]  ;;  %v502_v0 = vld [vmem:[%s12076_s28 + $0x500] sm:$0xff] }
 0x1da   :  { %1238 = vmatpush.msra.mxu3 %v391_v7  ;;  %v6599_v7 = vunpack.i.l.bf16 %v8333_v32 }
 0x1db   :  { %v9025_v23 = vpop.f32.mrf.mxu0  ;;  %1502 = vmatpush.msra.mxu2 %v505_v13  ;;  %v2122_v13 = vld [vmem:[%s12076_s28 + $0x450] sm:$0xff] }
 0x1dc   :  { %12092 = vst [vmem:[#allocation19_spill] sm:$0xff] %v9025_v23  ;;  %6264 = vmatpush.lsf.msrb.mxu3 %v210_v15  ;;  %v265_v15 = vld [vmem:[%s12075_s5 + $0x598] sm:$0xff]  ;;  %v5697_v23 = vld [vmem:[%s12075_s5 + $0xe28] sm:$0xff] }
 0x1dd   :  { %6169 = vmatpush.lsf.msrb.mxu2 %v324_v54  ;;  %v2121_v54 = vld [vmem:[%s12076_s28 + $0x448] sm:$0xff] }
 0x1de   :  { %1239 = vmatpush.msra.mxu3 %v390_v60  ;;  %6757 = vxpose.xlu2.b32.cont [3/16] (narrow) %v6756_v57, 56  ;;  %v322_v60 = vld [vmem:[%s12075_s5 + $0x760] sm:$0xff]  ;;  %v204_v57 = vld [vmem:[%s12075_s5 + $0x3b0] sm:$0xff] }
 0x1df   :  { %1503 = vmatpush.msra.mxu2 %v504_v30  ;;  %v9087_v32 = vpop.trf.xlu1  ;;  %v319_v30 = vld [vmem:[%s12075_s5 + $0x748] sm:$0xff] }
 0x1e0   :  { %5969 = vmatmul.lmr.bf16.vlgmr.msra.gmra.7.mxu0  ;;  %6265 = vmatpush.lsf.msrb.mxu3 %v209_v10  ;;  %v2123_v10 = vld [vmem:[%s12076_s28 + $0x458] sm:$0xff] }
 0x1e1   :  { %3056 = vmatpush.msra.mxu0 %v2127_v43  ;;  %6167 = vmatmul.lmr.bf16.gmra.7.mxu2  ;;  %v6758_v43 = vpack.i.bf16 %v5535_v21, %v265_v15  ;;  %v318_v15 = vld [vmem:[%s12075_s5 + $0x740] sm:$0xff]  ;;  %v2119_v21 = vld [vmem:[%s12076_s28 + $0x438] sm:$0xff] }
 0x1e2   :  { %6266 = vmatpush.lsf.msrb.mxu3 %v208_v59  ;;  %6170 = vmatpush.lsf.msrb.mxu2 %v323_v4  ;;  %v6721_v59 = vunpack.i.h.bf16 %v9087_v32  ;;  %v266_v4 = vld [vmem:[%s12075_s5 + $0x5a0] sm:$0xff] }
 0x1e3   :  { %3057 = vmatpush.msra.mxu0 %v2126_v48  ;;  %v9072_v39 = vpop.f32.mrf.mxu0  ;;  %2815 = vmatmul.f32.gmra.mxu1 %v6599_v7  ;;  %v320_v48 = vld [vmem:[%s12075_s5 + $0x750] sm:$0xff]  ;;  %v2120_v7 = vld [vmem:[%s12076_s28 + $0x440] sm:$0xff] }
 0x1e4   :  { %6267 = vmatpush.lsf.msrb.mxu3 %v207_v63  ;;  %12093 = vst [vmem:[#allocation20_spill] sm:$0xff] %v9072_v39  ;;  %1504 = vmatpush.msra.mxu2 %v503_v52  ;;  %v9117_v63 = vpop.f32.mrf.mxu1  ;;  %v580_v39 = vld [vmem:[%s12076_s28 + $0x770] sm:$0xff] }
 0x1e5   :  { %3058 = vmatpush.msra.mxu0 %v2125_v5 }
 0x1e6   :  { %6268 = vmatpush.lsf.msrb.mxu3 %v206_v2  ;;  %6171 = vmatpush.lsf.msrb.mxu2 %v322_v60  ;;  %v6604_v2 = vunpack.i.l.bf16 %v8363_v51  ;;  %v203_v51 = vld [vmem:[%s12075_s5 + $0x3a8] sm:$0xff] }
 0x1e7   :  { %3059 = vmatpush.msra.mxu0 %v2124_v6  ;;  %6759 = vxpose.xlu2.b32.cont [4/16] (narrow) %v6758_v43, 56  ;;  %v5536_v6 = vld [vmem:[%s12075_s5 + $0x920] sm:$0xff]  ;;  %v9131_v52 = vpop.trf.xlu1  ;;  %v201_v43 = vld [vmem:[%s12075_s5 + $0x398] sm:$0xff] }
 0x1e8   :  { %5970 = vmatmul.lmr.bf16.gmra.7.mxu0  ;;  %1505 = vmatpush.msra.mxu2 %v502_v0  ;;  %v6760_v60 = vpack.i.bf16 %v5536_v6, %v266_v4  ;;  %v202_v0 = vld [vmem:[%s12075_s5 + $0x3a0] sm:$0xff]  ;;  %v315_v4 = vld [vmem:[%s12075_s5 + $0x728] sm:$0xff] }
 0x1e9   :  { %3060 = vmatpush.msra.mxu0 %v2123_v10  ;;  %6269 = vmatpush.lsf.msrb.mxu3 %v205_v37  ;;  %v317_v10 = vld [vmem:[%s12075_s5 + $0x738] sm:$0xff]  ;;  %v2118_v37 = vld [vmem:[%s12076_s28 + $0x430] sm:$0xff] }
 0x1ea   :  { %6172 = vmatpush.lsf.msrb.mxu2 %v321_v35  ;;  %v6726_v35 = vunpack.i.h.bf16 %v9131_v52 }
 0x1eb   :  { %3061 = vmatpush.msra.mxu0 %v2122_v13  ;;  %v9119_v5 = vpop.f32.mrf.mxu0  ;;  %1506 = vmatmul.f32.vlgmr.msra.gmra.mxu2 %v6721_v59  ;;  %v316_v13 = vld [vmem:[%s12075_s5 + $0x730] sm:$0xff]  ;;  %v2117_v59 = vld [vmem:[%s12076_s28 + $0x428] sm:$0xff] }
 0x1ec   :  { %12094 = vst [vmem:[#allocation21_spill] sm:$0xff] %v9119_v5  ;;  %6173 = vmatpush.lsf.msrb.mxu2 %v320_v48  ;;  %6270 = vmatpush.lsf.msrb.mxu3 %v204_v57  ;;  %v200_v57 = vld [vmem:[%s12075_s5 + $0x390] sm:$0xff] }
 0x1ed   :  { %3062 = vmatpush.msra.mxu0 %v2121_v54  ;;  %2818 = vmatmul.f32.gmra.mxu1 %v6604_v2  ;;  %v6609_v54 = vunpack.i.l.bf16 %v8399_v9  ;;  %v5537_v2 = vld [vmem:[%s12075_s5 + $0x928] sm:$0xff]  ;;  %v9176_v9 = vpop.f32.mrf.mxu1 }
 0x1ee   :  { %6174 = vmatpush.lsf.msrb.mxu2 %v319_v30  ;;  %6271 = vmatpush.lsf.msrb.mxu3 %v203_v51  ;;  %v267_v30 = vld [vmem:[%s12075_s5 + $0x5a8] sm:$0xff] }
 0x1ef   :  { %3063 = vmatpush.msra.mxu0 %v2120_v7  ;;  %6761 = vxpose.xlu2.b32.cont [5/16] (narrow) %v6760_v60, 56  ;;  %v9178_v6 = vpop.trf.xlu1  ;;  %v2116_v7 = vld [vmem:[%s12076_s28 + $0x420] sm:$0xff]  ;;  %v199_v51 = vld [vmem:[%s12075_s5 + $0x388] sm:$0xff] }
 0x1f0   :  { %5971 = vmatmul.lmr.bf16.gmra.7.mxu0  ;;  %6175 = vmatpush.lsf.msrb.mxu2 %v318_v15 }
 0x1f1   :  { %3064 = vmatpush.msra.mxu0 %v2119_v21  ;;  %6272 = vmatpush.lsf.msrb.mxu3 %v202_v0  ;;  %v314_v21 = vld [vmem:[%s12075_s5 + $0x720] sm:$0xff]  ;;  %v6762_v0 = vpack.i.bf16 %v5537_v2, %v267_v30  ;;  %v469_v30 = vld [vmem:[%s12076_s28 + $0x3f8] sm:$0xff]  ;;  %v268_v2 = vld [vmem:[%s12075_s5 + $0x5b0] sm:$0xff] }
 0x1f2   :  { %6176 = vmatpush.lsf.msrb.mxu2 %v317_v10  ;;  %v5707_v10 = vld [vmem:[%s12075_s5 + $0xe78] sm:$0xff] }
 0x1f3   :  { %v9161_v48 = vpop.f32.mrf.mxu0  ;;  %3065 = vmatpush.msra.mxu0 %v2118_v37  ;;  %1509 = vmatmul.f32.gmra.mxu2 %v6726_v35  ;;  %v9186_v15 = vpop.trf.xlu0  ;;  %v198_v35 = vld [vmem:[%s12075_s5 + $0x380] sm:$0xff]  ;;  %v2115_v37 = vld [vmem:[%s12076_s28 + $0x418] sm:$0xff] }
 0x1f4   :  { %12095 = vst [vmem:[#allocation22_spill] sm:$0xff] %v9161_v48  ;;  %6273 = vmatpush.lsf.msrb.mxu3 %v201_v43  ;;  %6177 = vmatpush.lsf.msrb.mxu2 %v316_v13  ;;  %v6651_v60 = vunpack.i.l.bf16 %v9186_v15  ;;  %v6731_v43 = vunpack.i.h.bf16 %v9178_v6  ;;  %v5706_v13 = vld [vmem:[%s12075_s5 + $0xe70] sm:$0xff] }
 0x1f5   :  { %3066 = vmatpush.msra.mxu0 %v2117_v59  ;;  %2821 = vmatmul.f32.gmra.mxu1 %v6609_v54  ;;  %v313_v59 = vld [vmem:[%s12075_s5 + $0x718] sm:$0xff] }
 0x1f6   :  { %6274 = vmatpush.lsf.msrb.mxu3 %v200_v57  ;;  %6178 = vmatpush.lsf.msrb.mxu2 %v315_v4  ;;  %v6614_v57 = vunpack.i.l.bf16 %v8446_v42  ;;  %v5538_v4 = vld [vmem:[%s12075_s5 + $0x930] sm:$0xff] }
 0x1f7   :  { %3067 = vmatpush.msra.mxu0 %v2116_v7  ;;  %1240 = vmatmul.f32.vlgmr.msra.gmra.mxu3 %v6651_v60  ;;  %v2114_v7 = vld [vmem:[%s12076_s28 + $0x410] sm:$0xff] }
 0x1f8   :  { %5972 = vmatmul.lmr.bf16.gmra.7.mxu0  ;;  %6275 = vmatpush.lsf.msrb.mxu3 %v199_v51  ;;  %v312_v42 = vld [vmem:[%s12075_s5 + $0x710] sm:$0xff]  ;;  %v5705_v51 = vld [vmem:[%s12075_s5 + $0xe68] sm:$0xff] }
 0x1f9   :  { %6179 = vmatpush.lsf.msrb.mxu2 %v314_v21  ;;  %5976 = vmatpush.lsf.msrb.mxu0 %v5707_v10  ;;  %v9229_v21 = vpop.trf.xlu1  ;;  %v9236_v10 = vpop.f32.mrf.mxu1 }
 0x1fa   :  { %6276 = vmatpush.lsf.msrb.mxu3 %v198_v35  ;;  %6763 = vxpose.xlu2.b32.cont [6/16] (narrow) %v6762_v0, 56  ;;  %v2113_v0 = vld [vmem:[%s12076_s28 + $0x408] sm:$0xff]  ;;  %12098 = vst [vmem:[#allocation25_spill] sm:$0xff] %v9236_v10  ;;  %v5664_v10 = vld [vmem:[%s12075_s5 + $0xd20] sm:$0xff] }
 0x1fb   :  { %v9208_v54 = vpop.f32.mrf.mxu0  ;;  %3068 = vmatpush.msra.mxu0 %v2115_v37  ;;  %1512 = vmatmul.f32.gmra.mxu2 %v6731_v43  ;;  %v9231_v60 = vpop.trf.xlu0  ;;  %v6764_v37 = vpack.i.bf16 %v5538_v4, %v268_v2  ;;  %v311_v43 = vld [vmem:[%s12075_s5 + $0x708] sm:$0xff]  ;;  %v5703_v2 = vld [vmem:[%s12075_s5 + $0xe58] sm:$0xff] }
 0x1fc   :  { %12096 = vst [vmem:[#allocation23_spill] sm:$0xff] %v9208_v54  ;;  %6180 = vmatpush.lsf.msrb.mxu2 %v313_v59  ;;  %1376 = vmatpush.msra.mxu3 %v469_v30  ;;  %v6656_v35 = vunpack.i.l.bf16 %v9231_v60  ;;  %v468_v59 = vld [vmem:[%s12076_s28 + $0x3f0] sm:$0xff]  ;;  %v310_v30 = vld [vmem:[%s12075_s5 + $0x700] sm:$0xff]  ;;  %v9257_v4 = vpop.f32.mrf.mxu2 }
 0x1fd   :  { %5977 = vmatpush.lsf.msrb.mxu0 %v5706_v13  ;;  %12097 = vst [vmem:[#allocation24_spill] sm:$0xff] %v9231_v60  ;;  %2824 = vmatmul.f32.gmra.mxu1 %v6614_v57  ;;  %v5704_v13 = vld [vmem:[%s12075_s5 + $0xe60] sm:$0xff]  ;;  %v465_v60 = vld [vmem:[%s12076_s28 + $0x3d8] sm:$0xff] }
 0x1fe   :  { %6277 = vllmr.7.mxu3  ;;  %6181 = vmatpush.lsf.msrb.mxu2 %v312_v42  ;;  %v2112_v57 = vld [vmem:[%s12076_s28 + $0x400] sm:$0xff]  ;;  %v467_v42 = vld [vmem:[%s12076_s28 + $0x3e8] sm:$0xff] }
 0x1ff   :  { %3069 = vmatpush.msra.mxu0 %v2114_v7  ;;  %1243 = vmatmul.f32.gmra.mxu3 %v6656_v35  ;;  %v5539_v35 = vld [vmem:[%s12075_s5 + $0x938] sm:$0xff] }
 0x200   :  { %5973 = vmatmul.lmr.bf16.gmra.7.mxu0  ;;  %6182 = vmatpush.lsf.msrb.mxu2 %v311_v43  ;;  %v466_v43 = vld [vmem:[%s12076_s28 + $0x3e0] sm:$0xff] }
 0x201   :  { %5978 = vmatpush.lsf.msrb.mxu0 %v5705_v51  ;;  %1377 = vmatpush.msra.mxu3 %v468_v59  ;;  %v6736_v51 = vunpack.i.h.bf16 %v9229_v21  ;;  %v9280_v59 = vpop.trf.xlu1 }
 0x202   :  { %6765 = vxpose.xlu2.b32.cont [7/16] (narrow) %v6764_v37, 56  ;;  %6183 = vmatpush.lsf.msrb.mxu2 %v310_v30  ;;  %v5702_v37 = vld [vmem:[%s12075_s5 + $0xe50] sm:$0xff] }
 0x203   :  { %3070 = vmatpush.msra.mxu0 %v2113_v0  ;;  %v9259_v7 = vpop.f32.mrf.mxu0  ;;  %v269_v0 = vld [vmem:[%s12075_s5 + $0x5b8] sm:$0xff]  ;;  %6184 = vllmr.7.mxu2  ;;  %v9282_v40 = vpop.trf.xlu0 }
 0x204   :  { %12099 = vst [vmem:[#allocation26_spill] sm:$0xff] %v9259_v7  ;;  %1378 = vmatpush.msra.mxu3 %v467_v42  ;;  %v6661_v30 = vunpack.i.l.bf16 %v9282_v40  ;;  %1515 = vmatmul.f32.gmra.mxu2 %v6736_v51  ;;  %v5700_v42 = vld [vmem:[%s12075_s5 + $0xe40] sm:$0xff]  ;;  %v464_v51 = vld [vmem:[%s12076_s28 + $0x3d0] sm:$0xff] }
 0x205   :  { %5979 = vmatpush.lsf.msrb.mxu0 %v5704_v13  ;;  %v581_v13 = vld [vmem:[%s12076_s28 + $0x778] sm:$0xff]  ;;  %12100 = vst [vmem:[#allocation27_spill] sm:$0xff] %v9282_v40  ;;  %v576_v7 = vld [vmem:[%s12076_s28 + $0x750] sm:$0xff] }
 0x206   :  { %1379 = vmatpush.msra.mxu3 %v466_v43  ;;  %1642 = vmatpush.msra.mxu2 %v581_v13  ;;  %v578_v43 = vld [vmem:[%s12076_s28 + $0x760] sm:$0xff]  ;;  %v6741_v13 = vunpack.i.h.bf16 %v9280_v59 }
 0x207   :  { %3071 = vmatpush.msra.mxu0 %v2112_v57  ;;  %v5701_v57 = vld [vmem:[%s12075_s5 + $0xe48] sm:$0xff]  ;;  %1246 = vmatmul.f32.gmra.mxu3 %v6661_v30  ;;  %v9321_v30 = vpop.f32.mrf.mxu2 }
 0x208   :  { %5974 = vmatmul.lmr.bf16.gmra.7.mxu0  ;;  %1380 = vmatpush.msra.mxu3 %v465_v60  ;;  %v463_v60 = vld [vmem:[%s12076_s28 + $0x3c8] sm:$0xff] }
 0x209   :  { %5980 = vmatpush.lsf.msrb.mxu0 %v5703_v2  ;;  %v6766_v2 = vpack.i.bf16 %v5539_v35, %v269_v0  ;;  %v579_v0 = vld [vmem:[%s12076_s28 + $0x768] sm:$0xff]  ;;  %1643 = vmatpush.msra.mxu2 %v580_v39  ;;  %v5699_v35 = vld [vmem:[%s12075_s5 + $0xe38] sm:$0xff]  ;;  %v5540_v39 = vld [vmem:[%s12075_s5 + $0x940] sm:$0xff]  ;;  %v9329_v40 = vpop.trf.xlu1 }
 0x20a   :  { %1381 = vmatpush.msra.mxu3 %v464_v51 }
 0x20b   :  { %5981 = vmatpush.lsf.msrb.mxu0 %v5702_v37  ;;  %v9306_v37 = vpop.f32.mrf.mxu0  ;;  %6767 = vxpose.xlu2.b32.cont [8/16] (narrow) %v6766_v2, 56  ;;  %v5698_v2 = vld [vmem:[%s12075_s5 + $0xe30] sm:$0xff]  ;;  %v9331_v51 = vpop.trf.xlu0 }
 0x20c   :  { %12101 = vst [vmem:[#allocation28_spill] sm:$0xff] %v9306_v37  ;;  %1644 = vmatpush.msra.mxu2 %v579_v0  ;;  %v6666_v0 = vunpack.i.l.bf16 %v9331_v51  ;;  %1382 = vmatpush.msra.mxu3 %v463_v60 }
 0x20d   :  { %5982 = vmatpush.lsf.msrb.mxu0 %v5701_v57  ;;  %v270_v57 = vld [vmem:[%s12075_s5 + $0x5c0] sm:$0xff]  ;;  %12102 = vst [vmem:[#allocation29_spill] sm:$0xff] %v9331_v51  ;;  %1518 = vmatmul.f32.gmra.mxu2 %v6741_v13 }
 0x20e   :  { %1645 = vmatpush.msra.mxu2 %v578_v43  ;;  %v6768_v37 = vpack.i.bf16 %v5540_v39, %v270_v57  ;;  %v461_v43 = vld [vmem:[%s12076_s28 + $0x3b8] sm:$0xff]  ;;  %v5696_v13 = vld [vmem:[%s12075_s5 + $0xe20] sm:$0xff]  ;;  %v6520_v57 = vunpack.i.h.bf16 %v8331_v31  ;;  %v575_v39 = vld [vmem:[%s12076_s28 + $0x748] sm:$0xff] }
 0x20f   :  { %5983 = vmatpush.lsf.msrb.mxu0 %v5700_v42  ;;  %v577_v42 = vld [vmem:[%s12076_s28 + $0x758] sm:$0xff]  ;;  %1249 = vmatmul.f32.gmra.mxu3 %v6666_v0  ;;  %v5541_v31 = vld [vmem:[%s12075_s5 + $0x948] sm:$0xff]  ;;  %v9381_v51 = vpop.f32.mrf.mxu2 }
 0x210   :  { %5975 = vmatmul.lmr.bf16.gmra.7.mxu0  ;;  %1646 = vmatpush.msra.mxu2 %v577_v42  ;;  %v460_v42 = vld [vmem:[%s12076_s28 + $0x3b0] sm:$0xff]  ;;  %v459_v0 = vld [vmem:[%s12076_s28 + $0x3a8] sm:$0xff] }
 0x211   :  { %5984 = vmatpush.lsf.msrb.mxu0 %v5699_v35  ;;  %v462_v35 = vld [vmem:[%s12076_s28 + $0x3c0] sm:$0xff] }
 0x212   :  { %1383 = vmatpush.msra.mxu3 %v462_v35  ;;  %1647 = vmatpush.msra.mxu2 %v576_v7  ;;  %v6746_v7 = vunpack.i.h.bf16 %v9329_v40  ;;  %v9374_v35 = vpop.trf.xlu1 }
 0x213   :  { %5985 = vmatpush.lsf.msrb.mxu0 %v5698_v2  ;;  %v9353_v60 = vpop.f32.mrf.mxu0  ;;  %6769 = vxpose.xlu2.b32.cont [9/16] (narrow) %v6768_v37, 56  ;;  %v271_v2 = vld [vmem:[%s12075_s5 + $0x5c8] sm:$0xff]  ;;  %v574_v37 = vld [vmem:[%s12076_s28 + $0x740] sm:$0xff]  ;;  %12104 = vst [vmem:[#allocation31_spill] sm:$0xff] %v9374_v35 }
 0x214   :  { %12103 = vst [vmem:[#allocation30_spill] sm:$0xff] %v9353_v60  ;;  %1384 = vmatpush.msra.mxu3 %v461_v43  ;;  %1648 = vmatpush.msra.mxu2 %v575_v39  ;;  %v9376_v43 = vpop.trf.xlu0  ;;  %v6770_v62 = vpack.i.bf16 %v5541_v31, %v271_v2  ;;  %v458_v39 = vld [vmem:[%s12076_s28 + $0x3a0] sm:$0xff]  ;;  %v457_v2 = vld [vmem:[%s12076_s28 + $0x398] sm:$0xff]  ;;  %v572_v31 = vld [vmem:[%s12076_s28 + $0x730] sm:$0xff] }
 0x215   :  { %5986 = vmatpush.lsf.msrb.mxu0 %v5697_v23  ;;  %v5695_v23 = vld [vmem:[%s12075_s5 + $0xe18] sm:$0xff]  ;;  %12105 = vst [vmem:[#allocation32_spill] sm:$0xff] %v9376_v43  ;;  %v6671_v60 = vunpack.i.l.bf16 %v9376_v43  ;;  %1521 = vmatmul.f32.gmra.mxu2 %v6746_v7  ;;  %v454_v43 = vld [vmem:[%s12076_s28 + $0x380] sm:$0xff] }
 0x216   :  { %1385 = vmatpush.msra.mxu3 %v460_v42  ;;  %1649 = vmatpush.msra.mxu2 %v574_v37  ;;  %v5693_v42 = vld [vmem:[%s12075_s5 + $0xe08] sm:$0xff]  ;;  %v5692_v37 = vld [vmem:[%s12075_s5 + $0xe00] sm:$0xff] }
 0x217   :  { %5987 = vmatpush.lsf.msrb.mxu0 %v5696_v13  ;;  %v5694_v13 = vld [vmem:[%s12075_s5 + $0xe10] sm:$0xff]  ;;  %1252 = vmatmul.f32.gmra.mxu3 %v6671_v60 }
 0x218   :  { %3072 = vmatmul.f32.vlgmr.msra.gmra.mxu0 %v6520_v57  ;;  %v573_v57 = vld [vmem:[%s12076_s28 + $0x738] sm:$0xff]  ;;  %1386 = vmatpush.msra.mxu3 %v459_v0  ;;  %v456_v60 = vld [vmem:[%s12076_s28 + $0x390] sm:$0xff]  ;;  %v3449_v17 = vpop.xlane.xlu2 %3448 }
 0x219   :  { %5988 = vmatpush.lsf.msrb.mxu0 %v5695_v23  ;;  %v6525_v23 = vunpack.i.h.bf16 %v8361_v50  ;;  %1650 = vmatpush.msra.mxu2 %v573_v57  ;;  %v272_v0 = vld [vmem:[%s12075_s5 + $0x5d0] sm:$0xff] }
 0x21a   :  { %1387 = vmatpush.msra.mxu3 %v458_v39  ;;  %v5542_v50 = vld [vmem:[%s12075_s5 + $0x950] sm:$0xff]  ;;  %v2191_v39 = vld [vmem:[%s12076_s28 + $0x678] sm:$0xff] }
 0x21b   :  { %5989 = vmatpush.lsf.msrb.mxu0 %v5694_v13  ;;  %v9403_v7 = vpop.f32.mrf.mxu0  ;;  %6771 = vxpose.xlu2.b32.cont [10/16] (narrow) %v6770_v62, 56  ;;  %v571_v13 = vld [vmem:[%s12076_s28 + $0x728] sm:$0xff] }
 0x21c   :  { %12106 = vst [vmem:[#allocation33_spill] sm:$0xff] %v9403_v7  ;;  %1388 = vmatpush.msra.mxu3 %v457_v2  ;;  %1651 = vmatpush.msra.mxu2 %v572_v31  ;;  %v455_v62 = vld [vmem:[%s12076_s28 + $0x388] sm:$0xff]  ;;  %v9423_v57 = vpop.trf.xlu0  ;;  %v6751_v2 = vunpack.i.h.bf16 %v9374_v35  ;;  %v5588_v35 = vld [vmem:[%s12075_s5 + $0xac0] sm:$0xff] }
 0x21d   :  { %5990 = vmatpush.lsf.msrb.mxu0 %v5693_v42  ;;  %12107 = vst [vmem:[#allocation34_spill] sm:$0xff] %v9423_v57  ;;  %v570_v42 = vld [vmem:[%s12076_s28 + $0x720] sm:$0xff]  ;;  %v6676_v31 = vunpack.i.l.bf16 %v9423_v57  ;;  %v520_v57 = vld [vmem:[%s12076_s28 + $0x590] sm:$0xff]  ;;  %v5549_v7 = vld [vmem:[%s12075_s5 + $0x988] sm:$0xff] }
 0x21e   :  { %1389 = vmatpush.msra.mxu3 %v456_v60  ;;  %1652 = vmatpush.msra.mxu2 %v571_v13  ;;  %v9436_v60 = vpop.f32.mrf.mxu2  ;;  %v568_v13 = vld [vmem:[%s12076_s28 + $0x710] sm:$0xff] }
 0x21f   :  { %5991 = vmatpush.lsf.msrb.mxu0 %v5692_v37  ;;  %v6772_v37 = vpack.i.bf16 %v5542_v50, %v272_v0  ;;  %1255 = vmatmul.f32.gmra.mxu3 %v6676_v31  ;;  %v2190_v0 = vld [vmem:[%s12076_s28 + $0x670] sm:$0xff]  ;;  %v6530_v50 = vunpack.i.h.bf16 %v8397_v56  ;;  %v2189_v56 = vld [vmem:[%s12076_s28 + $0x668] sm:$0xff]  ;;  %v2188_v31 = vld [vmem:[%s12076_s28 + $0x660] sm:$0xff] }
 0x220   :  { %3075 = vmatmul.f32.gmra.mxu0 %v6525_v23  ;;  %1390 = vmatpush.msra.mxu3 %v455_v62  ;;  %v569_v23 = vld [vmem:[%s12076_s28 + $0x718] sm:$0xff] }
 0x221   :  { %3208 = vmatpush.msra.mxu0 %v2191_v39  ;;  %1653 = vmatpush.msra.mxu2 %v570_v42  ;;  %v273_v39 = vld [vmem:[%s12075_s5 + $0x5d8] sm:$0xff] }
 0x222   :  { %1524 = vmatmul.f32.gmra.mxu2 %v6751_v2  ;;  %1391 = vmatpush.msra.mxu3 %v454_v43  ;;  %v5543_v42 = vld [vmem:[%s12075_s5 + $0x958] sm:$0xff]  ;;  %v567_v43 = vld [vmem:[%s12076_s28 + $0x708] sm:$0xff] }
 0x223   :  { %v9445_v62 = vpop.f32.mrf.mxu0  ;;  %6773 = vxpose.xlu2.b32.cont [11/16] (narrow) %v6772_v37, 56  ;;  %1654 = vmatpush.msra.mxu2 %v569_v23  ;;  %v6774_v23 = vpack.i.bf16 %v5543_v42, %v273_v39 }
 0x224   :  { %12108 = vst [vmem:[#allocation35_spill] sm:$0xff] %v9445_v62  ;;  %3209 = vmatpush.msra.mxu0 %v2190_v0  ;;  %v9459_v2 = vpop.trf.xlu0  ;;  %v566_v0 = vld [vmem:[%s12076_s28 + $0x700] sm:$0xff]  ;;  %v2186_v62 = vld [vmem:[%s12076_s28 + $0x650] sm:$0xff] }
 0x225   :  { %1655 = vmatpush.msra.mxu2 %v568_v13  ;;  %12109 = vst [vmem:[#allocation36_spill] sm:$0xff] %v9459_v2  ;;  %v6681_v37 = vunpack.i.l.bf16 %v9459_v2  ;;  %v2187_v13 = vld [vmem:[%s12076_s28 + $0x658] sm:$0xff] }
 0x226   :  { %3210 = vmatpush.msra.mxu0 %v2189_v56  ;;  %v9475_v39 = vpop.f32.mrf.mxu2  ;;  %v274_v56 = vld [vmem:[%s12075_s5 + $0x5e0] sm:$0xff] }
 0x227   :  { %5992 = vllmr.7.mxu0  ;;  %1656 = vmatpush.msra.mxu2 %v567_v43  ;;  %12110 = vst [vmem:[#allocation37_spill] sm:$0xff] %v9475_v39  ;;  %v5544_v43 = vld [vmem:[%s12075_s5 + $0x960] sm:$0xff] }
 0x228   :  { %3078 = vmatmul.f32.gmra.mxu0 %v6530_v50  ;;  %1258 = vmatmul.f32.gmra.mxu3 %v6681_v37  ;;  %v6535_v50 = vunpack.i.h.bf16 %v8444_v41  ;;  %v2185_v41 = vld [vmem:[%s12076_s28 + $0x648] sm:$0xff]  ;;  %v2031_v37 = vld [vmem:[%s12076_s28 + $0x178] sm:$0xff] }
 0x229   :  { %3211 = vmatpush.msra.mxu0 %v2188_v31  ;;  %1657 = vmatpush.msra.mxu2 %v566_v0  ;;  %v2184_v31 = vld [vmem:[%s12076_s28 + $0x640] sm:$0xff]  ;;  %v533_v0 = vld [vmem:[%s12076_s28 + $0x5f8] sm:$0xff] }
 0x22a   :  { %6185 = vmatmul.lmr.bf16.vlgmr.msra.gmra.7.mxu2 }
 0x22b   :  { %6775 = vxpose.xlu2.b32.cont [12/16] (narrow) %v6774_v23, 56  ;;  %3212 = vmatpush.msra.mxu0 %v2187_v13  ;;  %v6776_v23 = vpack.i.bf16 %v5544_v43, %v274_v56  ;;  %v532_v13 = vld [vmem:[%s12076_s28 + $0x5f0] sm:$0xff] }
 0x22c   :  { %2828 = vmatpush.msra.mxu2 %v2031_v37  ;;  %v2182_v56 = vld [vmem:[%s12076_s28 + $0x630] sm:$0xff]  ;;  %v2181_v37 = vld [vmem:[%s12076_s28 + $0x628] sm:$0xff] }
 0x22d   :  { %v9477_v42 = vpop.f32.mrf.mxu0  ;;  %3213 = vmatpush.msra.mxu0 %v2186_v62  ;;  %v2183_v62 = vld [vmem:[%s12076_s28 + $0x638] sm:$0xff] }
 0x22e   :  { %12111 = vst [vmem:[#allocation38_spill] sm:$0xff] %v9477_v42  ;;  %v530_v42 = vld [vmem:[%s12076_s28 + $0x5e0] sm:$0xff] }
 0x22f   :  { %3214 = vmatpush.msra.mxu0 %v2185_v41  ;;  %v2030_v41 = vld [vmem:[%s12076_s28 + $0x170] sm:$0xff] }
 0x230   :  { %3081 = vmatmul.f32.gmra.mxu0 %v6535_v50  ;;  %6278 = vmatmul.lmr.bf16.vlgmr.msra.gmra.7.mxu3  ;;  %v6540_v50 = vunpack.i.h.bf16 %v8494_v44  ;;  %v5545_v44 = vld [vmem:[%s12075_s5 + $0x968] sm:$0xff] }
 0x231   :  { %3215 = vmatpush.msra.mxu0 %v2184_v31  ;;  %1528 = vmatpush.msra.mxu3 %v533_v0  ;;  %v275_v31 = vld [vmem:[%s12075_s5 + $0x5e8] sm:$0xff] }
 0x232   :  { %6186 = vmatmul.lmr.bf16.gmra.7.mxu2  ;;  %v9526_v0 = vld [vmem:[%s12074_s8 + $0x8] sm:$0xff]  ;;  %s12137_s8 = sld [smem:[#allocation104_spill]] }
 0x233   :  { %6777 = vxpose.xlu2.b32.cont [13/16] (narrow) %v6776_v23, 56  ;;  %3216 = vmatpush.msra.mxu0 %v2183_v62  ;;  %v9521_v23 = vpop.f32.mrf.mxu2  ;;  %v531_v62 = vld [vmem:[%s12076_s28 + $0x5e8] sm:$0xff]  ;;  %v3375_v2 = vsel %vm1718_vm0, %v9526_v0, 0.0 }
 0x234   :  { %1529 = vmatpush.msra.mxu3 %v532_v13  ;;  %12113 = vst [vmem:[#allocation40_spill] sm:$0xff] %v9521_v23  ;;  %2829 = vmatpush.msra.mxu2 %v2030_v41  ;;  %v2180_v13 = vld [vmem:[%s12076_s28 + $0x620] sm:$0xff] }
 0x235   :  { %v9507_v43 = vpop.f32.mrf.mxu0  ;;  %3217 = vmatpush.msra.mxu0 %v2182_v56  ;;  %v6778_v56 = vpack.i.bf16 %v5545_v44, %v275_v31  ;;  %v2028_v41 = vld [vmem:[%s12076_s28 + $0x160] sm:$0xff]  ;;  %v2179_v31 = vld [vmem:[%s12076_s28 + $0x618] sm:$0xff] }
 0x236   :  { %12112 = vst [vmem:[#allocation39_spill] sm:$0xff] %v9507_v43  ;;  %v2029_v43 = vld [vmem:[%s12076_s28 + $0x168] sm:$0xff]  ;;  %1530 = vmatpush.msra.mxu3 %v531_v62  ;;  %v2027_v44 = vld [vmem:[%s12076_s28 + $0x158] sm:$0xff]  ;;  %v330_v23 = vld [vmem:[%s12075_s5 + $0x7a0] sm:$0xff] }
 0x237   :  { %3218 = vmatpush.msra.mxu0 %v2181_v37  ;;  %2830 = vmatpush.msra.mxu2 %v2029_v43  ;;  %v6545_v43 = vunpack.i.h.bf16 %v8547_v46  ;;  %v528_v37 = vld [vmem:[%s12076_s28 + $0x5d0] sm:$0xff] }
 0x238   :  { %3084 = vmatmul.f32.gmra.mxu0 %v6540_v50  ;;  %v529_v50 = vld [vmem:[%s12076_s28 + $0x5d8] sm:$0xff]  ;;  %1531 = vmatpush.msra.mxu3 %v530_v42  ;;  %v276_v42 = vld [vmem:[%s12075_s5 + $0x5f0] sm:$0xff] }
 0x239   :  { %6279 = vmatmul.lmr.bf16.gmra.7.mxu3  ;;  %3219 = vmatpush.msra.mxu0 %v2180_v13  ;;  %v5546_v46 = vld [vmem:[%s12075_s5 + $0x970] sm:$0xff] }
 0x23a   :  { %2831 = vmatpush.msra.mxu2 %v2028_v41  ;;  %1532 = vmatpush.msra.mxu3 %v529_v50  ;;  %v2178_v13 = vld [vmem:[%s12076_s28 + $0x610] sm:$0xff] }
 0x23b   :  { %3376 = vadd.xlane.f32.xlu0 %v3375_v2  ;;  %6779 = vxpose.xlu2.b32.cont [14/16] (narrow) %v6778_v56, 56  ;;  %v2026_v41 = vld [vmem:[%s12076_s28 + $0x150] sm:$0xff]  ;;  %v527_v2 = vld [vmem:[%s12076_s28 + $0x5c8] sm:$0xff]  ;;  %v9578_v50 = vpop.f32.mrf.mxu2 }
 0x23c   :  { %3220 = vmatpush.msra.mxu0 %v2179_v31  ;;  %6187 = vmatmul.lmr.bf16.gmra.7.mxu2  ;;  %v2177_v56 = vld [vmem:[%s12076_s28 + $0x608] sm:$0xff]  ;;  %12115 = vst [vmem:[#allocation42_spill] sm:$0xff] %v9578_v50  ;;  %v6780_v31 = vpack.i.bf16 %v5546_v46, %v276_v42  ;;  %v6550_v42 = vunpack.i.h.bf16 %v8597_v18  ;;  %v2024_v46 = vld [vmem:[%s12076_s28 + $0x140] sm:$0xff]  ;;  %v5547_v18 = vld [vmem:[%s12075_s5 + $0x978] sm:$0xff] }
 0x23d   :  { %v9558_v62 = vpop.f32.mrf.mxu0  ;;  %2832 = vmatpush.msra.mxu2 %v2027_v44  ;;  %1533 = vmatpush.msra.mxu3 %v528_v37  ;;  %v526_v44 = vld [vmem:[%s12076_s28 + $0x5c0] sm:$0xff]  ;;  %v525_v37 = vld [vmem:[%s12076_s28 + $0x5b8] sm:$0xff] }
 0x23e   :  { %12114 = vst [vmem:[#allocation41_spill] sm:$0xff] %v9558_v62  ;;  %3221 = vmatpush.msra.mxu0 %v2178_v13  ;;  %v2025_v62 = vld [vmem:[%s12076_s28 + $0x148] sm:$0xff] }
 0x23f   :  { %2833 = vmatpush.msra.mxu2 %v2026_v41  ;;  %1534 = vmatpush.msra.mxu3 %v527_v2  ;;  %v524_v41 = vld [vmem:[%s12076_s28 + $0x5b0] sm:$0xff]  ;;  %v277_v2 = vld [vmem:[%s12075_s5 + $0x5f8] sm:$0xff] }
 0x240   :  { %3087 = vmatmul.f32.gmra.mxu0 %v6545_v43  ;;  %v2176_v43 = vld [vmem:[%s12076_s28 + $0x600] sm:$0xff] }
 0x241   :  { %6280 = vmatmul.lmr.bf16.gmra.7.mxu3  ;;  %3222 = vmatpush.msra.mxu0 %v2177_v56  ;;  %v523_v56 = vld [vmem:[%s12076_s28 + $0x5a8] sm:$0xff] }
 0x242   :  { %2834 = vmatpush.msra.mxu2 %v2025_v62  ;;  %1535 = vmatpush.msra.mxu3 %v526_v44  ;;  %v2023_v62 = vld [vmem:[%s12076_s28 + $0x138] sm:$0xff] }
 0x243   :  { %6781 = vxpose.xlu2.b32.cont [15/16] (narrow) %v6780_v31, 56  ;;  %3223 = vmatpush.msra.mxu0 %v2176_v43  ;;  %v2022_v31 = vld [vmem:[%s12076_s28 + $0x130] sm:$0xff]  ;;  %v9616_v44 = vpop.f32.mrf.mxu2  ;;  %v6782_v43 = vpack.i.bf16 %v5547_v18, %v277_v2  ;;  %v521_v2 = vld [vmem:[%s12076_s28 + $0x598] sm:$0xff] }
 0x244   :  { %6188 = vmatmul.lmr.bf16.gmra.7.mxu2  ;;  %1536 = vmatpush.msra.mxu3 %v525_v37  ;;  %v522_v37 = vld [vmem:[%s12076_s28 + $0x5a0] sm:$0xff] }
 0x245   :  { %v9596_v13 = vpop.f32.mrf.mxu0  ;;  %2835 = vmatpush.msra.mxu2 %v2024_v46  ;;  %v2021_v46 = vld [vmem:[%s12076_s28 + $0x128] sm:$0xff] }
 0x246   :  { %12116 = vst [vmem:[#allocation43_spill] sm:$0xff] %v9596_v13  ;;  %1537 = vmatpush.msra.mxu3 %v524_v41  ;;  %v2020_v41 = vld [vmem:[%s12076_s28 + $0x120] sm:$0xff]  ;;  %v9672_v13 = vld [vmem:[%s12076_s28 + $0x7e8] sm:$0xff] }
 0x247   :  { %2836 = vmatpush.msra.mxu2 %v2023_v62  ;;  %v5548_v62 = vld [vmem:[%s12075_s5 + $0x980] sm:$0xff] }
 0x248   :  { %3090 = vmatmul.f32.gmra.mxu0 %v6550_v42  ;;  %1538 = vmatpush.msra.mxu3 %v523_v56  ;;  %v341_v42 = vld [vmem:[%s12075_s5 + $0x7f8] sm:$0xff]  ;;  %v340_v56 = vld [vmem:[%s12075_s5 + $0x7f0] sm:$0xff] }
 0x249   :  { %6281 = vmatmul.lmr.bf16.gmra.7.mxu3  ;;  %2837 = vmatpush.msra.mxu2 %v2022_v31  ;;  %v5660_v31 = vld [vmem:[%s12075_s5 + $0xd00] sm:$0xff] }
 0x24a   :  { %1539 = vmatpush.msra.mxu3 %v522_v37  ;;  %v9647_v37 = vld [vmem:[%s12076_s28 + $0x7f8] sm:$0xff] }
 0x24b   :  { %6783 = vxpose.xlu2.b32.end [16/16] (narrow) %v6782_v43, 56  ;;  %2838 = vmatpush.msra.mxu2 %v2021_v46  ;;  %v2019_v43 = vld [vmem:[%s12076_s28 + $0x118] sm:$0xff]  ;;  %v9652_v46 = vpop.f32.mrf.mxu1 }
 0x24c   :  { %6189 = vmatmul.lmr.bf16.gmra.7.mxu2  ;;  %6285 = vmatpush.lsf.msrb.mxu3 %v341_v42  ;;  %12118 = vst [vmem:[#allocation45_spill] sm:$0xff] %v9652_v46  ;;  %v6819_v42 = vpack.i.bf16 %v5660_v31, %v5548_v62  ;;  %v519_v62 = vld [vmem:[%s12076_s28 + $0x588] sm:$0xff]  ;;  %v9686_v31 = vld [vmem:[%s12076_s28 + $0x7e0] sm:$0xff]  ;;  %v9775_v46 = vld [vmem:[%s12076_s28 + $0x7b0] sm:$0xff] }
 0x24d   :  { %v9633_v18 = vpop.f32.mrf.mxu0  ;;  %2839 = vmatpush.msra.mxu2 %v2020_v41  ;;  %v2018_v41 = vld [vmem:[%s12076_s28 + $0x110] sm:$0xff] }
 0x24e   :  { %12117 = vst [vmem:[#allocation44_spill] sm:$0xff] %v9633_v18  ;;  %1540 = vmatpush.msra.mxu3 %v521_v2  ;;  %v9660_v18 = vld [vmem:[%s12076_s28 + $0x7f0] sm:$0xff]  ;;  %v339_v2 = vld [vmem:[%s12075_s5 + $0x7e8] sm:$0xff] }
 0x24f   :  { %2840 = vmatpush.msra.mxu2 %v2019_v43 }
 0x250   :  { %5993 = vmatmul.lmr.bf16.vlgmr.msra.gmra.7.mxu0  ;;  %6286 = vmatpush.lsf.msrb.mxu3 %v340_v56  ;;  %v9674_v56 = vpop.f32.mrf.mxu2 }
 0x251   :  { %3322 = vmatpush.msra.mxu0 %v9647_v37  ;;  %6282 = vmatmul.lmr.bf16.gmra.7.mxu3 }
 0x252   :  { %1541 = vmatpush.msra.mxu3 %v520_v57  ;;  %2841 = vmatpush.msra.mxu2 %v2018_v41  ;;  %v2017_v57 = vld [vmem:[%s12076_s28 + $0x108] sm:$0xff]  ;;  %v338_v41 = vld [vmem:[%s12075_s5 + $0x7e0] sm:$0xff] }
 0x253   :  { %3323 = vmatpush.msra.mxu0 %v9660_v18  ;;  %6820 = vxpose.xlu2.b32.start [1/16] (narrow) %v6819_v42, 56  ;;  %v518_v42 = vld [vmem:[%s12076_s28 + $0x580] sm:$0xff]  ;;  %v9715_v54 = vpop.f32.mrf.mxu1 }
 0x254   :  { %6287 = vmatpush.lsf.msrb.mxu3 %v339_v2  ;;  %v5661_v2 = vld [vmem:[%s12075_s5 + $0xd08] sm:$0xff]  ;;  %6190 = vmatmul.lmr.bf16.gmra.7.mxu2  ;;  %12120 = vst [vmem:[#allocation47_spill] sm:$0xff] %v9715_v54  ;;  %v5662_v54 = vld [vmem:[%s12075_s5 + $0xd10] sm:$0xff] }
 0x255   :  { %v9688_v43 = vpop.f32.mrf.mxu0  ;;  %3324 = vmatpush.msra.mxu0 %v9672_v13  ;;  %2842 = vmatpush.msra.mxu2 %v2017_v57  ;;  %v6821_v50 = vpack.i.bf16 %v5661_v2, %v5549_v7  ;;  %v9720_v57 = vld [vmem:[%s12076_s28 + $0x7d0] sm:$0xff]  ;;  %v9729_v7 = vld [vmem:[%s12076_s28 + $0x7c8] sm:$0xff] }
 0x256   :  { %12119 = vst [vmem:[#allocation46_spill] sm:$0xff] %v9688_v43  ;;  %1542 = vmatpush.msra.mxu3 %v519_v62  ;;  %v2016_v43 = vld [vmem:[%s12076_s28 + $0x100] sm:$0xff]  ;;  %v337_v62 = vld [vmem:[%s12075_s5 + $0x7d8] sm:$0xff] }
 0x257   :  { %3325 = vmatpush.msra.mxu0 %v9686_v31  ;;  %2843 = vmatpush.msra.mxu2 %v2016_v43  ;;  %v335_v43 = vld [vmem:[%s12075_s5 + $0x7c8] sm:$0xff] }
 0x258   :  { %5994 = vmatmul.lmr.bf16.gmra.7.mxu0  ;;  %6288 = vmatpush.lsf.msrb.mxu3 %v338_v41  ;;  %v9735_v41 = vpop.f32.mrf.mxu2 }
 0x259   :  { %3326 = vmatpush.msra.mxu0 %v9710_v19  ;;  %6283 = vmatmul.lmr.bf16.gmra.7.mxu3  ;;  %12121 = vst [vmem:[#allocation48_spill] sm:$0xff] %v9735_v41 }
 0x25a   :  { %1543 = vmatpush.msra.mxu3 %v518_v42  ;;  %v5550_v42 = vld [vmem:[%s12075_s5 + $0x990] sm:$0xff] }
 0x25b   :  { %3327 = vmatpush.msra.mxu0 %v9720_v57  ;;  %6822 = vxpose.xlu2.b32.cont [2/16] (narrow) %v6821_v50, 56  ;;  %v334_v50 = vld [vmem:[%s12075_s5 + $0x7c0] sm:$0xff]  ;;  %v6823_v47 = vpack.i.bf16 %v5662_v54, %v5550_v42  ;;  %v9777_v54 = vpop.f32.mrf.mxu1  ;;  %v332_v42 = vld [vmem:[%s12075_s5 + $0x7b0] sm:$0xff] }
 0x25c   :  { %6289 = vmatpush.lsf.msrb.mxu3 %v337_v62  ;;  %v3453_v62 = vmul.f32 %v3449_v17, %v7450_v45  ;;  %6191 = vmatmul.lmr.bf16.gmra.7.mxu2  ;;  %v5595_v17 = vld [vmem:[%s12075_s5 + $0xaf8] sm:$0xff]  ;;  %12123 = vst [vmem:[#allocation50_spill] sm:$0xff] %v9777_v54  ;;  %v5592_v54 = vld [vmem:[%s12075_s5 + $0xae0] sm:$0xff] }
 0x25d   :  { %v9737_v2 = vpop.f32.mrf.mxu0  ;;  %3328 = vmatpush.msra.mxu0 %v9729_v7  ;;  %6072 = vmatpush.lsf.msrb.mxu1 %v5595_v17 }
 0x25e   :  { %6290 = vmatpush.lsf.msrb.mxu3 %v336_v8  ;;  %12122 = vst [vmem:[#allocation49_spill] sm:$0xff] %v9737_v2  ;;  %v9750_v8 = vld [vmem:[%s12076_s28 + $0x7c0] sm:$0xff]  ;;  %v9761_v2 = vld [vmem:[%s12076_s28 + $0x7b8] sm:$0xff]  ;;  %v9770_v48 = vadd.f32 1e-12, %v3453_v62  ;;  %v5593_v62 = vld [vmem:[%s12075_s5 + $0xae8] sm:$0xff] }
 0x25f   :  { %3329 = vmatpush.msra.mxu0 %v9750_v8 }
 0x260   :  { %6291 = vmatpush.lsf.msrb.mxu3 %v335_v43  ;;  %5995 = vmatmul.lmr.bf16.gmra.7.mxu0  ;;  %v5594_v43 = vld [vmem:[%s12075_s5 + $0xaf0] sm:$0xff]  ;;  %6912 = vrsqrt.f32 %v9770_v48  ;;  %vm3463_vm6 = vweird.f32 %v9770_v48 }
 0x261   :  { %6073 = vmatpush.lsf.msrb.mxu1 %v5594_v43  ;;  %6284 = vmatmul.lmr.bf16.gmra.7.mxu3  ;;  %v331_v43 = vld [vmem:[%s12075_s5 + $0x7a8] sm:$0xff] }
 0x262   :  { %6292 = vmatpush.lsf.msrb.mxu3 %v334_v50  ;;  %3330 = vmatpush.msra.mxu0 %v9761_v2  ;;  %v9789_v50 = vld [vmem:[%s12076_s28 + $0x7a8] sm:$0xff] }
 0x263   :  { %6074 = vmatpush.lsf.msrb.mxu1 %v5593_v62  ;;  %6824 = vxpose.xlu2.b32.cont [3/16] (narrow) %v6823_v47, 56  ;;  %v5663_v47 = vld [vmem:[%s12075_s5 + $0xd18] sm:$0xff]  ;;  %v9810_v62 = vld [vmem:[%s12076_s28 + $0x7a0] sm:$0xff]  ;;  %v9852_v26 = vpop.f32.mrf.mxu1 }
 0x264   :  { %6293 = vmatpush.lsf.msrb.mxu3 %v333_v12  ;;  %3331 = vmatpush.msra.mxu0 %v9775_v46  ;;  %v5551_v12 = vld [vmem:[%s12075_s5 + $0x998] sm:$0xff] }
 0x265   :  { %v9791_v17 = vpop.f32.mrf.mxu0  ;;  %6075 = vmatpush.lsf.msrb.mxu1 %v5592_v54  ;;  %v6825_v54 = vpack.i.bf16 %v5663_v47, %v5551_v12  ;;  %v328_v12 = vld [vmem:[%s12075_s5 + $0x790] sm:$0xff] }
 0x266   :  { %12124 = vst [vmem:[#allocation51_spill] sm:$0xff] %v9791_v17  ;;  %6294 = vmatpush.lsf.msrb.mxu3 %v332_v42  ;;  %v9812_v17 = vpop.f32.mrf.mxu2  ;;  %3332 = vmatpush.msra.mxu0 %v9789_v50  ;;  %v9824_v42 = vld [vmem:[%s12076_s28 + $0x798] sm:$0xff]  ;;  %v9845_v47 = vpop.eup %6912 }
 0x267   :  { %12125 = vst [vmem:[#allocation52_spill] sm:$0xff] %v9812_v17  ;;  %v329_v17 = vld [vmem:[%s12075_s5 + $0x798] sm:$0xff]  ;;  %6076 = vmatpush.lsf.msrb.mxu1 %v5591_v25  ;;  %v5589_v25 = vld [vmem:[%s12075_s5 + $0xac8] sm:$0xff]  ;;  %vm3464_vm5 = vweird.f32 %v9845_v47 }
 0x268   :  { %5996 = vmatmul.lmr.bf16.gmra.7.mxu0  ;;  %6295 = vmatpush.lsf.msrb.mxu3 %v331_v43  ;;  %v9836_v43 = vld [vmem:[%s12076_s28 + $0x790] sm:$0xff]  ;;  %vm9944_vm7 = vmor %vm3463_vm6, %vm3464_vm5 }
 0x269   :  { %3333 = vmatpush.msra.mxu0 %v9810_v62  ;;  %6077 = vmatpush.lsf.msrb.mxu1 %v5590_v11  ;;  %v327_v11 = vld [vmem:[%s12075_s5 + $0x788] sm:$0xff] }
 0x26a   :  { %6296 = vmatpush.lsf.msrb.mxu3 %v330_v23  ;;  %v9850_v23 = vld [vmem:[%s12076_s28 + $0x788] sm:$0xff] }
 0x26b   :  { %3334 = vmatpush.msra.mxu0 %v9824_v42  ;;  %6826 = vxpose.xlu2.b32.cont [4/16] (narrow) %v6825_v54, 56  ;;  %v9869_v54 = vld [vmem:[%s12076_s28 + $0x780] sm:$0xff] }
 0x26c   :  { %6297 = vmatpush.lsf.msrb.mxu3 %v329_v17  ;;  %v6784_v5 = vpop.trf.xlu2  ;;  %v5552_v17 = vld [vmem:[%s12075_s5 + $0x9a0] sm:$0xff]  ;;  %6078 = vmatpush.lsf.msrb.mxu1 %v5589_v25 }
 0x26d   :  { %v9854_v22 = vpop.f32.mrf.mxu0  ;;  %3335 = vmatpush.msra.mxu0 %v9836_v43  ;;  %v6788_v39 = vunpack.i.h.bf16 %v6784_v5  ;;  %v6785_v41 = vunpack.i.l.bf16 %v6784_v5  ;;  %v6827_v25 = vpack.i.bf16 %v5664_v10, %v5552_v17  ;;  %v5585_v10 = vld [vmem:[%s12075_s5 + $0xaa8] sm:$0xff] }
 0x26e   :  { %12126 = vst [vmem:[#allocation53_spill] sm:$0xff] %v9854_v22  ;;  %6298 = vmatpush.lsf.msrb.mxu3 %v328_v12  ;;  %v3458_v22 = vmul.f32 %v9845_v47, %v9770_v48  ;;  %v326_v12 = vld [vmem:[%s12075_s5 + $0x780] sm:$0xff]  ;;  %v9880_v61 = vpop.f32.mrf.mxu2  ;;  %6079 = vmatpush.lsf.msrb.mxu1 %v5588_v35  ;;  %v5665_v35 = vld [vmem:[%s12075_s5 + $0xd28] sm:$0xff] }
 0x26f   :  { %3336 = vmatpush.msra.mxu0 %v9850_v23  ;;  %12127 = vst [vmem:[#allocation54_spill] sm:$0xff] %v9880_v61  ;;  %2844 = vmatmul.f32.vlgmr.msra.gmra.mxu2 %v6788_v39 }
 0x270   :  { %5997 = vmatmul.lmr.bf16.gmra.7.mxu0  ;;  %6299 = vmatpush.lsf.msrb.mxu3 %v327_v11  ;;  %v3459_v5 = vmul.f32 %v9845_v47, %v3458_v22  ;;  %v5586_v11 = vld [vmem:[%s12075_s5 + $0xab0] sm:$0xff]  ;;  %v5553_v22 = vld [vmem:[%s12075_s5 + $0x9a8] sm:$0xff] }
 0x271   :  { %3337 = vmatpush.msra.mxu0 %v9869_v54  ;;  %1544 = vmatmul.f32.vlgmr.msra.gmra.mxu3 %v6785_v41 }
 0x272   :  { %6300 = vmatpush.lsf.msrb.mxu3 %v326_v12  ;;  %6080 = vmatpush.lsf.msrb.mxu1 %v5587_v34  ;;  %v9902_v34 = vpop.f32.mrf.mxu1  ;;  %v3460_v41 = vmul.f32 0.5, %v3459_v5  ;;  %v5584_v12 = vld [vmem:[%s12075_s5 + $0xaa0] sm:$0xff] }
 0x273   :  { %6828 = vxpose.xlu2.b32.cont [5/16] (narrow) %v6827_v25, 56  ;;  %v6829_v25 = vpack.i.bf16 %v5665_v35, %v5553_v22 }
 0x274   :  { %1680 = vmatpush.msra.mxu3 %v9647_v37  ;;  %v6789_v39 = vpop.trf.xlu2  ;;  %6081 = vmatpush.lsf.msrb.mxu1 %v5586_v11 }
 0x275   :  { %v9890_v61 = vpop.f32.mrf.mxu0  ;;  %v6790_v17 = vunpack.i.l.bf16 %v6789_v39  ;;  %v6793_v37 = vunpack.i.h.bf16 %v6789_v39  ;;  %v5666_v39 = vld [vmem:[%s12075_s5 + $0xd30] sm:$0xff] }
 0x276   :  { %12128 = vst [vmem:[#allocation55_spill] sm:$0xff] %v9890_v61  ;;  %1681 = vmatpush.msra.mxu3 %v9660_v18  ;;  %6082 = vmatpush.lsf.msrb.mxu1 %v5585_v10  ;;  %v3461_v61 = vsub.f32 1.5, %v3460_v41  ;;  %v9909_v11 = vpop.f32.mrf.mxu2  ;;  %v5583_v18 = vld [vmem:[%s12075_s5 + $0xa98] sm:$0xff] }
 0x277   :  { %2847 = vmatmul.f32.gmra.mxu2 %v6793_v37  ;;  %12129 = vst [vmem:[#allocation56_spill] sm:$0xff] %v9909_v11  ;;  %v2079_v37 = vld [vmem:[%s12076_s28 + $0x2f8] sm:$0xff]  ;;  %v5613_v11 = vld [vmem:[%s12075_s5 + $0xb88] sm:$0xff] }
 0x278   :  { %6301 = vllmr.7.mxu3  ;;  %5998 = vmatmul.lmr.bf16.gmra.7.mxu0  ;;  %v3462_v22 = vmul.f32 %v9845_v47, %v3461_v61 }
 0x279   :  { %1682 = vmatpush.msra.mxu3 %v9672_v13  ;;  %6083 = vmatpush.lsf.msrb.mxu1 %v5584_v12  ;;  %v5582_v13 = vld [vmem:[%s12075_s5 + $0xa90] sm:$0xff] }
 0x27a   :  { %1547 = vmatmul.f32.gmra.mxu3 %v6790_v17  ;;  %v9929_v35 = vpop.f32.mrf.mxu3  ;;  %v5581_v17 = vld [vmem:[%s12075_s5 + $0xa88] sm:$0xff]  ;;  %v9938_v12 = vpop.f32.mrf.mxu1  ;;  %v3466_v48 = vsel %vm9944_vm7, %v9845_v47, %v3462_v22  ;;  %v6654_v47 = vunpack.i.h.bf16 %v9186_v15  ;;  %v3492_v22 = vld [vmem:[%s12136_s11 + $0x18] sm:$0xff] }
 0x27b   :  { %1683 = vmatpush.msra.mxu3 %v9686_v31  ;;  %6830 = vxpose.xlu2.b32.cont [6/16] (narrow) %v6829_v25, 56  ;;  %v5554_v31 = vld [vmem:[%s12075_s5 + $0x9b0] sm:$0xff] }
 0x27c   :  { %v6794_v10 = vpop.trf.xlu2  ;;  %6084 = vmatpush.lsf.msrb.mxu1 %v5583_v18  ;;  %v6831_v61 = vpack.i.bf16 %v5666_v39, %v5554_v31  ;;  %v2078_v25 = vld [vmem:[%s12076_s28 + $0x2f0] sm:$0xff]  ;;  %v6888_v18 = vld [vmem:[%s12133_s9] ss:$0 sm:$0xff]  ;;  %v3477_v31 = vmul.f32 %v3466_v48, %v8727_v1 }
 0x27d   :  { %v9915_v5 = vpop.f32.mrf.mxu0  ;;  %1684 = vmatpush.msra.mxu3 %v9710_v19  ;;  %v6795_v19 = vunpack.i.l.bf16 %v6794_v10  ;;  %v6798_v41 = vunpack.i.h.bf16 %v6794_v10  ;;  %v3491_v1 = vld [vmem:[%s12136_s11 + $0x10] sm:$0xff] }
 0x27e   :  { %12130 = vst [vmem:[#allocation57_spill] sm:$0xff] %v9915_v5  ;;  %6085 = vmatpush.lsf.msrb.mxu1 %v5582_v13  ;;  %v9961_v13 = vpop.f32.mrf.mxu2  ;;  %v5562_v5 = vld [vmem:[%s12075_s5 + $0x9f0] sm:$0xff] }
 0x27f   :  { %1685 = vmatpush.msra.mxu3 %v9720_v57  ;;  %2850 = vmatmul.f32.gmra.mxu2 %v6798_v41  ;;  %12134 = vst [vmem:[#allocation58_spill] sm:$0xff] %v9961_v13  ;;  %v3482_v57 = vmul.f32 %v6888_v18, %v3477_v31  ;;  %v5556_v31 = vld [vmem:[%s12075_s5 + $0x9c0] sm:$0xff]  ;;  %v2034_v13 = vld [vmem:[%s12076_s28 + $0x190] sm:$0xff] }
 0x280   :  { %5999 = vmatmul.lmr.bf16.gmra.7.mxu0  ;;  %2942 = vmatpush.msra.mxu1 %v2079_v37 }
 0x281   :  { %1686 = vmatpush.msra.mxu3 %v9729_v7  ;;  %v5580_v7 = vld [vmem:[%s12075_s5 + $0xa80] sm:$0xff] }
 0x282   :  { %1550 = vmatmul.f32.gmra.mxu3 %v6795_v19  ;;  %6086 = vmatpush.lsf.msrb.mxu1 %v5581_v17  ;;  %v5555_v19 = vld [vmem:[%s12075_s5 + $0x9b8] sm:$0xff]  ;;  %v9980_v41 = vpop.f32.mrf.mxu3  ;;  %v9996_v48 = vpop.f32.mrf.mxu1 }
 0x283   :  { %1687 = vmatpush.msra.mxu3 %v9750_v8  ;;  %6832 = vxpose.xlu2.b32.cont [7/16] (narrow) %v6831_v61, 56  ;;  %v2077_v8 = vld [vmem:[%s12076_s28 + $0x2e8] sm:$0xff]  ;;  %v2076_v61 = vld [vmem:[%s12076_s28 + $0x2e0] sm:$0xff] }
 0x284   :  { %2943 = vmatpush.msra.mxu1 %v2078_v25  ;;  %v6799_v39 = vpop.trf.xlu2  ;;  %v6889_v25 = vld [vmem:[%s12137_s8] ss:$0 sm:$0xff] }
 0x285   :  { %v9963_v10 = vpop.f32.mrf.mxu0  ;;  %1688 = vmatpush.msra.mxu3 %v9761_v2  ;;  %v5667_v2 = vld [vmem:[%s12075_s5 + $0xd38] sm:$0xff]  ;;  %v6800_v17 = vunpack.i.l.bf16 %v6799_v39  ;;  %v6803_v15 = vunpack.i.h.bf16 %v6799_v39  ;;  %v2074_v39 = vld [vmem:[%s12076_s28 + $0x2d0] sm:$0xff] }
 0x286   :  { %12135 = vst [vmem:[#allocation59_spill] sm:$0xff] %v9963_v10  ;;  %6087 = vmatpush.lsf.msrb.mxu1 %v5580_v7  ;;  %v6833_v37 = vpack.i.bf16 %v5667_v2, %v5555_v19  ;;  %v3489_v7 = vld [vmem:[%s12136_s11] sm:$0xff] }
 0x287   :  { %1689 = vmatpush.msra.mxu3 %v9775_v46  ;;  %6088 = vllmr.7.mxu1  ;;  %v3490_v46 = vld [vmem:[%s12136_s11 + $0x8] sm:$0xff] }
 0x288   :  { %3338 = vmatmul.f32.vlgmr.msra.gmra.mxu0 %v6654_v47  ;;  %2944 = vmatpush.msra.mxu1 %v2077_v8  ;;  %v3487_v47 = vadd.f32 %v6889_v25, %v3482_v57 }
 0x289   :  { %3515 = vmatpush.msra.mxu0 %v3492_v22  ;;  %1690 = vmatpush.msra.mxu3 %v9789_v50  ;;  %v2075_v50 = vld [vmem:[%s12076_s28 + $0x2d8] sm:$0xff]  ;;  %v10017_v22 = vpop.f32.mrf.mxu2 }
 0x28a   :  { %1553 = vmatmul.f32.gmra.mxu3 %v6800_v17  ;;  %2853 = vmatmul.f32.gmra.mxu2 %v6803_v15  ;;  %v10019_v19 = vpop.f32.mrf.mxu3 }
 0x28b   :  { %3516 = vmatpush.msra.mxu0 %v3491_v1  ;;  %1691 = vmatpush.msra.mxu3 %v9810_v62  ;;  %v5668_v62 = vld [vmem:[%s12075_s5 + $0xd40] sm:$0xff] }
 0x28c   :  { %2945 = vmatpush.msra.mxu1 %v2076_v61  ;;  %6834 = vxpose.xlu2.b32.cont [8/16] (narrow) %v6833_v37, 56  ;;  %v6804_v8 = vpop.trf.xlu2  ;;  %v6835_v15 = vpack.i.bf16 %v5668_v62, %v5556_v31  ;;  %v2072_v1 = vld [vmem:[%s12076_s28 + $0x2c0] sm:$0xff]  ;;  %v10030_v37 = vpop.f32.mrf.mxu1  ;;  %v5610_v62 = vld [vmem:[%s12075_s5 + $0xb70] sm:$0xff] }
 0x28d   :  { %v10005_v18 = vpop.f32.mrf.mxu0  ;;  %3517 = vmatpush.msra.mxu0 %v3490_v46  ;;  %1692 = vmatpush.msra.mxu3 %v9824_v42  ;;  %v6805_v2 = vunpack.i.l.bf16 %v6804_v8  ;;  %v6808_v17 = vunpack.i.h.bf16 %v6804_v8  ;;  %v2073_v42 = vld [vmem:[%s12076_s28 + $0x2c8] sm:$0xff]  ;;  %12139 = vst [vmem:[#allocation61_spill] sm:$0xff] %v10030_v37  ;;  %v2070_v8 = vld [vmem:[%s12076_s28 + $0x2b0] sm:$0xff] }
 0x28e   :  { %12138 = vst [vmem:[#allocation60_spill] sm:$0xff] %v10005_v18  ;;  %2946 = vmatpush.msra.mxu1 %v2075_v50  ;;  %v5669_v46 = vld [vmem:[%s12075_s5 + $0xd48] sm:$0xff] }
 0x28f   :  { %3518 = vmatpush.msra.mxu0 %v3489_v7  ;;  %1693 = vmatpush.msra.mxu3 %v9836_v43  ;;  %v2071_v43 = vld [vmem:[%s12076_s28 + $0x2b8] sm:$0xff]  ;;  %v5617_v37 = vld [vmem:[%s12075_s5 + $0xba8] sm:$0xff] }
 0x290   :  { %5763 = vmatmul.msk.f32.vlgmr.msra.gmra.mxu0 %vm1718_vm0, %v3487_v47  ;;  %2947 = vmatpush.msra.mxu1 %v2074_v39  ;;  %v5609_v39 = vld [vmem:[%s12075_s5 + $0xb68] sm:$0xff] }
 0x291   :  { %1694 = vmatpush.msra.mxu3 %v9850_v23  ;;  %v5557_v23 = vld [vmem:[%s12075_s5 + $0x9c8] sm:$0xff]  ;;  %v10052_v47 = vpop.f32.mrf.mxu2 }
 0x292   :  { %1556 = vmatmul.f32.gmra.mxu3 %v6805_v2  ;;  %2856 = vmatmul.f32.gmra.mxu2 %v6808_v17  ;;  %v10044_v25 = vpop.f32.mrf.mxu3  ;;  %v6837_v31 = vpack.i.bf16 %v5669_v46, %v5557_v23  ;;  %v2069_v2 = vld [vmem:[%s12076_s28 + $0x2a8] sm:$0xff] }
 0x293   :  { %2948 = vmatpush.msra.mxu1 %v2073_v42  ;;  %1695 = vmatpush.msra.mxu3 %v9869_v54  ;;  %v5611_v54 = vld [vmem:[%s12075_s5 + $0xb78] sm:$0xff]  ;;  %v5608_v42 = vld [vmem:[%s12075_s5 + $0xb60] sm:$0xff] }
 0x294   :  { %6836 = vxpose.xlu2.b32.cont [9/16] (narrow) %v6835_v15, 56  ;;  %v6809_v57 = vpop.trf.xlu2  ;;  %6192 = vmatpush.lsf.msrb.mxu2 %v5611_v54  ;;  %v2068_v15 = vld [vmem:[%s12076_s28 + $0x2a0] sm:$0xff]  ;;  %v10077_v23 = vpop.f32.mrf.mxu1  ;;  %v5607_v54 = vld [vmem:[%s12075_s5 + $0xb58] sm:$0xff] }
 0x295   :  { %v10032_v61 = vpop.f32.mrf.mxu0  ;;  %2949 = vmatpush.msra.mxu1 %v2072_v1  ;;  %v6810_v50 = vunpack.i.l.bf16 %v6809_v57  ;;  %v6813_v7 = vunpack.i.h.bf16 %v6809_v57  ;;  %v5670_v57 = vld [vmem:[%s12075_s5 + $0xd50] sm:$0xff]  ;;  %12142 = vst [vmem:[#allocation64_spill] sm:$0xff] %v10077_v23 }
 0x296   :  { %12140 = vst [vmem:[#allocation62_spill] sm:$0xff] %v10032_v61  ;;  %6193 = vmatpush.lsf.msrb.mxu2 %v5610_v62  ;;  %v5606_v62 = vld [vmem:[%s12075_s5 + $0xb50] sm:$0xff] }
 0x297   :  { %2950 = vmatpush.msra.mxu1 %v2071_v43  ;;  %v5558_v43 = vld [vmem:[%s12075_s5 + $0x9d0] sm:$0xff] }
 0x298   :  { %6194 = vmatpush.lsf.msrb.mxu2 %v5609_v39  ;;  %v5605_v39 = vld [vmem:[%s12075_s5 + $0xb48] sm:$0xff] }
 0x299   :  { %2951 = vmatpush.msra.mxu1 %v2070_v8  ;;  %v2067_v8 = vld [vmem:[%s12076_s28 + $0x298] sm:$0xff] }
 0x29a   :  { %1559 = vmatmul.f32.gmra.mxu3 %v6810_v50  ;;  %2859 = vmatmul.f32.gmra.mxu2 %v6813_v7  ;;  %v10079_v46 = vpop.f32.mrf.mxu3 }
 0x29b   :  { %2952 = vmatpush.msra.mxu1 %v2069_v2  ;;  %6195 = vmatpush.lsf.msrb.mxu2 %v5608_v42  ;;  %v10093_v2 = vpop.f32.mrf.mxu2  ;;  %v2066_v42 = vld [vmem:[%s12076_s28 + $0x290] sm:$0xff] }
 0x29c   :  { %6838 = vxpose.xlu2.b32.cont [10/16] (narrow) %v6837_v31, 56  ;;  %v6814_v1 = vpop.trf.xlu2  ;;  %v6839_v31 = vpack.i.bf16 %v5670_v57, %v5558_v43  ;;  %v2065_v43 = vld [vmem:[%s12076_s28 + $0x288] sm:$0xff]  ;;  %v5559_v57 = vld [vmem:[%s12075_s5 + $0x9d8] sm:$0xff] }
 0x29d   :  { %v10063_v17 = vpop.f32.mrf.mxu0  ;;  %v6815_v50 = vunpack.i.l.bf16 %v6814_v1  ;;  %v6818_v7 = vunpack.i.h.bf16 %v6814_v1  ;;  %2953 = vmatpush.msra.mxu1 %v2068_v15  ;;  %6196 = vmatpush.lsf.msrb.mxu2 %v5607_v54  ;;  %v5604_v1 = vld [vmem:[%s12075_s5 + $0xb40] sm:$0xff] }
 0x29e   :  { %12141 = vst [vmem:[#allocation63_spill] sm:$0xff] %v10063_v17  ;;  %v2064_v54 = vld [vmem:[%s12076_s28 + $0x280] sm:$0xff] }
 0x29f   :  { %6197 = vmatpush.lsf.msrb.mxu2 %v5606_v62  ;;  %2954 = vmatpush.msra.mxu1 %v2067_v8  ;;  %v5603_v8 = vld [vmem:[%s12075_s5 + $0xb38] sm:$0xff] }
 0x2a1   :  { %6198 = vmatpush.lsf.msrb.mxu2 %v5605_v39  ;;  %2955 = vmatpush.msra.mxu1 %v2066_v42  ;;  %v5602_v39 = vld [vmem:[%s12075_s5 + $0xb30] sm:$0xff]  ;;  %v5601_v42 = vld [vmem:[%s12075_s5 + $0xb28] sm:$0xff] }
 0x2a2   :  { %1562 = vmatmul.f32.gmra.mxu3 %v6815_v50  ;;  %2862 = vmatmul.f32.gmra.mxu2 %v6818_v7  ;;  %v5671_v50 = vld [vmem:[%s12075_s5 + $0xd58] sm:$0xff]  ;;  %v10112_v7 = vpop.f32.mrf.mxu3 }
 0x2a3   :  { %6199 = vmatpush.lsf.msrb.mxu2 %v5604_v1  ;;  %2956 = vmatpush.msra.mxu1 %v2065_v43  ;;  %v6841_v62 = vpack.i.bf16 %v5671_v50, %v5559_v57  ;;  %v10128_v1 = vpop.f32.mrf.mxu2  ;;  %v5600_v43 = vld [vmem:[%s12075_s5 + $0xb20] sm:$0xff] }
 0x2a4   :  { %6840 = vxpose.xlu2.b32.cont [11/16] (narrow) %v6839_v31, 56  ;;  %v10120_v31 = vpop.f32.mrf.mxu1  ;;  %12145 = vst [vmem:[#allocation67_spill] sm:$0xff] %v10128_v1  ;;  %v5560_v57 = vld [vmem:[%s12075_s5 + $0x9e0] sm:$0xff] }
 0x2a5   :  { %v10098_v15 = vpop.f32.mrf.mxu0  ;;  %12144 = vst [vmem:[#allocation66_spill] sm:$0xff] %v10120_v31  ;;  %6200 = vmatpush.lsf.msrb.mxu2 %v5603_v8  ;;  %2957 = vmatpush.msra.mxu1 %v2064_v54  ;;  %v5672_v50 = vld [vmem:[%s12075_s5 + $0xd60] sm:$0xff] }
 0x2a6   :  { %12143 = vst [vmem:[#allocation65_spill] sm:$0xff] %v10098_v15  ;;  %v2047_v15 = vld [vmem:[%s12076_s28 + $0x1f8] sm:$0xff] }
 0x2a7   :  { %6201 = vmatpush.lsf.msrb.mxu2 %v5602_v39 }
 0x2a8   :  { %6089 = vmatmul.lmr.bf16.vlgmr.msra.gmra.7.mxu1 }
 0x2a9   :  { %6202 = vmatpush.lsf.msrb.mxu2 %v5601_v42  ;;  %v6843_v42 = vpack.i.bf16 %v5672_v50, %v5560_v57  ;;  %v2046_v57 = vld [vmem:[%s12076_s28 + $0x1f0] sm:$0xff] }
 0x2aa   :  { %6302 = vmatmul.lmr.bf16.vlgmr.msra.gmra.7.mxu3 }
 0x2ab   :  { %v10141_v54 = vpop.f32.mrf.mxu3  ;;  %6203 = vmatpush.lsf.msrb.mxu2 %v5600_v43  ;;  %v5597_v43 = vld [vmem:[%s12075_s5 + $0xb08] sm:$0xff]  ;;  %2866 = vmatpush.msra.mxu3 %v2047_v15  ;;  %v10177_v15 = vpop.f32.mrf.mxu2 }
 0x2ac   :  { %6842 = vxpose.xlu2.b32.cont [12/16] (narrow) %v6841_v62, 56  ;;  %v5599_v62 = vld [vmem:[%s12075_s5 + $0xb18] sm:$0xff]  ;;  %v10156_v17 = vpop.f32.mrf.mxu1  ;;  %12149 = vst [vmem:[#allocation71_spill] sm:$0xff] %v10177_v15 }
 0x2ad   :  { %v10130_v18 = vpop.f32.mrf.mxu0  ;;  %6204 = vmatpush.lsf.msrb.mxu2 %v5599_v62  ;;  %v5596_v62 = vld [vmem:[%s12075_s5 + $0xb00] sm:$0xff]  ;;  %2867 = vmatpush.msra.mxu3 %v2046_v57 }
 0x2ae   :  { %12146 = vst [vmem:[#allocation68_spill] sm:$0xff] %v10130_v18  ;;  %v3377_v8 = vpop.xlane.xlu0 %3376  ;;  %v5598_v18 = vld [vmem:[%s12075_s5 + $0xb10] sm:$0xff]  ;;  %v2044_v57 = vld [vmem:[%s12076_s28 + $0x1e0] sm:$0xff] }
 0x2af   :  { %v3386_v39 = vmul.f32 %v7450_v45, %v3377_v8  ;;  %6205 = vmatpush.lsf.msrb.mxu2 %v5598_v18  ;;  %v5673_v18 = vld [vmem:[%s12075_s5 + $0xd68] sm:$0xff] }
 0x2b0   :  { %6090 = vmatmul.lmr.bf16.gmra.7.mxu1 }
 0x2b1   :  { %v10159_v61 = vsub.f32 %v9526_v0, %v3386_v39  ;;  %6206 = vmatpush.lsf.msrb.mxu2 %v5597_v43  ;;  %v5561_v0 = vld [vmem:[%s12075_s5 + $0x9e8] sm:$0xff] }
 0x2b2   :  { %6303 = vmatmul.lmr.bf16.gmra.7.mxu3  ;;  %v2045_v43 = vld [vmem:[%s12076_s28 + $0x1e8] sm:$0xff]  ;;  %v6845_v10 = vpack.i.bf16 %v5673_v18, %v5561_v0  ;;  %v2094_v0 = vld [vmem:[%s12076_s28 + $0x370] sm:$0xff] }
 0x2b3   :  { %12147 = vst [vmem:[#allocation69_spill] sm:$0xff] %v10159_v61  ;;  %v3390_v8 = vmul.f32 %v10159_v61, %v10159_v61  ;;  %v10179_v39 = vpop.f32.mrf.mxu3  ;;  %6207 = vmatpush.lsf.msrb.mxu2 %v5596_v62  ;;  %2868 = vmatpush.msra.mxu3 %v2045_v43  ;;  %v2043_v62 = vld [vmem:[%s12076_s28 + $0x1d8] sm:$0xff]  ;;  %v2093_v18 = vld [vmem:[%s12076_s28 + $0x368] sm:$0xff]  ;;  %v10233_v61 = vpop.f32.mrf.mxu2 }
 0x2b4   :  { %6844 = vxpose.xlu2.b32.cont [13/16] (narrow) %v6843_v42, 56  ;;  %6208 = vllmr.7.mxu2  ;;  %v10209_v43 = vpop.f32.mrf.mxu1  ;;  %12151 = vst [vmem:[#allocation73_spill] sm:$0xff] %v10233_v61 }
 0x2b5   :  { %v10164_v50 = vpop.f32.mrf.mxu0  ;;  %v3394_v42 = vsel %vm1718_vm0, %v3390_v8, 0.0  ;;  %v2095_v8 = vld [vmem:[%s12076_s28 + $0x378] sm:$0xff]  ;;  %2869 = vmatpush.msra.mxu3 %v2044_v57  ;;  %v2141_v57 = vld [vmem:[%s12076_s28 + $0x4e8] sm:$0xff] }
 0x2b6   :  { %12148 = vst [vmem:[#allocation70_spill] sm:$0xff] %v10164_v50  ;;  %3395 = vadd.xlane.f32.xlu1 %v3394_v42  ;;  %v2143_v50 = vld [vmem:[%s12076_s28 + $0x4f8] sm:$0xff]  ;;  %2980 = vmatpush.msra.mxu2 %v2095_v8  ;;  %v2142_v42 = vld [vmem:[%s12076_s28 + $0x4f0] sm:$0xff] }
 0x2b7   :  { %3094 = vmatpush.msra.mxu1 %v2143_v50  ;;  %v2042_v50 = vld [vmem:[%s12076_s28 + $0x1d0] sm:$0xff]  ;;  %2870 = vmatpush.msra.mxu3 %v2043_v62  ;;  %v2092_v62 = vld [vmem:[%s12076_s28 + $0x360] sm:$0xff] }
 0x2b8   :  { %2981 = vmatpush.msra.mxu2 %v2094_v0  ;;  %6091 = vmatmul.lmr.bf16.gmra.7.mxu1  ;;  %v5674_v0 = vld [vmem:[%s12075_s5 + $0xd70] sm:$0xff] }
 0x2b9   :  { %3095 = vmatpush.msra.mxu1 %v2142_v42  ;;  %2871 = vmatpush.msra.mxu3 %v2042_v50  ;;  %v2040_v42 = vld [vmem:[%s12076_s28 + $0x1c0] sm:$0xff]  ;;  %v2091_v50 = vld [vmem:[%s12076_s28 + $0x358] sm:$0xff] }
 0x2ba   :  { %6304 = vmatmul.lmr.bf16.gmra.7.mxu3  ;;  %2982 = vmatpush.msra.mxu2 %v2093_v18  ;;  %v6847_v18 = vpack.i.bf16 %v5674_v0, %v5562_v5  ;;  %v2089_v5 = vld [vmem:[%s12076_s28 + $0x348] sm:$0xff]  ;;  %v2139_v0 = vld [vmem:[%s12076_s28 + $0x4d8] sm:$0xff] }
 0x2bb   :  { %3096 = vmatpush.msra.mxu1 %v2141_v57  ;;  %v2039_v57 = vld [vmem:[%s12076_s28 + $0x1b8] sm:$0xff] }
 0x2bc   :  { %6846 = vxpose.xlu2.b32.cont [14/16] (narrow) %v6845_v10, 56  ;;  %v10222_v31 = vpop.f32.mrf.mxu3  ;;  %v2041_v10 = vld [vmem:[%s12076_s28 + $0x1c8] sm:$0xff]  ;;  %2983 = vmatpush.msra.mxu2 %v2092_v62  ;;  %v2090_v62 = vld [vmem:[%s12076_s28 + $0x350] sm:$0xff]  ;;  %v10267_v61 = vpop.f32.mrf.mxu1 }
 0x2bd   :  { %v10211_v8 = vpop.f32.mrf.mxu0  ;;  %2872 = vmatpush.msra.mxu3 %v2041_v10  ;;  %v2038_v10 = vld [vmem:[%s12076_s28 + $0x1b0] sm:$0xff]  ;;  %12153 = vst [vmem:[#allocation75_spill] sm:$0xff] %v10267_v61 }
 0x2be   :  { %12150 = vst [vmem:[#allocation72_spill] sm:$0xff] %v10211_v8  ;;  %v2140_v8 = vld [vmem:[%s12076_s28 + $0x4e0] sm:$0xff]  ;;  %2984 = vmatpush.msra.mxu2 %v2091_v50 }
 0x2bf   :  { %2873 = vmatpush.msra.mxu3 %v2040_v42  ;;  %3097 = vmatpush.msra.mxu1 %v2140_v8  ;;  %v2138_v42 = vld [vmem:[%s12076_s28 + $0x4d0] sm:$0xff]  ;;  %v5563_v8 = vld [vmem:[%s12075_s5 + $0x9f8] sm:$0xff] }
 0x2c0   :  { %2985 = vmatpush.msra.mxu2 %v2090_v62  ;;  %6092 = vmatmul.lmr.bf16.gmra.7.mxu1  ;;  %v5675_v62 = vld [vmem:[%s12075_s5 + $0xd78] sm:$0xff] }
 0x2c1   :  { %2874 = vmatpush.msra.mxu3 %v2039_v57  ;;  %3098 = vmatpush.msra.mxu1 %v2139_v0  ;;  %v2088_v57 = vld [vmem:[%s12076_s28 + $0x340] sm:$0xff]  ;;  %v6849_v0 = vpack.i.bf16 %v5675_v62, %v5563_v8  ;;  %v2086_v8 = vld [vmem:[%s12076_s28 + $0x330] sm:$0xff]  ;;  %v10295_v62 = vpop.f32.mrf.mxu2 }
 0x2c2   :  { %6305 = vmatmul.lmr.bf16.gmra.7.mxu3  ;;  %2986 = vmatpush.msra.mxu2 %v2089_v5  ;;  %v2137_v5 = vld [vmem:[%s12076_s28 + $0x4c8] sm:$0xff]  ;;  %12154 = vst [vmem:[#allocation76_spill] sm:$0xff] %v10295_v62  ;;  %v2134_v62 = vld [vmem:[%s12076_s28 + $0x4b0] sm:$0xff] }
 0x2c3   :  { %2875 = vmatpush.msra.mxu3 %v2038_v10  ;;  %3099 = vmatpush.msra.mxu1 %v2138_v42  ;;  %v2036_v10 = vld [vmem:[%s12076_s28 + $0x1a0] sm:$0xff]  ;;  %v5627_v42 = vld [vmem:[%s12075_s5 + $0xbf8] sm:$0xff] }
 0x2c4   :  { %6848 = vxpose.xlu2.b32.cont [15/16] (narrow) %v6847_v18, 56  ;;  %v10269_v23 = vpop.f32.mrf.mxu3  ;;  %v2037_v18 = vld [vmem:[%s12076_s28 + $0x1a8] sm:$0xff]  ;;  %2987 = vmatpush.msra.mxu2 %v2088_v57  ;;  %v2035_v57 = vld [vmem:[%s12076_s28 + $0x198] sm:$0xff] }
 0x2c5   :  { %v10256_v50 = vpop.f32.mrf.mxu0  ;;  %2876 = vmatpush.msra.mxu3 %v2037_v18  ;;  %v5626_v18 = vld [vmem:[%s12075_s5 + $0xbf0] sm:$0xff]  ;;  %3100 = vmatpush.msra.mxu1 %v2137_v5  ;;  %v2136_v5 = vld [vmem:[%s12076_s28 + $0x4c0] sm:$0xff] }
 0x2c6   :  { %12152 = vst [vmem:[#allocation74_spill] sm:$0xff] %v10256_v50  ;;  %v2087_v50 = vld [vmem:[%s12076_s28 + $0x338] sm:$0xff] }
 0x2c7   :  { %2988 = vmatpush.msra.mxu2 %v2087_v50  ;;  %2877 = vmatpush.msra.mxu3 %v2036_v10  ;;  %v2085_v50 = vld [vmem:[%s12076_s28 + $0x328] sm:$0xff] }
 0x2c8   :  { %v5625_v10 = vld [vmem:[%s12075_s5 + $0xbe8] sm:$0xff]  ;;  %6093 = vmatmul.lmr.bf16.gmra.7.mxu1 }
 0x2c9   :  { %6309 = vmatpush.lsf.msrb.mxu3 %v5627_v42  ;;  %2989 = vmatpush.msra.mxu2 %v2086_v8  ;;  %v2033_v8 = vld [vmem:[%s12076_s28 + $0x188] sm:$0xff] }
 0x2ca   :  { %6306 = vmatmul.lmr.bf16.gmra.7.mxu3  ;;  %3101 = vmatpush.msra.mxu1 %v2136_v5 }
 0x2cb   :  { %2878 = vmatpush.msra.mxu3 %v2035_v57  ;;  %2990 = vmatpush.msra.mxu2 %v2085_v50  ;;  %v5624_v57 = vld [vmem:[%s12075_s5 + $0xbe0] sm:$0xff]  ;;  %v10331_v50 = vpop.f32.mrf.mxu1 }
 0x2cc   :  { %6850 = vxpose.xlu2.b32.end [16/16] (narrow) %v6849_v0, 56  ;;  %v10314_v42 = vpop.f32.mrf.mxu3  ;;  %v2084_v0 = vld [vmem:[%s12076_s28 + $0x320] sm:$0xff]  ;;  %12156 = vst [vmem:[#allocation78_spill] sm:$0xff] %v10331_v50  ;;  %v10348_v50 = vpop.f32.mrf.mxu2 }
 0x2cd   :  { %v10306_v15 = vpop.f32.mrf.mxu0  ;;  %6310 = vmatpush.lsf.msrb.mxu3 %v5626_v18  ;;  %2991 = vmatpush.msra.mxu2 %v2084_v0  ;;  %v2083_v18 = vld [vmem:[%s12076_s28 + $0x318] sm:$0xff]  ;;  %v2082_v0 = vld [vmem:[%s12076_s28 + $0x310] sm:$0xff] }
 0x2ce   :  { %12155 = vst [vmem:[#allocation77_spill] sm:$0xff] %v10306_v15  ;;  %v5623_v15 = vld [vmem:[%s12075_s5 + $0xbd8] sm:$0xff] }
 0x2cf   :  { %2879 = vmatpush.msra.mxu3 %v2034_v13  ;;  %v2135_v13 = vld [vmem:[%s12076_s28 + $0x4b8] sm:$0xff]  ;;  %2992 = vmatpush.msra.mxu2 %v2083_v18  ;;  %v2081_v18 = vld [vmem:[%s12076_s28 + $0x308] sm:$0xff] }
 0x2d0   :  { %3102 = vmatpush.msra.mxu1 %v2135_v13  ;;  %v5621_v13 = vld [vmem:[%s12075_s5 + $0xbc8] sm:$0xff] }
 0x2d1   :  { %6311 = vmatpush.lsf.msrb.mxu3 %v5625_v10  ;;  %v2032_v10 = vld [vmem:[%s12076_s28 + $0x180] sm:$0xff]  ;;  %2993 = vmatpush.msra.mxu2 %v2082_v0 }
 0x2d2   :  { %6307 = vmatmul.lmr.bf16.gmra.7.mxu3  ;;  %3103 = vmatpush.msra.mxu1 %v2134_v62  ;;  %v2132_v62 = vld [vmem:[%s12076_s28 + $0x4a0] sm:$0xff] }
 0x2d3   :  { %2880 = vmatpush.msra.mxu3 %v2033_v8  ;;  %v5622_v8 = vld [vmem:[%s12075_s5 + $0xbd0] sm:$0xff]  ;;  %2994 = vmatpush.msra.mxu2 %v2081_v18  ;;  %v2131_v18 = vld [vmem:[%s12076_s28 + $0x498] sm:$0xff] }
 0x2d4   :  { %6094 = vmatmul.lmr.bf16.gmra.7.mxu1  ;;  %v10370_v0 = vpop.f32.mrf.mxu3  ;;  %v10391_v61 = vpop.f32.mrf.mxu2 }
 0x2d5   :  { %6312 = vmatpush.lsf.msrb.mxu3 %v5624_v57  ;;  %v10350_v5 = vpop.f32.mrf.mxu0  ;;  %v2133_v57 = vld [vmem:[%s12076_s28 + $0x4a8] sm:$0xff]  ;;  %12160 = vst [vmem:[#allocation82_spill] sm:$0xff] %v10391_v61  ;;  %v2102_v61 = vld [vmem:[%s12076_s28 + $0x3b0] sm:$0xff] }
 0x2d6   :  { %12157 = vst [vmem:[#allocation79_spill] sm:$0xff] %v10350_v5  ;;  %3104 = vmatpush.msra.mxu1 %v2133_v57  ;;  %v5618_v57 = vld [vmem:[%s12075_s5 + $0xbb0] sm:$0xff] }
 0x2d7   :  { %2881 = vmatpush.msra.mxu3 %v2032_v10  ;;  %v2080_v10 = vld [vmem:[%s12076_s28 + $0x300] sm:$0xff] }
 0x2d8   :  { %2995 = vmatpush.msra.mxu2 %v2080_v10  ;;  %v10378_v10 = vpop.f32.mrf.mxu1  ;;  %3105 = vmatpush.msra.mxu1 %v2132_v62  ;;  %v5616_v62 = vld [vmem:[%s12075_s5 + $0xba0] sm:$0xff] }
 0x2d9   :  { %6313 = vmatpush.lsf.msrb.mxu3 %v5623_v15  ;;  %v5620_v15 = vld [vmem:[%s12075_s5 + $0xbc0] sm:$0xff]  ;;  %6209 = vmatmul.lmr.bf16.vlgmr.msra.gmra.7.mxu2  ;;  %12158 = vst [vmem:[#allocation80_spill] sm:$0xff] %v10378_v10 }
 0x2da   :  { %6308 = vmatmul.lmr.bf16.gmra.7.mxu3  ;;  %3106 = vmatpush.msra.mxu1 %v2131_v18  ;;  %v5615_v18 = vld [vmem:[%s12075_s5 + $0xb98] sm:$0xff] }
 0x2db   :  { %6314 = vmatpush.lsf.msrb.mxu3 %v5622_v8  ;;  %v5619_v8 = vld [vmem:[%s12075_s5 + $0xbb8] sm:$0xff] }
 0x2dc   :  { %6095 = vmatmul.lmr.bf16.gmra.7.mxu1 }
 0x2dd   :  { %6315 = vmatpush.lsf.msrb.mxu3 %v5621_v13  ;;  %v10383_v5 = vpop.f32.mrf.mxu0  ;;  %v2130_v13 = vld [vmem:[%s12076_s28 + $0x490] sm:$0xff] }
 0x2de   :  { %12159 = vst [vmem:[#allocation81_spill] sm:$0xff] %v10383_v5  ;;  %3107 = vmatpush.msra.mxu1 %v2130_v13  ;;  %v10406_v5 = vpop.f32.mrf.mxu3  ;;  %v5614_v13 = vld [vmem:[%s12075_s5 + $0xb90] sm:$0xff] }
 0x2df   :  { %6316 = vmatpush.lsf.msrb.mxu3 %v5620_v15  ;;  %v2129_v15 = vld [vmem:[%s12076_s28 + $0x488] sm:$0xff]  ;;  %12161 = vst [vmem:[#allocation83_spill] sm:$0xff] %v10406_v5  ;;  %v2108_v5 = vld [vmem:[%s12076_s28 + $0x3e0] sm:$0xff] }
 0x2e0   :  { %3108 = vmatpush.msra.mxu1 %v2129_v15  ;;  %v10421_v15 = vpop.f32.mrf.mxu2 }
 0x2e1   :  { %6317 = vmatpush.lsf.msrb.mxu3 %v5619_v8  ;;  %v2128_v8 = vld [vmem:[%s12076_s28 + $0x480] sm:$0xff]  ;;  %6210 = vmatmul.lmr.bf16.gmra.7.mxu2  ;;  %12164 = vst [vmem:[#allocation86_spill] sm:$0xff] %v10421_v15 }
 0x2e2   :  { %3109 = vmatpush.msra.mxu1 %v2128_v8 }
 0x2e3   :  { %6318 = vmatpush.lsf.msrb.mxu3 %v5618_v57  ;;  %v6718_v57 = vunpack.i.l.bf16 %v9087_v32  ;;  %v5612_v32 = vld [vmem:[%s12075_s5 + $0xb80] sm:$0xff] }
 0x2e5   :  { %6319 = vmatpush.lsf.msrb.mxu3 %v5617_v37  ;;  %v10411_v37 = vpop.f32.mrf.mxu1  ;;  %v10413_v10 = vpop.f32.mrf.mxu0  ;;  %3110 = vmatmul.f32.vlgmr.msra.gmra.mxu1 %v6718_v57  ;;  %v5723_v57 = vld [vmem:[%s12075_s5 + $0xef8] sm:$0xff] }
 0x2e6   :  { %12162 = vst [vmem:[#allocation84_spill] sm:$0xff] %v10411_v37  ;;  %v10424_v8 = vpop.f32.mrf.mxu3  ;;  %6096 = vmatpush.lsf.msrb.mxu1 %v5723_v57 }
 0x2e7   :  { %6320 = vmatpush.lsf.msrb.mxu3 %v5616_v62  ;;  %12163 = vst [vmem:[#allocation85_spill] sm:$0xff] %v10413_v10  ;;  %v6723_v62 = vunpack.i.l.bf16 %v9131_v52  ;;  %v5722_v52 = vld [vmem:[%s12075_s5 + $0xef0] sm:$0xff] }
 0x2e8   :  { %12165 = vst [vmem:[#allocation87_spill] sm:$0xff] %v10424_v8  ;;  %6097 = vmatpush.lsf.msrb.mxu1 %v5722_v52  ;;  %v10457_v57 = vpop.f32.mrf.mxu2  ;;  %v2109_v52 = vld [vmem:[%s12076_s28 + $0x3e8] sm:$0xff] }
 0x2e9   :  { %6321 = vmatpush.lsf.msrb.mxu3 %v5615_v18  ;;  %6211 = vmatmul.lmr.bf16.gmra.7.mxu2  ;;  %12168 = vst [vmem:[#allocation90_spill] sm:$0xff] %v10457_v57  ;;  %v2157_v57 = vld [vmem:[%s12076_s28 + $0x568] sm:$0xff] }
 0x2eb   :  { %6322 = vmatpush.lsf.msrb.mxu3 %v5614_v13 }
 0x2ed   :  { %6323 = vmatpush.lsf.msrb.mxu3 %v5613_v11  ;;  %v10426_v18 = vpop.f32.mrf.mxu0  ;;  %v10428_v10 = vpop.trf.xlu2  ;;  %v2111_v11 = vld [vmem:[%s12076_s28 + $0x3f8] sm:$0xff]  ;;  %3113 = vmatmul.f32.gmra.mxu1 %v6723_v62  ;;  %v2158_v62 = vld [vmem:[%s12076_s28 + $0x570] sm:$0xff] }
 0x2ee   :  { %12166 = vst [vmem:[#allocation88_spill] sm:$0xff] %v10426_v18  ;;  %v10433_v13 = vpop.f32.mrf.mxu1  ;;  %v6852_v37 = vunpack.i.l.bf16 %v10428_v10  ;;  %v2159_v18 = vld [vmem:[%s12076_s28 + $0x578] sm:$0xff] }
 0x2ef   :  { %6324 = vmatpush.lsf.msrb.mxu3 %v5612_v32  ;;  %12167 = vst [vmem:[#allocation89_spill] sm:$0xff] %v10433_v13  ;;  %v2110_v32 = vld [vmem:[%s12076_s28 + $0x3f0] sm:$0xff]  ;;  %v5721_v13 = vld [vmem:[%s12075_s5 + $0xee8] sm:$0xff]  ;;  %3132 = vmatpush.msra.mxu2 %v2159_v18 }
 0x2f0   :  { %6325 = vllmr.7.mxu3  ;;  %6098 = vmatpush.lsf.msrb.mxu1 %v5721_v13  ;;  %v2107_v13 = vld [vmem:[%s12076_s28 + $0x3d8] sm:$0xff] }
 0x2f1   :  { %2882 = vmatmul.f32.vlgmr.msra.gmra.mxu3 %v6852_v37  ;;  %6212 = vmatmul.lmr.bf16.gmra.7.mxu2  ;;  %v5720_v37 = vld [vmem:[%s12075_s5 + $0xee0] sm:$0xff] }
 0x2f2   :  { %3018 = vmatpush.msra.mxu3 %v2111_v11  ;;  %v6728_v11 = vunpack.i.l.bf16 %v9178_v6  ;;  %3133 = vmatpush.msra.mxu2 %v2158_v62  ;;  %v5719_v6 = vld [vmem:[%s12075_s5 + $0xed8] sm:$0xff]  ;;  %v5718_v62 = vld [vmem:[%s12075_s5 + $0xed0] sm:$0xff] }
 0x2f3   :  { %6099 = vmatpush.lsf.msrb.mxu1 %v5720_v37  ;;  %v2155_v37 = vld [vmem:[%s12076_s28 + $0x558] sm:$0xff] }
 0x2f4   :  { %3019 = vmatpush.msra.mxu3 %v2110_v32  ;;  %v10463_v8 = vpop.f32.mrf.mxu3  ;;  %3134 = vmatpush.msra.mxu2 %v2157_v57  ;;  %v2156_v32 = vld [vmem:[%s12076_s28 + $0x560] sm:$0xff]  ;;  %v2106_v57 = vld [vmem:[%s12076_s28 + $0x3d0] sm:$0xff] }
 0x2f5   :  { %v10465_v15 = vpop.f32.mrf.mxu0  ;;  %v10473_v1 = vpop.trf.xlu2  ;;  %6100 = vmatpush.lsf.msrb.mxu1 %v5719_v6  ;;  %v2154_v6 = vld [vmem:[%s12076_s28 + $0x550] sm:$0xff] }
 0x2f6   :  { %12169 = vst [vmem:[#allocation91_spill] sm:$0xff] %v10465_v15  ;;  %3020 = vmatpush.msra.mxu3 %v2109_v52  ;;  %v6857_v18 = vunpack.i.l.bf16 %v10473_v1  ;;  %3116 = vmatmul.f32.gmra.mxu1 %v6728_v11  ;;  %v10491_v52 = vpop.f32.mrf.mxu1  ;;  %v2105_v11 = vld [vmem:[%s12076_s28 + $0x3c8] sm:$0xff] }
 0x2f7   :  { %12170 = vst [vmem:[#allocation92_spill] sm:$0xff] %v10491_v52  ;;  %3135 = vmatpush.msra.mxu2 %v2156_v32  ;;  %6101 = vmatpush.lsf.msrb.mxu1 %v5718_v62  ;;  %v10509_v32 = vpop.f32.mrf.mxu2  ;;  %v2104_v52 = vld [vmem:[%s12076_s28 + $0x3c0] sm:$0xff]  ;;  %v2153_v62 = vld [vmem:[%s12076_s28 + $0x548] sm:$0xff] }
 0x2f8   :  { %3021 = vmatpush.msra.mxu3 %v2108_v5  ;;  %v5717_v5 = vld [vmem:[%s12075_s5 + $0xec8] sm:$0xff]  ;;  %12171 = vst [vmem:[#allocation93_spill] sm:$0xff] %v10509_v32 }
 0x2f9   :  { %2885 = vmatmul.f32.gmra.mxu3 %v6857_v18  ;;  %6213 = vmatmul.lmr.bf16.gmra.7.mxu2  ;;  %v5716_v18 = vld [vmem:[%s12075_s5 + $0xec0] sm:$0xff] }
 0x2fa   :  { %3022 = vmatpush.msra.mxu3 %v2107_v13  ;;  %3136 = vmatpush.msra.mxu2 %v2155_v37  ;;  %v6733_v13 = vunpack.i.l.bf16 %v9229_v21  ;;  %v5715_v21 = vld [vmem:[%s12075_s5 + $0xeb8] sm:$0xff] }
 0x2fb   :  { %6102 = vmatpush.lsf.msrb.mxu1 %v5717_v5  ;;  %v2103_v5 = vld [vmem:[%s12076_s28 + $0x3b8] sm:$0xff] }
 0x2fc   :  { %3023 = vmatpush.msra.mxu3 %v2106_v57  ;;  %3137 = vmatpush.msra.mxu2 %v2154_v6  ;;  %v2152_v6 = vld [vmem:[%s12076_s28 + $0x540] sm:$0xff] }
 0x2fd   :  { %v10511_v15 = vpop.f32.mrf.mxu3  ;;  %v10519_v37 = vpop.f32.mrf.mxu0  ;;  %6103 = vmatpush.lsf.msrb.mxu1 %v5716_v18  ;;  %v2151_v18 = vld [vmem:[%s12076_s28 + $0x538] sm:$0xff] }
 0x2fe   :  { %12172 = vst [vmem:[#allocation94_spill] sm:$0xff] %v10519_v37  ;;  %v10521_v57 = vpop.trf.xlu2  ;;  %3024 = vmatpush.msra.mxu3 %v2105_v11  ;;  %3138 = vmatpush.msra.mxu2 %v2153_v62  ;;  %v1166_v37 = vadd.f32 %v8705_v36, %v8225_v38  ;;  %v5714_v11 = vld [vmem:[%s12075_s5 + $0xeb0] sm:$0xff]  ;;  %v5713_v38 = vld [vmem:[%s12075_s5 + $0xea8] sm:$0xff]  ;;  %v10548_v36 = vpop.f32.mrf.mxu1 }
 0x2ff   :  { %v6862_v32 = vunpack.i.l.bf16 %v10521_v57  ;;  %3119 = vmatmul.f32.gmra.mxu1 %v6733_v13  ;;  %12173 = vst [vmem:[#allocation95_spill] sm:$0xff] %v10548_v36  ;;  %v2150_v13 = vld [vmem:[%s12076_s28 + $0x530] sm:$0xff] }
 0x300   :  { %3025 = vmatpush.msra.mxu3 %v2104_v52  ;;  %6104 = vmatpush.lsf.msrb.mxu1 %v5715_v21  ;;  %v1204_v62 = vadd.f32 %v9257_v4, %v1166_v37  ;;  %v2101_v52 = vld [vmem:[%s12076_s28 + $0x3a8] sm:$0xff]  ;;  %v2100_v21 = vld [vmem:[%s12076_s28 + $0x3a0] sm:$0xff]  ;;  %v5710_v36 = vld [vmem:[%s12075_s5 + $0xe90] sm:$0xff] }
 0x301   :  { %2888 = vmatmul.f32.gmra.mxu3 %v6862_v32  ;;  %3139 = vmatpush.msra.mxu2 %v2152_v6  ;;  %v5712_v32 = vld [vmem:[%s12075_s5 + $0xea0] sm:$0xff] }
 0x302   :  { %3026 = vmatpush.msra.mxu3 %v2103_v5  ;;  %6214 = vmatmul.lmr.bf16.gmra.7.mxu2  ;;  %v1242_v4 = vadd.f32 %v9929_v35, %v1204_v62  ;;  %v2149_v5 = vld [vmem:[%s12076_s28 + $0x528] sm:$0xff]  ;;  %v2148_v62 = vld [vmem:[%s12076_s28 + $0x520] sm:$0xff] }
 0x303   :  { %6105 = vmatpush.lsf.msrb.mxu1 %v5714_v11  ;;  %3140 = vmatpush.msra.mxu2 %v2151_v18  ;;  %v2099_v18 = vld [vmem:[%s12076_s28 + $0x398] sm:$0xff] }
 0x304   :  { %3027 = vmatpush.msra.mxu3 %v2102_v61  ;;  %v5711_v61 = vld [vmem:[%s12075_s5 + $0xe98] sm:$0xff] }
 0x305   :  { %v10560_v37 = vpop.f32.mrf.mxu3  ;;  %6106 = vmatpush.lsf.msrb.mxu1 %v5713_v38  ;;  %v10568_v6 = vpop.f32.mrf.mxu0  ;;  %3141 = vmatpush.msra.mxu2 %v2150_v13  ;;  %v1169_v38 = vadd.f32 %v8767_v28, %v8261_v58  ;;  %v2147_v58 = vld [vmem:[%s12076_s28 + $0x518] sm:$0xff]  ;;  %v5709_v28 = vld [vmem:[%s12075_s5 + $0xe88] sm:$0xff] }
 0x306   :  { %v10570_v35 = vpop.trf.xlu2  ;;  %3028 = vmatpush.msra.mxu3 %v2101_v52  ;;  %v1280_v52 = vadd.f32 %v8502_v14, %v1242_v4  ;;  %v10585_v13 = vpop.f32.mrf.mxu2  ;;  %v6890_v4 = vld [vmem:[%s12174_s3] ss:$0 sm:$0xff] }
 0x307   :  { %v6867_v11 = vunpack.i.l.bf16 %v10570_v35  ;;  %6107 = vmatpush.lsf.msrb.mxu1 %v5712_v32  ;;  %3142 = vmatpush.msra.mxu2 %v2149_v5  ;;  %v2098_v32 = vld [vmem:[%s12076_s28 + $0x390] sm:$0xff]  ;;  %v1207_v14 = vadd.f32 %v9321_v30, %v1169_v38 }
 0x308   :  { %3029 = vmatpush.msra.mxu3 %v2100_v21  ;;  %v2097_v21 = vld [vmem:[%s12076_s28 + $0x388] sm:$0xff]  ;;  %v2146_v30 = vld [vmem:[%s12076_s28 + $0x510] sm:$0xff] }
 0x309   :  { %2891 = vmatmul.f32.gmra.mxu3 %v6867_v11  ;;  %6108 = vmatpush.lsf.msrb.mxu1 %v5711_v61  ;;  %v1245_v5 = vadd.f32 %v9980_v41, %v1207_v14  ;;  %v1318_v61 = vadd.f32 %v9061_v55, %v1280_v52  ;;  %v5708_v11 = vld [vmem:[%s12075_s5 + $0xe80] sm:$0xff]  ;;  %v2145_v41 = vld [vmem:[%s12076_s28 + $0x508] sm:$0xff]  ;;  %v6855_v55 = vunpack.i.h.bf16 %v10428_v10 }
 0x30a   :  { %3030 = vmatpush.msra.mxu3 %v2099_v18  ;;  %3143 = vmatpush.msra.mxu2 %v2148_v62  ;;  %v10614_v18 = vpop.f32.mrf.mxu1  ;;  %v2144_v14 = vld [vmem:[%s12076_s28 + $0x500] sm:$0xff] }
 0x30b   :  { %6215 = vmatmul.lmr.bf16.gmra.7.mxu2  ;;  %6109 = vmatpush.lsf.msrb.mxu1 %v5710_v36  ;;  %12175 = vst [vmem:[#allocation96_spill] sm:$0xff] %v10614_v18  ;;  %v2096_v36 = vld [vmem:[%s12076_s28 + $0x380] sm:$0xff]  ;;  %v1283_v18 = vadd.f32 %v8555_v49, %v1245_v5  ;;  %v1356_v10 = vadd.f32 %v9616_v44, %v1318_v61 }
 0x30c   :  { %3031 = vmatpush.msra.mxu3 %v2098_v32  ;;  %3144 = vmatpush.msra.mxu2 %v2147_v58 }
 0x30d   :  { %v10616_v62 = vpop.f32.mrf.mxu3  ;;  %6110 = vmatpush.lsf.msrb.mxu1 %v5709_v28  ;;  %v3520_v38 = vpop.f32.mrf.mxu0  ;;  %v1172_v28 = vadd.f32 %v8821_v20, %v8303_v16  ;;  %v1394_v16 = vadd.f32 %v10179_v39, %v1356_v10  ;;  %v2206_v20 = vld [vmem:[%s12076_s28 + $0x6f0] sm:$0xff]  ;;  %v1321_v44 = vadd.f32 %v9117_v63, %v1283_v18  ;;  %v6860_v63 = vunpack.i.h.bf16 %v10473_v1 }
 0x30e   :  { %v10625_v52 = vpop.trf.xlu2  ;;  %3032 = vmatpush.msra.mxu3 %v2097_v21  ;;  %3145 = vmatpush.msra.mxu2 %v2146_v30  ;;  %v10627_v32 = vadd.f32 %v6890_v4, %v3520_v38  ;;  %v2207_v4 = vld [vmem:[%s12076_s28 + $0x6f8] sm:$0xff]  ;;  %v6738_v21 = vunpack.i.l.bf16 %v9280_v59  ;;  %v10645_v49 = vpop.f32.mrf.mxu2  ;;  %v1175_v18 = vadd.f32 %v8866_v3, %v8335_v33  ;;  %v6743_v38 = vunpack.i.l.bf16 %v9329_v40  ;;  %v2201_v40 = vld [vmem:[%s12076_s28 + $0x6c8] sm:$0xff] }
 0x30f   :  { %v6872_v58 = vunpack.i.l.bf16 %v10625_v52  ;;  %6111 = vmatpush.lsf.msrb.mxu1 %v5708_v11  ;;  %v1210_v30 = vadd.f32 %v9381_v51, %v1172_v28  ;;  %v2205_v51 = vld [vmem:[%s12076_s28 + $0x6e8] sm:$0xff]  ;;  %v1432_v5 = vadd.f32 %v8836_v29, %v1394_v16  ;;  %v2204_v11 = vld [vmem:[%s12076_s28 + $0x6e0] sm:$0xff]  ;;  %v1359_v29 = vadd.f32 %v9674_v56, %v1321_v44 }
 0x310   :  { %3033 = vmatpush.msra.mxu3 %v2096_v36  ;;  %3146 = vmatpush.msra.mxu2 %v2145_v41 }
 0x311   :  { %3528 = vrot.lane.b32.xlu1 %v10627_v32, %s12051_s25  ;;  %2894 = vmatmul.f32.gmra.mxu3 %v6872_v58  ;;  %v1248_v59 = vadd.f32 %v10019_v19, %v1210_v30  ;;  %v1213_v58 = vadd.f32 %v9436_v60, %v1175_v18  ;;  %v1397_v1 = vadd.f32 %v10222_v31, %v1359_v29  ;;  %v12176_v31 = vld [vmem:[#allocation13_spill] sm:$0xff] }
 0x312   :  { %6112 = vllmr.7.mxu1  ;;  %3147 = vmatpush.msra.mxu2 %v2144_v14  ;;  %v10667_v36 = vpop.f32.mrf.mxu1  ;;  %v1470_v33 = vadd.f32 %v9852_v26, %v1432_v5  ;;  %v1178_v26 = vadd.f32 %v8921_v27, %v8365_v53  ;;  %v12177_v30 = vld [vmem:[#allocation9_spill] sm:$0xff]  ;;  %v2199_v27 = vld [vmem:[%s12076_s28 + $0x6b8] sm:$0xff] }
 0x313   :  { %3246 = vmatpush.msra.mxu1 %v2207_v4  ;;  %3148 = vmatmul.f32.vlgmr.msra.gmra.mxu2 %v6855_v55  ;;  %v1286_v41 = vadd.f32 %v8608_v24, %v1248_v59  ;;  %v2203_v55 = vld [vmem:[%s12076_s28 + $0x6d8] sm:$0xff]  ;;  %v2202_v24 = vld [vmem:[%s12076_s28 + $0x6d0] sm:$0xff]  ;;  %v1251_v3 = vadd.f32 %v10044_v25, %v1213_v58  ;;  %v1435_v28 = vadd.f32 %v12176_v31, %v1397_v1 }
 0x314   :  { %3122 = vmatmul.f32.gmra.mxu1 %v6738_v21  ;;  %v1508_v10 = vadd.f32 %v10017_v22, %v1470_v33  ;;  %v6865_v21 = vunpack.i.h.bf16 %v10521_v57  ;;  %v12179_v22 = vld [vmem:[#allocation31_spill] sm:$0xff]  ;;  %v12181_v18 = vld [vmem:[#allocation25_spill] sm:$0xff] }
 0x315   :  { %v10655_v39 = vpop.f32.mrf.mxu3  ;;  %3247 = vmatpush.msra.mxu1 %v2206_v20  ;;  %v1324_v56 = vadd.f32 %v9176_v9, %v1286_v41  ;;  %v2200_v9 = vld [vmem:[%s12076_s28 + $0x6c0] sm:$0xff]  ;;  %v1289_v16 = vadd.f32 %v12177_v30, %v1251_v3  ;;  %v6748_v44 = vunpack.i.l.bf16 %v12179_v22  ;;  %v12182_v29 = vld [vmem:[#allocation21_spill] sm:$0xff]  ;;  %v12190_v22 = vld [vmem:[#allocation22_spill] sm:$0xff] }
 0x316   :  { %v10658_v61 = vpop.trf.xlu2  ;;  %v10683_v14 = vpop.f32.mrf.mxu2  ;;  %v12178_v20 = vld [vmem:[#allocation48_spill] sm:$0xff]  ;;  %v1546_v53 = vadd.f32 %v10463_v8, %v1508_v10  ;;  %v2198_v8 = vld [vmem:[%s12076_s28 + $0x6b0] sm:$0xff] }
 0x317   :  { %v6877_v19 = vunpack.i.l.bf16 %v10658_v61  ;;  %3248 = vmatpush.msra.mxu1 %v2205_v51  ;;  %v1362_v59 = vadd.f32 %v12178_v20, %v1324_v56  ;;  %v12180_v51 = vld [vmem:[#allocation37_spill] sm:$0xff]  ;;  %v1327_v41 = vadd.f32 %v12181_v18, %v1289_v16  ;;  %v6870_v56 = vunpack.i.h.bf16 %v10570_v35 }
 0x318   :  { %v1216_v5 = vadd.f32 %v12180_v51, %v1178_v26  ;;  %v12186_v26 = vld [vmem:[#allocation16_spill] sm:$0xff]  ;;  %v2194_v20 = vld [vmem:[%s12076_s28 + $0x690] sm:$0xff] }
 0x319   :  { %2897 = vmatmul.f32.gmra.mxu3 %v6877_v19  ;;  %3249 = vmatpush.msra.mxu1 %v2204_v11  ;;  %v1400_v57 = vadd.f32 %v10269_v23, %v1362_v59  ;;  %v1473_v19 = vadd.f32 %v9902_v34, %v1435_v28  ;;  %v12183_v34 = vld [vmem:[#allocation14_spill] sm:$0xff]  ;;  %v12187_v28 = vld [vmem:[#allocation52_spill] sm:$0xff]  ;;  %v12189_v59 = vld [vmem:[#allocation45_spill] sm:$0xff] }
 0x31a   :  { %v10709_v11 = vpop.f32.mrf.mxu1  ;;  %v1365_v10 = vadd.f32 %v12187_v28, %v1327_v41  ;;  %v12192_v41 = vld [vmem:[#allocation8_spill] sm:$0xff]  ;;  %v12198_v28 = vld [vmem:[#allocation23_spill] sm:$0xff] }
 0x31b   :  { %3250 = vmatpush.msra.mxu1 %v2203_v55  ;;  %3151 = vmatmul.f32.gmra.mxu2 %v6860_v63  ;;  %v1254_v63 = vadd.f32 %v10079_v46, %v1216_v5  ;;  %v1584_v55 = vadd.f32 %v12182_v29, %v1546_v53  ;;  %v1438_v58 = vadd.f32 %v12183_v34, %v1400_v57  ;;  %v2196_v46 = vld [vmem:[%s12076_s28 + $0x6a0] sm:$0xff]  ;;  %v12193_v29 = vld [vmem:[#allocation18_spill] sm:$0xff]  ;;  %v6875_v34 = vunpack.i.h.bf16 %v10625_v52 }
 0x31c   :  { %3125 = vmatmul.f32.gmra.mxu1 %v6743_v38  ;;  %v2197_v38 = vld [vmem:[%s12076_s28 + $0x6a8] sm:$0xff]  ;;  %v1511_v1 = vadd.f32 %v10052_v47, %v1473_v19  ;;  %v1403_v16 = vadd.f32 %v10314_v42, %v1365_v10  ;;  %v12191_v57 = vld [vmem:[#allocation15_spill] sm:$0xff] }
 0x31d   :  { %v10688_v60 = vpop.f32.mrf.mxu3  ;;  %3251 = vmatpush.msra.mxu1 %v2202_v24  ;;  %v12184_v24 = vld [vmem:[#allocation10_spill] sm:$0xff]  ;;  %v1622_v47 = vadd.f32 %v10156_v17, %v1584_v55  ;;  %v1476_v35 = vadd.f32 %v9938_v12, %v1438_v58  ;;  %v2193_v12 = vld [vmem:[%s12076_s28 + $0x688] sm:$0xff]  ;;  %v1184_v55 = vadd.f32 %v12193_v29, %v12192_v41  ;;  %v12195_v58 = vld [vmem:[#allocation11_spill] sm:$0xff] }
 0x31e   :  { %v10694_v25 = vpop.trf.xlu2  ;;  %v10726_v33 = vpop.f32.mrf.mxu2  ;;  %v1292_v3 = vadd.f32 %v12184_v24, %v1254_v63  ;;  %v1441_v19 = vadd.f32 %v12191_v57, %v1403_v16  ;;  %v12209_v29 = vld [vmem:[#allocation86_spill] sm:$0xff] }
 0x31f   :  { %v6882_v4 = vunpack.i.l.bf16 %v10694_v25  ;;  %3252 = vmatpush.msra.mxu1 %v2201_v40  ;;  %v12185_v40 = vld [vmem:[#allocation7_spill] sm:$0xff]  ;;  %v1660_v42 = vadd.f32 %v10348_v50, %v1622_v47  ;;  %v12194_v50 = vld [vmem:[#allocation54_spill] sm:$0xff] }
 0x320   :  { %v1181_v31 = vadd.f32 %v12186_v26, %v12185_v40  ;;  %v1479_v40 = vadd.f32 %v9996_v48, %v1441_v19  ;;  %v12197_v26 = vld [vmem:[#allocation47_spill] sm:$0xff] }
 0x321   :  { %2900 = vmatmul.f32.gmra.mxu3 %v6882_v4  ;;  %3253 = vmatpush.msra.mxu1 %v2200_v9  ;;  %v1549_v9 = vadd.f32 %v10511_v15, %v1511_v1  ;;  %v2195_v4 = vld [vmem:[%s12076_s28 + $0x698] sm:$0xff]  ;;  %v1330_v15 = vadd.f32 %v12189_v59, %v1292_v3  ;;  %v12202_v59 = vld [vmem:[#allocation12_spill] sm:$0xff] }
 0x322   :  { %v10748_v17 = vpop.f32.mrf.mxu1  ;;  %v12196_v3 = vld [vmem:[#allocation42_spill] sm:$0xff] }
 0x323   :  { %3254 = vmatpush.msra.mxu1 %v2199_v27  ;;  %3154 = vmatmul.f32.gmra.mxu2 %v6865_v21  ;;  %v12188_v21 = vld [vmem:[#allocation40_spill] sm:$0xff] }
 0x324   :  { %3128 = vmatmul.f32.gmra.mxu1 %v6748_v44  ;;  %v1219_v30 = vadd.f32 %v12188_v21, %v1181_v31  ;;  %v1587_v44 = vadd.f32 %v12190_v22, %v1549_v9  ;;  %v12199_v9 = vld [vmem:[#allocation82_spill] sm:$0xff] }
 0x325   :  { %v10722_v23 = vpop.f32.mrf.mxu3  ;;  %3255 = vmatpush.msra.mxu1 %v2198_v8  ;;  %v1514_v8 = vadd.f32 %v10093_v2, %v1476_v35  ;;  %v12201_v35 = vld [vmem:[#allocation67_spill] sm:$0xff] }
 0x326   :  { %v1257_v27 = vadd.f32 %v10112_v7, %v1219_v30  ;;  %v2192_v7 = vld [vmem:[%s12076_s28 + $0x680] sm:$0xff]  ;;  %v10768_v24 = vpop.f32.mrf.mxu2  ;;  %v1625_v2 = vadd.f32 %v10209_v43, %v1587_v44  ;;  %v12200_v30 = vld [vmem:[#allocation17_spill] sm:$0xff] }
 0x327   :  { %3256 = vmatpush.msra.mxu1 %v2197_v38  ;;  %v1368_v38 = vadd.f32 %v12194_v50, %v1330_v15  ;;  %v12204_v44 = vld [vmem:[#allocation75_spill] sm:$0xff] }
 0x328   :  { %v1295_v1 = vadd.f32 %v12195_v58, %v1257_v27  ;;  %v1663_v47 = vadd.f32 %v12199_v9, %v1625_v2  ;;  %v12214_v9 = vld [vmem:[#allocation87_spill] sm:$0xff] }
 0x329   :  { %6326 = vmatmul.lmr.bf16.vlgmr.msra.gmra.7.mxu3  ;;  %3257 = vmatpush.msra.mxu1 %v2196_v46  ;;  %v3396_v53 = vpop.xlane.xlu1 %3395  ;;  %v1552_v46 = vadd.f32 %v10560_v37, %v1514_v8  ;;  %v1406_v52 = vadd.f32 %v10370_v0, %v1368_v38  ;;  %v1517_v0 = vadd.f32 %v12201_v35, %v1479_v40  ;;  %v12212_v40 = vld [vmem:[#allocation58_spill] sm:$0xff] }
 0x32a   :  { %v3398_v51 = vmul.f32 %v3396_v53, %v7450_v45  ;;  %v1333_v31 = vadd.f32 %v12197_v26, %v1295_v1  ;;  %v10782_v21 = vpop.f32.mrf.mxu1  ;;  %v12203_v53 = vld [vmem:[#allocation56_spill] sm:$0xff]  ;;  %v12211_v1 = vld [vmem:[#allocation71_spill] sm:$0xff] }
 0x32b   :  { %3258 = vmatpush.msra.mxu1 %v2195_v4  ;;  %3157 = vmatmul.f32.gmra.mxu2 %v6870_v56  ;;  %v1222_v56 = vadd.f32 %v12196_v3, %v1184_v55  ;;  %v1590_v10 = vadd.f32 %v12198_v28, %v1552_v46  ;;  %v1444_v16 = vadd.f32 %v12200_v30, %v1406_v52  ;;  %v6885_v52 = vunpack.i.h.bf16 %v10694_v25  ;;  %v12216_v30 = vld [vmem:[#allocation69_spill] sm:$0xff] }
 0x32c   :  { %v3400_v63 = vadd.f32 1e-12, %v3398_v51  ;;  %v1371_v27 = vadd.f32 %v12203_v53, %v1333_v31  ;;  %v1555_v22 = vadd.f32 %v10616_v62, %v1517_v0  ;;  %v12213_v31 = vld [vmem:[#allocation78_spill] sm:$0xff] }
 0x32d   :  { %v1697_v5 = vpop.f32.mrf.mxu3  ;;  %3259 = vmatpush.msra.mxu1 %v2194_v20  ;;  %v1260_v37 = vadd.f32 %v10141_v54, %v1222_v56  ;;  %v6880_v54 = vunpack.i.h.bf16 %v10658_v61  ;;  %v1628_v51 = vadd.f32 %v12204_v44, %v1590_v10  ;;  %v12206_v61 = vld [vmem:[#allocation61_spill] sm:$0xff] }
 0x32e   :  { %v1698_v18 = vadd.f32 %v1697_v5, %v1660_v42  ;;  %6914 = vrsqrt.f32 %v3400_v63  ;;  %v10798_v57 = vpop.f32.mrf.mxu2  ;;  %v1482_v19 = vadd.f32 %v12206_v61, %v1444_v16  ;;  %vm3417_vm9 = vweird.f32 %v3400_v63  ;;  %v12217_v16 = vld [vmem:[#allocation28_spill] sm:$0xff] }
 0x32f   :  { %3260 = vmatpush.msra.mxu1 %v2193_v12  ;;  %v1298_v15 = vadd.f32 %v12202_v59, %v1260_v37  ;;  %v12205_v12 = vld [vmem:[#allocation83_spill] sm:$0xff]  ;;  %v1666_v55 = vadd.f32 %v12209_v29, %v1628_v51  ;;  %v12222_v61 = vld [vmem:[#allocation80_spill] sm:$0xff]  ;;  %v12225_v29 = vld [vmem:[#allocation93_spill] sm:$0xff] }
 0x330   :  { %1719 = vst.msk [vmem:[%s12006_s27] sm:$0xff] %vm1718_vm0, %v1698_v18  ;;  %v1409_v5 = vadd.f32 %v12205_v12, %v1371_v27  ;;  %v12207_v18 = vld [vmem:[#allocation50_spill] sm:$0xff]  ;;  %v1520_v46 = vadd.f32 %v12211_v1, %v1482_v19  ;;  %v12220_v27 = vld [vmem:[#allocation73_spill] sm:$0xff]  ;;  %v7013_v51 = vld [vmem:[%s12078_s1] ss:$0 sm:$0xff]  ;;  %s12047_s1 = smov 112  }
 0x331   :  { %6327 = vmatmul.lmr.bf16.gmra.7.mxu3  ;;  %3261 = vmatpush.msra.mxu1 %v2192_v7  ;;  %v1336_v62 = vadd.f32 %v12207_v18, %v1298_v15  ;;  %v12208_v7 = vld [vmem:[#allocation26_spill] sm:$0xff]  ;;  %v12219_v15 = vld [vmem:[#allocation20_spill] sm:$0xff] }
 0x332   :  { %v1593_v41 = vadd.f32 %v12208_v7, %v1555_v22  ;;  %v10806_v3 = vpop.f32.mrf.mxu1  ;;  %v1558_v26 = vadd.f32 %v10655_v39, %v1520_v46  ;;  %v5676_v39 = vld [vmem:[%s12075_s5 + $0xd80] sm:$0xff]  ;;  %v12223_v18 = vld [vmem:[#allocation66_spill] sm:$0xff] }
 0x333   :  { %6113 = vmatmul.lmr.bf16.vlgmr.msra.gmra.7.mxu1  ;;  %3160 = vmatmul.f32.gmra.mxu2 %v6875_v34  ;;  %v12210_v34 = vld [vmem:[#allocation19_spill] sm:$0xff]  ;;  %v1374_v37 = vadd.f32 %v12212_v40, %v1336_v62  ;;  %v12224_v7 = vld [vmem:[#allocation30_spill] sm:$0xff] }
 0x334   :  { %v6915_v43 = vpop.eup %6914  ;;  %v1447_v58 = vadd.f32 %v12210_v34, %v1409_v5  ;;  %v1631_v28 = vadd.f32 %v12213_v31, %v1593_v41  ;;  %v1596_v35 = vadd.f32 %v12217_v16, %v1558_v26  ;;  %v12226_v34 = vld [vmem:[#allocation76_spill] sm:$0xff]  ;;  %v5678_v40 = vld [vmem:[%s12075_s5 + $0xd90] sm:$0xff] }
 0x335   :  { %v1700_v4 = vpop.f32.mrf.mxu3  ;;  %3596 = vrot.lane.b32.xlu2 %v10627_v32, %s12028_s26  ;;  %v3412_v48 = vmul.f32 %v6915_v43, %v3400_v63  ;;  %vm3418_vm8 = vweird.f32 %v6915_v43  ;;  %v5680_v16 = vld [vmem:[%s12075_s5 + $0xda0] sm:$0xff]  ;;  %s12045_s26 = smov 56  }
 0x336   :  { %v1701_v20 = vadd.f32 %v1700_v4, %v1663_v47  ;;  %vm3419_vm10 = vmor %vm3417_vm9, %vm3418_vm8  ;;  %v1412_v47 = vadd.f32 %v12214_v9, %v1374_v37  ;;  %v12215_v4 = vld [vmem:[#allocation64_spill] sm:$0xff]  ;;  %v10823_v0 = vpop.f32.mrf.mxu2  ;;  %v1634_v19 = vadd.f32 %v12222_v61, %v1596_v35  ;;  %v12228_v37 = vld [vmem:[#allocation33_spill] sm:$0xff] }
 0x337   :  { %v3413_v42 = vmul.f32 %v6915_v43, %v3412_v48  ;;  %v1485_v63 = vadd.f32 %v12215_v4, %v1447_v58  ;;  %v12229_v9 = vld [vmem:[#allocation89_spill] sm:$0xff]  ;;  %v5679_v4 = vld [vmem:[%s12075_s5 + $0xd98] sm:$0xff] }
 0x338   :  { %1720 = vst.msk [vmem:[%s12006_s27 + $0x8] sm:$0xff] %vm1718_vm0, %v1701_v20  ;;  %v12218_v20 = vld [vmem:[#allocation90_spill] sm:$0xff]  ;;  %v1450_v53 = vadd.f32 %v12219_v15, %v1412_v47 }
 0x339   :  { %6328 = vmatmul.lmr.bf16.gmra.7.mxu3  ;;  %v3414_v8 = vmul.f32 0.5, %v3413_v42  ;;  %v1669_v48 = vadd.f32 %v12218_v20, %v1631_v28  ;;  %v1523_v22 = vadd.f32 %v12220_v27, %v1485_v63  ;;  %v5681_v20 = vld [vmem:[%s12075_s5 + $0xda8] sm:$0xff] }
 0x33a   :  { %v1488_v62 = vadd.f32 %v12223_v18, %v1450_v53  ;;  %v5683_v53 = vld [vmem:[%s12075_s5 + $0xdb8] sm:$0xff] }
 0x33b   :  { %6114 = vmatmul.lmr.bf16.gmra.7.mxu1  ;;  %3163 = vmatmul.f32.gmra.mxu2 %v6880_v54  ;;  %v3415_v50 = vsub.f32 1.5, %v3414_v8  ;;  %v1561_v12 = vadd.f32 %v10688_v60, %v1523_v22  ;;  %v10844_v8 = vpop.f32.mrf.mxu1  ;;  %v5677_v60 = vld [vmem:[%s12075_s5 + $0xd88] sm:$0xff] }
 0x33c   :  { %v1526_v58 = vadd.f32 %v12226_v34, %v1488_v62  ;;  %v5736_v34 = vld [vmem:[%s12075_s5 + $0xf60] sm:$0xff] }
 0x33d   :  { %v1703_v38 = vpop.f32.mrf.mxu3  ;;  %v3416_v56 = vmul.f32 %v6915_v43, %v3415_v50  ;;  %v1599_v41 = vadd.f32 %v12224_v7, %v1561_v12  ;;  %v5738_v7 = vld [vmem:[%s12075_s5 + $0xf70] sm:$0xff] }
 0x33e   :  { %v1704_v2 = vadd.f32 %v1703_v38, %v1666_v55  ;;  %v1672_v55 = vadd.f32 %v12225_v29, %v1634_v19  ;;  %v10852_v38 = vpop.f32.mrf.mxu2  ;;  %v1564_v46 = vadd.f32 %v10722_v23, %v1526_v58  ;;  %v5685_v19 = vld [vmem:[%s12075_s5 + $0xdc8] sm:$0xff]  ;;  %v5686_v29 = vld [vmem:[%s12075_s5 + $0xdd0] sm:$0xff]  ;;  %v5735_v58 = vld [vmem:[%s12075_s5 + $0xf58] sm:$0xff] }
 0x33f   :  { %v3420_v10 = vsel %vm3419_vm10, %v6915_v43, %v3416_v56  ;;  %v7012_v43 = vld [vmem:[%s12077_s6] ss:$0 sm:$0xff]  ;;  %s12039_s6 = smov 40  }
 0x340   :  { %1721 = vst.msk [vmem:[%s12006_s27 + $0x10] sm:$0xff] %vm1718_vm0, %v1704_v2  ;;  %v3422_v25 = vmul.f32 %v3420_v10, %v12216_v30  ;;  %v12227_v2 = vld [vmem:[#allocation84_spill] sm:$0xff]  ;;  %v1602_v26 = vadd.f32 %v12228_v37, %v1564_v46  ;;  %v5734_v46 = vld [vmem:[%s12075_s5 + $0xf50] sm:$0xff] }
 0x341   :  { %6329 = vmatmul.lmr.bf16.gmra.7.mxu3  ;;  %v1637_v56 = vadd.f32 %v12227_v2, %v1599_v41  ;;  %v5687_v2 = vld [vmem:[%s12075_s5 + $0xdd8] sm:$0xff] }
 0x342   :  { %v3427_v54 = vmul.f32 %v7012_v43, %v3422_v25  ;;  %v1640_v47 = vadd.f32 %v12229_v9, %v1602_v26  ;;  %v5682_v43 = vld [vmem:[%s12075_s5 + $0xdb0] sm:$0xff]  ;;  %v5732_v26 = vld [vmem:[%s12075_s5 + $0xf40] sm:$0xff] }
 0x343   :  { %6115 = vmatmul.lmr.bf16.gmra.7.mxu1  ;;  %3166 = vmatmul.f32.gmra.mxu2 %v6885_v52  ;;  %v10861_v52 = vpop.f32.mrf.mxu1  ;;  %v1675_v31 = vadd.f32 %v10585_v13, %v1637_v56  ;;  %v5733_v56 = vld [vmem:[%s12075_s5 + $0xf48] sm:$0xff]  ;;  %v5688_v9 = vld [vmem:[%s12075_s5 + $0xde0] sm:$0xff] }
 0x344   :  { %v10834_v42 = vadd.f32 %v7013_v51, %v3427_v54  ;;  %v1678_v13 = vadd.f32 %v10645_v49, %v1640_v47  ;;  %v5684_v51 = vld [vmem:[%s12075_s5 + $0xdc0] sm:$0xff]  ;;  %v5729_v47 = vld [vmem:[%s12075_s5 + $0xf28] sm:$0xff] }
 0x345   :  { %v1706_v59 = vpop.f32.mrf.mxu3 }
 0x346   :  { %v1707_v44 = vadd.f32 %v1706_v59, %v1669_v48  ;;  %2592 = vxpose.xlu1.b32.start [1/16] (narrow) %v5676_v39, 56  ;;  %12221 = vst [vmem:[#allocation13_spill] sm:$0xff] %v10834_v42  ;;  %v3438_v5 = vsel %vm1718_vm0, %v10834_v42, 0.0  ;;  %v10868_v10 = vpop.f32.mrf.mxu2 }
 0x347   :  { %3439 = vadd.xlane.f32.xlu0 %v3438_v5 }
 0x348   :  { %1722 = vst.msk [vmem:[%s12006_s27 + $0x18] sm:$0xff] %vm1718_vm0, %v1707_v44 }
 0x349   :  { %6330 = vmatmul.lmr.bf16.gmra.7.mxu3 }
 0x34b   :  { %6116 = vmatmul.lmr.bf16.gmra.7.mxu1  ;;  %v10879_v63 = vpop.f32.mrf.mxu1 }
 0x34d   :  { %v1709_v50 = vpop.f32.mrf.mxu3 }
 0x34e   :  { %v1710_v1 = vadd.f32 %v1709_v50, %v1672_v55  ;;  %2593 = vxpose.xlu1.b32.cont [2/16] (narrow) %v5677_v60, 56  ;;  %v5739_v60 = vld [vmem:[%s12075_s5 + $0xf78] sm:$0xff]  ;;  %v5737_v55 = vld [vmem:[%s12075_s5 + $0xf68] sm:$0xff] }
 0x34f   :  { %6216 = vmatpush.lsf.msrb.mxu2 %v5739_v60  ;;  %v5724_v60 = vld [vmem:[%s12075_s5 + $0xf00] sm:$0xff] }
 0x350   :  { %1723 = vst.msk [vmem:[%s12006_s27 + $0x20] sm:$0xff] %vm1718_vm0, %v1710_v1 }
 0x351   :  { %6331 = vmatmul.lmr.bf16.gmra.7.mxu3  ;;  %6217 = vmatpush.lsf.msrb.mxu2 %v5738_v7  ;;  %v2173_v7 = vld [vmem:[%s12076_s28 + $0x5e8] sm:$0xff] }
 0x353   :  { %6117 = vmatmul.lmr.bf16.gmra.7.mxu1  ;;  %v10890_v49 = vpop.f32.mrf.mxu1  ;;  %6218 = vmatpush.lsf.msrb.mxu2 %v5737_v55  ;;  %v2223_v55 = vld [vmem:[%s12076_s28 + $0x778] sm:$0xff] }
 0x355   :  { %v1712_v23 = vpop.f32.mrf.mxu3  ;;  %6219 = vmatpush.lsf.msrb.mxu2 %v5736_v34 }
 0x356   :  { %v1713_v28 = vadd.f32 %v1712_v23, %v1675_v31  ;;  %2594 = vxpose.xlu1.b32.cont [3/16] (narrow) %v5678_v40, 56  ;;  %v5731_v31 = vld [vmem:[%s12075_s5 + $0xf38] sm:$0xff]  ;;  %v5730_v23 = vld [vmem:[%s12075_s5 + $0xf30] sm:$0xff] }
 0x357   :  { %6220 = vmatpush.lsf.msrb.mxu2 %v5735_v58  ;;  %v5690_v58 = vld [vmem:[%s12075_s5 + $0xdf0] sm:$0xff] }
 0x358   :  { %1724 = vst.msk [vmem:[%s12006_s27 + $0x28] sm:$0xff] %vm1718_vm0, %v1713_v28 }
 0x359   :  { %6332 = vmatmul.lmr.bf16.gmra.7.mxu3  ;;  %6221 = vmatpush.lsf.msrb.mxu2 %v5734_v46  ;;  %v2171_v46 = vld [vmem:[%s12076_s28 + $0x5d8] sm:$0xff] }
 0x35b   :  { %6118 = vmatmul.lmr.bf16.gmra.7.mxu1  ;;  %v10897_v48 = vpop.f32.mrf.mxu1  ;;  %6222 = vmatpush.lsf.msrb.mxu2 %v5733_v56 }
 0x35c   :  { %v10881_v39 = vpop.f32.mrf.mxu2 }
 0x35d   :  { %v1715_v30 = vpop.f32.mrf.mxu3  ;;  %6223 = vmatpush.lsf.msrb.mxu2 %v5732_v26  ;;  %v2170_v26 = vld [vmem:[%s12076_s28 + $0x5d0] sm:$0xff] }
 0x35e   :  { %v1716_v25 = vadd.f32 %v1715_v30, %v1678_v13  ;;  %2595 = vxpose.xlu1.b32.cont [4/16] (narrow) %v5679_v4, 56  ;;  %v5728_v30 = vld [vmem:[%s12075_s5 + $0xf20] sm:$0xff] }
 0x35f   :  { %6224 = vmatpush.lsf.msrb.mxu2 %v5731_v31  ;;  %v2221_v31 = vld [vmem:[%s12076_s28 + $0x768] sm:$0xff] }
 0x360   :  { %1726 = vst.msk [vmem:[%s12006_s27 + $0x30] sm:$0x1] %vm1725_vm11, %v1716_v25  ;;  %v5727_v25 = vld [vmem:[%s12075_s5 + $0xf18] sm:$0xff] }
 0x361   :  { %6225 = vmatpush.lsf.msrb.mxu2 %v5730_v23 }
 0x363   :  { %6119 = vmatmul.lmr.bf16.gmra.7.mxu1  ;;  %v10906_v15 = vpop.f32.mrf.mxu1  ;;  %6226 = vmatpush.lsf.msrb.mxu2 %v5729_v47  ;;  %v2220_v47 = vld [vmem:[%s12076_s28 + $0x760] sm:$0xff] }
 0x364   :  { %v10892_v35 = vpop.f32.mrf.mxu2 }
 0x365   :  { %6227 = vmatpush.lsf.msrb.mxu2 %v5728_v30  ;;  %v2168_v30 = vld [vmem:[%s12076_s28 + $0x5c0] sm:$0xff] }
 0x366   :  { %2596 = vxpose.xlu1.b32.cont [5/16] (narrow) %v5680_v16, 56  ;;  %v5726_v16 = vld [vmem:[%s12075_s5 + $0xf10] sm:$0xff] }
 0x367   :  { %6228 = vmatpush.lsf.msrb.mxu2 %v5727_v25  ;;  %v2219_v25 = vld [vmem:[%s12076_s28 + $0x758] sm:$0xff] }
 0x369   :  { %6229 = vmatpush.lsf.msrb.mxu2 %v5726_v16 }
 0x36b   :  { %v10921_v5 = vpop.f32.mrf.mxu1 }
 0x36c   :  { %v10904_v59 = vpop.f32.mrf.mxu2 }
 0x36e   :  { %2597 = vxpose.xlu1.b32.cont [6/16] (narrow) %v5681_v20, 56  ;;  %v5689_v20 = vld [vmem:[%s12075_s5 + $0xde8] sm:$0xff] }
 0x373   :  { %v10932_v62 = vpop.f32.mrf.mxu1 }
 0x374   :  { %v10902_v54 = vpop.f32.mrf.mxu3  ;;  %v10913_v22 = vpop.f32.mrf.mxu2 }
 0x376   :  { %2598 = vxpose.xlu1.b32.cont [7/16] (narrow) %v5682_v43, 56  ;;  %v2175_v43 = vld [vmem:[%s12076_s28 + $0x5f8] sm:$0xff] }
 0x377   :  { %3170 = vmatpush.msra.mxu3 %v2175_v43 }
 0x37b   :  { %v10956_v1 = vpop.f32.mrf.mxu1 }
 0x37c   :  { %v10911_v27 = vpop.f32.mrf.mxu3  ;;  %v10925_v61 = vpop.f32.mrf.mxu2 }
 0x37e   :  { %2599 = vxpose.xlu1.b32.cont [8/16] (narrow) %v5683_v53, 56  ;;  %v5725_v53 = vld [vmem:[%s12075_s5 + $0xf08] sm:$0xff] }
 0x37f   :  { %6230 = vmatpush.lsf.msrb.mxu2 %v5725_v53  ;;  %v5691_v53 = vld [vmem:[%s12075_s5 + $0xdf8] sm:$0xff]  ;;  %s12030_s5 = smov 64  }
 0x381   :  { %6231 = vmatpush.lsf.msrb.mxu2 %v5724_v60  ;;  %v2218_v60 = vld [vmem:[%s12076_s28 + $0x750] sm:$0xff] }
 0x382   :  { %6232 = vllmr.7.mxu2 }
 0x383   :  { %v3529_v44 = vpop.permute.xlu1 %3528  ;;  %v10980_v28 = vpop.f32.mrf.mxu1  ;;  %3284 = vmatpush.msra.mxu2 %v2223_v55 }
 0x384   :  { %5765 = vmatpush.xpose.msk.msra.mxu1 %vm3530_vm12, %v3529_v44  ;;  %v10919_v12 = vpop.f32.mrf.mxu3 }
 0x385   :  { %v10940_v41 = vpop.f32.mrf.mxu2 }
 0x386   :  { %2600 = vxpose.xlu1.b32.cont [9/16] (narrow) %v5684_v51, 56 }
 0x387   :  { %5766 = vmatmul.msk.f32.vlgmr.msra.gmra.mxu1 %vm3530_vm12, %v10627_v32 }
 0x38c   :  { %v10930_v18 = vpop.f32.mrf.mxu3 }
 0x38e   :  { %2601 = vxpose.xlu1.b32.cont [10/16] (narrow) %v5685_v19, 56  ;;  %v10969_v37 = vpop.f32.mrf.mxu2  ;;  %v2174_v19 = vld [vmem:[%s12076_s28 + $0x5f0] sm:$0xff] }
 0x38f   :  { %3171 = vmatpush.msra.mxu3 %v2174_v19  ;;  %v2167_v19 = vld [vmem:[%s12076_s28 + $0x5b8] sm:$0xff] }
 0x391   :  { %v11012_v51 = vpop.f32.mrf.mxu1  ;;  %3172 = vmatpush.msra.mxu3 %v2173_v7 }
 0x394   :  { %v10948_v50 = vpop.f32.mrf.mxu3 }
 0x396   :  { %2602 = vxpose.xlu1.b32.cont [11/16] (narrow) %v5686_v29, 56  ;;  %v10990_v13 = vpop.f32.mrf.mxu2  ;;  %v2172_v29 = vld [vmem:[%s12076_s28 + $0x5e0] sm:$0xff] }
 0x397   :  { %3173 = vmatpush.msra.mxu3 %v2172_v29 }
 0x399   :  { %3174 = vmatpush.msra.mxu3 %v2171_v46  ;;  %v11048_v23 = vpop.f32.mrf.mxu1  ;;  %v2217_v46 = vld [vmem:[%s12076_s28 + $0x748] sm:$0xff] }
 0x39b   :  { %3175 = vmatpush.msra.mxu3 %v2170_v26 }
 0x39c   :  { %v10967_v40 = vpop.f32.mrf.mxu3 }
 0x39e   :  { %2603 = vxpose.xlu1.b32.cont [12/16] (narrow) %v5687_v2, 56  ;;  %v11029_v34 = vpop.f32.mrf.mxu2  ;;  %v2222_v2 = vld [vmem:[%s12076_s28 + $0x770] sm:$0xff] }
 0x39f   :  { %3285 = vmatpush.msra.mxu2 %v2222_v2 }
 0x3a1   :  { %3286 = vmatpush.msra.mxu2 %v2221_v31  ;;  %v2216_v31 = vld [vmem:[%s12076_s28 + $0x740] sm:$0xff] }
 0x3a3   :  { %3287 = vmatpush.msra.mxu2 %v2220_v47  ;;  %v11098_v47 = vpop.f32.mrf.mxu1 }
 0x3a4   :  { %v10988_v4 = vpop.f32.mrf.mxu3 }
 0x3a5   :  { %3288 = vmatpush.msra.mxu2 %v2219_v25  ;;  %v12231_v25 = vld [vmem:[#allocation44_spill] sm:$0xff] }
 0x3a6   :  { %2604 = vxpose.xlu1.b32.cont [13/16] (narrow) %v5688_v9, 56  ;;  %v2169_v9 = vld [vmem:[%s12076_s28 + $0x5c8] sm:$0xff]  ;;  %v11062_v16 = vpop.f32.mrf.mxu2 }
 0x3a7   :  { %3176 = vmatpush.msra.mxu3 %v2169_v9  ;;  %3289 = vmatpush.msra.mxu2 %v2218_v60  ;;  %v2164_v9 = vld [vmem:[%s12076_s28 + $0x5a0] sm:$0xff]  ;;  %v2163_v60 = vld [vmem:[%s12076_s28 + $0x598] sm:$0xff] }
 0x3a9   :  { %3177 = vmatpush.msra.mxu3 %v2168_v30  ;;  %3290 = vmatpush.msra.mxu2 %v2217_v46 }
 0x3ab   :  { %3178 = vmatpush.msra.mxu3 %v2167_v19  ;;  %3291 = vmatpush.msra.mxu2 %v2216_v31 }
 0x3ac   :  { %v11010_v44 = vpop.f32.mrf.mxu3 }
 0x3ae   :  { %2605 = vxpose.xlu1.b32.cont [14/16] (narrow) %v5689_v20, 56  ;;  %v12230_v20 = vld [vmem:[#allocation43_spill] sm:$0xff] }
 0x3af   :  { %v2820_v43 = vadd.f32 %v10709_v11, %v12230_v20  ;;  %v2823_v20 = vadd.f32 %v10748_v17, %v12231_v25  ;;  %v11120_v17 = vpop.f32.mrf.mxu2 }
 0x3b1   :  { %v2858_v55 = vadd.f32 %v10823_v0, %v2820_v43  ;;  %v2165_v0 = vld [vmem:[%s12076_s28 + $0x5a8] sm:$0xff]  ;;  %v2861_v46 = vadd.f32 %v10852_v38, %v2823_v20  ;;  %v11137_v38 = vpop.f32.mrf.mxu1  ;;  %v12233_v20 = vld [vmem:[#allocation59_spill] sm:$0xff] }
 0x3b2   :  { %v12232_v43 = vld [vmem:[#allocation57_spill] sm:$0xff] }
 0x3b3   :  { %v2896_v2 = vadd.f32 %v10948_v50, %v2858_v55  ;;  %v2215_v50 = vld [vmem:[%s12076_s28 + $0x738] sm:$0xff]  ;;  %v2162_v55 = vld [vmem:[%s12076_s28 + $0x590] sm:$0xff] }
 0x3b4   :  { %v11040_v56 = vpop.f32.mrf.mxu3  ;;  %3292 = vmatpush.msra.mxu2 %v2215_v50  ;;  %v2160_v50 = vld [vmem:[%s12076_s28 + $0x580] sm:$0xff] }
 0x3b6   :  { %2606 = vxpose.xlu1.b32.cont [15/16] (narrow) %v5690_v58, 56  ;;  %v2166_v58 = vld [vmem:[%s12076_s28 + $0x5b0] sm:$0xff] }
 0x3b7   :  { %3179 = vmatpush.msra.mxu3 %v2166_v58  ;;  %v2213_v58 = vld [vmem:[%s12076_s28 + $0x728] sm:$0xff] }
 0x3b9   :  { %3180 = vmatpush.msra.mxu3 %v2165_v0  ;;  %v2212_v0 = vld [vmem:[%s12076_s28 + $0x720] sm:$0xff] }
 0x3ba   :  { %v3440_v7 = vpop.xlane.xlu0 %3439 }
 0x3bb   :  { %v3442_v11 = vmul.f32 %v3440_v7, %v7450_v45  ;;  %3181 = vmatpush.msra.mxu3 %v2164_v9  ;;  %v2214_v7 = vld [vmem:[%s12076_s28 + $0x730] sm:$0xff]  ;;  %v2899_v9 = vadd.f32 %v10967_v40, %v2861_v46 }
 0x3bc   :  { %v11075_v29 = vpop.f32.mrf.mxu3  ;;  %3293 = vmatpush.msra.mxu2 %v2214_v7  ;;  %v2210_v40 = vld [vmem:[%s12076_s28 + $0x710] sm:$0xff]  ;;  %v2208_v7 = vld [vmem:[%s12076_s28 + $0x700] sm:$0xff] }
 0x3bd   :  { %v11087_v26 = vsub.f32 %v10834_v42, %v3442_v11  ;;  %3182 = vmatpush.msra.mxu3 %v2163_v60  ;;  %v3161_v60 = vpop.f32.mrf.mxu2 }
 0x3be   :  { %2607 = vxpose.xlu1.b32.end [16/16] (narrow) %v5691_v53, 56  ;;  %v2934_v53 = vadd.f32 %v12232_v43, %v2896_v2  ;;  %v2161_v2 = vld [vmem:[%s12076_s28 + $0x588] sm:$0xff]  ;;  %3294 = vmatpush.msra.mxu2 %v2213_v58 }
 0x3bf   :  { %v3446_v30 = vmul.f32 %v11087_v26, %v11087_v26  ;;  %3183 = vmatpush.msra.mxu3 %v2162_v55  ;;  %v12234_v55 = vld [vmem:[#allocation70_spill] sm:$0xff] }
 0x3c0   :  { %v2972_v31 = vadd.f32 %v10890_v49, %v2934_v53  ;;  %3295 = vmatpush.msra.mxu2 %v2212_v0  ;;  %v2937_v49 = vadd.f32 %v12233_v20, %v2899_v9  ;;  %v2209_v53 = vld [vmem:[%s12076_s28 + $0x708] sm:$0xff] }
 0x3c1   :  { %v3450_v19 = vsel %vm1718_vm0, %v3446_v30, 0.0  ;;  %3184 = vmatpush.msra.mxu3 %v2161_v2  ;;  %v2211_v30 = vld [vmem:[%s12076_s28 + $0x718] sm:$0xff]  ;;  %v11156_v2 = vpop.f32.mrf.mxu1 }
 0x3c2   :  { %3451 = vadd.xlane.f32.xlu0 %v3450_v19  ;;  %v3010_v25 = vadd.f32 %v10925_v61, %v2972_v31  ;;  %3296 = vmatpush.msra.mxu2 %v2211_v30  ;;  %v2975_v61 = vadd.f32 %v10897_v48, %v2937_v49  ;;  %v12235_v30 = vld [vmem:[#allocation72_spill] sm:$0xff] }
 0x3c3   :  { %3185 = vmatpush.msra.mxu3 %v2160_v50 }
 0x3c4   :  { %v11118_v11 = vpop.f32.mrf.mxu3  ;;  %3297 = vmatpush.msra.mxu2 %v2210_v40  ;;  %v3013_v0 = vadd.f32 %v10940_v41, %v2975_v61  ;;  %v7018_v61 = vld [vmem:[%s12076_s28 + $0x7d8] sm:$0xff] }
 0x3c5   :  { %v3164_v48 = vpop.f32.mrf.mxu2 }
 0x3c6   :  { %3298 = vmatpush.msra.mxu2 %v2209_v53 }
 0x3c8   :  { %3299 = vmatpush.msra.mxu2 %v2208_v7  ;;  %v7017_v7 = vld [vmem:[%s12076_s28 + $0x7e0] sm:$0xff] }
 0x3c9   :  { %6233 = vmatmul.lmr.bf16.vlgmr.msra.gmra.7.mxu2  ;;  %v11167_v49 = vpop.f32.mrf.mxu1 }
 0x3cc   :  { %v3047_v43 = vpop.f32.mrf.mxu3 }
 0x3cd   :  { %v3048_v19 = vadd.f32 %v3047_v43, %v3010_v25  ;;  %v7015_v43 = vld [vmem:[%s12076_s28 + $0x7f0] sm:$0xff] }
 0x3cf   :  { %v3086_v58 = vadd.f32 %v12234_v55, %v3048_v19  ;;  %v7016_v19 = vld [vmem:[%s12076_s28 + $0x7e8] sm:$0xff]  ;;  %v7019_v55 = vld [vmem:[%s12076_s28 + $0x7d0] sm:$0xff] }
 0x3d1   :  { %v3124_v46 = vadd.f32 %v11012_v51, %v3086_v58  ;;  %6234 = vmatmul.lmr.bf16.gmra.7.mxu2  ;;  %v11171_v41 = vpop.f32.mrf.mxu1  ;;  %v7020_v58 = vld [vmem:[%s12076_s28 + $0x7c8] sm:$0xff] }
 0x3d3   :  { %v11159_v31 = vadd.f32 %v3161_v60, %v3124_v46 }
 0x3d4   :  { %v3050_v9 = vpop.f32.mrf.mxu3 }
 0x3d5   :  { %v3051_v50 = vadd.f32 %v3050_v9, %v3013_v0  ;;  %v7021_v9 = vld [vmem:[%s12076_s28 + $0x7c0] sm:$0xff] }
 0x3d6   :  { %3569 = vrot.lane.b32.xlu0 %v10627_v32, %s12030_s5  ;;  %s12041_s5 = smov 104  }
 0x3d7   :  { %v3089_v25 = vadd.f32 %v12235_v30, %v3051_v50  ;;  %v7022_v50 = vld [vmem:[%s12076_s28 + $0x7b8] sm:$0xff]  ;;  %v7023_v30 = vld [vmem:[%s12076_s28 + $0x7b0] sm:$0xff] }
 0x3d9   :  { %v3127_v20 = vadd.f32 %v11048_v23, %v3089_v25  ;;  %6235 = vmatmul.lmr.bf16.gmra.7.mxu2  ;;  %v7014_v23 = vld [vmem:[%s12076_s28 + $0x7f8] sm:$0xff]  ;;  %v11181_v53 = vpop.f32.mrf.mxu1  ;;  %v7024_v25 = vld [vmem:[%s12076_s28 + $0x7a8] sm:$0xff] }
 0x3db   :  { %v11165_v51 = vadd.f32 %v3164_v48, %v3127_v20  ;;  %v7025_v20 = vld [vmem:[%s12076_s28 + $0x7a0] sm:$0xff] }
 0x3de   :  { %3598 = vrot.lane.b32.xlu0 %v10627_v32, %s12032_s29  ;;  %s12237_s29 = sld [smem:[#allocation100_spill]] }
 0x3e1   :  { %6236 = vmatmul.lmr.bf16.gmra.7.mxu2  ;;  %v11200_v46 = vpop.f32.mrf.mxu1 }
 0x3e6   :  { %3671 = vrot.lane.b32.xlu0 %v10627_v32, %s12043_s2 }
 0x3e9   :  { %6237 = vmatmul.lmr.bf16.gmra.7.mxu2 }
 0x3ea   :  { %v2608_v40 = vpop.trf.xlu1 }
 0x3eb   :  { %3186 = vmatmul.f32.vlgmr.msra.gmra.mxu3 %v2608_v40  ;;  %v11217_v40 = vpop.f32.mrf.mxu1 }
 0x3ec   :  { %5864 = vmatpush.msra.mxu3 %v7014_v23  ;;  %12236 = vst [vmem:[#allocation9_spill] sm:$0xff] %v11217_v40  ;;  %v7026_v23 = vld [vmem:[%s12076_s28 + $0x798] sm:$0xff] }
 0x3ee   :  { %5865 = vmatpush.msra.mxu3 %v7015_v43  ;;  %3669 = vrot.lane.b32.xlu0 %v10627_v32, %s12047_s1  ;;  %v7027_v43 = vld [vmem:[%s12076_s28 + $0x790] sm:$0xff] }
 0x3f0   :  { %5866 = vmatpush.msra.mxu3 %v7016_v19  ;;  %v7028_v19 = vld [vmem:[%s12076_s28 + $0x788] sm:$0xff] }
 0x3f1   :  { %6238 = vmatmul.lmr.bf16.gmra.7.mxu2 }
 0x3f2   :  { %v2609_v60 = vpop.trf.xlu1  ;;  %5867 = vmatpush.msra.mxu3 %v7017_v7  ;;  %v7029_v7 = vld [vmem:[%s12076_s28 + $0x780] sm:$0xff]  ;;  %s12049_s28 = smov 72  }
 0x3f3   :  { %3189 = vmatmul.f32.gmra.mxu3 %v2609_v60 }
 0x3f4   :  { %5868 = vmatpush.msra.mxu3 %v7018_v61 }
 0x3f6   :  { %5869 = vmatpush.msra.mxu3 %v7019_v55 }
 0x3f8   :  { %5870 = vmatpush.msra.mxu3 %v7020_v58  ;;  %v11234_v58 = vld [vmem:[%s12237_s29] ss:$0 sm:$0xff] }
 0x3f9   :  { %6239 = vmatmul.lmr.bf16.gmra.7.mxu2  ;;  %12238 = vst [vmem:[#allocation48_spill] sm:$0xff] %v11234_v58 }
 0x3fa   :  { %v2610_v0 = vpop.trf.xlu1  ;;  %5871 = vmatpush.msra.mxu3 %v7021_v9 }
 0x3fb   :  { %3192 = vmatmul.f32.gmra.mxu3 %v2610_v0 }
 0x3fc   :  { %5872 = vmatpush.msra.mxu3 %v7022_v50 }
 0x3fe   :  { %5873 = vmatpush.msra.mxu3 %v7023_v30 }
 0x400   :  { %5874 = vmatpush.msra.mxu3 %v7024_v25  ;;  %v12239_v25 = vld [vmem:[#allocation24_spill] sm:$0xff] }
 0x402   :  { %v2611_v48 = vpop.trf.xlu1  ;;  %5875 = vmatpush.msra.mxu3 %v7025_v20  ;;  %v12240_v20 = vld [vmem:[#allocation27_spill] sm:$0xff] }
 0x403   :  { %3195 = vmatmul.f32.gmra.mxu3 %v2611_v48  ;;  %v6659_v48 = vunpack.i.h.bf16 %v12239_v25 }
 0x404   :  { %5876 = vmatpush.msra.mxu3 %v7026_v23  ;;  %v3552_v61 = vpop.f32.mrf.mxu1  ;;  %v6664_v23 = vunpack.i.h.bf16 %v12240_v20 }
 0x405   :  { %v3555_v55 = vmul.f32 0.35355338, %v3552_v61  ;;  %v12242_v61 = vld [vmem:[#allocation32_spill] sm:$0xff] }
 0x406   :  { %5877 = vmatpush.msra.mxu3 %v7027_v43  ;;  %v12241_v43 = vld [vmem:[#allocation29_spill] sm:$0xff] }
 0x407   :  { %v11237_v9 = vadd.f32 %v11234_v58, %v3555_v55  ;;  %v6674_v55 = vunpack.i.h.bf16 %v12242_v61  ;;  %v12244_v58 = vld [vmem:[#allocation36_spill] sm:$0xff]  ;;  %v12245_v61 = vld [vmem:[#allocation35_spill] sm:$0xff] }
 0x408   :  { %5878 = vmatpush.msra.mxu3 %v7028_v19  ;;  %v6669_v19 = vunpack.i.h.bf16 %v12241_v43  ;;  %v6684_v43 = vunpack.i.h.bf16 %v12244_v58 }
 0x409   :  { %v3558_v50 = vsel %vm3530_vm12, %v11237_v9, -inf }
 0x40a   :  { %v2612_v60 = vpop.trf.xlu1  ;;  %5879 = vmatpush.msra.mxu3 %v7029_v7 }
 0x40b   :  { %3198 = vmatmul.f32.gmra.mxu3 %v2612_v60 }
 0x412   :  { %v2613_v0 = vpop.trf.xlu1 }
 0x413   :  { %3201 = vmatmul.f32.gmra.mxu3 %v2613_v0 }
 0x418   :  { %3559 = vmax.xlane.f32.xlu0 %v3558_v50  ;;  %v12243_v50 = vld [vmem:[#allocation34_spill] sm:$0xff] }
 0x41a   :  { %v2614_v30 = vpop.trf.xlu1 }
 0x41b   :  { %3204 = vmatmul.f32.gmra.mxu3 %v2614_v30  ;;  %v6679_v30 = vunpack.i.h.bf16 %v12243_v50 }
 0x423   :  { %3341 = vmatmul.f32.vlgmr.msra.gmra.mxu3 %v6659_v48 }
 0x42b   :  { %3344 = vmatmul.f32.gmra.mxu3 %v6664_v23 }
 0x42c   :  { %3744 = vrot.lane.b32.xlu0 %v10627_v32, %s12049_s28 }
 0x433   :  { %3347 = vmatmul.f32.gmra.mxu3 %v6669_v19 }
 0x435   :  { %v3452_v60 = vpop.xlane.xlu0 %3451 }
 0x436   :  { %v3454_v7 = vmul.f32 %v3452_v60, %v7450_v45 }
 0x438   :  { %v3456_v0 = vadd.f32 1e-12, %v3454_v7 }
 0x43a   :  { %6916 = vrsqrt.f32 %v3456_v0  ;;  %vm3473_vm14 = vweird.f32 %v3456_v0 }
 0x43b   :  { %3350 = vmatmul.f32.gmra.mxu3 %v6674_v55  ;;  %v12246_v55 = vld [vmem:[#allocation92_spill] sm:$0xff] }
 0x43c   :  { %v2808_v50 = vadd.f32 %v12246_v55, %v12245_v61  ;;  %v11275_v61 = vpop.f32.mrf.mxu3  ;;  %v11278_v55 = vpop.f32.mrf.mxu2 }
 0x43e   :  { %v2846_v58 = vadd.f32 %v10683_v14, %v2808_v50 }
 0x440   :  { %v6917_v25 = vpop.eup %6916 }
 0x441   :  { %v3468_v48 = vmul.f32 %v6917_v25, %v3456_v0  ;;  %vm3474_vm13 = vweird.f32 %v6917_v25  ;;  %v11263_v0 = vld [vmem:[%s12137_s8] ss:$0 sm:$0xff] }
 0x442   :  { %vm3475_vm15 = vmor %vm3473_vm14, %vm3474_vm13 }
 0x443   :  { %3353 = vmatmul.f32.gmra.mxu3 %v6679_v30  ;;  %v3469_v20 = vmul.f32 %v6917_v25, %v3468_v48  ;;  %v11256_v30 = vld [vmem:[%s12133_s9] ss:$0 sm:$0xff] }
 0x445   :  { %v3470_v23 = vmul.f32 0.5, %v3469_v20  ;;  %v12247_v20 = vld [vmem:[#allocation49_spill] sm:$0xff] }
 0x447   :  { %v3471_v42 = vsub.f32 1.5, %v3470_v23 }
 0x448   :  { %v3570_v19 = vpop.permute.xlu0 %3569 }
 0x449   :  { %v3472_v40 = vmul.f32 %v6917_v25, %v3471_v42  ;;  %3590 = vmatpush.msra.mxu2 %v3570_v19 }
 0x44b   :  { %3356 = vmatmul.f32.gmra.mxu3 %v6684_v43  ;;  %v3476_v60 = vsel %vm3475_vm15, %v6917_v25, %v3472_v40  ;;  %v2884_v40 = vadd.f32 %v10902_v54, %v2846_v58  ;;  %v3597_v25 = vpop.permute.xlu2 %3596 }
 0x44c   :  { %v3478_v7 = vmul.f32 %v3476_v60, %v11087_v26  ;;  %v12248_v60 = vld [vmem:[#allocation62_spill] sm:$0xff] }
 0x44d   :  { %v2922_v23 = vadd.f32 %v12247_v20, %v2884_v40  ;;  %v3301_v40 = vpop.f32.mrf.mxu2  ;;  %v12250_v20 = vld [vmem:[#allocation38_spill] sm:$0xff] }
 0x44e   :  { %v3483_v48 = vmul.f32 %v11256_v30, %v3478_v7 }
 0x44f   :  { %v2960_v14 = vadd.f32 %v10806_v3, %v2922_v23  ;;  %v12251_v23 = vld [vmem:[#allocation95_spill] sm:$0xff] }
 0x450   :  { %v3599_v42 = vpop.permute.xlu0 %3598  ;;  %v3488_v26 = vadd.f32 %v11263_v0, %v3483_v48 }
 0x451   :  { %5768 = vmatpush.xpose.msk.msra.mxu3 %vm3530_vm12, %v3599_v42  ;;  %v2998_v43 = vadd.f32 %v10881_v39, %v2960_v14  ;;  %v12249_v42 = vld [vmem:[#allocation77_spill] sm:$0xff]  ;;  %v2811_v14 = vadd.f32 %v12251_v23, %v12250_v20 }
 0x452   :  { %5764 = vmatmul.msk.f32.gmra.mxu0 %vm1718_vm0, %v3488_v26 }
 0x453   :  { %v3036_v19 = vadd.f32 %v11010_v44, %v2998_v43 }
 0x454   :  { %5769 = vmatmul.msk.f32.vlgmr.msra.gmra.mxu3 %vm3530_vm12, %v3597_v25 }
 0x455   :  { %v3074_v7 = vadd.f32 %v12248_v60, %v3036_v19  ;;  %v12253_v60 = vld [vmem:[#allocation96_spill] sm:$0xff] }
 0x457   :  { %v3112_v54 = vadd.f32 %v10921_v5, %v3074_v7  ;;  %v2849_v5 = vadd.f32 %v10726_v33, %v2811_v14  ;;  %v12255_v33 = vld [vmem:[#allocation41_spill] sm:$0xff] }
 0x459   :  { %v3150_v50 = vadd.f32 %v10990_v13, %v3112_v54  ;;  %v11291_v13 = vpop.permute.xlu0 %3671  ;;  %v2887_v43 = vadd.f32 %v10911_v27, %v2849_v5  ;;  %v12254_v54 = vld [vmem:[#allocation51_spill] sm:$0xff] }
 0x45a   :  { %v12257_v5 = vld [vmem:[#allocation63_spill] sm:$0xff] }
 0x46e   :  { %v3187_v48 = vpop.f32.mrf.mxu3 }
 0x46f   :  { %v3188_v58 = vadd.f32 %v3187_v48, %v3150_v50 }
 0x471   :  { %v3226_v26 = vadd.f32 %v12249_v42, %v3188_v58  ;;  %v11300_v42 = vpop.permute.xlu0 %3669 }
 0x473   :  { %v3264_v3 = vadd.f32 %v11137_v38, %v3226_v26  ;;  %v12252_v38 = vld [vmem:[#allocation39_spill] sm:$0xff] }
 0x474   :  { %v2814_v7 = vadd.f32 %v12253_v60, %v12252_v38 }
 0x475   :  { %v3302_v39 = vadd.f32 %v3301_v40, %v3264_v3  ;;  %v2817_v40 = vadd.f32 %v10667_v36, %v12255_v33  ;;  %v12256_v3 = vld [vmem:[#allocation53_spill] sm:$0xff] }
 0x476   :  { %v3190_v25 = vpop.f32.mrf.mxu3  ;;  %v2852_v50 = vadd.f32 %v10768_v24, %v2814_v7 }
 0x477   :  { %v3340_v44 = vadd.f32 %v10568_v6, %v3302_v39  ;;  %v2925_v6 = vadd.f32 %v12254_v54, %v2887_v43  ;;  %v12259_v54 = vld [vmem:[#allocation65_spill] sm:$0xff] }
 0x478   :  { %v2890_v58 = vadd.f32 %v10919_v12, %v2852_v50  ;;  %v3304_v50 = vpop.f32.mrf.mxu2 }
 0x479   :  { %5756 = vst.msk [vmem:[%s12006_s27 + $0x38] sm:$0xff] %vm1718_vm0, %v3340_v44  ;;  %v2963_v48 = vadd.f32 %v10844_v8, %v2925_v6  ;;  %v2855_v44 = vadd.f32 %v10798_v57, %v2817_v40 }
 0x47a   :  { %v2928_v39 = vadd.f32 %v12256_v3, %v2890_v58 }
 0x47b   :  { %v3001_v27 = vadd.f32 %v10892_v35, %v2963_v48  ;;  %v2893_v8 = vadd.f32 %v10930_v18, %v2855_v44  ;;  %v12258_v35 = vld [vmem:[#allocation55_spill] sm:$0xff]  ;;  %v12262_v44 = vld [vmem:[#allocation46_spill] sm:$0xff] }
 0x47c   :  { %v2966_v24 = vadd.f32 %v10861_v52, %v2928_v39 }
 0x47d   :  { %v3039_v20 = vadd.f32 %v11040_v56, %v3001_v27  ;;  %v2931_v60 = vadd.f32 %v12258_v35, %v2893_v8  ;;  %v12261_v27 = vld [vmem:[#allocation68_spill] sm:$0xff]  ;;  %v12265_v35 = vld [vmem:[#allocation85_spill] sm:$0xff] }
 0x47e   :  { %v3193_v19 = vpop.f32.mrf.mxu3  ;;  %v3004_v36 = vadd.f32 %v10904_v59, %v2966_v24 }
 0x47f   :  { %v3077_v43 = vadd.f32 %v12257_v5, %v3039_v20  ;;  %v2969_v52 = vadd.f32 %v10879_v63, %v2931_v60  ;;  %v12260_v63 = vld [vmem:[#allocation79_spill] sm:$0xff] }
 0x480   :  { %v3042_v56 = vadd.f32 %v11075_v29, %v3004_v36  ;;  %v3307_v24 = vpop.f32.mrf.mxu2 }
 0x481   :  { %v3115_v57 = vadd.f32 %v10932_v62, %v3077_v43  ;;  %v3007_v48 = vadd.f32 %v10913_v22, %v2969_v52  ;;  %v2826_v22 = vadd.f32 %v10782_v21, %v12262_v44  ;;  %v12264_v21 = vld [vmem:[#allocation60_spill] sm:$0xff]  ;;  %v12270_v44 = vld [vmem:[#allocation9_spill] sm:$0xff] }
 0x482   :  { %v3080_v6 = vadd.f32 %v12259_v54, %v3042_v56 }
 0x483   :  { %v3153_v18 = vadd.f32 %v11029_v34, %v3115_v57  ;;  %v3045_v29 = vadd.f32 %v11118_v11, %v3007_v48  ;;  %v12267_v48 = vld [vmem:[#allocation74_spill] sm:$0xff] }
 0x484   :  { %v3118_v62 = vadd.f32 %v10956_v1, %v3080_v6  ;;  %v2864_v1 = vadd.f32 %v10868_v10, %v2826_v22 }
 0x485   :  { %v3191_v59 = vadd.f32 %v3190_v25, %v3153_v18  ;;  %v3083_v3 = vadd.f32 %v12261_v27, %v3045_v29  ;;  %v12266_v18 = vld [vmem:[#allocation88_spill] sm:$0xff] }
 0x486   :  { %v3196_v26 = vpop.f32.mrf.mxu3  ;;  %v3156_v34 = vadd.f32 %v11062_v16, %v3118_v62  ;;  %v2902_v8 = vadd.f32 %v10988_v4, %v2864_v1  ;;  %v12263_v16 = vld [vmem:[#allocation81_spill] sm:$0xff] }
 0x487   :  { %v3229_v33 = vadd.f32 %v12260_v63, %v3191_v59  ;;  %v3121_v11 = vadd.f32 %v10980_v28, %v3083_v3 }
 0x488   :  { %v3194_v20 = vadd.f32 %v3193_v19, %v3156_v34  ;;  %v2940_v36 = vadd.f32 %v12264_v21, %v2902_v8  ;;  %v3310_v10 = vpop.f32.mrf.mxu2 }
 0x489   :  { %v3267_v25 = vadd.f32 %v11156_v2, %v3229_v33  ;;  %v3159_v43 = vadd.f32 %v11120_v17, %v3121_v11 }
 0x48a   :  { %v2978_v28 = vadd.f32 %v10906_v15, %v2940_v36 }
 0x48b   :  { %v3560_v23 = vpop.xlane.xlu0 %3559  ;;  %v3197_v19 = vadd.f32 %v3196_v26, %v3159_v43 }
 0x48c   :  { %v3561_v14 = vsub.f32 %v11237_v9, %v3560_v23  ;;  %v3305_v23 = vadd.f32 %v3304_v50, %v3267_v25 }
 0x48d   :  { %v3235_v60 = vadd.f32 %v12265_v35, %v3197_v19 }
 0x48e   :  { %v3199_v12 = vpop.f32.mrf.mxu3  ;;  %v3562_v38 = vmul.f32 1.442695, %v3561_v14  ;;  %v3232_v14 = vadd.f32 %v12263_v16, %v3194_v20 }
 0x48f   :  { %v3273_v26 = vadd.f32 %v11171_v41, %v3235_v60  ;;  %v3200_v56 = vadd.f32 %v3199_v12, %v11159_v31  ;;  %v12268_v12 = vld [vmem:[#allocation91_spill] sm:$0xff] }
 0x490   :  { %6918 = vpow2.f32 %v3562_v38  ;;  %v3270_v2 = vadd.f32 %v11167_v49, %v3232_v14  ;;  %v3016_v49 = vadd.f32 %v10969_v37, %v2978_v28  ;;  %v3313_v6 = vpop.f32.mrf.mxu2 }
 0x491   :  { %v3311_v52 = vadd.f32 %v3310_v10, %v3273_v26  ;;  %v3238_v54 = vadd.f32 %v12266_v18, %v3200_v56 }
 0x492   :  { %v3308_v4 = vadd.f32 %v3307_v24, %v3270_v2  ;;  %v3054_v15 = vadd.f32 %v11275_v61, %v3016_v49  ;;  %v7032_v24 = vld [vmem:[%s12174_s3] ss:$0 sm:$0xff] }
 0x493   :  { %v3276_v37 = vadd.f32 %v11181_v53, %v3238_v54 }
 0x494   :  { %v3092_v59 = vadd.f32 %v12267_v48, %v3054_v15 }
 0x495   :  { %v3314_v61 = vadd.f32 %v3313_v6, %v3276_v37 }
 0x496   :  { %v3202_v7 = vpop.f32.mrf.mxu3  ;;  %v11319_v9 = vpop.eup %6918  ;;  %v3130_v31 = vadd.f32 %v11098_v47, %v3092_v59 }
 0x497   :  { %v3564_v58 = vsel %vm3530_vm12, %v11319_v9, 0.0  ;;  %v3203_v41 = vadd.f32 %v3202_v7, %v11165_v51  ;;  %v12269_v7 = vld [vmem:[#allocation94_spill] sm:$0xff] }
 0x498   :  { %3565 = vadd.xlane.f32.xlu0 %v3564_v58  ;;  %v3168_v63 = vadd.f32 %v11278_v55, %v3130_v31  ;;  %v3316_v34 = vpop.f32.mrf.mxu2 }
 0x499   :  { %v3241_v62 = vadd.f32 %v12268_v12, %v3203_v41 }
 0x49b   :  { %v3279_v27 = vadd.f32 %v11200_v46, %v3241_v62 }
 0x49d   :  { %v3317_v51 = vadd.f32 %v3316_v34, %v3279_v27 }
 0x49e   :  { %v3205_v40 = vpop.f32.mrf.mxu3  ;;  %v3745_v39 = vpop.permute.xlu0 %3744 }
 0x49f   :  { %5774 = vmatpush.xpose.msk.msra.mxu0 %vm3530_vm12, %v3745_v39  ;;  %v3206_v53 = vadd.f32 %v3205_v40, %v3168_v63 }
 0x4a0   :  { %v3319_v55 = vpop.f32.mrf.mxu2 }
 0x4a1   :  { %v3244_v3 = vadd.f32 %v12269_v7, %v3206_v53 }
 0x4a3   :  { %v3282_v22 = vadd.f32 %v12270_v44, %v3244_v3 }
 0x4a5   :  { %v3320_v46 = vadd.f32 %v3319_v55, %v3282_v22 }
 0x4a6   :  { %v3342_v5 = vpop.f32.mrf.mxu3 }
 0x4a7   :  { %v3343_v38 = vadd.f32 %v3342_v5, %v3305_v23  ;;  %v12273_v5 = vld [vmem:[#allocation48_spill] sm:$0xff] }
 0x4a9   :  { %5757 = vst.msk [vmem:[%s12006_s27 + $0x40] sm:$0xff] %vm1718_vm0, %v3343_v38 }
 0x4ac   :  { %3742 = vrot.lane.b32.xlu0 %v10627_v32, %s12041_s5 }
 0x4ae   :  { %v3345_v57 = vpop.f32.mrf.mxu3 }
 0x4af   :  { %v3346_v17 = vadd.f32 %v3345_v57, %v3308_v4 }
 0x4b1   :  { %5758 = vst.msk [vmem:[%s12006_s27 + $0x48] sm:$0xff] %vm1718_vm0, %v3346_v17 }
 0x4b6   :  { %v3348_v50 = vpop.f32.mrf.mxu3 }
 0x4b7   :  { %v3349_v58 = vadd.f32 %v3348_v50, %v3311_v52 }
 0x4b9   :  { %5759 = vst.msk [vmem:[%s12006_s27 + $0x50] sm:$0xff] %vm1718_vm0, %v3349_v58  ;;  %v6892_v58 = vld [vmem:[%s12237_s29 + $0x1] ss:$0 sm:$0xff] }
 0x4be   :  { %v3351_v29 = vpop.f32.mrf.mxu3 }
 0x4bf   :  { %v3352_v33 = vadd.f32 %v3351_v29, %v3314_v61 }
 0x4c1   :  { %5760 = vst.msk [vmem:[%s12006_s27 + $0x58] sm:$0xff] %vm1718_vm0, %v3352_v33 }
 0x4c6   :  { %v3354_v47 = vpop.f32.mrf.mxu3 }
 0x4c7   :  { %v3355_v39 = vadd.f32 %v3354_v47, %v3317_v51 }
 0x4c9   :  { %5761 = vst.msk [vmem:[%s12006_s27 + $0x60] sm:$0xff] %vm1718_vm0, %v3355_v39 }
 0x4ce   :  { %v3357_v40 = vpop.f32.mrf.mxu3 }
 0x4cf   :  { %v3358_v25 = vadd.f32 %v3357_v40, %v3320_v46  ;;  %v3523_v20 = vpop.f32.mrf.mxu0 }
 0x4d0   :  { %v11385_v1 = vadd.f32 %v7032_v24, %v3523_v20 }
 0x4d1   :  { %5762 = vst.msk [vmem:[%s12006_s27 + $0x68] sm:$0x1] %vm1725_vm11, %v3358_v25  ;;  %s12271_s27 = smov 88  }
 0x4d2   :  { %4028 = vrot.lane.b32.xlu1 %v11385_v1, %s12041_s5  ;;  %3817 = vrot.lane.b32.xlu0 %v11385_v1, %s12051_s25  ;;  %s12276_s25 = smov 16   ;;  %s12277_s5 = sld [smem:[#allocation108_spill]] }
 0x4d7   :  { %v3621_v8 = vpop.f32.mrf.mxu3 }
 0x4d8   :  { %v3624_v16 = vmul.f32 0.35355338, %v3621_v8 }
 0x4da   :  { %3958 = vrot.lane.b32.xlu0 %v11385_v1, %s12043_s2  ;;  %v3625_v43 = vadd.f32 %v12273_v5, %v3624_v16  ;;  %s12275_s2 = sld [smem:[#allocation107_spill]] }
 0x4dc   :  { %v3626_v38 = vsel %vm3530_vm12, %v3625_v43, -inf }
 0x4e2   :  { %3956 = vrot.lane.b32.xlu0 %v11385_v1, %s12047_s1 }
 0x4ea   :  { %3886 = vrot.lane.b32.xlu0 %v11385_v1, %s12271_s27 }
 0x4f2   :  { %3884 = vrot.lane.b32.xlu0 %v11385_v1, %s12272_s4 }
 0x50b   :  { %v3566_v11 = vpop.xlane.xlu0 %3565 }
 0x50c   :  { %6920 = vrcp.f32 %v3566_v11 }
 0x512   :  { %v6921_v23 = vpop.eup %6920 }
 0x513   :  { %v3568_v14 = vmul.f32 %v6921_v23, %v11319_v9 }
 0x515   :  { %5767 = vmatmul.msk.f32.vlgmr.msra.gmra.mxu2 %vm3530_vm12, %v3568_v14 }
 0x516   :  { %5771 = vmatpush.xpose.msk.msra.mxu2 %vm3530_vm12, %v11291_v13 }
 0x51c   :  { %3627 = vmax.xlane.f32.xlu0 %v3626_v38 }
 0x51d   :  { %5772 = vmatmul.msk.f32.vlgmr.msra.gmra.mxu2 %vm3530_vm12, %v11300_v42 }
 0x51e   :  { %v3743_v21 = vpop.permute.xlu0 %3742 }
 0x51f   :  { %5775 = vmatmul.msk.f32.vlgmr.msra.gmra.mxu0 %vm3530_vm12, %v3743_v21 }
 0x530   :  { %4030 = vrot.lane.b32.xlu0 %v11385_v1, %s12049_s28 }
 0x544   :  { %v3818_v9 = vpop.permute.xlu0 %3817  ;;  %v4029_v52 = vpop.permute.xlu1 %4028 }
 0x545   :  { %5777 = vmatpush.xpose.msk.msra.mxu2 %vm3530_vm12, %v3818_v9 }
 0x548   :  { %5778 = vmatmul.msk.f32.vlgmr.msra.gmra.mxu2 %vm3530_vm12, %v11385_v1 }
 0x54c   :  { %v3959_v13 = vpop.permute.xlu0 %3958 }
 0x54d   :  { %5783 = vmatpush.xpose.msk.msra.mxu2 %vm3530_vm12, %v3959_v13 }
 0x554   :  { %v3957_v36 = vpop.permute.xlu0 %3956 }
 0x555   :  { %5784 = vmatmul.msk.f32.vlgmr.msra.gmra.mxu2 %vm3530_vm12, %v3957_v36 }
 0x55c   :  { %v3887_v2 = vpop.permute.xlu0 %3886 }
 0x55d   :  { %5780 = vmatpush.xpose.msk.msra.mxu0 %vm3530_vm12, %v3887_v2 }
 0x564   :  { %v3885_v42 = vpop.permute.xlu0 %3884 }
 0x565   :  { %5781 = vmatmul.msk.f32.vlgmr.msra.gmra.mxu0 %vm3530_vm12, %v3885_v42 }
 0x58f   :  { %v3628_v10 = vpop.xlane.xlu0 %3627 }
 0x590   :  { %v3629_v28 = vsub.f32 %v3625_v43, %v3628_v10 }
 0x592   :  { %v3630_v57 = vmul.f32 1.442695, %v3629_v28 }
 0x594   :  { %6922 = vpow2.f32 %v3630_v57 }
 0x598   :  { %v3592_v19 = vpop.f32.mrf.mxu2 }
 0x599   :  { %3595 = vst.msk [vmem:[#allocation2] sm:$0xff] %vm3530_vm12, %v3592_v19 }
 0x59a   :  { %v11424_v54 = vpop.eup %6922 }
 0x59b   :  { %v3632_v6 = vsel %vm3530_vm12, %v11424_v54, 0.0 }
 0x59c   :  { %v3767_v4 = vpop.f32.mrf.mxu0 }
 0x59d   :  { %v3770_v35 = vmul.f32 0.35355338, %v3767_v4 }
 0x59f   :  { %v3771_v60 = vadd.f32 %v12273_v5, %v3770_v35 }
 0x5a0   :  { %v3694_v17 = vpop.f32.mrf.mxu2 }
 0x5a1   :  { %v3697_v49 = vmul.f32 0.35355338, %v3694_v17  ;;  %v3772_v26 = vsel %vm3530_vm12, %v3771_v60, -inf }
 0x5a2   :  { %3773 = vmax.xlane.f32.xlu0 %v3772_v26  ;;  %v4031_v56 = vpop.permute.xlu0 %4030 }
 0x5a3   :  { %5786 = vmatpush.xpose.msk.msra.mxu0 %vm3530_vm12, %v4031_v56  ;;  %v3698_v15 = vadd.f32 %v12273_v5, %v3697_v49 }
 0x5a5   :  { %v3699_v18 = vsel %vm3530_vm12, %v3698_v15, -inf }
 0x5a6   :  { %3700 = vmax.xlane.f32.xlu2 %v3699_v18  ;;  %5787 = vmatmul.msk.f32.vlgmr.msra.gmra.mxu0 %vm3530_vm12, %v4029_v52 }
 0x5ae   :  { %3633 = vadd.xlane.f32.xlu2 %v3632_v6 }
 0x5b6   :  { %3710 = vrot.lane.b32.xlu0 %v10627_v32, %s12037_s30 }
 0x5be   :  { %3783 = vrot.lane.b32.xlu0 %v10627_v32, %s12039_s6 }
 0x5cb   :  { %v3840_v50 = vpop.f32.mrf.mxu2 }
 0x5cc   :  { %v3843_v20 = vmul.f32 0.35355338, %v3840_v50 }
 0x5ce   :  { %v3845_v11 = vadd.f32 %v6892_v58, %v3843_v20 }
 0x5d0   :  { %v3846_v14 = vsel %vm3530_vm12, %v3845_v11, -inf }
 0x5d8   :  { %v3981_v48 = vpop.f32.mrf.mxu2 }
 0x5d9   :  { %v3984_v59 = vmul.f32 0.35355338, %v3981_v48 }
 0x5db   :  { %v3985_v37 = vadd.f32 %v6892_v58, %v3984_v59 }
 0x5dd   :  { %v3986_v41 = vsel %vm3530_vm12, %v3985_v37, -inf }
 0x5de   :  { %3987 = vmax.xlane.f32.xlu1 %v3986_v41 }
 0x5e2   :  { %v3909_v31 = vpop.f32.mrf.mxu0 }
 0x5e3   :  { %v3912_v61 = vmul.f32 0.35355338, %v3909_v31 }
 0x5e5   :  { %v3913_v12 = vadd.f32 %v6892_v58, %v3912_v61 }
 0x5e7   :  { %v3914_v62 = vsel %vm3530_vm12, %v3913_v12, -inf }
 0x5e8   :  { %3915 = vmax.xlane.f32.xlu0 %v3914_v62 }
 0x5f7   :  { %3925 = vrot.lane.b32.xlu1 %v11385_v1, %s12045_s26 }
 0x5fc   :  { %3857 = vrot.lane.b32.xlu0 %v11385_v1, %s12274_s7 }
 0x615   :  { %v3774_v29 = vpop.xlane.xlu0 %3773 }
 0x616   :  { %v3775_v63 = vsub.f32 %v3771_v60, %v3774_v29 }
 0x618   :  { %v3776_v33 = vmul.f32 1.442695, %v3775_v63 }
 0x619   :  { %v3701_v34 = vpop.xlane.xlu2 %3700 }
 0x61a   :  { %6924 = vpow2.f32 %v3776_v33  ;;  %v3702_v27 = vsub.f32 %v3698_v15, %v3701_v34  ;;  %v4105_v34 = vld [vmem:[%s12275_s2 + $0x18] sm:$0xff] }
 0x61b   :  { %4124 = vmatpush.msra.mxu2 %v4105_v34 }
 0x61c   :  { %v3703_v53 = vmul.f32 1.442695, %v3702_v27  ;;  %v4104_v27 = vld [vmem:[%s12275_s2 + $0x10] sm:$0xff] }
 0x61d   :  { %4125 = vmatpush.msra.mxu2 %v4104_v27 }
 0x61e   :  { %6926 = vpow2.f32 %v3703_v53  ;;  %v4103_v53 = vld [vmem:[%s12275_s2 + $0x8] sm:$0xff] }
 0x61f   :  { %4126 = vmatpush.msra.mxu2 %v4103_v53  ;;  %v4338_v53 = vld [vmem:[%s11993_s14 + $0x78] sm:$0xff] }
 0x620   :  { %v6925_v51 = vpop.eup %6924  ;;  %4339 = vmatpush.msra.mxu0 %v4338_v53 }
 0x621   :  { %v3778_v7 = vsel %vm3530_vm12, %v6925_v51, 0.0  ;;  %v3634_v9 = vpop.xlane.xlu2 %3633 }
 0x622   :  { %3779 = vadd.xlane.f32.xlu2 %v3778_v7 }
 0x623   :  { %v4053_v8 = vpop.f32.mrf.mxu0 }
 0x624   :  { %v6927_v3 = vpop.eup %6926  ;;  %v4056_v16 = vmul.f32 0.35355338, %v4053_v8  ;;  %v6893_v8 = vld [vmem:[%s12277_s5] ss:$0 sm:$0xff] }
 0x625   :  { %v3705_v39 = vsel %vm3530_vm12, %v6927_v3, 0.0 }
 0x626   :  { %v4057_v5 = vadd.f32 %v6892_v58, %v4056_v16  ;;  %v12278_v16 = vld [vmem:[#allocation6_spill] sm:$0xff] }
 0x628   :  { %v3711_v47 = vpop.permute.xlu0 %3710  ;;  %v4058_v43 = vsel %vm3530_vm12, %v4057_v5, -inf }
 0x629   :  { %3731 = vmatpush.msra.mxu3 %v3711_v47 }
 0x62a   :  { %3706 = vadd.xlane.f32.xlu2 %v3705_v39 }
 0x630   :  { %v3784_v25 = vpop.permute.xlu0 %3783 }
 0x642   :  { %3637 = vrot.lane.b32.xlu2 %v10627_v32, %s12045_s26  ;;  %s12285_s26 = smov 104  }
 0x651   :  { %v3988_v44 = vpop.xlane.xlu1 %3987 }
 0x652   :  { %v3989_v22 = vsub.f32 %v3985_v37, %v3988_v44 }
 0x654   :  { %v3990_v55 = vmul.f32 1.442695, %v3989_v22 }
 0x656   :  { %6928 = vpow2.f32 %v3990_v55 }
 0x65b   :  { %v3916_v24 = vpop.xlane.xlu0 %3915 }
 0x65c   :  { %v11445_v46 = vpop.eup %6928  ;;  %v3917_v23 = vsub.f32 %v3913_v12, %v3916_v24 }
 0x65d   :  { %v3992_v40 = vsel %vm3530_vm12, %v11445_v46, 0.0 }
 0x65e   :  { %3993 = vadd.xlane.f32.xlu1 %v3992_v40  ;;  %v3918_v32 = vmul.f32 1.442695, %v3917_v23 }
 0x660   :  { %6930 = vpow2.f32 %v3918_v32 }
 0x661   :  { %6932 = vrcp.f32 %v3634_v9 }
 0x666   :  { %v6931_v38 = vpop.eup %6930 }
 0x667   :  { %v3920_v21 = vsel %vm3530_vm12, %v6931_v38, 0.0  ;;  %v6933_v2 = vpop.eup %6932 }
 0x668   :  { %v3636_v19 = vmul.f32 %v6933_v2, %v11424_v54 }
 0x669   :  { %v3926_v57 = vpop.permute.xlu1 %3925 }
 0x66b   :  { %3847 = vmax.xlane.f32.xlu2 %v3846_v14 }
 0x66e   :  { %v3858_v4 = vpop.permute.xlu0 %3857 }
 0x673   :  { %4059 = vmax.xlane.f32.xlu2 %v4058_v43 }
 0x67b   :  { %3921 = vadd.xlane.f32.xlu2 %v3920_v21 }
 0x695   :  { %v3780_v13 = vpop.xlane.xlu2 %3779 }
 0x69d   :  { %v3707_v36 = vpop.xlane.xlu2 %3706 }
 0x69e   :  { %6934 = vrcp.f32 %v3707_v36 }
 0x69f   :  { %6936 = vrcp.f32 %v3780_v13 }
 0x6a4   :  { %v6935_v42 = vpop.eup %6934 }
 0x6a5   :  { %v3709_v10 = vmul.f32 %v6935_v42, %v6927_v3  ;;  %v3638_v28 = vpop.permute.xlu2 %3637  ;;  %v6937_v35 = vpop.eup %6936 }
 0x6a6   :  { %3658 = vmatpush.msra.mxu1 %v3638_v28  ;;  %v3782_v60 = vmul.f32 %v6937_v35, %v6925_v51  ;;  %v4102_v51 = vld [vmem:[%s12275_s2] sm:$0xff]  ;;  %v4192_v28 = vld [vmem:[%s11991_s12 + $0x8] sm:$0xff] }
 0x6a7   :  { %5770 = vmatmul.msk.f32.vlgmr.msra.gmra.mxu1 %vm3530_vm12, %v3636_v19  ;;  %5773 = vmatmul.msk.f32.vlgmr.msra.gmra.mxu3 %vm3530_vm12, %v3709_v10  ;;  %v4194_v19 = vld [vmem:[%s11991_s12 + $0x18] sm:$0xff]  ;;  %v4193_v10 = vld [vmem:[%s11991_s12 + $0x10] sm:$0xff] }
 0x6a8   :  { %3878 = vmatpush.msra.mxu3 %v3858_v4  ;;  %3804 = vmatpush.msra.mxu1 %v3784_v25  ;;  %v4191_v4 = vld [vmem:[%s11991_s12] sm:$0xff] }
 0x6a9   :  { %4127 = vmatpush.msra.mxu2 %v4102_v51  ;;  %v4337_v51 = vld [vmem:[%s11993_s14 + $0x70] sm:$0xff] }
 0x6aa   :  { %4340 = vmatpush.msra.mxu0 %v4337_v51 }
 0x6af   :  { %5776 = vmatmul.msk.f32.vlgmr.msra.gmra.mxu1 %vm3530_vm12, %v3782_v60 }
 0x6b0   :  { %3946 = vmatpush.msra.mxu1 %v3926_v57 }
 0x6d1   :  { %v3994_v3 = vpop.xlane.xlu1 %3993 }
 0x6de   :  { %v3848_v17 = vpop.xlane.xlu2 %3847 }
 0x6df   :  { %v3849_v59 = vsub.f32 %v3845_v11, %v3848_v17  ;;  %v12279_v17 = vld [vmem:[#allocation13_spill] sm:$0xff] }
 0x6e1   :  { %v3850_v58 = vmul.f32 1.442695, %v3849_v59 }
 0x6e6   :  { %v4060_v49 = vpop.xlane.xlu2 %4059 }
 0x6e7   :  { %v4061_v26 = vsub.f32 %v4057_v5, %v4060_v49 }
 0x6e9   :  { %v4062_v56 = vmul.f32 1.442695, %v4061_v26 }
 0x6eb   :  { %6938 = vpow2.f32 %v4062_v56 }
 0x6ee   :  { %v3922_v15 = vpop.xlane.xlu2 %3921 }
 0x6ef   :  { %6940 = vrcp.f32 %v3922_v15 }
 0x6f0   :  { %6942 = vpow2.f32 %v3850_v58 }
 0x6f1   :  { %v6939_v52 = vpop.eup %6938 }
 0x6f2   :  { %v4064_v18 = vsel %vm3530_vm12, %v6939_v52, 0.0 }
 0x6f3   :  { %4065 = vadd.xlane.f32.xlu2 %v4064_v18 }
 0x6f5   :  { %v6941_v54 = vpop.eup %6940 }
 0x6f6   :  { %v3924_v6 = vmul.f32 %v6941_v54, %v6931_v38  ;;  %v6943_v37 = vpop.eup %6942 }
 0x6f7   :  { %v3852_v41 = vsel %vm3530_vm12, %v6943_v37, 0.0 }
 0x6f8   :  { %5782 = vmatmul.msk.f32.vlgmr.msra.gmra.mxu1 %vm3530_vm12, %v3924_v6 }
 0x70b   :  { %3997 = vrot.lane.b32.xlu2 %v11385_v1, %s12037_s30  ;;  %s12055_s30 = smov 16  }
 0x713   :  { %4069 = vrot.lane.b32.xlu2 %v11385_v1, %s12039_s6  ;;  %s12283_s6 = smov 56  }
 0x724   :  { %v3660_v50 = vpop.f32.mrf.mxu1 }
 0x725   :  { %3664 = vrot.lane.b32.xlu0 %v3660_v50, %s12053_s0 }
 0x72a   :  { %v3733_v31 = vpop.f32.mrf.mxu3 }
 0x72c   :  { %v3806_v48 = vpop.f32.mrf.mxu1 }
 0x72d   :  { %3810 = vrot.lane.b32.xlu1 %v3806_v48, %s12057_s10 }
 0x74f   :  { %3853 = vadd.xlane.f32.xlu0 %v3852_v41 }
 0x763   :  { %3737 = vrot.lane.b32.xlu0 %v3733_v31, %s12055_s30  ;;  %s12282_s30 = smov 112  }
 0x766   :  { %v4066_v1 = vpop.xlane.xlu2 %4065 }
 0x767   :  { %6944 = vrcp.f32 %v4066_v1 }
 0x76d   :  { %v6945_v12 = vpop.eup %6944 }
 0x76e   :  { %v3998_v61 = vpop.permute.xlu2 %3997  ;;  %v4068_v29 = vmul.f32 %v6945_v12, %v6939_v52 }
 0x775   :  { %v3948_v62 = vpop.f32.mrf.mxu1 }
 0x776   :  { %v4070_v63 = vpop.permute.xlu2 %4069  ;;  %3952 = vrot.lane.b32.xlu0 %v3948_v62, %s12053_s0  ;;  %s12286_s0 = smov 40  }
 0x777   :  { %4090 = vmatpush.msra.mxu1 %v4070_v63 }
 0x778   :  { %5788 = vmatmul.msk.f32.vlgmr.msra.gmra.mxu1 %vm3530_vm12, %v4068_v29  ;;  %v7076_v29 = vmov 1.4142135  }
 0x797   :  { %v3665_v33 = vpop.permute.xlu0 %3664 }
 0x798   :  { %3668 = vst.msk [vmem:[#allocation2] sm:$0xff] %vm3667_vm1, %v3665_v33 }
 0x79f   :  { %v3811_v40 = vpop.permute.xlu1 %3810 }
 0x7c2   :  { %v3854_v7 = vpop.xlane.xlu0 %3853 }
 0x7c3   :  { %6946 = vrcp.f32 %v3854_v7 }
 0x7c4   :  { %6948 = vrcp.f32 %v3994_v3  ;;  %v4336_v3 = vld [vmem:[%s11993_s14 + $0x68] sm:$0xff] }
 0x7c5   :  { %4341 = vmatpush.msra.mxu0 %v4336_v3 }
 0x7c9   :  { %v6947_v47 = vpop.eup %6946 }
 0x7ca   :  { %v3856_v39 = vmul.f32 %v6947_v47, %v6943_v37  ;;  %v6949_v44 = vpop.eup %6948  ;;  %v11545_v47 = vld [vmem:[%s11992_s13] ss:$0 sm:$0xff] }
 0x7cb   :  { %v3996_v22 = vmul.f32 %v6949_v44, %v11445_v46 }
 0x7cc   :  { %5779 = vmatmul.msk.f32.vlgmr.msra.gmra.mxu3 %vm3530_vm12, %v3856_v39  ;;  %v4335_v39 = vld [vmem:[%s11993_s14 + $0x60] sm:$0xff] }
 0x7cd   :  { %4018 = vmatpush.msra.mxu3 %v3998_v61  ;;  %4342 = vmatpush.msra.mxu0 %v4335_v39 }
 0x7d4   :  { %5785 = vmatmul.msk.f32.vlgmr.msra.gmra.mxu3 %vm3530_vm12, %v3996_v22 }
 0x7d5   :  { %v3738_v55 = vpop.permute.xlu0 %3737  ;;  %4217 = vmatpush.msra.mxu3 %v4194_v19  ;;  %v4326_v19 = vld [vmem:[%s11993_s14 + $0x18] sm:$0xff] }
 0x7d6   :  { %3741 = vst.msk [vmem:[#allocation2] sm:$0xff] %vm3740_vm2, %v3738_v55  ;;  %v4334_v55 = vld [vmem:[%s11993_s14 + $0x58] sm:$0xff] }
 0x7d7   :  { %3814 = vst.msk [vmem:[#allocation2] sm:$0xff] %vm3813_vm3, %v3811_v40  ;;  %4218 = vmatpush.msra.mxu3 %v4193_v10  ;;  %4343 = vmatpush.msra.mxu0 %v4334_v55 }
 0x7d9   :  { %4219 = vmatpush.msra.mxu3 %v4192_v28  ;;  %v4325_v28 = vld [vmem:[%s11993_s14 + $0x10] sm:$0xff] }
 0x7db   :  { %4220 = vmatpush.msra.mxu3 %v4191_v4 }
 0x7de   :  { %v4100_v25 = vld [vmem:[#allocation2] sm:$0xff] }
 0x7df   :  { %5789 = vmatmul.msk.f32.vlgmr.msra.gmra.mxu2 %vm1718_vm0, %v4100_v25  ;;  %v4333_v25 = vld [vmem:[%s11993_s14 + $0x50] sm:$0xff] }
 0x7e0   :  { %4344 = vmatpush.msra.mxu0 %v4333_v25 }
 0x7e8   :  { %v3953_v11 = vpop.permute.xlu0 %3952 }
 0x7f5   :  { %v4092_v20 = vpop.f32.mrf.mxu1 }
 0x7f6   :  { %4096 = vrot.lane.b32.xlu2 %v4092_v20, %s12057_s10  ;;  %s12281_s10 = smov 72  }
 0x84f   :  { %v3880_v24 = vpop.f32.mrf.mxu3 }
 0x850   :  { %3883 = vst.msk [vmem:[#allocation2 + $0x8] sm:$0xff] %vm3530_vm12, %v3880_v24  ;;  %v4097_v38 = vpop.permute.xlu2 %4096  ;;  %v4332_v24 = vld [vmem:[%s11993_s14 + $0x48] sm:$0xff] }
 0x851   :  { %3955 = vst.msk [vmem:[#allocation2 + $0x8] sm:$0xff] %vm3667_vm1, %v3953_v11  ;;  %4345 = vmatpush.msra.mxu0 %v4332_v24 }
 0x857   :  { %v4020_v46 = vpop.f32.mrf.mxu3 }
 0x858   :  { %4024 = vrot.lane.b32.xlu1 %v4020_v46, %s12276_s25  ;;  %v4331_v46 = vld [vmem:[%s11993_s14 + $0x40] sm:$0xff] }
 0x859   :  { %4346 = vmatpush.msra.mxu0 %v4331_v46 }
 0x862   :  { %v4129_v23 = vpop.f32.mrf.mxu2 }
 0x863   :  { %v4135_v14 = vadd.f32 %v4129_v23, %v12278_v16  ;;  %v4330_v23 = vld [vmem:[%s11993_s14 + $0x38] sm:$0xff] }
 0x864   :  { %4347 = vmatpush.msra.mxu0 %v4330_v23 }
 0x865   :  { %v11495_v32 = vadd.f32 %v6893_v8, %v4135_v14 }
 0x867   :  { %v4143_v5 = vsel %vm1718_vm0, %v11495_v32, 0.0 }
 0x868   :  { %4144 = vadd.xlane.f32.xlu0 %v4143_v5  ;;  %v4329_v5 = vld [vmem:[%s11993_s14 + $0x30] sm:$0xff] }
 0x869   :  { %4348 = vmatpush.msra.mxu0 %v4329_v5 }
 0x8ca   :  { %v4025_v43 = vpop.permute.xlu1 %4024 }
 0x8cb   :  { %4027 = vst.msk [vmem:[#allocation2 + $0x8] sm:$0xff] %vm3740_vm2, %v4025_v43 }
 0x8cc   :  { %4099 = vst.msk [vmem:[#allocation2 + $0x8] sm:$0xff] %vm3813_vm3, %v4097_v38 }
 0x8d3   :  { %v4101_v21 = vld [vmem:[#allocation2 + $0x8] sm:$0xff] }
 0x8d4   :  { %5790 = vmatmul.msk.f32.gmra.mxu2 %vm1718_vm0, %v4101_v21  ;;  %v4328_v21 = vld [vmem:[%s11993_s14 + $0x28] sm:$0xff] }
 0x8d5   :  { %4349 = vmatpush.msra.mxu0 %v4328_v21 }
 0x8db   :  { %v4145_v9 = vpop.xlane.xlu0 %4144 }
 0x8dc   :  { %v4149_v13 = vmul.f32 %v4145_v9, %v7450_v45 }
 0x8de   :  { %v4151_v36 = vsub.f32 %v11495_v32, %v4149_v13 }
 0x8e0   :  { %v4153_v2 = vmul.f32 %v4151_v36, %v4151_v36 }
 0x8e2   :  { %v4155_v42 = vsel %vm1718_vm0, %v4153_v2, 0.0 }
 0x8e3   :  { %4156 = vadd.xlane.f32.xlu1 %v4155_v42 }
 0x956   :  { %v4157_v35 = vpop.xlane.xlu1 %4156 }
 0x957   :  { %v4161_v60 = vmul.f32 %v4157_v35, %v7450_v45  ;;  %v4132_v57 = vpop.f32.mrf.mxu2 }
 0x958   :  { %v4136_v49 = vadd.f32 %v4132_v57, %v12279_v17  ;;  %v4323_v57 = vld [vmem:[%s11993_s14] sm:$0xff] }
 0x959   :  { %v4163_v26 = vadd.f32 1e-12, %v4161_v60  ;;  %v4324_v60 = vld [vmem:[%s11993_s14 + $0x8] sm:$0xff] }
 0x95a   :  { %v11519_v56 = vadd.f32 %v6893_v8, %v4136_v49 }
 0x95b   :  { %6950 = vrsqrt.f32 %v4163_v26  ;;  %vm4171_vm5 = vweird.f32 %v4163_v26 }
 0x95c   :  { %v4146_v15 = vsel %vm1718_vm0, %v11519_v56, 0.0  ;;  %6952 = vrcp.f32 %v7076_v29 }
 0x95d   :  { %4147 = vadd.xlane.f32.xlu2 %v4146_v15 }
 0x961   :  { %v6951_v52 = vpop.eup %6950 }
 0x962   :  { %v4166_v18 = vmul.f32 %v6951_v52, %v4163_v26  ;;  %vm4172_vm4 = vweird.f32 %v6951_v52  ;;  %v6953_v63 = vpop.eup %6952 }
 0x963   :  { %vm4173_vm6 = vmor %vm4171_vm5, %vm4172_vm4  ;;  %v4231_v33 = vmul.f32 1.4142135, %v6953_v63  ;;  %vm4235_vm7 = vweird.f32 %v6953_v63 }
 0x964   :  { %v4167_v54 = vmul.f32 %v6951_v52, %v4166_v18 }
 0x965   :  { %v4232_v34 = vsub.f32 1.0, %v4231_v33 }
 0x966   :  { %v4168_v6 = vmul.f32 0.5, %v4167_v54 }
 0x967   :  { %v4233_v27 = vmul.f32 %v6953_v63, %v4232_v34 }
 0x968   :  { %v4169_v50 = vsub.f32 1.5, %v4168_v6 }
 0x969   :  { %v4234_v7 = vadd.f32 %v6953_v63, %v4233_v27 }
 0x96a   :  { %v4170_v48 = vmul.f32 %v6951_v52, %v4169_v50 }
 0x96b   :  { %v11550_v22 = vsel %vm4235_vm7, %v6953_v63, %v4234_v7 }
 0x96c   :  { %v4174_v59 = vsel %vm4173_vm6, %v6951_v52, %v4170_v48 }
 0x96d   :  { %v4185_v58 = vmul.f32 %v4174_v59, %v4151_v36  ;;  %v4327_v36 = vld [vmem:[%s11993_s14 + $0x20] sm:$0xff] }
 0x96e   :  { %4350 = vmatpush.msra.mxu0 %v4327_v36 }
 0x96f   :  { %v4187_v37 = vmul.f32 %v11256_v30, %v4185_v58 }
 0x970   :  { %4351 = vmatpush.msra.mxu0 %v4326_v19 }
 0x971   :  { %v4189_v41 = vadd.f32 %v11263_v0, %v4187_v37 }
 0x972   :  { %4352 = vmatpush.msra.mxu0 %v4325_v28 }
 0x973   :  { %5791 = vmatmul.msk.f32.vlgmr.msra.gmra.mxu3 %vm1718_vm0, %v4189_v41 }
 0x974   :  { %4353 = vmatpush.msra.mxu0 %v4324_v60 }
 0x976   :  { %4354 = vmatpush.msra.mxu0 %v4323_v57 }
 0x9d0   :  { %v4148_v31 = vpop.xlane.xlu2 %4147 }
 0x9d1   :  { %v4150_v1 = vmul.f32 %v4148_v31, %v7450_v45 }
 0x9d3   :  { %v11528_v61 = vsub.f32 %v11519_v56, %v4150_v1 }
 0x9d5   :  { %v4154_v12 = vmul.f32 %v11528_v61, %v11528_v61 }
 0x9d7   :  { %v4158_v62 = vsel %vm1718_vm0, %v4154_v12, 0.0 }
 0x9d8   :  { %4159 = vadd.xlane.f32.xlu0 %v4158_v62 }
 0x9f6   :  { %v4222_v44 = vpop.f32.mrf.mxu3 }
 0x9f7   :  { %v11556_v40 = vadd.f32 %v11545_v47, %v4222_v44 }
 0x9f9   :  { %v4237_v20 = vmul.f32 %v11550_v22, %v11556_v40  ;;  %v4228_v27 = vmul.f32 0.5, %v11556_v40 }
 0x9fb   :  { %v4239_v11 = vmul.f32 %v4237_v20, %v4237_v20 }
 0x9fd   :  { %v4240_v8 = vmin.f32 %v4239_v11, 16.0 }
 0x9ff   :  { %v4241_v16 = vmul.f32 2.1237322e-06, %v4240_v8  ;;  %v4252_v14 = vmul.f32 3.8918573e-05, %v4240_v8 }
 0xa01   :  { %v4242_v43 = vadd.f32 0.00028619796, %v4241_v16  ;;  %v4253_v38 = vadd.f32 0.001143296, %v4252_v14  ;;  %v11602_v16 = vld [vmem:[%s11994_s15] ss:$0 sm:$0xff] }
 0xa03   :  { %v4243_v9 = vmul.f32 %v4242_v43, %v4240_v8  ;;  %v4254_v13 = vmul.f32 %v4253_v38, %v4240_v8 }
 0xa05   :  { %v4255_v2 = vadd.f32 0.014752088, %v4254_v13  ;;  %v4244_v42 = vadd.f32 0.0036580483, %v4243_v9 }
 0xa07   :  { %v4256_v10 = vmul.f32 %v4255_v2, %v4240_v8  ;;  %v4245_v35 = vmul.f32 %v4244_v42, %v4240_v8 }
 0xa09   :  { %v4257_v4 = vadd.f32 0.112945676, %v4256_v10  ;;  %v4246_v26 = vadd.f32 0.05243302, %v4245_v35 }
 0xa0b   :  { %v4258_v17 = vmul.f32 %v4257_v4, %v4240_v8  ;;  %v4247_v18 = vmul.f32 %v4246_v26, %v4240_v8 }
 0xa0d   :  { %v4259_v49 = vadd.f32 0.4994258, %v4258_v17  ;;  %v4248_v54 = vadd.f32 0.18741608, %v4247_v18 }
 0xa0f   :  { %v4260_v15 = vmul.f32 %v4259_v49, %v4240_v8  ;;  %v4249_v50 = vmul.f32 %v4248_v54, %v4240_v8 }
 0xa11   :  { %v4261_v52 = vadd.f32 1.0, %v4260_v15  ;;  %v4250_v37 = vadd.f32 1.1283791, %v4249_v50 }
 0xa13   :  { %6954 = vrcp.f32 %v4261_v52  ;;  %v4273_v58 = vand.u32 2147483648, %v4261_v52  ;;  %v4271_v31 = vand.u32 2147483647, %v4261_v52  ;;  %vm4267_vm9 = vweird.f32 %v4261_v52 }
 0xa14   :  { %v4251_v62 = vmul.f32 %v4250_v37, %v4237_v20 }
 0xa15   :  { %v4274_v12 = vor.u32 1.1754944e-38, %v4273_v58  ;;  %vm4272_vm11 = vcmp.eq.f32.partialorder %v4271_v31, 8.507059e+37 }
 0xa19   :  { %v6955_v6 = vpop.eup %6954 }
 0xa1a   :  { %v4263_v48 = vmul.f32 %v6955_v6, %v4261_v52  ;;  %vm4268_vm8 = vweird.f32 %v6955_v6 }
 0xa1b   :  { %vm4269_vm10 = vmor %vm4267_vm9, %vm4268_vm8 }
 0xa1c   :  { %v4264_v59 = vsub.f32 1.0, %v4263_v48 }
 0xa1e   :  { %v4265_v41 = vmul.f32 %v6955_v6, %v4264_v59 }
 0xa20   :  { %v4266_v1 = vadd.f32 %v6955_v6, %v4265_v41 }
 0xa22   :  { %v4270_v29 = vsel %vm4269_vm10, %v6955_v6, %v4266_v1 }
 0xa23   :  { %v4275_v63 = vsel %vm4272_vm11, %v4274_v12, %v4270_v29 }
 0xa24   :  { %v4276_v33 = vmul.f32 %v4275_v63, %v4251_v62 }
 0xa26   :  { %v5793_v34 = vclamps-f32 %v4276_v33, 1.0 }
 0xa28   :  { %v4319_v53 = vadd.f32 1.0, %v5793_v34 }
 0xa2a   :  { %v4321_v51 = vmul.f32 %v4319_v53, %v4228_v27 }
 0xa2c   :  { %4355 = vmatmul.f32.vlgmr.msra.gmra.mxu0 %v4321_v51 }
 0xa4b   :  { %v4160_v7 = vpop.xlane.xlu0 %4159 }
 0xa4c   :  { %v4162_v3 = vmul.f32 %v4160_v7, %v7450_v45 }
 0xa4e   :  { %v4164_v39 = vadd.f32 1e-12, %v4162_v3 }
 0xa50   :  { %6956 = vrsqrt.f32 %v4164_v39  ;;  %vm4181_vm14 = vweird.f32 %v4164_v39 }
 0xa56   :  { %v6957_v44 = vpop.eup %6956 }
 0xa57   :  { %v4176_v55 = vmul.f32 %v6957_v44, %v4164_v39  ;;  %vm4182_vm13 = vweird.f32 %v6957_v44 }
 0xa58   :  { %vm4183_vm15 = vmor %vm4181_vm14, %vm4182_vm13 }
 0xa59   :  { %v4177_v25 = vmul.f32 %v6957_v44, %v4176_v55  ;;  %v5797_v55 = vld [vmem:[%s12136_s11 + $0x30] sm:$0xff] }
 0xa5b   :  { %v4178_v24 = vmul.f32 0.5, %v4177_v25  ;;  %v5796_v25 = vld [vmem:[%s12136_s11 + $0x28] sm:$0xff] }
 0xa5d   :  { %v4179_v20 = vsub.f32 1.5, %v4178_v24  ;;  %v5795_v24 = vld [vmem:[%s12136_s11 + $0x20] sm:$0xff] }
 0xa5f   :  { %v4180_v11 = vmul.f32 %v6957_v44, %v4179_v20 }
 0xa61   :  { %v4184_v46 = vsel %vm4183_vm15, %v6957_v44, %v4180_v11  ;;  %v5798_v44 = vld [vmem:[%s12136_s11 + $0x38] sm:$0xff]  ;;  %s12284_s11 = smov 80  }
 0xa62   :  { %v4186_v40 = vmul.f32 %v4184_v46, %v11528_v61  ;;  %4446 = vmatpush.msra.mxu1 %v5798_v44 }
 0xa64   :  { %v4188_v8 = vmul.f32 %v11256_v30, %v4186_v40  ;;  %4447 = vmatpush.msra.mxu1 %v5797_v55 }
 0xa66   :  { %v4190_v23 = vadd.f32 %v11263_v0, %v4188_v8  ;;  %4448 = vmatpush.msra.mxu1 %v5796_v25 }
 0xa68   :  { %5792 = vmatmul.msk.f32.gmra.mxu3 %vm1718_vm0, %v4190_v23  ;;  %4449 = vmatpush.msra.mxu1 %v5795_v24 }
 0xaa9   :  { %v4356_v14 = vpop.f32.mrf.mxu0 }
 0xaaa   :  { %v4362_v5 = vadd.f32 %v4356_v14, %v11495_v32 }
 0xaac   :  { %v11606_v43 = vadd.f32 %v11602_v16, %v4362_v5 }
 0xaae   :  { %v4370_v61 = vsel %vm1718_vm0, %v11606_v43, 0.0 }
 0xaaf   :  { %4371 = vadd.xlane.f32.xlu1 %v4370_v61 }
 0xaeb   :  { %v4225_v30 = vpop.f32.mrf.mxu3 }
 0xaec   :  { %v4226_v0 = vadd.f32 %v11545_v47, %v4225_v30 }
 0xaee   :  { %v4238_v38 = vmul.f32 %v11550_v22, %v4226_v0  ;;  %v4229_v33 = vmul.f32 0.5, %v4226_v0 }
 0xaf0   :  { %v4279_v21 = vmul.f32 %v4238_v38, %v4238_v38 }
 0xaf2   :  { %v4280_v9 = vmin.f32 %v4279_v21, 16.0 }
 0xaf4   :  { %v4281_v13 = vmul.f32 2.1237322e-06, %v4280_v9  ;;  %v4292_v36 = vmul.f32 3.8918573e-05, %v4280_v9 }
 0xaf6   :  { %v4282_v2 = vadd.f32 0.00028619796, %v4281_v13  ;;  %v4293_v42 = vadd.f32 0.001143296, %v4292_v36  ;;  %v11643_v36 = vld [vmem:[%s12137_s8] ss:$0 sm:$0xff] }
 0xaf7   :  { %s12280_s8 = smov 96  }
 0xaf8   :  { %v4283_v19 = vmul.f32 %v4282_v2, %v4280_v9  ;;  %v4294_v32 = vmul.f32 %v4293_v42, %v4280_v9 }
 0xafa   :  { %v4295_v10 = vadd.f32 0.014752088, %v4294_v32  ;;  %v4284_v28 = vadd.f32 0.0036580483, %v4283_v19 }
 0xafc   :  { %v4296_v4 = vmul.f32 %v4295_v10, %v4280_v9  ;;  %v4285_v60 = vmul.f32 %v4284_v28, %v4280_v9 }
 0xafe   :  { %v4297_v35 = vadd.f32 0.112945676, %v4296_v4  ;;  %v4286_v49 = vadd.f32 0.05243302, %v4285_v60  ;;  %v11653_v4 = vld [vmem:[%s12174_s3 + $0x1] ss:$0 sm:$0xff] }
 0xb00   :  { %v4298_v57 = vmul.f32 %v4297_v35, %v4280_v9  ;;  %v4287_v15 = vmul.f32 %v4286_v49, %v4280_v9 }
 0xb02   :  { %v4299_v17 = vadd.f32 0.4994258, %v4298_v57  ;;  %v4288_v52 = vadd.f32 0.18741608, %v4287_v15 }
 0xb04   :  { %v4300_v26 = vmul.f32 %v4299_v17, %v4280_v9  ;;  %v4289_v54 = vmul.f32 %v4288_v52, %v4280_v9 }
 0xb06   :  { %v4301_v47 = vadd.f32 1.0, %v4300_v26  ;;  %v4290_v59 = vadd.f32 1.1283791, %v4289_v54 }
 0xb08   :  { %6958 = vrcp.f32 %v4301_v47  ;;  %v4313_v48 = vand.u32 2147483648, %v4301_v47  ;;  %v4311_v37 = vand.u32 2147483647, %v4301_v47  ;;  %vm4307_vm5 = vweird.f32 %v4301_v47 }
 0xb09   :  { %v4291_v1 = vmul.f32 %v4290_v59, %v4238_v38 }
 0xb0a   :  { %v4314_v31 = vor.u32 1.1754944e-38, %v4313_v48  ;;  %vm4312_vm7 = vcmp.eq.f32.partialorder %v4311_v37, 8.507059e+37 }
 0xb0e   :  { %v6959_v18 = vpop.eup %6958 }
 0xb0f   :  { %v4303_v6 = vmul.f32 %v6959_v18, %v4301_v47  ;;  %vm4308_vm4 = vweird.f32 %v6959_v18 }
 0xb10   :  { %vm4309_vm6 = vmor %vm4307_vm5, %vm4308_vm4 }
 0xb11   :  { %v4304_v50 = vsub.f32 1.0, %v4303_v6 }
 0xb13   :  { %v4305_v58 = vmul.f32 %v6959_v18, %v4304_v50 }
 0xb15   :  { %v4306_v41 = vadd.f32 %v6959_v18, %v4305_v58 }
 0xb17   :  { %v4310_v12 = vsel %vm4309_vm6, %v6959_v18, %v4306_v41 }
 0xb18   :  { %v4315_v62 = vsel %vm4312_vm7, %v4314_v31, %v4310_v12  ;;  %v11676_v31 = vld [vmem:[%s12237_s29] ss:$0 sm:$0xff] }
 0xb19   :  { %v4316_v29 = vmul.f32 %v4315_v62, %v4291_v1 }
 0xb1b   :  { %v5794_v63 = vclamps-f32 %v4316_v29, 1.0 }
 0xb1d   :  { %v4320_v34 = vadd.f32 1.0, %v5794_v63 }
 0xb1f   :  { %v4322_v27 = vmul.f32 %v4320_v34, %v4229_v33 }
 0xb21   :  { %4358 = vmatmul.f32.gmra.mxu0 %v4322_v27 }
 0xb22   :  { %v4372_v53 = vpop.xlane.xlu1 %4371 }
 0xb23   :  { %v4376_v51 = vmul.f32 %v4372_v53, %v7450_v45 }
 0xb25   :  { %v4378_v7 = vsub.f32 %v11606_v43, %v4376_v51 }
 0xb27   :  { %v4380_v3 = vmul.f32 %v4378_v7, %v4378_v7 }
 0xb29   :  { %v4382_v39 = vsel %vm1718_vm0, %v4380_v3, 0.0 }
 0xb2a   :  { %4383 = vadd.xlane.f32.xlu2 %v4382_v39 }
 0xb9d   :  { %v4384_v20 = vpop.xlane.xlu2 %4383 }
 0xb9e   :  { %v4388_v11 = vmul.f32 %v4384_v20, %v7450_v45  ;;  %v4359_v46 = vpop.f32.mrf.mxu0 }
 0xb9f   :  { %v4363_v40 = vadd.f32 %v4359_v46, %v11519_v56 }
 0xba0   :  { %v4390_v8 = vadd.f32 1e-12, %v4388_v11 }
 0xba1   :  { %v11630_v23 = vadd.f32 %v11602_v16, %v4363_v40  ;;  %v11637_v16 = vld [vmem:[%s12133_s9] ss:$0 sm:$0xff] }
 0xba2   :  { %6960 = vrsqrt.f32 %v4390_v8  ;;  %vm4398_vm9 = vweird.f32 %v4390_v8 }
 0xba3   :  { %v4373_v14 = vsel %vm1718_vm0, %v11630_v23, 0.0 }
 0xba4   :  { %4374 = vadd.xlane.f32.xlu0 %v4373_v14 }
 0xba8   :  { %v6961_v5 = vpop.eup %6960 }
 0xba9   :  { %v4393_v61 = vmul.f32 %v6961_v5, %v4390_v8  ;;  %vm4399_vm8 = vweird.f32 %v6961_v5 }
 0xbaa   :  { %vm4400_vm10 = vmor %vm4398_vm9, %vm4399_vm8 }
 0xbab   :  { %v4394_v30 = vmul.f32 %v6961_v5, %v4393_v61 }
 0xbad   :  { %v4395_v0 = vmul.f32 0.5, %v4394_v30 }
 0xbaf   :  { %v4396_v38 = vsub.f32 1.5, %v4395_v0 }
 0xbb1   :  { %v4397_v21 = vmul.f32 %v6961_v5, %v4396_v38 }
 0xbb3   :  { %v4401_v9 = vsel %vm4400_vm10, %v6961_v5, %v4397_v21 }
 0xbb4   :  { %v4412_v56 = vmul.f32 %v4401_v9, %v4378_v7 }
 0xbb6   :  { %v4414_v13 = vmul.f32 %v11637_v16, %v4412_v56 }
 0xbb8   :  { %v4416_v2 = vadd.f32 %v11643_v36, %v4414_v13 }
 0xbba   :  { %5800 = vmatmul.msk.f32.vlgmr.msra.gmra.mxu1 %vm1718_vm0, %v4416_v2 }
 0xc17   :  { %v4375_v42 = vpop.xlane.xlu0 %4374 }
 0xc18   :  { %v4377_v19 = vmul.f32 %v4375_v42, %v7450_v45 }
 0xc1a   :  { %v4379_v32 = vsub.f32 %v11630_v23, %v4377_v19 }
 0xc1c   :  { %v4381_v10 = vmul.f32 %v4379_v32, %v4379_v32 }
 0xc1e   :  { %v4385_v28 = vsel %vm1718_vm0, %v4381_v10, 0.0 }
 0xc1f   :  { %4386 = vadd.xlane.f32.xlu1 %v4385_v28 }
 0xc37   :  { %v4451_v35 = vpop.f32.mrf.mxu1 }
 0xc38   :  { %v11656_v60 = vadd.f32 %v11653_v4, %v4451_v35 }
 0xc3a   :  { %4459 = vrot.lane.b32.xlu2 %v11656_v60, %s12280_s8  ;;  %4528 = vrot.lane.b32.xlu0 %v11656_v60, %s12271_s27 }
 0xc3b   :  { %4526 = vrot.lane.b32.xlu1 %v11656_v60, %s12272_s4 }
 0xc92   :  { %v4387_v57 = vpop.xlane.xlu1 %4386 }
 0xc93   :  { %v4389_v17 = vmul.f32 %v4387_v57, %v7450_v45 }
 0xc94   :  { %v4460_v49 = vpop.permute.xlu2 %4459 }
 0xc95   :  { %v4391_v26 = vadd.f32 1e-12, %v4389_v17  ;;  %5802 = vmatpush.xpose.msk.msra.mxu2 %vm3530_vm12, %v4460_v49 }
 0xc97   :  { %6962 = vrsqrt.f32 %v4391_v26  ;;  %vm4408_vm13 = vweird.f32 %v4391_v26 }
 0xc98   :  { %5803 = vmatmul.msk.f32.vlgmr.msra.gmra.mxu2 %vm3530_vm12, %v11656_v60 }
 0xc9d   :  { %v6963_v47 = vpop.eup %6962 }
 0xc9e   :  { %v4403_v15 = vmul.f32 %v6963_v47, %v4391_v26  ;;  %vm4409_vm11 = vweird.f32 %v6963_v47 }
 0xc9f   :  { %vm4410_vm14 = vmor %vm4408_vm13, %vm4409_vm11 }
 0xca0   :  { %v4404_v52 = vmul.f32 %v6963_v47, %v4403_v15 }
 0xca2   :  { %v4405_v18 = vmul.f32 0.5, %v4404_v52 }
 0xca4   :  { %v4406_v54 = vsub.f32 1.5, %v4405_v18 }
 0xca6   :  { %v4407_v6 = vmul.f32 %v6963_v47, %v4406_v54 }
 0xca8   :  { %v4411_v50 = vsel %vm4410_vm14, %v6963_v47, %v4407_v6  ;;  %vm5299_vm14 = vcmask 1040384  }
 0xca9   :  { %v4413_v48 = vmul.f32 %v4411_v50, %v4379_v32 }
 0xcab   :  { %v4415_v59 = vmul.f32 %v11637_v16, %v4413_v48 }
 0xcac   :  { %v4529_v58 = vpop.permute.xlu0 %4528 }
 0xcad   :  { %5805 = vmatpush.xpose.msk.msra.mxu1 %vm3530_vm12, %v4529_v58  ;;  %v4417_v37 = vadd.f32 %v11643_v36, %v4415_v59  ;;  %v4527_v41 = vpop.permute.xlu1 %4526 }
 0xcaf   :  { %5801 = vmatmul.msk.f32.gmra.mxu1 %vm1718_vm0, %v4417_v37 }
 0xcb7   :  { %5806 = vmatmul.msk.f32.vlgmr.msra.gmra.mxu1 %vm3530_vm12, %v4527_v41 }
 0xd1b   :  { %v4482_v1 = vpop.f32.mrf.mxu2 }
 0xd1c   :  { %v4485_v12 = vmul.f32 0.35355338, %v4482_v1 }
 0xd1e   :  { %v4487_v62 = vadd.f32 %v11676_v31, %v4485_v12 }
 0xd20   :  { %v4488_v29 = vsel %vm3530_vm12, %v4487_v62, -inf }
 0xd21   :  { %4489 = vmax.xlane.f32.xlu0 %v4488_v29 }
 0xd2c   :  { %v4454_v63 = vpop.f32.mrf.mxu1 }
 0xd2d   :  { %v11699_v40 = vadd.f32 %v11653_v4, %v4454_v63 }
 0xd34   :  { %v4551_v33 = vpop.f32.mrf.mxu1 }
 0xd35   :  { %v4554_v34 = vmul.f32 0.35355338, %v4551_v33  ;;  %4499 = vrot.lane.b32.xlu0 %v11656_v60, %s12274_s7 }
 0xd37   :  { %v4555_v27 = vadd.f32 %v11676_v31, %v4554_v34 }
 0xd39   :  { %v4556_v53 = vsel %vm3530_vm12, %v4555_v27, -inf }
 0xd3a   :  { %4557 = vmax.xlane.f32.xlu2 %v4556_v53 }
 0xd3d   :  { %4672 = vrot.lane.b32.xlu0 %v11656_v60, %s12281_s10 }
 0xd45   :  { %4598 = vrot.lane.b32.xlu0 %v11656_v60, %s12282_s30 }
 0xd94   :  { %v4490_v51 = vpop.xlane.xlu0 %4489 }
 0xd95   :  { %v4491_v7 = vsub.f32 %v4487_v62, %v4490_v51 }
 0xd97   :  { %v4492_v3 = vmul.f32 1.442695, %v4491_v7  ;;  %v6898_v7 = vld [vmem:[%s12237_s29 + $0x1] ss:$0 sm:$0xff]  ;;  %s12288_s29 = smov 24  }
 0xd99   :  { %6964 = vpow2.f32 %v4492_v3 }
 0xd9f   :  { %v6965_v39 = vpop.eup %6964 }
 0xda0   :  { %v4494_v44 = vsel %vm3530_vm12, %v6965_v39, 0.0 }
 0xda1   :  { %4495 = vadd.xlane.f32.xlu1 %v4494_v44 }
 0xda7   :  { %v4500_v55 = vpop.permute.xlu0 %4499 }
 0xda8   :  { %4520 = vmatpush.msra.mxu3 %v4500_v55 }
 0xdad   :  { %v4558_v25 = vpop.xlane.xlu2 %4557 }
 0xdae   :  { %v4559_v24 = vsub.f32 %v4555_v27, %v4558_v25 }
 0xdaf   :  { %v4673_v0 = vpop.permute.xlu0 %4672 }
 0xdb0   :  { %v4560_v20 = vmul.f32 1.442695, %v4559_v24 }
 0xdb2   :  { %6966 = vpow2.f32 %v4560_v20 }
 0xdb7   :  { %v4599_v56 = vpop.permute.xlu0 %4598 }
 0xdb8   :  { %v6967_v11 = vpop.eup %6966 }
 0xdb9   :  { %v4562_v46 = vsel %vm3530_vm12, %v6967_v11, 0.0 }
 0xdba   :  { %4563 = vadd.xlane.f32.xlu2 %v4562_v46  ;;  %4567 = vrot.lane.b32.xlu1 %v11656_v60, %s12283_s6 }
 0xdd2   :  { %4600 = vrot.lane.b32.xlu2 %v11656_v60, %s12284_s11 }
 0xdda   :  { %4670 = vrot.lane.b32.xlu2 %v11656_v60, %s12285_s26 }
 0xde2   :  { %4711 = vrot.lane.b32.xlu2 %v11656_v60, %s12286_s0 }
 0xdea   :  { %4811 = vrot.lane.b32.xlu2 %v11699_v40, %s12272_s4  ;;  %s12287_s4 = smov 48  }
 0xe14   :  { %v4496_v8 = vpop.xlane.xlu1 %4495 }
 0xe15   :  { %6968 = vrcp.f32 %v4496_v8 }
 0xe1b   :  { %v6969_v14 = vpop.eup %6968 }
 0xe1c   :  { %v4498_v5 = vmul.f32 %v6969_v14, %v6965_v39 }
 0xe1e   :  { %5804 = vmatmul.msk.f32.vlgmr.msra.gmra.mxu3 %vm3530_vm12, %v4498_v5 }
 0xe2c   :  { %v4568_v61 = vpop.permute.xlu1 %4567 }
 0xe2d   :  { %v4564_v30 = vpop.xlane.xlu2 %4563  ;;  %4588 = vmatpush.msra.mxu2 %v4568_v61 }
 0xe2e   :  { %6970 = vrcp.f32 %v4564_v30 }
 0xe34   :  { %v6971_v38 = vpop.eup %6970 }
 0xe35   :  { %v4566_v21 = vmul.f32 %v6971_v38, %v6967_v11  ;;  %v4601_v9 = vpop.permute.xlu2 %4600 }
 0xe36   :  { %5808 = vmatpush.xpose.msk.msra.mxu3 %vm3530_vm12, %v4601_v9 }
 0xe37   :  { %5807 = vmatmul.msk.f32.vlgmr.msra.gmra.mxu2 %vm3530_vm12, %v4566_v21 }
 0xe38   :  { %5811 = vmatpush.xpose.msk.msra.mxu2 %vm3530_vm12, %v4673_v0 }
 0xe39   :  { %5809 = vmatmul.msk.f32.vlgmr.msra.gmra.mxu3 %vm3530_vm12, %v4599_v56 }
 0xe3d   :  { %v4671_v13 = vpop.permute.xlu2 %4670 }
 0xe3f   :  { %5812 = vmatmul.msk.f32.vlgmr.msra.gmra.mxu2 %vm3530_vm12, %v4671_v13 }
 0xe45   :  { %v4712_v2 = vpop.permute.xlu2 %4711 }
 0xe46   :  { %4732 = vmatpush.msra.mxu3 %v4712_v2 }
 0xe4d   :  { %v4812_v58 = vpop.permute.xlu2 %4811 }
 0xea1   :  { %v4522_v42 = vpop.f32.mrf.mxu3 }
 0xea2   :  { %4525 = vst.msk [vmem:[#allocation2] sm:$0xff] %vm3530_vm12, %v4522_v42 }
 0xeba   :  { %v11710_v19 = vpop.f32.mrf.mxu2 }
 0xebc   :  { %v4623_v32 = vpop.f32.mrf.mxu3 }
 0xebd   :  { %v4626_v10 = vmul.f32 0.35355338, %v4623_v32 }
 0xebf   :  { %v4627_v28 = vadd.f32 %v11676_v31, %v4626_v10 }
 0xec1   :  { %v4628_v4 = vsel %vm3530_vm12, %v4627_v28, -inf }
 0xec2   :  { %v4695_v35 = vpop.f32.mrf.mxu2  ;;  %4629 = vmax.xlane.f32.xlu1 %v4628_v4 }
 0xec3   :  { %v4698_v57 = vmul.f32 0.35355338, %v4695_v35 }
 0xec5   :  { %v4699_v17 = vadd.f32 %v11676_v31, %v4698_v57 }
 0xec7   :  { %v4700_v49 = vsel %vm3530_vm12, %v4699_v17, -inf }
 0xec8   :  { %4701 = vmax.xlane.f32.xlu0 %v4700_v49 }
 0xedb   :  { %4744 = vrot.lane.b32.xlu1 %v11699_v40, %s12280_s8  ;;  %s12290_s8 = sld [smem:[#allocation109_spill]] }
 0xedc   :  { %4639 = vrot.lane.b32.xlu0 %v11656_v60, %s12287_s4 }
 0xee4   :  { %4813 = vrot.lane.b32.xlu0 %v11699_v40, %s12271_s27 }
 0xeec   :  { %4885 = vrot.lane.b32.xlu0 %v11699_v40, %s12284_s11 }
 0xef4   :  { %4955 = vrot.lane.b32.xlu0 %v11699_v40, %s12285_s26 }
 0xf35   :  { %v4630_v26 = vpop.xlane.xlu1 %4629 }
 0xf36   :  { %v4631_v47 = vsub.f32 %v4627_v28, %v4630_v26 }
 0xf38   :  { %v4632_v15 = vmul.f32 1.442695, %v4631_v47 }
 0xf3a   :  { %6972 = vpow2.f32 %v4632_v15 }
 0xf3b   :  { %v4702_v52 = vpop.xlane.xlu0 %4701 }
 0xf3c   :  { %v4703_v18 = vsub.f32 %v4699_v17, %v4702_v52 }
 0xf3e   :  { %v4704_v54 = vmul.f32 1.442695, %v4703_v18 }
 0xf40   :  { %v6973_v6 = vpop.eup %6972  ;;  %6974 = vpow2.f32 %v4704_v54 }
 0xf41   :  { %v4634_v60 = vsel %vm3530_vm12, %v6973_v6, 0.0 }
 0xf42   :  { %4635 = vadd.xlane.f32.xlu2 %v4634_v60 }
 0xf46   :  { %v6975_v50 = vpop.eup %6974 }
 0xf47   :  { %v4706_v48 = vsel %vm3530_vm12, %v6975_v50, 0.0 }
 0xf48   :  { %4707 = vadd.xlane.f32.xlu1 %v4706_v48 }
 0xf4d   :  { %v4745_v37 = vpop.permute.xlu1 %4744 }
 0xf4e   :  { %v4640_v59 = vpop.permute.xlu0 %4639 }
 0xf4f   :  { %4660 = vmatpush.msra.mxu1 %v4640_v59 }
 0xf56   :  { %v4814_v12 = vpop.permute.xlu0 %4813 }
 0xf5a   :  { %4883 = vrot.lane.b32.xlu2 %v11699_v40, %s12282_s30 }
 0xf5e   :  { %v4886_v33 = vpop.permute.xlu0 %4885 }
 0xf61   :  { %4957 = vrot.lane.b32.xlu1 %v11699_v40, %s12281_s10  ;;  %s7077_s10 = smov [#allocation3]  }
 0xf62   :  { %s5485_s30 = sshll.u32 %s7077_s10, 4  ;;  %s5486_s30 = int_to_ptr.vmem [resolvable:$true] %s5485_s30 }
 0xf66   :  { %v4956_v53 = vpop.permute.xlu0 %4955 }
 0xfb5   :  { %v4636_v41 = vpop.xlane.xlu2 %4635 }
 0xfb6   :  { %6976 = vrcp.f32 %v4636_v41  ;;  %v5826_v41 = vld [vmem:[%s12275_s2 + $0x20] sm:$0xff] }
 0xfbb   :  { %v4708_v31 = vpop.xlane.xlu1 %4707 }
 0xfbc   :  { %v6977_v1 = vpop.eup %6976  ;;  %6978 = vrcp.f32 %v4708_v31 }
 0xfbd   :  { %v4638_v62 = vmul.f32 %v6977_v1, %v6973_v6  ;;  %v4884_v34 = vpop.permute.xlu2 %4883 }
 0xfbf   :  { %5810 = vmatmul.msk.f32.vlgmr.msra.gmra.mxu1 %vm3530_vm12, %v4638_v62 }
 0xfc0   :  { %5814 = vmatpush.xpose.msk.msra.mxu1 %vm3530_vm12, %v4745_v37  ;;  %v5828_v37 = vld [vmem:[%s12275_s2 + $0x30] sm:$0xff] }
 0xfc2   :  { %v6979_v29 = vpop.eup %6978 }
 0xfc3   :  { %v4710_v63 = vmul.f32 %v6979_v29, %v6975_v50 }
 0xfc5   :  { %5813 = vmatmul.msk.f32.vlgmr.msra.gmra.mxu3 %vm3530_vm12, %v4710_v63 }
 0xfc6   :  { %5817 = vmatpush.xpose.msk.msra.mxu3 %vm3530_vm12, %v4814_v12 }
 0xfc7   :  { %5815 = vmatmul.msk.f32.vlgmr.msra.gmra.mxu1 %vm3530_vm12, %v11699_v40 }
 0xfc8   :  { %5820 = vmatpush.xpose.msk.msra.mxu1 %vm3530_vm12, %v4886_v33 }
 0xfcd   :  { %5818 = vmatmul.msk.f32.vlgmr.msra.gmra.mxu3 %vm3530_vm12, %v4812_v58  ;;  %v5829_v58 = vld [vmem:[%s12275_s2 + $0x38] sm:$0xff] }
 0xfcf   :  { %5821 = vmatmul.msk.f32.vlgmr.msra.gmra.mxu1 %vm3530_vm12, %v4884_v34 }
 0xfd0   :  { %5052 = vmatpush.msra.mxu1 %v5829_v58 }
 0xfd2   :  { %5053 = vmatpush.msra.mxu1 %v5828_v37 }
 0xfd3   :  { %v4958_v27 = vpop.permute.xlu1 %4957 }
 0xfd4   :  { %5823 = vmatpush.xpose.msk.msra.mxu3 %vm3530_vm12, %v4958_v27 }
 0xfd7   :  { %5824 = vmatmul.msk.f32.vlgmr.msra.gmra.mxu3 %vm3530_vm12, %v4956_v53 }
0x103c   :  { %v4662_v51 = vpop.f32.mrf.mxu1 }
0x1044   :  { %v4767_v3 = vpop.f32.mrf.mxu1 }
0x1045   :  { %v4770_v39 = vmul.f32 0.35355338, %v4767_v3 }
0x1047   :  { %v4772_v44 = vadd.f32 %v6898_v7, %v4770_v39 }
0x1048   :  { %v4734_v55 = vpop.f32.mrf.mxu3 }
0x1049   :  { %v4773_v25 = vsel %vm3530_vm12, %v4772_v44, -inf }
0x104a   :  { %4774 = vmax.xlane.f32.xlu1 %v4773_v25 }
0x104c   :  { %v4908_v24 = vpop.f32.mrf.mxu1 }
0x104d   :  { %v4911_v20 = vmul.f32 0.35355338, %v4908_v24 }
0x104f   :  { %v4912_v11 = vadd.f32 %v6898_v7, %v4911_v20 }
0x1050   :  { %v4836_v46 = vpop.f32.mrf.mxu3 }
0x1051   :  { %v4839_v8 = vmul.f32 0.35355338, %v4836_v46  ;;  %v4913_v14 = vsel %vm3530_vm12, %v4912_v11, -inf }
0x1052   :  { %4914 = vmax.xlane.f32.xlu0 %v4913_v14 }
0x1053   :  { %v4840_v5 = vadd.f32 %v6898_v7, %v4839_v8  ;;  %v6899_v8 = vld [vmem:[%s12277_s5 + $0x1] ss:$0 sm:$0xff] }
0x1055   :  { %v4841_v61 = vsel %vm3530_vm12, %v4840_v5, -inf }
0x1056   :  { %4842 = vmax.xlane.f32.xlu2 %v4841_v61 }
0x105a   :  { %v4980_v30 = vpop.f32.mrf.mxu3 }
0x105b   :  { %v4983_v0 = vmul.f32 0.35355338, %v4980_v30 }
0x105d   :  { %v4984_v38 = vadd.f32 %v6898_v7, %v4983_v0 }
0x105f   :  { %v4985_v21 = vsel %vm3530_vm12, %v4984_v38, -inf }
0x1060   :  { %4986 = vmax.xlane.f32.xlu1 %v4985_v21 }
0x106e   :  { %4784 = vrot.lane.b32.xlu2 %v11699_v40, %s12274_s7  ;;  %s12289_s7 = smov 8  }
0x10bd   :  { %v4775_v9 = vpop.xlane.xlu1 %4774 }
0x10be   :  { %v4776_v56 = vsub.f32 %v4772_v44, %v4775_v9 }
0x10c0   :  { %v4777_v13 = vmul.f32 1.442695, %v4776_v56 }
0x10c2   :  { %6980 = vpow2.f32 %v4777_v13 }
0x10c5   :  { %v4915_v2 = vpop.xlane.xlu0 %4914 }
0x10c6   :  { %v4916_v42 = vsub.f32 %v4912_v11, %v4915_v2 }
0x10c8   :  { %v6981_v32 = vpop.eup %6980  ;;  %v4917_v10 = vmul.f32 1.442695, %v4916_v42 }
0x10c9   :  { %v4843_v28 = vpop.xlane.xlu2 %4842  ;;  %v4779_v4 = vsel %vm3530_vm12, %v6981_v32, 0.0 }
0x10ca   :  { %6982 = vpow2.f32 %v4917_v10  ;;  %v4844_v35 = vsub.f32 %v4840_v5, %v4843_v28  ;;  %4780 = vadd.xlane.f32.xlu2 %v4779_v4  ;;  %v5836_v28 = vld [vmem:[%s11991_s12 + $0x38] sm:$0xff]  ;;  %v5835_v4 = vld [vmem:[%s11991_s12 + $0x30] sm:$0xff] }
0x10cc   :  { %v4845_v57 = vmul.f32 1.442695, %v4844_v35  ;;  %v5834_v35 = vld [vmem:[%s11991_s12 + $0x28] sm:$0xff] }
0x10ce   :  { %6984 = vpow2.f32 %v4845_v57 }
0x10d0   :  { %v6983_v17 = vpop.eup %6982 }
0x10d1   :  { %v4785_v49 = vpop.permute.xlu2 %4784  ;;  %v4919_v26 = vsel %vm3530_vm12, %v6983_v17, 0.0 }
0x10d2   :  { %4805 = vmatpush.msra.mxu2 %v4785_v49  ;;  %4920 = vadd.xlane.f32.xlu1 %v4919_v26 }
0x10d3   :  { %v4987_v47 = vpop.xlane.xlu1 %4986 }
0x10d4   :  { %v6985_v15 = vpop.eup %6984  ;;  %v4988_v52 = vsub.f32 %v4984_v38, %v4987_v47 }
0x10d5   :  { %v4847_v18 = vsel %vm3530_vm12, %v6985_v15, 0.0 }
0x10d6   :  { %v4989_v54 = vmul.f32 1.442695, %v4988_v52  ;;  %4848 = vadd.xlane.f32.xlu0 %v4847_v18 }
0x10d8   :  { %6986 = vpow2.f32 %v4989_v54 }
0x10de   :  { %v6987_v6 = vpop.eup %6986 }
0x10df   :  { %v4991_v60 = vsel %vm3530_vm12, %v6987_v6, 0.0 }
0x10e0   :  { %4992 = vadd.xlane.f32.xlu0 %v4991_v60 }
0x10e2   :  { %4996 = vrot.lane.b32.xlu2 %v11699_v40, %s12286_s0 }
0x10ea   :  { %4738 = vrot.lane.b32.xlu2 %v4734_v55, %s12288_s29 }
0x10eb   :  { %4852 = vrot.lane.b32.xlu1 %v11699_v40, %s12283_s6 }
0x10f3   :  { %4594 = vrot.lane.b32.xlu1 %v11710_v19, %s12289_s7 }
0x10f4   :  { %4924 = vrot.lane.b32.xlu0 %v11699_v40, %s12287_s4  ;;  %v5827_v40 = vld [vmem:[%s12275_s2 + $0x28] sm:$0xff] }
0x10f5   :  { %5054 = vmatpush.msra.mxu1 %v5827_v40 }
0x10f7   :  { %5055 = vmatpush.msra.mxu1 %v5826_v41  ;;  %v5857_v41 = vld [vmem:[%s11993_s14 + $0xf8] sm:$0xff] }
0x10f8   :  { %5264 = vmatpush.msra.mxu3 %v5857_v41 }
0x10fc   :  { %4666 = vrot.lane.b32.xlu0 %v4662_v51, %s12276_s25 }
0x113d   :  { %v4781_v50 = vpop.xlane.xlu2 %4780 }
0x113e   :  { %6988 = vrcp.f32 %v4781_v50 }
0x1144   :  { %v6989_v48 = vpop.eup %6988 }
0x1145   :  { %v4783_v59 = vmul.f32 %v6989_v48, %v6981_v32  ;;  %v4921_v31 = vpop.xlane.xlu1 %4920  ;;  %v4997_v63 = vpop.permute.xlu2 %4996 }
0x1147   :  { %5816 = vmatmul.msk.f32.vlgmr.msra.gmra.mxu2 %vm3530_vm12, %v4783_v59 }
0x1149   :  { %v4849_v19 = vpop.xlane.xlu0 %4848 }
0x114a   :  { %6990 = vrcp.f32 %v4849_v19 }
0x114d   :  { %v4739_v39 = vpop.permute.xlu2 %4738 }
0x1150   :  { %v6991_v12 = vpop.eup %6990 }
0x1151   :  { %v4851_v62 = vmul.f32 %v6991_v12, %v6985_v15  ;;  %v11845_v12 = vld [vmem:[%s11992_s13 + $0x1] ss:$0 sm:$0xff] }
0x1153   :  { %v4993_v1 = vpop.xlane.xlu0 %4992 }
0x1154   :  { %6992 = vrcp.f32 %v4993_v1  ;;  %v5855_v1 = vld [vmem:[%s11993_s14 + $0xe8] sm:$0xff] }
0x1155   :  { %6994 = vrcp.f32 %v4921_v31  ;;  %v5856_v31 = vld [vmem:[%s11993_s14 + $0xf0] sm:$0xff] }
0x1156   :  { %5265 = vmatpush.msra.mxu3 %v5856_v31 }
0x1158   :  { %5266 = vmatpush.msra.mxu3 %v5855_v1 }
0x115a   :  { %v6993_v33 = vpop.eup %6992 }
0x115b   :  { %v6995_v34 = vpop.eup %6994  ;;  %v4995_v27 = vmul.f32 %v6993_v33, %v6987_v6 }
0x115c   :  { %v4923_v51 = vmul.f32 %v6995_v34, %v6983_v17  ;;  %v5852_v34 = vld [vmem:[%s11993_s14 + $0xd0] sm:$0xff] }
0x115d   :  { %v4853_v29 = vpop.permute.xlu1 %4852 }
0x115e   :  { %4873 = vmatpush.msra.mxu0 %v4853_v29 }
0x115f   :  { %5819 = vmatmul.msk.f32.vlgmr.msra.gmra.mxu0 %vm3530_vm12, %v4851_v62  ;;  %v5854_v62 = vld [vmem:[%s11993_s14 + $0xe0] sm:$0xff] }
0x1160   :  { %5017 = vmatpush.msra.mxu0 %v4997_v63  ;;  %5267 = vmatpush.msra.mxu3 %v5854_v62  ;;  %v5853_v63 = vld [vmem:[%s11993_s14 + $0xd8] sm:$0xff] }
0x1162   :  { %5268 = vmatpush.msra.mxu3 %v5853_v63 }
0x1164   :  { %5269 = vmatpush.msra.mxu3 %v5852_v34 }
0x1165   :  { %v4595_v53 = vpop.permute.xlu1 %4594 }
0x1166   :  { %4597 = vst.msk [vmem:[#allocation2] sm:$0xff] %vm3667_vm1, %v4595_v53  ;;  %v4925_v7 = vpop.permute.xlu0 %4924  ;;  %v5851_v53 = vld [vmem:[%s11993_s14 + $0xc8] sm:$0xff] }
0x1167   :  { %4945 = vmatpush.msra.mxu2 %v4925_v7  ;;  %5825 = vmatmul.msk.f32.vlgmr.msra.gmra.mxu0 %vm3530_vm12, %v4995_v27  ;;  %v5850_v7 = vld [vmem:[%s11993_s14 + $0xc0] sm:$0xff] }
0x1168   :  { %5822 = vmatmul.msk.f32.vlgmr.msra.gmra.mxu2 %vm3530_vm12, %v4923_v51  ;;  %5270 = vmatpush.msra.mxu3 %v5851_v53 }
0x1169   :  { %5148 = vmatpush.msra.mxu2 %v5836_v28 }
0x116a   :  { %5271 = vmatpush.msra.mxu3 %v5850_v7 }
0x116b   :  { %5149 = vmatpush.msra.mxu2 %v5835_v4 }
0x116d   :  { %5150 = vmatpush.msra.mxu2 %v5834_v35 }
0x116e   :  { %v4667_v3 = vpop.permute.xlu0 %4666 }
0x116f   :  { %4669 = vst.msk [vmem:[#allocation2] sm:$0xff] %vm3740_vm2, %v4667_v3 }
0x1170   :  { %4741 = vst.msk [vmem:[#allocation2] sm:$0xff] %vm3813_vm3, %v4739_v39  ;;  %v5849_v39 = vld [vmem:[%s11993_s14 + $0xb8] sm:$0xff] }
0x1171   :  { %5272 = vmatpush.msra.mxu3 %v5849_v39 }
0x1177   :  { %v5027_v44 = vld [vmem:[#allocation2] sm:$0xff] }
0x1178   :  { %5830 = vmatmul.msk.f32.vlgmr.msra.gmra.mxu1 %vm1718_vm0, %v5027_v44 }
0x11ca   :  { %v4807_v55 = vpop.f32.mrf.mxu2 }
0x11cb   :  { %4810 = vst.msk [vmem:[#allocation2 + $0x8] sm:$0xff] %vm3530_vm12, %v4807_v55 }
0x11dc   :  { %v4875_v25 = vpop.f32.mrf.mxu0 }
0x11dd   :  { %4879 = vrot.lane.b32.xlu1 %v4875_v25, %s12289_s7  ;;  %v5848_v25 = vld [vmem:[%s11993_s14 + $0xb0] sm:$0xff] }
0x11de   :  { %5273 = vmatpush.msra.mxu3 %v5848_v25 }
0x11e4   :  { %v5019_v24 = vpop.f32.mrf.mxu0 }
0x11e5   :  { %5023 = vrot.lane.b32.xlu2 %v5019_v24, %s12288_s29 }
0x11eb   :  { %v4947_v20 = vpop.f32.mrf.mxu2 }
0x11ec   :  { %4951 = vrot.lane.b32.xlu0 %v4947_v20, %s12276_s25 }
0x11f5   :  { %v5057_v11 = vpop.f32.mrf.mxu1 }
0x11f6   :  { %v5063_v46 = vadd.f32 %v5057_v11, %v11606_v43  ;;  %v5847_v11 = vld [vmem:[%s11993_s14 + $0xa8] sm:$0xff] }
0x11f7   :  { %5274 = vmatpush.msra.mxu3 %v5847_v11 }
0x11f8   :  { %v11794_v14 = vadd.f32 %v6899_v8, %v5063_v46 }
0x11fa   :  { %v5072_v5 = vsel %vm1718_vm0, %v11794_v14, 0.0 }
0x1207   :  { %5073 = vadd.xlane.f32.xlu1 %v5072_v5  ;;  %v5846_v5 = vld [vmem:[%s11993_s14 + $0xa0] sm:$0xff] }
0x1208   :  { %5275 = vmatpush.msra.mxu3 %v5846_v5 }
0x123f   :  { %v5024_v0 = vpop.permute.xlu2 %5023 }
0x124f   :  { %v4880_v61 = vpop.permute.xlu1 %4879 }
0x1250   :  { %4882 = vst.msk [vmem:[#allocation2 + $0x8] sm:$0xff] %vm3667_vm1, %v4880_v61 }
0x125e   :  { %v4952_v30 = vpop.permute.xlu0 %4951 }
0x125f   :  { %4954 = vst.msk [vmem:[#allocation2 + $0x8] sm:$0xff] %vm3740_vm2, %v4952_v30 }
0x1260   :  { %5026 = vst.msk [vmem:[#allocation2 + $0x8] sm:$0xff] %vm3813_vm3, %v5024_v0  ;;  %v5845_v0 = vld [vmem:[%s11993_s14 + $0x98] sm:$0xff] }
0x1261   :  { %5276 = vmatpush.msra.mxu3 %v5845_v0 }
0x1267   :  { %v5028_v43 = vld [vmem:[#allocation2 + $0x8] sm:$0xff] }
0x1268   :  { %5831 = vmatmul.msk.f32.gmra.mxu1 %vm1718_vm0, %v5028_v43 }
0x127a   :  { %v5074_v38 = vpop.xlane.xlu1 %5073 }
0x127b   :  { %v5078_v21 = vmul.f32 %v5074_v38, %v7450_v45  ;;  %v5844_v38 = vld [vmem:[%s11993_s14 + $0x90] sm:$0xff] }
0x127c   :  { %5277 = vmatpush.msra.mxu3 %v5844_v38 }
0x127d   :  { %v5080_v9 = vsub.f32 %v11794_v14, %v5078_v21 }
0x127f   :  { %v5082_v56 = vmul.f32 %v5080_v9, %v5080_v9 }
0x1281   :  { %v5084_v13 = vsel %vm1718_vm0, %v5082_v56, 0.0  ;;  %v5843_v56 = vld [vmem:[%s11993_s14 + $0x88] sm:$0xff] }
0x1282   :  { %5085 = vadd.xlane.f32.xlu2 %v5084_v13  ;;  %v5842_v13 = vld [vmem:[%s11993_s14 + $0x80] sm:$0xff]  ;;  %5278 = vmatpush.msra.mxu3 %v5843_v56 }
0x1284   :  { %5279 = vmatpush.msra.mxu3 %v5842_v13 }
0x12e5   :  { %v5060_v2 = vpop.f32.mrf.mxu1 }
0x12e6   :  { %v5064_v42 = vadd.f32 %v5060_v2, %v11630_v23  ;;  %v5833_v23 = vld [vmem:[%s11991_s12 + $0x20] sm:$0xff] }
0x12e7   :  { %5151 = vmatpush.msra.mxu2 %v5833_v23 }
0x12e8   :  { %v11806_v32 = vadd.f32 %v6899_v8, %v5064_v42 }
0x12ea   :  { %v5075_v10 = vsel %vm1718_vm0, %v11806_v32, 0.0 }
0x12eb   :  { %5076 = vadd.xlane.f32.xlu0 %v5075_v10 }
0x12f5   :  { %v5086_v57 = vpop.xlane.xlu2 %5085 }
0x12f6   :  { %v5090_v17 = vmul.f32 %v5086_v57, %v7450_v45 }
0x12f8   :  { %v5092_v49 = vadd.f32 1e-12, %v5090_v17 }
0x12fa   :  { %6996 = vrsqrt.f32 %v5092_v49  ;;  %vm5100_vm1 = vweird.f32 %v5092_v49 }
0x1300   :  { %v6997_v26 = vpop.eup %6996 }
0x1301   :  { %v5095_v47 = vmul.f32 %v6997_v26, %v5092_v49  ;;  %vm5101_vm12 = vweird.f32 %v6997_v26 }
0x1302   :  { %vm5102_vm2 = vmor %vm5100_vm1, %vm5101_vm12 }
0x1303   :  { %v5096_v15 = vmul.f32 %v6997_v26, %v5095_v47 }
0x1305   :  { %v5097_v52 = vmul.f32 0.5, %v5096_v15 }
0x1307   :  { %v5098_v18 = vsub.f32 1.5, %v5097_v52 }
0x1309   :  { %v5099_v54 = vmul.f32 %v6997_v26, %v5098_v18 }
0x130b   :  { %v5103_v6 = vsel %vm5102_vm2, %v6997_v26, %v5099_v54 }
0x130c   :  { %v5114_v60 = vmul.f32 %v5103_v6, %v5080_v9 }
0x130e   :  { %v5116_v50 = vmul.f32 %v11637_v16, %v5114_v60 }
0x1310   :  { %v5118_v48 = vadd.f32 %v11643_v36, %v5116_v50 }
0x1312   :  { %5838 = vmatmul.msk.f32.vlgmr.msra.gmra.mxu2 %vm1718_vm0, %v5118_v48 }
0x135e   :  { %v5077_v59 = vpop.xlane.xlu0 %5076 }
0x135f   :  { %v5079_v58 = vmul.f32 %v5077_v59, %v7450_v45 }
0x1361   :  { %v11828_v37 = vsub.f32 %v11806_v32, %v5079_v58 }
0x1363   :  { %v5083_v19 = vmul.f32 %v11828_v37, %v11828_v37 }
0x1365   :  { %v5087_v40 = vsel %vm1718_vm0, %v5083_v19, 0.0 }
0x1366   :  { %5088 = vadd.xlane.f32.xlu1 %v5087_v40 }
0x1395   :  { %v5153_v29 = vpop.f32.mrf.mxu2 }
0x1396   :  { %v11854_v33 = vadd.f32 %v11845_v12, %v5153_v29 }
0x1398   :  { %v5161_v27 = vmul.f32 %v11854_v33, %v11550_v22  ;;  %v5159_v19 = vmul.f32 0.5, %v11854_v33 }
0x139a   :  { %v5163_v51 = vmul.f32 %v5161_v27, %v5161_v27 }
0x139c   :  { %v5164_v3 = vmin.f32 %v5163_v51, 16.0 }
0x139e   :  { %v5165_v44 = vmul.f32 2.1237322e-06, %v5164_v3  ;;  %v5176_v55 = vmul.f32 3.8918573e-05, %v5164_v3 }
0x13a0   :  { %v5166_v24 = vadd.f32 0.00028619796, %v5165_v44  ;;  %v5177_v20 = vadd.f32 0.001143296, %v5176_v55 }
0x13a2   :  { %v5167_v46 = vmul.f32 %v5166_v24, %v5164_v3  ;;  %v5178_v8 = vmul.f32 %v5177_v20, %v5164_v3 }
0x13a4   :  { %v5179_v61 = vadd.f32 0.014752088, %v5178_v8  ;;  %v5168_v30 = vadd.f32 0.0036580483, %v5167_v46 }
0x13a6   :  { %v5180_v43 = vmul.f32 %v5179_v61, %v5164_v3  ;;  %v5169_v9 = vmul.f32 %v5168_v30, %v5164_v3 }
0x13a8   :  { %v5181_v21 = vadd.f32 0.112945676, %v5180_v43  ;;  %v5170_v10 = vadd.f32 0.05243302, %v5169_v9 }
0x13aa   :  { %v5182_v2 = vmul.f32 %v5181_v21, %v5164_v3  ;;  %v5171_v35 = vmul.f32 %v5170_v10, %v5164_v3 }
0x13ac   :  { %v5183_v42 = vadd.f32 0.4994258, %v5182_v2  ;;  %v5172_v23 = vadd.f32 0.18741608, %v5171_v35 }
0x13ae   :  { %v5184_v28 = vmul.f32 %v5183_v42, %v5164_v3  ;;  %v5173_v17 = vmul.f32 %v5172_v23, %v5164_v3 }
0x13b0   :  { %v5185_v4 = vadd.f32 1.0, %v5184_v28  ;;  %v5174_v15 = vadd.f32 1.1283791, %v5173_v17 }
0x13b2   :  { %6998 = vrcp.f32 %v5185_v4  ;;  %v5197_v47 = vand.u32 2147483648, %v5185_v4  ;;  %v5195_v18 = vand.u32 2147483647, %v5185_v4  ;;  %vm5191_vm15 = vweird.f32 %v5185_v4 }
0x13b3   :  { %v5175_v60 = vmul.f32 %v5174_v15, %v5161_v27 }
0x13b4   :  { %v5198_v6 = vor.u32 1.1754944e-38, %v5197_v47  ;;  %vm5196_vm5 = vcmp.eq.f32.partialorder %v5195_v18, 8.507059e+37 }
0x13b8   :  { %v6999_v57 = vpop.eup %6998 }
0x13b9   :  { %v5187_v49 = vmul.f32 %v6999_v57, %v5185_v4  ;;  %vm5192_vm3 = vweird.f32 %v6999_v57 }
0x13ba   :  { %vm5193_vm4 = vmor %vm5191_vm15, %vm5192_vm3  ;;  %vm5417_vm15 = vcmask 254976  }
0x13bb   :  { %v5188_v26 = vsub.f32 1.0, %v5187_v49 }
0x13bd   :  { %v5189_v52 = vmul.f32 %v6999_v57, %v5188_v26 }
0x13bf   :  { %v5190_v54 = vadd.f32 %v6999_v57, %v5189_v52 }
0x13c1   :  { %v5194_v50 = vsel %vm5193_vm4, %v6999_v57, %v5190_v54 }
0x13c2   :  { %v5199_v48 = vsel %vm5196_vm5, %v5198_v6, %v5194_v50  ;;  %v5304_v50 = vld [vmem:[%s11995_s16 + $0x18] sm:$0xff] }
0x13c3   :  { %v5200_v59 = vmul.f32 %v5199_v48, %v5175_v60  ;;  %5324 = vmatpush.msra.mxu0 %v5304_v50  ;;  %v5303_v48 = vld [vmem:[%s11995_s16 + $0x10] sm:$0xff] }
0x13c5   :  { %v5840_v58 = vclamps-f32 %v5200_v59, 1.0  ;;  %5325 = vmatpush.msra.mxu0 %v5303_v48  ;;  %v5302_v59 = vld [vmem:[%s11995_s16 + $0x8] sm:$0xff]  ;;  %v6905_v48 = vld [vmem:[%s12001_s22] ss:$0 sm:$0xff]  ;;  %s12292_s22 = sld [smem:[#allocation111_spill]] }
0x13c7   :  { %v5243_v40 = vadd.f32 1.0, %v5840_v58  ;;  %v5301_v58 = vld [vmem:[%s11995_s16] sm:$0xff]  ;;  %5326 = vmatpush.msra.mxu0 %v5302_v59 }
0x13c9   :  { %v5245_v41 = vmul.f32 %v5243_v40, %v5159_v19  ;;  %5327 = vmatpush.msra.mxu0 %v5301_v58 }
0x13cb   :  { %5280 = vmatmul.f32.vlgmr.msra.gmra.mxu3 %v5245_v41  ;;  %s5487_s11 = sshll.u32 %s12292_s22, 4  ;;  %s5488_s11 = int_to_ptr.hbm [resolvable:$true] %s5487_s11 }
0x13d9   :  { %v5089_v31 = vpop.xlane.xlu1 %5088 }
0x13da   :  { %v5091_v1 = vmul.f32 %v5089_v31, %v7450_v45  ;;  %v6901_v31 = vld [vmem:[%s11994_s15 + $0x1] ss:$0 sm:$0xff] }
0x13dc   :  { %v5093_v62 = vadd.f32 1e-12, %v5091_v1 }
0x13de   :  { %7000 = vrsqrt.f32 %v5093_v62  ;;  %vm5110_vm7 = vweird.f32 %v5093_v62 }
0x13e4   :  { %v7001_v29 = vpop.eup %7000 }
0x13e5   :  { %v5105_v63 = vmul.f32 %v7001_v29, %v5093_v62  ;;  %vm5111_vm6 = vweird.f32 %v7001_v29 }
0x13e6   :  { %vm5112_vm8 = vmor %vm5110_vm7, %vm5111_vm6 }
0x13e7   :  { %v5106_v34 = vmul.f32 %v7001_v29, %v5105_v63 }
0x13e9   :  { %v5107_v53 = vmul.f32 0.5, %v5106_v34 }
0x13eb   :  { %v5108_v27 = vsub.f32 1.5, %v5107_v53  ;;  %v5336_v53 = vld [vmem:[%s11997_s18 + $0x18] sm:$0xff] }
0x13ed   :  { %v5109_v51 = vmul.f32 %v7001_v29, %v5108_v27  ;;  %v5333_v27 = vld [vmem:[%s11997_s18] sm:$0xff] }
0x13ef   :  { %v5113_v7 = vsel %vm5112_vm8, %v7001_v29, %v5109_v51  ;;  %v6902_v51 = vld [vmem:[%s11996_s17] ss:$0 sm:$0xff] }
0x13f0   :  { %v5115_v33 = vmul.f32 %v5113_v7, %v11828_v37 }
0x13f2   :  { %v5117_v3 = vmul.f32 %v11637_v16, %v5115_v33 }
0x13f4   :  { %v5119_v39 = vadd.f32 %v11643_v36, %v5117_v3 }
0x13f6   :  { %5839 = vmatmul.msk.f32.gmra.mxu2 %vm1718_vm0, %v5119_v39  ;;  %v5387_v39 = vld [vmem:[%s11999_s20 + $0x18] sm:$0xff] }
0x13f7   :  { %5407 = vmatpush.msra.mxu1 %v5387_v39 }
0x144e   :  { %v5281_v19 = vpop.f32.mrf.mxu3 }
0x144f   :  { %v5287_v41 = vadd.f32 %v5281_v19, %v11794_v14  ;;  %v5335_v14 = vld [vmem:[%s11997_s18 + $0x10] sm:$0xff] }
0x1451   :  { %v5294_v29 = vadd.f32 %v6901_v31, %v5287_v41  ;;  %v6907_v41 = vld [vmem:[%s12291_s23] ss:$0 sm:$0xff] }
0x1479   :  { %v5156_v44 = vpop.f32.mrf.mxu2 }
0x147a   :  { %v5157_v55 = vadd.f32 %v11845_v12, %v5156_v44  ;;  %v6903_v44 = vld [vmem:[%s11998_s19] ss:$0 sm:$0xff] }
0x147c   :  { %v5162_v25 = vmul.f32 %v5157_v55, %v11550_v22  ;;  %v5160_v54 = vmul.f32 0.5, %v5157_v55  ;;  %v5386_v55 = vld [vmem:[%s11999_s20 + $0x10] sm:$0xff] }
0x147d   :  { %5408 = vmatpush.msra.mxu1 %v5386_v55 }
0x147e   :  { %v5203_v24 = vmul.f32 %v5162_v25, %v5162_v25 }
0x1480   :  { %v5204_v20 = vmin.f32 %v5203_v24, 16.0  ;;  %v5384_v24 = vld [vmem:[%s11999_s20] sm:$0xff] }
0x1482   :  { %v5205_v11 = vmul.f32 2.1237322e-06, %v5204_v20  ;;  %v5216_v46 = vmul.f32 3.8918573e-05, %v5204_v20 }
0x1484   :  { %v5206_v8 = vadd.f32 0.00028619796, %v5205_v11  ;;  %v5217_v5 = vadd.f32 0.001143296, %v5216_v46 }
0x1486   :  { %v5207_v61 = vmul.f32 %v5206_v8, %v5204_v20  ;;  %v5218_v30 = vmul.f32 %v5217_v5, %v5204_v20 }
0x1488   :  { %v5219_v37 = vadd.f32 0.014752088, %v5218_v30  ;;  %v5208_v0 = vadd.f32 0.0036580483, %v5207_v61 }
0x148a   :  { %v5220_v16 = vmul.f32 %v5219_v37, %v5204_v20  ;;  %v5209_v36 = vmul.f32 %v5208_v0, %v5204_v20 }
0x148c   :  { %v5221_v43 = vadd.f32 0.112945676, %v5220_v16  ;;  %v5210_v9 = vadd.f32 0.05243302, %v5209_v36 }
0x148e   :  { %v5222_v38 = vmul.f32 %v5221_v43, %v5204_v20  ;;  %v5211_v13 = vmul.f32 %v5210_v9, %v5204_v20 }
0x1490   :  { %v5223_v21 = vadd.f32 0.4994258, %v5222_v38  ;;  %v5212_v22 = vadd.f32 0.18741608, %v5211_v13 }
0x1492   :  { %v5224_v56 = vmul.f32 %v5223_v21, %v5204_v20  ;;  %v5213_v42 = vmul.f32 %v5212_v22, %v5204_v20 }
0x1494   :  { %v5225_v12 = vadd.f32 1.0, %v5224_v56  ;;  %v5214_v35 = vadd.f32 1.1283791, %v5213_v42 }
0x1496   :  { %7002 = vrcp.f32 %v5225_v12  ;;  %v5237_v4 = vand.u32 2147483648, %v5225_v12  ;;  %v5235_v57 = vand.u32 2147483647, %v5225_v12  ;;  %vm5231_vm10 = vweird.f32 %v5225_v12 }
0x1497   :  { %v5215_v26 = vmul.f32 %v5214_v35, %v5162_v25  ;;  %v5385_v25 = vld [vmem:[%s11999_s20 + $0x8] sm:$0xff] }
0x1498   :  { %v5238_v49 = vor.u32 1.1754944e-38, %v5237_v4  ;;  %vm5236_vm13 = vcmp.eq.f32.partialorder %v5235_v57, 8.507059e+37  ;;  %5409 = vmatpush.msra.mxu1 %v5385_v25  ;;  %v5450_v57 = vld [vmem:[%s12003_s24 + $0x10] sm:$0xff] }
0x149a   :  { %5410 = vmatpush.msra.mxu1 %v5384_v24 }
0x149c   :  { %v7003_v2 = vpop.eup %7002 }
0x149d   :  { %v5227_v10 = vmul.f32 %v7003_v2, %v5225_v12  ;;  %vm5232_vm9 = vweird.f32 %v7003_v2  ;;  %v6904_v12 = vld [vmem:[%s12000_s21] ss:$0 sm:$0xff] }
0x149e   :  { %vm5233_vm11 = vmor %vm5231_vm10, %vm5232_vm9 }
0x149f   :  { %v5228_v28 = vsub.f32 1.0, %v5227_v10 }
0x14a1   :  { %v5229_v23 = vmul.f32 %v7003_v2, %v5228_v28 }
0x14a3   :  { %v5230_v17 = vadd.f32 %v7003_v2, %v5229_v23  ;;  %v5451_v23 = vld [vmem:[%s12003_s24 + $0x18] sm:$0xff] }
0x14a4   :  { %5471 = vmatpush.msra.mxu2 %v5451_v23 }
0x14a5   :  { %v5234_v47 = vsel %vm5233_vm11, %v7003_v2, %v5230_v17  ;;  %v5449_v17 = vld [vmem:[%s12003_s24 + $0x8] sm:$0xff] }
0x14a6   :  { %v5239_v15 = vsel %vm5236_vm13, %v5238_v49, %v5234_v47  ;;  %5472 = vmatpush.msra.mxu2 %v5450_v57  ;;  %v5448_v49 = vld [vmem:[%s12003_s24] sm:$0xff] }
0x14a7   :  { %v5240_v52 = vmul.f32 %v5239_v15, %v5215_v26 }
0x14a8   :  { %5473 = vmatpush.msra.mxu2 %v5449_v17 }
0x14a9   :  { %v5841_v18 = vclamps-f32 %v5240_v52, 1.0 }
0x14aa   :  { %5474 = vmatpush.msra.mxu2 %v5448_v49 }
0x14ab   :  { %v5244_v6 = vadd.f32 1.0, %v5841_v18 }
0x14ad   :  { %v5246_v60 = vmul.f32 %v5244_v6, %v5160_v54 }
0x14af   :  { %5283 = vmatmul.f32.gmra.mxu3 %v5246_v60 }
0x1532   :  { %v5284_v40 = vpop.f32.mrf.mxu3 }
0x1533   :  { %v5288_v1 = vadd.f32 %v5284_v40, %v11806_v32  ;;  %v5334_v32 = vld [vmem:[%s11997_s18 + $0x8] sm:$0xff] }
0x1535   :  { %v5295_v62 = vadd.f32 %v6901_v31, %v5288_v1 }
0x1537   :  { %v5297_v63 = vrot.slane %v5295_v62, 7 }
0x1539   :  { %v5300_v34 = vsel %vm5299_vm14, %v5294_v29, %v5297_v63 }
0x153a   :  { %5859 = vmatmul.msk.f32.vlgmr.msra.gmra.mxu0 %vm1718_vm0, %v5300_v34 }
0x153b   :  { %5356 = vmatpush.msra.mxu0 %v5336_v53 }
0x153d   :  { %5357 = vmatpush.msra.mxu0 %v5335_v14 }
0x153f   :  { %5358 = vmatpush.msra.mxu0 %v5334_v32 }
0x1541   :  { %5359 = vmatpush.msra.mxu0 %v5333_v27 }
0x15b7   :  { %v5329_v7 = vpop.f32.mrf.mxu0 }
0x15b8   :  { %v5330_v33 = vadd.f32 %v6902_v51, %v5329_v7 }
0x15ba   :  { %7004 = vtanh.f32 %v5330_v33 }
0x15c0   :  { %v7005_v3 = vpop.eup %7004 }
0x15c1   :  { %5860 = vmatmul.msk.f32.vlgmr.msra.gmra.mxu0 %vm1718_vm0, %v7005_v3 }
0x163e   :  { %v5361_v20 = vpop.f32.mrf.mxu0 }
0x163f   :  { %v5362_v11 = vadd.f32 %v6903_v44, %v5361_v20 }
0x1641   :  { %v5861_v46 = vmul.f32 -1.442695, %v5362_v11 }
0x1643   :  { %7006 = vpow2.f32 %v5861_v46 }
0x1649   :  { %v7007_v8 = vpop.eup %7006 }
0x164a   :  { %v5367_v5 = vadd.f32 1.0, %v7007_v8 }
0x164c   :  { %7008 = vrcp.f32 %v5367_v5  ;;  %v5379_v0 = vand.u32 2147483648, %v5367_v5  ;;  %v5377_v43 = vand.u32 2147483647, %v5367_v5  ;;  %vm5373_vm1 = vweird.f32 %v5367_v5 }
0x164e   :  { %v5380_v38 = vor.u32 1.1754944e-38, %v5379_v0  ;;  %vm5378_vm3 = vcmp.eq.f32.partialorder %v5377_v43, 8.507059e+37 }
0x1652   :  { %v7009_v61 = vpop.eup %7008 }
0x1653   :  { %v5369_v30 = vmul.f32 %v7009_v61, %v5367_v5  ;;  %vm5374_vm12 = vweird.f32 %v7009_v61 }
0x1654   :  { %vm5375_vm2 = vmor %vm5373_vm1, %vm5374_vm12 }
0x1655   :  { %v5370_v37 = vsub.f32 1.0, %v5369_v30 }
0x1657   :  { %v5371_v16 = vmul.f32 %v7009_v61, %v5370_v37 }
0x1659   :  { %v5372_v36 = vadd.f32 %v7009_v61, %v5371_v16 }
0x165b   :  { %v5376_v21 = vsel %vm5375_vm2, %v7009_v61, %v5372_v36 }
0x165c   :  { %v5381_v9 = vsel %vm5378_vm3, %v5380_v38, %v5376_v21 }
0x165d   :  { %v5383_v56 = vmul.f32 %v5381_v9, %v5362_v11 }
0x165f   :  { %5862 = vmatmul.msk.f32.vlgmr.msra.gmra.mxu1 %vm1718_vm0, %v5383_v56 }
0x16dc   :  { %v5412_v13 = vpop.f32.mrf.mxu1 }
0x16dd   :  { %v5413_v22 = vadd.f32 %v6904_v12, %v5412_v13 }
0x16df   :  { %v5418_v2 = vsel %vm5417_vm15, %v5413_v22, 0.0 }
0x16e0   :  { %5419 = vadd.xlane.f32.xlu0 %v5418_v2 }
0x1753   :  { %v5420_v42 = vpop.xlane.xlu0 %5419 }
0x1754   :  { %v5421_v10 = vmul.f32 %v5420_v42, %v7450_v45 }
0x1756   :  { %v5422_v28 = vsub.f32 %v5413_v22, %v5421_v10 }
0x1758   :  { %v5423_v4 = vmul.f32 %v5422_v28, %v5422_v28 }
0x175a   :  { %v5424_v35 = vsel %vm5417_vm15, %v5423_v4, 0.0 }
0x175b   :  { %5425 = vadd.xlane.f32.xlu2 %v5424_v35 }
0x17ce   :  { %v5426_v26 = vpop.xlane.xlu2 %5425 }
0x17cf   :  { %v5427_v47 = vmul.f32 %v5426_v26, %v7450_v45  ;;  %v6906_v45 = vld [vmem:[%s12290_s8] ss:$0 sm:$0xff] }
0x17d1   :  { %v5428_v15 = vadd.f32 1e-12, %v5427_v47 }
0x17d3   :  { %7010 = vrsqrt.f32 %v5428_v15  ;;  %vm5435_vm5 = vweird.f32 %v5428_v15 }
0x17d9   :  { %v7011_v52 = vpop.eup %7010 }
0x17da   :  { %v5430_v18 = vmul.f32 %v7011_v52, %v5428_v15  ;;  %vm5436_vm4 = vweird.f32 %v7011_v52 }
0x17db   :  { %vm5437_vm6 = vmor %vm5435_vm5, %vm5436_vm4 }
0x17dc   :  { %v5431_v54 = vmul.f32 %v7011_v52, %v5430_v18 }
0x17de   :  { %v5432_v6 = vmul.f32 0.5, %v5431_v54 }
0x17e0   :  { %v5433_v60 = vsub.f32 1.5, %v5432_v6 }
0x17e2   :  { %v5434_v50 = vmul.f32 %v7011_v52, %v5433_v60 }
0x17e4   :  { %v5438_v59 = vsel %vm5437_vm6, %v7011_v52, %v5434_v50 }
0x17e5   :  { %v5439_v58 = vmul.f32 %v5438_v59, %v5422_v28 }
0x17e7   :  { %v5443_v19 = vmul.f32 %v6905_v48, %v5439_v58 }
0x17e9   :  { %v5447_v40 = vadd.f32 %v6906_v45, %v5443_v19 }
0x17eb   :  { %5863 = vmatmul.msk.f32.vlgmr.msra.gmra.mxu2 %vm1718_vm0, %v5447_v40 }
0x186e   :  { %v5476_v31 = vpop.f32.mrf.mxu2 }
0x186f   :  { %v5477_v1 = vadd.f32 %v6907_v41, %v5476_v31 }
0x1871   :  { %5479 = vst [vmem:[#allocation3] sm:$0x3] %v5477_v1 }
0x1872   :  { %5490 = dma.vmem_to_hbm [thread:$0]  %s5486_s30, 32, %s5488_s11, [#allocation4]  }
0x1873   :  { %7059 = dma.done.wait [#allocation4], 32  }
0x1874   :  { %7060 = vsyncadd [#allocation4], 4294967264 }
0x1875   :  { %5499 = vsyncpa [#allocation4], 1 }

</bundles_post_ra>
